<compile_context>
chip_gen: v7x
topology: tpu7x:2x2x1
jax: 0.10.0
libtpu: 0.0.40
codegen_flags: <defaults>
</compile_context>

<pallas_src>
import jax
import jax.numpy as jnp
from jax import lax
from jax.experimental import pallas as pl
from jax.experimental.pallas import tpu as pltpu


C = 128            # lane-padded channel width used for every layer
IMG = 32           # MNIST-style 32x32 input (spatial sizes hard-coded for this net)
TB = 8             # samples processed per grid step (== sublane tile height)
K0 = 16            # lanes used by the block-0 im2col taps (9 taps zero-padded to 16)
BN_EPS = 0.8       # nn.BatchNorm2d(out_filters, 0.8) -> eps = 0.8
LEAKY = 0.2
H1, H2, H3 = 17, 9, 5   # top/left-halo-padded spatial sizes of the scratch activations


def _zero_halo(ref):
    # Zero only the top-row / left-column halo strips (the only halo positions the
    # stride-2 taps ever read); the interior is fully overwritten every grid step.
    # All stores are full (TB, C) = (8, 128) tiles on outer dims -> no masking.
    h, w, tb, c = ref.shape
    ref[0, :, :, :] = jnp.zeros((w, tb, c), jnp.float32)
    ref[:, pl.ds(0, 1), :, :] = jnp.zeros((h, 1, tb, c), jnp.float32)


def _disc_kernel(x_ref, w0_ref, w_ref, ep_ref, head_ref, out_ref,
                 a1_ref, a2_ref, a3_ref):
    f32 = jnp.float32
    bf16 = jnp.bfloat16

    _zero_halo(a1_ref)
    _zero_halo(a2_ref)
    _zero_halo(a3_ref)

    def epilogue(acc, layer, bn=True):
        # bias -> LeakyReLU(0.2) -> (eval-mode BatchNorm affine).
        # Invariant: bias/scale/shift and weight columns are zero-padded past the real
        # channel count, so the padded lanes of every activation stay exactly 0.
        y = acc + ep_ref[layer, 0:1, :]
        y = jnp.maximum(y, LEAKY * y)
        if bn:
            y = y * ep_ref[layer, 1:2, :] + ep_ref[layer, 2:3, :]
        return y

    # ---- block 0: 32x32x1 -> 16x16x16 ---------------------------------------
    # Host-side im2col packed all 9 taps into the K lanes -> a single matmul per
    # output row with M = 16 output cols * 8 samples = 128 rows (16-vreg acc).
    w0 = w0_ref[...]                                        # (C, C) bf16
    zpad = jnp.zeros((16 * TB, C - K0), bf16)
    for ho in range(16):
        chunk = x_ref[pl.ds(ho * 16 * TB, 16 * TB), :]      # (128, K0) bf16
        lhs = jnp.concatenate([chunk, zpad], axis=1)        # (128, C)  bf16
        acc = jnp.dot(lhs, w0, preferred_element_type=f32)  # (128, C)  f32
        y = epilogue(acc, 0, bn=False)
        a1_ref[1 + ho, pl.ds(1, 16), :, :] = y.reshape(16, TB, C)

    # ---- blocks 1-3: 9 accumulated MXU matmuls, samples stacked into M -------
    def conv_taps(src_ref, layer, row_slice, n_rows, n_cols):
        m = n_rows * n_cols * TB
        acc = jnp.zeros((m, C), f32)
        for kh in range(3):
            for kw in range(3):
                tap = src_ref[row_slice(kh), pl.ds(kw, n_cols, stride=2), :, :]
                acc = acc + jnp.dot(tap.reshape(m, C).astype(bf16),
                                    w_ref[layer - 1, kh * 3 + kw],
                                    preferred_element_type=f32)
        return epilogue(acc, layer)

    # block 1: 16x16x16 -> 8x8x32  (two output rows per chunk -> 16-vreg accumulator)
    for rp in range(4):
        y = conv_taps(a1_ref, 1, lambda kh: pl.ds(4 * rp + kh, 2, stride=2), 2, 8)
        a2_ref[pl.ds(1 + 2 * rp, 2), pl.ds(1, 8), :, :] = y.reshape(2, 8, TB, C)

    # block 2: 8x8x32 -> 4x4x64  (M = 16 positions * 8 samples = 128)
    y = conv_taps(a2_ref, 2, lambda kh: pl.ds(kh, 4, stride=2), 4, 4)
    a3_ref[pl.ds(1, 4), pl.ds(1, 4), :, :] = y.reshape(4, 4, TB, C)

    # block 3: 4x4x64 -> 2x2x128, fused with the Linear(512 -> 1) + Sigmoid head
    y3 = conv_taps(a3_ref, 3, lambda kh: pl.ds(kh, 2, stride=2), 2, 2)   # (4*TB, C)
    prod = y3 * head_ref[...]                        # FC weight pre-permuted to the
    part = jnp.sum(prod.reshape(4, TB, C), axis=0)   # kernel's (position, sample) row
    logits = jnp.sum(part, axis=1, keepdims=True)    # order -> per-sample logits (TB, 1)
    logits = logits + ep_ref[0, 3:4, 0:1]            # fc bias

    e = jnp.exp(-jnp.abs(logits))                    # stable sigmoid, single exp
    r = 1.0 / (1.0 + e)
    sig = jnp.where(logits >= 0.0, r, 1.0 - r)
    out_ref[...] = jnp.broadcast_to(sig, (TB, C)).astype(out_ref.dtype)


# -----------------------------------------------------------------------------
# Host wrapper
# -----------------------------------------------------------------------------
def _im2col_block0(img, b_pad):
    # (B,1,32,32) NCHW -> (G, 256*TB, K0) bf16 im2col for the first stride-2 conv.
    # Rows ordered (output position p = ho*16+wo, sample-within-step s); lanes are
    # the 9 3x3 taps (zero padded to K0).
    b = img.shape[0]
    xp = jnp.pad(img[:, 0].astype(jnp.float32), ((0, b_pad - b), (1, 1), (1, 1)))
    taps = [xp[:, kh:kh + IMG:2, kw:kw + IMG:2] for kh in range(3) for kw in range(3)]
    xcol = jnp.stack(taps, axis=-1).reshape(b_pad, 256, 9)
    xcol = jnp.pad(xcol, ((0, 0), (0, 0), (0, K0 - 9)))
    g = b_pad // TB
    xcol = xcol.reshape(g, TB, 256, K0).transpose(0, 2, 1, 3)   # (G, 256, TB, K0)
    return xcol.reshape(g, 256 * TB, K0).astype(jnp.bfloat16)


@jax.jit
def discriminator_forward(img, params):
    B, ch, H, W = img.shape
    assert ch == 1 and H == IMG and W == IMG
    b_pad = ((B + TB - 1) // TB) * TB
    g = b_pad // TB
    xcol = _im2col_block0(img, b_pad)

    out = pl.pallas_call(
        _disc_kernel,
        out_shape=jax.ShapeDtypeStruct((b_pad, C), jnp.float32),
        grid=(g,),
        in_specs=[
            pl.BlockSpec((None, 256 * TB, K0), lambda i: (i, 0, 0)),   # block-0 im2col (bf16)
            pl.BlockSpec((C, C), lambda i: (0, 0)),                    # block-0 weights (bf16)
            pl.BlockSpec((3, 9, C, C), lambda i: (0, 0, 0, 0)),        # conv weights 1-3 (bf16)
            pl.BlockSpec((4, 8, C), lambda i: (0, 0, 0)),              # bias/scale/shift (+fc bias)
            pl.BlockSpec((4 * TB, C), lambda i: (0, 0)),               # fc weight (pre-permuted)
        ],
        out_specs=pl.BlockSpec((TB, C), lambda i: (i, 0)),
        scratch_shapes=[
            pltpu.VMEM((H1, H1, TB, C), jnp.float32),   # block-0 output (+top/left halo)
            pltpu.VMEM((H2, H2, TB, C), jnp.float32),   # block-1 output
            pltpu.VMEM((H3, H3, TB, C), jnp.float32),   # block-2 output
        ],
        compiler_params=pltpu.CompilerParams(
            dimension_semantics=("parallel",),          # v7x: grid steps across TensorCores
        ),
    )(xcol, params["w0"], params["w"], params["ep"], params["head"])
    return out[:B, 0:1]                                 # (B, 1)


# -----------------------------------------------------------------------------
# Deterministic synthetic parameters (PyTorch layouts) + packing + pure-JAX reference
# -----------------------------------------------------------------------------
def init_params(key):
    chans = [1, 16, 32, 64, 128]
    keys = jax.random.split(key, 16)
    ki = 0
    layers = []
    for li in range(4):
        cin, cout = chans[li], chans[li + 1]
        w = 0.1 * jax.random.normal(keys[ki], (cout, cin, 3, 3), jnp.float32); ki += 1
        b = 0.1 * jax.random.normal(keys[ki], (cout,), jnp.float32); ki += 1
        if li == 0:
            gamma = beta = None
        else:
            gamma = 1.0 + 0.1 * jax.random.normal(keys[ki], (cout,), jnp.float32); ki += 1
            beta = 0.1 * jax.random.normal(keys[ki], (cout,), jnp.float32); ki += 1
        layers.append({"w": w, "b": b, "gamma": gamma, "beta": beta})
    ds = IMG // 2 ** 4                                    # 2
    fc_w = 0.1 * jax.random.normal(keys[ki], (1, 128 * ds * ds), jnp.float32); ki += 1
    fc_b = 0.1 * jax.random.normal(keys[ki], (1,), jnp.float32); ki += 1
    return layers, {"w": fc_w, "b": fc_b}


def pack_params(layers, fc):
    # Pack into the kernel's layouts.  All per-channel params / weight columns are
    # zero-padded past the real channel count (padded-lane == 0 invariant).
    chans = [1, 16, 32, 64, 128]
    w0 = jnp.zeros((C, C), jnp.float32)
    w0 = w0.at[:9, :16].set(jnp.transpose(layers[0]["w"].reshape(16, 9), (1, 0)))
    ep = jnp.zeros((4, 8, C), jnp.float32)
    ep = ep.at[0, 0, :16].set(layers[0]["b"])
    w = jnp.zeros((3, 9, C, C), jnp.float32)
    for li in range(1, 4):
        cin, cout = chans[li], chans[li + 1]
        p = layers[li]
        w9 = jnp.transpose(p["w"], (2, 3, 1, 0)).reshape(9, cin, cout)
        w = w.at[li - 1, :, :cin, :cout].set(w9)
        scale = p["gamma"] / jnp.sqrt(1.0 + BN_EPS)       # eval BN: running mean 0, var 1
        ep = ep.at[li, 0, :cout].set(p["b"])
        ep = ep.at[li, 1, :cout].set(scale)
        ep = ep.at[li, 2, :cout].set(p["beta"])
    ep = ep.at[0, 3, 0].set(fc["b"][0])
    ds = IMG // 2 ** 4
    # torch NCHW-flatten (c,h,w) order -> kernel (h*2+w, c) order, replicated per sample slot
    head = jnp.transpose(fc["w"].reshape(128, ds, ds), (1, 2, 0)).reshape(ds * ds, 128)
    head = jnp.repeat(head, TB, axis=0)                   # (4*TB, C), row = p*TB + s
    return {"w0": w0.astype(jnp.bfloat16), "w": w.astype(jnp.bfloat16),
            "ep": ep, "head": head}


def reference_forward(img, layers, fc):
    # Pure-JAX reference of the PyTorch module in eval mode.
    x = img.astype(jnp.float32)
    for li, p in enumerate(layers):
        x = lax.conv_general_dilated(
            x, p["w"], window_strides=(2, 2), padding=((1, 1), (1, 1)),
            dimension_numbers=("NCHW", "OIHW", "NCHW"),
            precision=lax.Precision.HIGHEST)
        x = x + p["b"][None, :, None, None]
        x = jnp.where(x >= 0.0, x, LEAKY * x)             # LeakyReLU(0.2); Dropout2d = id
        if li > 0:                                        # eval-mode BatchNorm2d(eps=0.8)
            scale = p["gamma"] / jnp.sqrt(1.0 + BN_EPS)
            x = x * scale[None, :, None, None] + p["beta"][None, :, None, None]
    flat = x.reshape(x.shape[0], -1)                      # NCHW flatten, like torch .view
    logit = flat @ fc["w"].T + fc["b"]
    return jax.nn.sigmoid(logit)


if __name__ == "__main__":
    key = jax.random.PRNGKey(0)
    pkey, xkey = jax.random.split(key)

    BATCH, CHANNELS = 2, 1                                # MNIST-style: 1 channel, 32x32
    layers, fc = init_params(pkey)
    params = pack_params(layers, fc)
    img = jax.random.normal(xkey, (BATCH, CHANNELS, IMG, IMG), jnp.float32)

    out = discriminator_forward(img, params)
    out = jax.block_until_ready(out)

    assert out.shape == (BATCH, 1), out.shape
    assert bool(jnp.all(jnp.isfinite(out))), "non-finite output"
    assert bool(jnp.all((out >= 0.0) & (out <= 1.0))), "sigmoid output out of range"

    ref = reference_forward(img, layers, fc)
    err = float(jnp.max(jnp.abs(out - ref)))
    assert err < 2e-2, f"kernel/reference mismatch: {err}"
    print("KERNEL_OK")
</pallas_src>

<mosaic_0001>
module attributes {stable_mosaic.version = 11 : i64} {
  func.func @_disc_kernel(%arg0: i32, %arg1: memref<1x2048x16xbf16, #tpu.memory_space<vmem>>, %arg2: memref<128x128xbf16, #tpu.memory_space<vmem>>, %arg3: memref<3x9x128x128xbf16, #tpu.memory_space<vmem>>, %arg4: memref<4x8x128xf32, #tpu.memory_space<vmem>>, %arg5: memref<32x128xf32, #tpu.memory_space<vmem>>, %arg6: memref<8x128xf32, #tpu.memory_space<vmem>>, %arg7: memref<17x17x8x128xf32, #tpu.memory_space<vmem>>, %arg8: memref<9x9x8x128xf32, #tpu.memory_space<vmem>>, %arg9: memref<5x5x8x128xf32, #tpu.memory_space<vmem>>) attributes {dimension_semantics = [#tpu.dimension_semantics<parallel>], iteration_bounds = array<i64: 1>, scalar_prefetch = 0 : i64, scratch_operands = 3 : i64, tpu.core_type = #tpu.core_type<tc>, window_params = [{transform_indices = @transform_0, window_bounds = array<i64: 1, 2048, 16>}, {pipeline_mode = #tpu.pipeline_mode<synchronous>, transform_indices = @transform_1, window_bounds = array<i64: 128, 128>}, {pipeline_mode = #tpu.pipeline_mode<synchronous>, transform_indices = @transform_2, window_bounds = array<i64: 3, 9, 128, 128>}, {pipeline_mode = #tpu.pipeline_mode<synchronous>, transform_indices = @transform_3, window_bounds = array<i64: 4, 8, 128>}, {pipeline_mode = #tpu.pipeline_mode<synchronous>, transform_indices = @transform_4, window_bounds = array<i64: 32, 128>}, {transform_indices = @transform_5, window_bounds = array<i64: 8, 128>}]} {
    %cst = arith.constant 0.000000e+00 : f32
    %0 = vector.broadcast %cst : f32 to vector<17x8x128xf32>
    %c0 = arith.constant 0 : index
    %c0_0 = arith.constant 0 : index
    %c0_1 = arith.constant 0 : index
    %c0_2 = arith.constant 0 : index
    %1 = vector.load %arg7[%c0, %c0_0, %c0_1, %c0_2] : memref<17x17x8x128xf32, #tpu.memory_space<vmem>>, vector<1x17x8x128xf32>
    %2 = vector.shape_cast %1 : vector<1x17x8x128xf32> to vector<17x8x128xf32>
    %3 = vector.shape_cast %0 : vector<17x8x128xf32> to vector<1x17x8x128xf32>
    tpu.vector_store %arg7[%c0, %c0_0, %c0_1, %c0_2], %3 {strides = array<i32>} : memref<17x17x8x128xf32, #tpu.memory_space<vmem>>, vector<1x17x8x128xf32>,
    %cst_3 = arith.constant 0.000000e+00 : f32
    %4 = vector.broadcast %cst_3 : f32 to vector<17x1x8x128xf32>
    %c0_4 = arith.constant 0 : index
    %c0_5 = arith.constant 0 : index
    %c0_6 = arith.constant 0 : index
    %c0_7 = arith.constant 0 : index
    %5 = vector.load %arg7[%c0_4, %c0_5, %c0_6, %c0_7] : memref<17x17x8x128xf32, #tpu.memory_space<vmem>>, vector<17x1x8x128xf32>
    tpu.vector_store %arg7[%c0_4, %c0_5, %c0_6, %c0_7], %4 {strides = array<i32>} : memref<17x17x8x128xf32, #tpu.memory_space<vmem>>, vector<17x1x8x128xf32>,
    %cst_8 = arith.constant 0.000000e+00 : f32
    %6 = vector.broadcast %cst_8 : f32 to vector<9x8x128xf32>
    %c0_9 = arith.constant 0 : index
    %c0_10 = arith.constant 0 : index
    %c0_11 = arith.constant 0 : index
    %c0_12 = arith.constant 0 : index
    %7 = vector.load %arg8[%c0_9, %c0_10, %c0_11, %c0_12] : memref<9x9x8x128xf32, #tpu.memory_space<vmem>>, vector<1x9x8x128xf32>
    %8 = vector.shape_cast %7 : vector<1x9x8x128xf32> to vector<9x8x128xf32>
    %9 = vector.shape_cast %6 : vector<9x8x128xf32> to vector<1x9x8x128xf32>
    tpu.vector_store %arg8[%c0_9, %c0_10, %c0_11, %c0_12], %9 {strides = array<i32>} : memref<9x9x8x128xf32, #tpu.memory_space<vmem>>, vector<1x9x8x128xf32>,
    %cst_13 = arith.constant 0.000000e+00 : f32
    %10 = vector.broadcast %cst_13 : f32 to vector<9x1x8x128xf32>
    %c0_14 = arith.constant 0 : index
    %c0_15 = arith.constant 0 : index
    %c0_16 = arith.constant 0 : index
    %c0_17 = arith.constant 0 : index
    %11 = vector.load %arg8[%c0_14, %c0_15, %c0_16, %c0_17] : memref<9x9x8x128xf32, #tpu.memory_space<vmem>>, vector<9x1x8x128xf32>
    tpu.vector_store %arg8[%c0_14, %c0_15, %c0_16, %c0_17], %10 {strides = array<i32>} : memref<9x9x8x128xf32, #tpu.memory_space<vmem>>, vector<9x1x8x128xf32>,
    %cst_18 = arith.constant 0.000000e+00 : f32
    %12 = vector.broadcast %cst_18 : f32 to vector<5x8x128xf32>
    %c0_19 = arith.constant 0 : index
    %c0_20 = arith.constant 0 : index
    %c0_21 = arith.constant 0 : index
    %c0_22 = arith.constant 0 : index
    %13 = vector.load %arg9[%c0_19, %c0_20, %c0_21, %c0_22] : memref<5x5x8x128xf32, #tpu.memory_space<vmem>>, vector<1x5x8x128xf32>
    %14 = vector.shape_cast %13 : vector<1x5x8x128xf32> to vector<5x8x128xf32>
    %15 = vector.shape_cast %12 : vector<5x8x128xf32> to vector<1x5x8x128xf32>
    tpu.vector_store %arg9[%c0_19, %c0_20, %c0_21, %c0_22], %15 {strides = array<i32>} : memref<5x5x8x128xf32, #tpu.memory_space<vmem>>, vector<1x5x8x128xf32>,
    %cst_23 = arith.constant 0.000000e+00 : f32
    %16 = vector.broadcast %cst_23 : f32 to vector<5x1x8x128xf32>
    %c0_24 = arith.constant 0 : index
    %c0_25 = arith.constant 0 : index
    %c0_26 = arith.constant 0 : index
    %c0_27 = arith.constant 0 : index
    %17 = vector.load %arg9[%c0_24, %c0_25, %c0_26, %c0_27] : memref<5x5x8x128xf32, #tpu.memory_space<vmem>>, vector<5x1x8x128xf32>
    tpu.vector_store %arg9[%c0_24, %c0_25, %c0_26, %c0_27], %16 {strides = array<i32>} : memref<5x5x8x128xf32, #tpu.memory_space<vmem>>, vector<5x1x8x128xf32>,
    %c0_28 = arith.constant 0 : index
    %c0_29 = arith.constant 0 : index
    %18 = vector.load %arg2[%c0_28, %c0_29] : memref<128x128xbf16, #tpu.memory_space<vmem>>, vector<128x128xbf16>
    %cst_30 = arith.constant 0.000000e+00 : bf16
    %19 = vector.broadcast %cst_30 : bf16 to vector<128x112xbf16>
    %c0_31 = arith.constant 0 : index
    %c0_32 = arith.constant 0 : index
    %c0_33 = arith.constant 0 : index
    %20 = vector.load %arg1[%c0_31, %c0_32, %c0_33] : memref<1x2048x16xbf16, #tpu.memory_space<vmem>>, vector<1x128x16xbf16>
    %21 = vector.shape_cast %20 : vector<1x128x16xbf16> to vector<128x16xbf16>
    %22 = tpu.concatenate %21, %19 in 1 : vector<128x16xbf16>, vector<128x112xbf16> -> vector<128x128xbf16>
    %cst_34 = arith.constant dense<0.000000e+00> : vector<128x128xf32>
    %23 = tpu.matmul %22, %18, %cst_34 {dimension_numbers = #tpu.dot_dimension_numbers<[1], [0], [0], [1], [0, 0, 1, 1], [], []>} : vector<128x128xbf16>, vector<128x128xbf16>, vector<128x128xf32> -> vector<128x128xf32>
    %c0_35 = arith.constant 0 : index
    %c0_36 = arith.constant 0 : index
    %c0_37 = arith.constant 0 : index
    %24 = vector.load %arg4[%c0_35, %c0_36, %c0_37] : memref<4x8x128xf32, #tpu.memory_space<vmem>>, vector<1x1x128xf32>
    %25 = vector.shape_cast %24 : vector<1x1x128xf32> to vector<1x128xf32>
    %26 = vector.broadcast %25 : vector<1x128xf32> to vector<128x128xf32>
    %27 = arith.addf %23, %26 : vector<128x128xf32>
    %cst_38 = arith.constant 2.000000e-01 : f32
    %28 = vector.broadcast %cst_38 : f32 to vector<128x128xf32>
    %29 = arith.mulf %28, %27 : vector<128x128xf32>
    %30 = arith.maximumf %27, %29 : vector<128x128xf32>
    %31 = vector.shape_cast %30 : vector<128x128xf32> to vector<16x8x128xf32>
    %c1 = arith.constant 1 : index
    %c1_39 = arith.constant 1 : index
    %c0_40 = arith.constant 0 : index
    %c0_41 = arith.constant 0 : index
    %32 = vector.load %arg7[%c1, %c1_39, %c0_40, %c0_41] : memref<17x17x8x128xf32, #tpu.memory_space<vmem>>, vector<1x16x8x128xf32>
    %33 = vector.shape_cast %32 : vector<1x16x8x128xf32> to vector<16x8x128xf32>
    %34 = vector.shape_cast %31 : vector<16x8x128xf32> to vector<1x16x8x128xf32>
    tpu.vector_store %arg7[%c1, %c1_39, %c0_40, %c0_41], %34 {strides = array<i32>} : memref<17x17x8x128xf32, #tpu.memory_space<vmem>>, vector<1x16x8x128xf32>,
    %c0_42 = arith.constant 0 : index
    %c128 = arith.constant 128 : index
    %c0_43 = arith.constant 0 : index
    %35 = vector.load %arg1[%c0_42, %c128, %c0_43] : memref<1x2048x16xbf16, #tpu.memory_space<vmem>>, vector<1x128x16xbf16>
    %36 = vector.shape_cast %35 : vector<1x128x16xbf16> to vector<128x16xbf16>
    %37 = tpu.concatenate %36, %19 in 1 : vector<128x16xbf16>, vector<128x112xbf16> -> vector<128x128xbf16>
    %cst_44 = arith.constant dense<0.000000e+00> : vector<128x128xf32>
    %38 = tpu.matmul %37, %18, %cst_44 {dimension_numbers = #tpu.dot_dimension_numbers<[1], [0], [0], [1], [0, 0, 1, 1], [], []>} : vector<128x128xbf16>, vector<128x128xbf16>, vector<128x128xf32> -> vector<128x128xf32>
    %c0_45 = arith.constant 0 : index
    %c0_46 = arith.constant 0 : index
    %c0_47 = arith.constant 0 : index
    %39 = vector.load %arg4[%c0_45, %c0_46, %c0_47] : memref<4x8x128xf32, #tpu.memory_space<vmem>>, vector<1x1x128xf32>
    %40 = vector.shape_cast %39 : vector<1x1x128xf32> to vector<1x128xf32>
    %41 = vector.broadcast %40 : vector<1x128xf32> to vector<128x128xf32>
    %42 = arith.addf %38, %41 : vector<128x128xf32>
    %cst_48 = arith.constant 2.000000e-01 : f32
    %43 = vector.broadcast %cst_48 : f32 to vector<128x128xf32>
    %44 = arith.mulf %43, %42 : vector<128x128xf32>
    %45 = arith.maximumf %42, %44 : vector<128x128xf32>
    %46 = vector.shape_cast %45 : vector<128x128xf32> to vector<16x8x128xf32>
    %c2 = arith.constant 2 : index
    %c1_49 = arith.constant 1 : index
    %c0_50 = arith.constant 0 : index
    %c0_51 = arith.constant 0 : index
    %47 = vector.load %arg7[%c2, %c1_49, %c0_50, %c0_51] : memref<17x17x8x128xf32, #tpu.memory_space<vmem>>, vector<1x16x8x128xf32>
    %48 = vector.shape_cast %47 : vector<1x16x8x128xf32> to vector<16x8x128xf32>
    %49 = vector.shape_cast %46 : vector<16x8x128xf32> to vector<1x16x8x128xf32>
    tpu.vector_store %arg7[%c2, %c1_49, %c0_50, %c0_51], %49 {strides = array<i32>} : memref<17x17x8x128xf32, #tpu.memory_space<vmem>>, vector<1x16x8x128xf32>,
    %c0_52 = arith.constant 0 : index
    %c256 = arith.constant 256 : index
    %c0_53 = arith.constant 0 : index
    %50 = vector.load %arg1[%c0_52, %c256, %c0_53] : memref<1x2048x16xbf16, #tpu.memory_space<vmem>>, vector<1x128x16xbf16>
    %51 = vector.shape_cast %50 : vector<1x128x16xbf16> to vector<128x16xbf16>
    %52 = tpu.concatenate %51, %19 in 1 : vector<128x16xbf16>, vector<128x112xbf16> -> vector<128x128xbf16>
    %cst_54 = arith.constant dense<0.000000e+00> : vector<128x128xf32>
    %53 = tpu.matmul %52, %18, %cst_54 {dimension_numbers = #tpu.dot_dimension_numbers<[1], [0], [0], [1], [0, 0, 1, 1], [], []>} : vector<128x128xbf16>, vector<128x128xbf16>, vector<128x128xf32> -> vector<128x128xf32>
    %c0_55 = arith.constant 0 : index
    %c0_56 = arith.constant 0 : index
    %c0_57 = arith.constant 0 : index
    %54 = vector.load %arg4[%c0_55, %c0_56, %c0_57] : memref<4x8x128xf32, #tpu.memory_space<vmem>>, vector<1x1x128xf32>
    %55 = vector.shape_cast %54 : vector<1x1x128xf32> to vector<1x128xf32>
    %56 = vector.broadcast %55 : vector<1x128xf32> to vector<128x128xf32>
    %57 = arith.addf %53, %56 : vector<128x128xf32>
    %cst_58 = arith.constant 2.000000e-01 : f32
    %58 = vector.broadcast %cst_58 : f32 to vector<128x128xf32>
    %59 = arith.mulf %58, %57 : vector<128x128xf32>
    %60 = arith.maximumf %57, %59 : vector<128x128xf32>
    %61 = vector.shape_cast %60 : vector<128x128xf32> to vector<16x8x128xf32>
    %c3 = arith.constant 3 : index
    %c1_59 = arith.constant 1 : index
    %c0_60 = arith.constant 0 : index
    %c0_61 = arith.constant 0 : index
    %62 = vector.load %arg7[%c3, %c1_59, %c0_60, %c0_61] : memref<17x17x8x128xf32, #tpu.memory_space<vmem>>, vector<1x16x8x128xf32>
    %63 = vector.shape_cast %62 : vector<1x16x8x128xf32> to vector<16x8x128xf32>
    %64 = vector.shape_cast %61 : vector<16x8x128xf32> to vector<1x16x8x128xf32>
    tpu.vector_store %arg7[%c3, %c1_59, %c0_60, %c0_61], %64 {strides = array<i32>} : memref<17x17x8x128xf32, #tpu.memory_space<vmem>>, vector<1x16x8x128xf32>,
    %c0_62 = arith.constant 0 : index
    %c384 = arith.constant 384 : index
    %c0_63 = arith.constant 0 : index
    %65 = vector.load %arg1[%c0_62, %c384, %c0_63] : memref<1x2048x16xbf16, #tpu.memory_space<vmem>>, vector<1x128x16xbf16>
    %66 = vector.shape_cast %65 : vector<1x128x16xbf16> to vector<128x16xbf16>
    %67 = tpu.concatenate %66, %19 in 1 : vector<128x16xbf16>, vector<128x112xbf16> -> vector<128x128xbf16>
    %cst_64 = arith.constant dense<0.000000e+00> : vector<128x128xf32>
    %68 = tpu.matmul %67, %18, %cst_64 {dimension_numbers = #tpu.dot_dimension_numbers<[1], [0], [0], [1], [0, 0, 1, 1], [], []>} : vector<128x128xbf16>, vector<128x128xbf16>, vector<128x128xf32> -> vector<128x128xf32>
    %c0_65 = arith.constant 0 : index
    %c0_66 = arith.constant 0 : index
    %c0_67 = arith.constant 0 : index
    %69 = vector.load %arg4[%c0_65, %c0_66, %c0_67] : memref<4x8x128xf32, #tpu.memory_space<vmem>>, vector<1x1x128xf32>
    %70 = vector.shape_cast %69 : vector<1x1x128xf32> to vector<1x128xf32>
    %71 = vector.broadcast %70 : vector<1x128xf32> to vector<128x128xf32>
    %72 = arith.addf %68, %71 : vector<128x128xf32>
    %cst_68 = arith.constant 2.000000e-01 : f32
    %73 = vector.broadcast %cst_68 : f32 to vector<128x128xf32>
    %74 = arith.mulf %73, %72 : vector<128x128xf32>
    %75 = arith.maximumf %72, %74 : vector<128x128xf32>
    %76 = vector.shape_cast %75 : vector<128x128xf32> to vector<16x8x128xf32>
    %c4 = arith.constant 4 : index
    %c1_69 = arith.constant 1 : index
    %c0_70 = arith.constant 0 : index
    %c0_71 = arith.constant 0 : index
    %77 = vector.load %arg7[%c4, %c1_69, %c0_70, %c0_71] : memref<17x17x8x128xf32, #tpu.memory_space<vmem>>, vector<1x16x8x128xf32>
    %78 = vector.shape_cast %77 : vector<1x16x8x128xf32> to vector<16x8x128xf32>
    %79 = vector.shape_cast %76 : vector<16x8x128xf32> to vector<1x16x8x128xf32>
    tpu.vector_store %arg7[%c4, %c1_69, %c0_70, %c0_71], %79 {strides = array<i32>} : memref<17x17x8x128xf32, #tpu.memory_space<vmem>>, vector<1x16x8x128xf32>,
    %c0_72 = arith.constant 0 : index
    %c512 = arith.constant 512 : index
    %c0_73 = arith.constant 0 : index
    %80 = vector.load %arg1[%c0_72, %c512, %c0_73] : memref<1x2048x16xbf16, #tpu.memory_space<vmem>>, vector<1x128x16xbf16>
    %81 = vector.shape_cast %80 : vector<1x128x16xbf16> to vector<128x16xbf16>
    %82 = tpu.concatenate %81, %19 in 1 : vector<128x16xbf16>, vector<128x112xbf16> -> vector<128x128xbf16>
    %cst_74 = arith.constant dense<0.000000e+00> : vector<128x128xf32>
    %83 = tpu.matmul %82, %18, %cst_74 {dimension_numbers = #tpu.dot_dimension_numbers<[1], [0], [0], [1], [0, 0, 1, 1], [], []>} : vector<128x128xbf16>, vector<128x128xbf16>, vector<128x128xf32> -> vector<128x128xf32>
    %c0_75 = arith.constant 0 : index
    %c0_76 = arith.constant 0 : index
    %c0_77 = arith.constant 0 : index
    %84 = vector.load %arg4[%c0_75, %c0_76, %c0_77] : memref<4x8x128xf32, #tpu.memory_space<vmem>>, vector<1x1x128xf32>
    %85 = vector.shape_cast %84 : vector<1x1x128xf32> to vector<1x128xf32>
    %86 = vector.broadcast %85 : vector<1x128xf32> to vector<128x128xf32>
    %87 = arith.addf %83, %86 : vector<128x128xf32>
    %cst_78 = arith.constant 2.000000e-01 : f32
    %88 = vector.broadcast %cst_78 : f32 to vector<128x128xf32>
    %89 = arith.mulf %88, %87 : vector<128x128xf32>
    %90 = arith.maximumf %87, %89 : vector<128x128xf32>
    %91 = vector.shape_cast %90 : vector<128x128xf32> to vector<16x8x128xf32>
    %c5 = arith.constant 5 : index
    %c1_79 = arith.constant 1 : index
    %c0_80 = arith.constant 0 : index
    %c0_81 = arith.constant 0 : index
    %92 = vector.load %arg7[%c5, %c1_79, %c0_80, %c0_81] : memref<17x17x8x128xf32, #tpu.memory_space<vmem>>, vector<1x16x8x128xf32>
    %93 = vector.shape_cast %92 : vector<1x16x8x128xf32> to vector<16x8x128xf32>
    %94 = vector.shape_cast %91 : vector<16x8x128xf32> to vector<1x16x8x128xf32>
    tpu.vector_store %arg7[%c5, %c1_79, %c0_80, %c0_81], %94 {strides = array<i32>} : memref<17x17x8x128xf32, #tpu.memory_space<vmem>>, vector<1x16x8x128xf32>,
    %c0_82 = arith.constant 0 : index
    %c640 = arith.constant 640 : index
    %c0_83 = arith.constant 0 : index
    %95 = vector.load %arg1[%c0_82, %c640, %c0_83] : memref<1x2048x16xbf16, #tpu.memory_space<vmem>>, vector<1x128x16xbf16>
    %96 = vector.shape_cast %95 : vector<1x128x16xbf16> to vector<128x16xbf16>
    %97 = tpu.concatenate %96, %19 in 1 : vector<128x16xbf16>, vector<128x112xbf16> -> vector<128x128xbf16>
    %cst_84 = arith.constant dense<0.000000e+00> : vector<128x128xf32>
    %98 = tpu.matmul %97, %18, %cst_84 {dimension_numbers = #tpu.dot_dimension_numbers<[1], [0], [0], [1], [0, 0, 1, 1], [], []>} : vector<128x128xbf16>, vector<128x128xbf16>, vector<128x128xf32> -> vector<128x128xf32>
    %c0_85 = arith.constant 0 : index
    %c0_86 = arith.constant 0 : index
    %c0_87 = arith.constant 0 : index
    %99 = vector.load %arg4[%c0_85, %c0_86, %c0_87] : memref<4x8x128xf32, #tpu.memory_space<vmem>>, vector<1x1x128xf32>
    %100 = vector.shape_cast %99 : vector<1x1x128xf32> to vector<1x128xf32>
    %101 = vector.broadcast %100 : vector<1x128xf32> to vector<128x128xf32>
    %102 = arith.addf %98, %101 : vector<128x128xf32>
    %cst_88 = arith.constant 2.000000e-01 : f32
    %103 = vector.broadcast %cst_88 : f32 to vector<128x128xf32>
    %104 = arith.mulf %103, %102 : vector<128x128xf32>
    %105 = arith.maximumf %102, %104 : vector<128x128xf32>
    %106 = vector.shape_cast %105 : vector<128x128xf32> to vector<16x8x128xf32>
    %c6 = arith.constant 6 : index
    %c1_89 = arith.constant 1 : index
    %c0_90 = arith.constant 0 : index
    %c0_91 = arith.constant 0 : index
    %107 = vector.load %arg7[%c6, %c1_89, %c0_90, %c0_91] : memref<17x17x8x128xf32, #tpu.memory_space<vmem>>, vector<1x16x8x128xf32>
    %108 = vector.shape_cast %107 : vector<1x16x8x128xf32> to vector<16x8x128xf32>
    %109 = vector.shape_cast %106 : vector<16x8x128xf32> to vector<1x16x8x128xf32>
    tpu.vector_store %arg7[%c6, %c1_89, %c0_90, %c0_91], %109 {strides = array<i32>} : memref<17x17x8x128xf32, #tpu.memory_space<vmem>>, vector<1x16x8x128xf32>,
    %c0_92 = arith.constant 0 : index
    %c768 = arith.constant 768 : index
    %c0_93 = arith.constant 0 : index
    %110 = vector.load %arg1[%c0_92, %c768, %c0_93] : memref<1x2048x16xbf16, #tpu.memory_space<vmem>>, vector<1x128x16xbf16>
    %111 = vector.shape_cast %110 : vector<1x128x16xbf16> to vector<128x16xbf16>
    %112 = tpu.concatenate %111, %19 in 1 : vector<128x16xbf16>, vector<128x112xbf16> -> vector<128x128xbf16>
    %cst_94 = arith.constant dense<0.000000e+00> : vector<128x128xf32>
    %113 = tpu.matmul %112, %18, %cst_94 {dimension_numbers = #tpu.dot_dimension_numbers<[1], [0], [0], [1], [0, 0, 1, 1], [], []>} : vector<128x128xbf16>, vector<128x128xbf16>, vector<128x128xf32> -> vector<128x128xf32>
    %c0_95 = arith.constant 0 : index
    %c0_96 = arith.constant 0 : index
    %c0_97 = arith.constant 0 : index
    %114 = vector.load %arg4[%c0_95, %c0_96, %c0_97] : memref<4x8x128xf32, #tpu.memory_space<vmem>>, vector<1x1x128xf32>
    %115 = vector.shape_cast %114 : vector<1x1x128xf32> to vector<1x128xf32>
    %116 = vector.broadcast %115 : vector<1x128xf32> to vector<128x128xf32>
    %117 = arith.addf %113, %116 : vector<128x128xf32>
    %cst_98 = arith.constant 2.000000e-01 : f32
    %118 = vector.broadcast %cst_98 : f32 to vector<128x128xf32>
    %119 = arith.mulf %118, %117 : vector<128x128xf32>
    %120 = arith.maximumf %117, %119 : vector<128x128xf32>
    %121 = vector.shape_cast %120 : vector<128x128xf32> to vector<16x8x128xf32>
    %c7 = arith.constant 7 : index
    %c1_99 = arith.constant 1 : index
    %c0_100 = arith.constant 0 : index
    %c0_101 = arith.constant 0 : index
    %122 = vector.load %arg7[%c7, %c1_99, %c0_100, %c0_101] : memref<17x17x8x128xf32, #tpu.memory_space<vmem>>, vector<1x16x8x128xf32>
    %123 = vector.shape_cast %122 : vector<1x16x8x128xf32> to vector<16x8x128xf32>
    %124 = vector.shape_cast %121 : vector<16x8x128xf32> to vector<1x16x8x128xf32>
    tpu.vector_store %arg7[%c7, %c1_99, %c0_100, %c0_101], %124 {strides = array<i32>} : memref<17x17x8x128xf32, #tpu.memory_space<vmem>>, vector<1x16x8x128xf32>,
    %c0_102 = arith.constant 0 : index
    %c896 = arith.constant 896 : index
    %c0_103 = arith.constant 0 : index
    %125 = vector.load %arg1[%c0_102, %c896, %c0_103] : memref<1x2048x16xbf16, #tpu.memory_space<vmem>>, vector<1x128x16xbf16>
    %126 = vector.shape_cast %125 : vector<1x128x16xbf16> to vector<128x16xbf16>
    %127 = tpu.concatenate %126, %19 in 1 : vector<128x16xbf16>, vector<128x112xbf16> -> vector<128x128xbf16>
    %cst_104 = arith.constant dense<0.000000e+00> : vector<128x128xf32>
    %128 = tpu.matmul %127, %18, %cst_104 {dimension_numbers = #tpu.dot_dimension_numbers<[1], [0], [0], [1], [0, 0, 1, 1], [], []>} : vector<128x128xbf16>, vector<128x128xbf16>, vector<128x128xf32> -> vector<128x128xf32>
    %c0_105 = arith.constant 0 : index
    %c0_106 = arith.constant 0 : index
    %c0_107 = arith.constant 0 : index
    %129 = vector.load %arg4[%c0_105, %c0_106, %c0_107] : memref<4x8x128xf32, #tpu.memory_space<vmem>>, vector<1x1x128xf32>
    %130 = vector.shape_cast %129 : vector<1x1x128xf32> to vector<1x128xf32>
    %131 = vector.broadcast %130 : vector<1x128xf32> to vector<128x128xf32>
    %132 = arith.addf %128, %131 : vector<128x128xf32>
    %cst_108 = arith.constant 2.000000e-01 : f32
    %133 = vector.broadcast %cst_108 : f32 to vector<128x128xf32>
    %134 = arith.mulf %133, %132 : vector<128x128xf32>
    %135 = arith.maximumf %132, %134 : vector<128x128xf32>
    %136 = vector.shape_cast %135 : vector<128x128xf32> to vector<16x8x128xf32>
    %c8 = arith.constant 8 : index
    %c1_109 = arith.constant 1 : index
    %c0_110 = arith.constant 0 : index
    %c0_111 = arith.constant 0 : index
    %137 = vector.load %arg7[%c8, %c1_109, %c0_110, %c0_111] : memref<17x17x8x128xf32, #tpu.memory_space<vmem>>, vector<1x16x8x128xf32>
    %138 = vector.shape_cast %137 : vector<1x16x8x128xf32> to vector<16x8x128xf32>
    %139 = vector.shape_cast %136 : vector<16x8x128xf32> to vector<1x16x8x128xf32>
    tpu.vector_store %arg7[%c8, %c1_109, %c0_110, %c0_111], %139 {strides = array<i32>} : memref<17x17x8x128xf32, #tpu.memory_space<vmem>>, vector<1x16x8x128xf32>,
    %c0_112 = arith.constant 0 : index
    %c1024 = arith.constant 1024 : index
    %c0_113 = arith.constant 0 : index
    %140 = vector.load %arg1[%c0_112, %c1024, %c0_113] : memref<1x2048x16xbf16, #tpu.memory_space<vmem>>, vector<1x128x16xbf16>
    %141 = vector.shape_cast %140 : vector<1x128x16xbf16> to vector<128x16xbf16>
    %142 = tpu.concatenate %141, %19 in 1 : vector<128x16xbf16>, vector<128x112xbf16> -> vector<128x128xbf16>
    %cst_114 = arith.constant dense<0.000000e+00> : vector<128x128xf32>
    %143 = tpu.matmul %142, %18, %cst_114 {dimension_numbers = #tpu.dot_dimension_numbers<[1], [0], [0], [1], [0, 0, 1, 1], [], []>} : vector<128x128xbf16>, vector<128x128xbf16>, vector<128x128xf32> -> vector<128x128xf32>
    %c0_115 = arith.constant 0 : index
    %c0_116 = arith.constant 0 : index
    %c0_117 = arith.constant 0 : index
    %144 = vector.load %arg4[%c0_115, %c0_116, %c0_117] : memref<4x8x128xf32, #tpu.memory_space<vmem>>, vector<1x1x128xf32>
    %145 = vector.shape_cast %144 : vector<1x1x128xf32> to vector<1x128xf32>
    %146 = vector.broadcast %145 : vector<1x128xf32> to vector<128x128xf32>
    %147 = arith.addf %143, %146 : vector<128x128xf32>
    %cst_118 = arith.constant 2.000000e-01 : f32
    %148 = vector.broadcast %cst_118 : f32 to vector<128x128xf32>
    %149 = arith.mulf %148, %147 : vector<128x128xf32>
    %150 = arith.maximumf %147, %149 : vector<128x128xf32>
    %151 = vector.shape_cast %150 : vector<128x128xf32> to vector<16x8x128xf32>
    %c9 = arith.constant 9 : index
    %c1_119 = arith.constant 1 : index
    %c0_120 = arith.constant 0 : index
    %c0_121 = arith.constant 0 : index
    %152 = vector.load %arg7[%c9, %c1_119, %c0_120, %c0_121] : memref<17x17x8x128xf32, #tpu.memory_space<vmem>>, vector<1x16x8x128xf32>
    %153 = vector.shape_cast %152 : vector<1x16x8x128xf32> to vector<16x8x128xf32>
    %154 = vector.shape_cast %151 : vector<16x8x128xf32> to vector<1x16x8x128xf32>
    tpu.vector_store %arg7[%c9, %c1_119, %c0_120, %c0_121], %154 {strides = array<i32>} : memref<17x17x8x128xf32, #tpu.memory_space<vmem>>, vector<1x16x8x128xf32>,
    %c0_122 = arith.constant 0 : index
    %c1152 = arith.constant 1152 : index
    %c0_123 = arith.constant 0 : index
    %155 = vector.load %arg1[%c0_122, %c1152, %c0_123] : memref<1x2048x16xbf16, #tpu.memory_space<vmem>>, vector<1x128x16xbf16>
    %156 = vector.shape_cast %155 : vector<1x128x16xbf16> to vector<128x16xbf16>
    %157 = tpu.concatenate %156, %19 in 1 : vector<128x16xbf16>, vector<128x112xbf16> -> vector<128x128xbf16>
    %cst_124 = arith.constant dense<0.000000e+00> : vector<128x128xf32>
    %158 = tpu.matmul %157, %18, %cst_124 {dimension_numbers = #tpu.dot_dimension_numbers<[1], [0], [0], [1], [0, 0, 1, 1], [], []>} : vector<128x128xbf16>, vector<128x128xbf16>, vector<128x128xf32> -> vector<128x128xf32>
    %c0_125 = arith.constant 0 : index
    %c0_126 = arith.constant 0 : index
    %c0_127 = arith.constant 0 : index
    %159 = vector.load %arg4[%c0_125, %c0_126, %c0_127] : memref<4x8x128xf32, #tpu.memory_space<vmem>>, vector<1x1x128xf32>
    %160 = vector.shape_cast %159 : vector<1x1x128xf32> to vector<1x128xf32>
    %161 = vector.broadcast %160 : vector<1x128xf32> to vector<128x128xf32>
    %162 = arith.addf %158, %161 : vector<128x128xf32>
    %cst_128 = arith.constant 2.000000e-01 : f32
    %163 = vector.broadcast %cst_128 : f32 to vector<128x128xf32>
    %164 = arith.mulf %163, %162 : vector<128x128xf32>
    %165 = arith.maximumf %162, %164 : vector<128x128xf32>
    %166 = vector.shape_cast %165 : vector<128x128xf32> to vector<16x8x128xf32>
    %c10 = arith.constant 10 : index
    %c1_129 = arith.constant 1 : index
    %c0_130 = arith.constant 0 : index
    %c0_131 = arith.constant 0 : index
    %167 = vector.load %arg7[%c10, %c1_129, %c0_130, %c0_131] : memref<17x17x8x128xf32, #tpu.memory_space<vmem>>, vector<1x16x8x128xf32>
    %168 = vector.shape_cast %167 : vector<1x16x8x128xf32> to vector<16x8x128xf32>
    %169 = vector.shape_cast %166 : vector<16x8x128xf32> to vector<1x16x8x128xf32>
    tpu.vector_store %arg7[%c10, %c1_129, %c0_130, %c0_131], %169 {strides = array<i32>} : memref<17x17x8x128xf32, #tpu.memory_space<vmem>>, vector<1x16x8x128xf32>,
    %c0_132 = arith.constant 0 : index
    %c1280 = arith.constant 1280 : index
    %c0_133 = arith.constant 0 : index
    %170 = vector.load %arg1[%c0_132, %c1280, %c0_133] : memref<1x2048x16xbf16, #tpu.memory_space<vmem>>, vector<1x128x16xbf16>
    %171 = vector.shape_cast %170 : vector<1x128x16xbf16> to vector<128x16xbf16>
    %172 = tpu.concatenate %171, %19 in 1 : vector<128x16xbf16>, vector<128x112xbf16> -> vector<128x128xbf16>
    %cst_134 = arith.constant dense<0.000000e+00> : vector<128x128xf32>
    %173 = tpu.matmul %172, %18, %cst_134 {dimension_numbers = #tpu.dot_dimension_numbers<[1], [0], [0], [1], [0, 0, 1, 1], [], []>} : vector<128x128xbf16>, vector<128x128xbf16>, vector<128x128xf32> -> vector<128x128xf32>
    %c0_135 = arith.constant 0 : index
    %c0_136 = arith.constant 0 : index
    %c0_137 = arith.constant 0 : index
    %174 = vector.load %arg4[%c0_135, %c0_136, %c0_137] : memref<4x8x128xf32, #tpu.memory_space<vmem>>, vector<1x1x128xf32>
    %175 = vector.shape_cast %174 : vector<1x1x128xf32> to vector<1x128xf32>
    %176 = vector.broadcast %175 : vector<1x128xf32> to vector<128x128xf32>
    %177 = arith.addf %173, %176 : vector<128x128xf32>
    %cst_138 = arith.constant 2.000000e-01 : f32
    %178 = vector.broadcast %cst_138 : f32 to vector<128x128xf32>
    %179 = arith.mulf %178, %177 : vector<128x128xf32>
    %180 = arith.maximumf %177, %179 : vector<128x128xf32>
    %181 = vector.shape_cast %180 : vector<128x128xf32> to vector<16x8x128xf32>
    %c11 = arith.constant 11 : index
    %c1_139 = arith.constant 1 : index
    %c0_140 = arith.constant 0 : index
    %c0_141 = arith.constant 0 : index
    %182 = vector.load %arg7[%c11, %c1_139, %c0_140, %c0_141] : memref<17x17x8x128xf32, #tpu.memory_space<vmem>>, vector<1x16x8x128xf32>
    %183 = vector.shape_cast %182 : vector<1x16x8x128xf32> to vector<16x8x128xf32>
    %184 = vector.shape_cast %181 : vector<16x8x128xf32> to vector<1x16x8x128xf32>
    tpu.vector_store %arg7[%c11, %c1_139, %c0_140, %c0_141], %184 {strides = array<i32>} : memref<17x17x8x128xf32, #tpu.memory_space<vmem>>, vector<1x16x8x128xf32>,
    %c0_142 = arith.constant 0 : index
    %c1408 = arith.constant 1408 : index
    %c0_143 = arith.constant 0 : index
    %185 = vector.load %arg1[%c0_142, %c1408, %c0_143] : memref<1x2048x16xbf16, #tpu.memory_space<vmem>>, vector<1x128x16xbf16>
    %186 = vector.shape_cast %185 : vector<1x128x16xbf16> to vector<128x16xbf16>
    %187 = tpu.concatenate %186, %19 in 1 : vector<128x16xbf16>, vector<128x112xbf16> -> vector<128x128xbf16>
    %cst_144 = arith.constant dense<0.000000e+00> : vector<128x128xf32>
    %188 = tpu.matmul %187, %18, %cst_144 {dimension_numbers = #tpu.dot_dimension_numbers<[1], [0], [0], [1], [0, 0, 1, 1], [], []>} : vector<128x128xbf16>, vector<128x128xbf16>, vector<128x128xf32> -> vector<128x128xf32>
    %c0_145 = arith.constant 0 : index
    %c0_146 = arith.constant 0 : index
    %c0_147 = arith.constant 0 : index
    %189 = vector.load %arg4[%c0_145, %c0_146, %c0_147] : memref<4x8x128xf32, #tpu.memory_space<vmem>>, vector<1x1x128xf32>
    %190 = vector.shape_cast %189 : vector<1x1x128xf32> to vector<1x128xf32>
    %191 = vector.broadcast %190 : vector<1x128xf32> to vector<128x128xf32>
    %192 = arith.addf %188, %191 : vector<128x128xf32>
    %cst_148 = arith.constant 2.000000e-01 : f32
    %193 = vector.broadcast %cst_148 : f32 to vector<128x128xf32>
    %194 = arith.mulf %193, %192 : vector<128x128xf32>
    %195 = arith.maximumf %192, %194 : vector<128x128xf32>
    %196 = vector.shape_cast %195 : vector<128x128xf32> to vector<16x8x128xf32>
    %c12 = arith.constant 12 : index
    %c1_149 = arith.constant 1 : index
    %c0_150 = arith.constant 0 : index
    %c0_151 = arith.constant 0 : index
    %197 = vector.load %arg7[%c12, %c1_149, %c0_150, %c0_151] : memref<17x17x8x128xf32, #tpu.memory_space<vmem>>, vector<1x16x8x128xf32>
    %198 = vector.shape_cast %197 : vector<1x16x8x128xf32> to vector<16x8x128xf32>
    %199 = vector.shape_cast %196 : vector<16x8x128xf32> to vector<1x16x8x128xf32>
    tpu.vector_store %arg7[%c12, %c1_149, %c0_150, %c0_151], %199 {strides = array<i32>} : memref<17x17x8x128xf32, #tpu.memory_space<vmem>>, vector<1x16x8x128xf32>,
    %c0_152 = arith.constant 0 : index
    %c1536 = arith.constant 1536 : index
    %c0_153 = arith.constant 0 : index
    %200 = vector.load %arg1[%c0_152, %c1536, %c0_153] : memref<1x2048x16xbf16, #tpu.memory_space<vmem>>, vector<1x128x16xbf16>
    %201 = vector.shape_cast %200 : vector<1x128x16xbf16> to vector<128x16xbf16>
    %202 = tpu.concatenate %201, %19 in 1 : vector<128x16xbf16>, vector<128x112xbf16> -> vector<128x128xbf16>
    %cst_154 = arith.constant dense<0.000000e+00> : vector<128x128xf32>
    %203 = tpu.matmul %202, %18, %cst_154 {dimension_numbers = #tpu.dot_dimension_numbers<[1], [0], [0], [1], [0, 0, 1, 1], [], []>} : vector<128x128xbf16>, vector<128x128xbf16>, vector<128x128xf32> -> vector<128x128xf32>
    %c0_155 = arith.constant 0 : index
    %c0_156 = arith.constant 0 : index
    %c0_157 = arith.constant 0 : index
    %204 = vector.load %arg4[%c0_155, %c0_156, %c0_157] : memref<4x8x128xf32, #tpu.memory_space<vmem>>, vector<1x1x128xf32>
    %205 = vector.shape_cast %204 : vector<1x1x128xf32> to vector<1x128xf32>
    %206 = vector.broadcast %205 : vector<1x128xf32> to vector<128x128xf32>
    %207 = arith.addf %203, %206 : vector<128x128xf32>
    %cst_158 = arith.constant 2.000000e-01 : f32
    %208 = vector.broadcast %cst_158 : f32 to vector<128x128xf32>
    %209 = arith.mulf %208, %207 : vector<128x128xf32>
    %210 = arith.maximumf %207, %209 : vector<128x128xf32>
    %211 = vector.shape_cast %210 : vector<128x128xf32> to vector<16x8x128xf32>
    %c13 = arith.constant 13 : index
    %c1_159 = arith.constant 1 : index
    %c0_160 = arith.constant 0 : index
    %c0_161 = arith.constant 0 : index
    %212 = vector.load %arg7[%c13, %c1_159, %c0_160, %c0_161] : memref<17x17x8x128xf32, #tpu.memory_space<vmem>>, vector<1x16x8x128xf32>
    %213 = vector.shape_cast %212 : vector<1x16x8x128xf32> to vector<16x8x128xf32>
    %214 = vector.shape_cast %211 : vector<16x8x128xf32> to vector<1x16x8x128xf32>
    tpu.vector_store %arg7[%c13, %c1_159, %c0_160, %c0_161], %214 {strides = array<i32>} : memref<17x17x8x128xf32, #tpu.memory_space<vmem>>, vector<1x16x8x128xf32>,
    %c0_162 = arith.constant 0 : index
    %c1664 = arith.constant 1664 : index
    %c0_163 = arith.constant 0 : index
    %215 = vector.load %arg1[%c0_162, %c1664, %c0_163] : memref<1x2048x16xbf16, #tpu.memory_space<vmem>>, vector<1x128x16xbf16>
    %216 = vector.shape_cast %215 : vector<1x128x16xbf16> to vector<128x16xbf16>
    %217 = tpu.concatenate %216, %19 in 1 : vector<128x16xbf16>, vector<128x112xbf16> -> vector<128x128xbf16>
    %cst_164 = arith.constant dense<0.000000e+00> : vector<128x128xf32>
    %218 = tpu.matmul %217, %18, %cst_164 {dimension_numbers = #tpu.dot_dimension_numbers<[1], [0], [0], [1], [0, 0, 1, 1], [], []>} : vector<128x128xbf16>, vector<128x128xbf16>, vector<128x128xf32> -> vector<128x128xf32>
    %c0_165 = arith.constant 0 : index
    %c0_166 = arith.constant 0 : index
    %c0_167 = arith.constant 0 : index
    %219 = vector.load %arg4[%c0_165, %c0_166, %c0_167] : memref<4x8x128xf32, #tpu.memory_space<vmem>>, vector<1x1x128xf32>
    %220 = vector.shape_cast %219 : vector<1x1x128xf32> to vector<1x128xf32>
    %221 = vector.broadcast %220 : vector<1x128xf32> to vector<128x128xf32>
    %222 = arith.addf %218, %221 : vector<128x128xf32>
    %cst_168 = arith.constant 2.000000e-01 : f32
    %223 = vector.broadcast %cst_168 : f32 to vector<128x128xf32>
    %224 = arith.mulf %223, %222 : vector<128x128xf32>
    %225 = arith.maximumf %222, %224 : vector<128x128xf32>
    %226 = vector.shape_cast %225 : vector<128x128xf32> to vector<16x8x128xf32>
    %c14 = arith.constant 14 : index
    %c1_169 = arith.constant 1 : index
    %c0_170 = arith.constant 0 : index
    %c0_171 = arith.constant 0 : index
    %227 = vector.load %arg7[%c14, %c1_169, %c0_170, %c0_171] : memref<17x17x8x128xf32, #tpu.memory_space<vmem>>, vector<1x16x8x128xf32>
    %228 = vector.shape_cast %227 : vector<1x16x8x128xf32> to vector<16x8x128xf32>
    %229 = vector.shape_cast %226 : vector<16x8x128xf32> to vector<1x16x8x128xf32>
    tpu.vector_store %arg7[%c14, %c1_169, %c0_170, %c0_171], %229 {strides = array<i32>} : memref<17x17x8x128xf32, #tpu.memory_space<vmem>>, vector<1x16x8x128xf32>,
    %c0_172 = arith.constant 0 : index
    %c1792 = arith.constant 1792 : index
    %c0_173 = arith.constant 0 : index
    %230 = vector.load %arg1[%c0_172, %c1792, %c0_173] : memref<1x2048x16xbf16, #tpu.memory_space<vmem>>, vector<1x128x16xbf16>
    %231 = vector.shape_cast %230 : vector<1x128x16xbf16> to vector<128x16xbf16>
    %232 = tpu.concatenate %231, %19 in 1 : vector<128x16xbf16>, vector<128x112xbf16> -> vector<128x128xbf16>
    %cst_174 = arith.constant dense<0.000000e+00> : vector<128x128xf32>
    %233 = tpu.matmul %232, %18, %cst_174 {dimension_numbers = #tpu.dot_dimension_numbers<[1], [0], [0], [1], [0, 0, 1, 1], [], []>} : vector<128x128xbf16>, vector<128x128xbf16>, vector<128x128xf32> -> vector<128x128xf32>
    %c0_175 = arith.constant 0 : index
    %c0_176 = arith.constant 0 : index
    %c0_177 = arith.constant 0 : index
    %234 = vector.load %arg4[%c0_175, %c0_176, %c0_177] : memref<4x8x128xf32, #tpu.memory_space<vmem>>, vector<1x1x128xf32>
    %235 = vector.shape_cast %234 : vector<1x1x128xf32> to vector<1x128xf32>
    %236 = vector.broadcast %235 : vector<1x128xf32> to vector<128x128xf32>
    %237 = arith.addf %233, %236 : vector<128x128xf32>
    %cst_178 = arith.constant 2.000000e-01 : f32
    %238 = vector.broadcast %cst_178 : f32 to vector<128x128xf32>
    %239 = arith.mulf %238, %237 : vector<128x128xf32>
    %240 = arith.maximumf %237, %239 : vector<128x128xf32>
    %241 = vector.shape_cast %240 : vector<128x128xf32> to vector<16x8x128xf32>
    %c15 = arith.constant 15 : index
    %c1_179 = arith.constant 1 : index
    %c0_180 = arith.constant 0 : index
    %c0_181 = arith.constant 0 : index
    %242 = vector.load %arg7[%c15, %c1_179, %c0_180, %c0_181] : memref<17x17x8x128xf32, #tpu.memory_space<vmem>>, vector<1x16x8x128xf32>
    %243 = vector.shape_cast %242 : vector<1x16x8x128xf32> to vector<16x8x128xf32>
    %244 = vector.shape_cast %241 : vector<16x8x128xf32> to vector<1x16x8x128xf32>
    tpu.vector_store %arg7[%c15, %c1_179, %c0_180, %c0_181], %244 {strides = array<i32>} : memref<17x17x8x128xf32, #tpu.memory_space<vmem>>, vector<1x16x8x128xf32>,
    %c0_182 = arith.constant 0 : index
    %c1920 = arith.constant 1920 : index
    %c0_183 = arith.constant 0 : index
    %245 = vector.load %arg1[%c0_182, %c1920, %c0_183] : memref<1x2048x16xbf16, #tpu.memory_space<vmem>>, vector<1x128x16xbf16>
    %246 = vector.shape_cast %245 : vector<1x128x16xbf16> to vector<128x16xbf16>
    %247 = tpu.concatenate %246, %19 in 1 : vector<128x16xbf16>, vector<128x112xbf16> -> vector<128x128xbf16>
    %cst_184 = arith.constant dense<0.000000e+00> : vector<128x128xf32>
    %248 = tpu.matmul %247, %18, %cst_184 {dimension_numbers = #tpu.dot_dimension_numbers<[1], [0], [0], [1], [0, 0, 1, 1], [], []>} : vector<128x128xbf16>, vector<128x128xbf16>, vector<128x128xf32> -> vector<128x128xf32>
    %c0_185 = arith.constant 0 : index
    %c0_186 = arith.constant 0 : index
    %c0_187 = arith.constant 0 : index
    %249 = vector.load %arg4[%c0_185, %c0_186, %c0_187] : memref<4x8x128xf32, #tpu.memory_space<vmem>>, vector<1x1x128xf32>
    %250 = vector.shape_cast %249 : vector<1x1x128xf32> to vector<1x128xf32>
    %251 = vector.broadcast %250 : vector<1x128xf32> to vector<128x128xf32>
    %252 = arith.addf %248, %251 : vector<128x128xf32>
    %cst_188 = arith.constant 2.000000e-01 : f32
    %253 = vector.broadcast %cst_188 : f32 to vector<128x128xf32>
    %254 = arith.mulf %253, %252 : vector<128x128xf32>
    %255 = arith.maximumf %252, %254 : vector<128x128xf32>
    %256 = vector.shape_cast %255 : vector<128x128xf32> to vector<16x8x128xf32>
    %c16 = arith.constant 16 : index
    %c1_189 = arith.constant 1 : index
    %c0_190 = arith.constant 0 : index
    %c0_191 = arith.constant 0 : index
    %257 = vector.load %arg7[%c16, %c1_189, %c0_190, %c0_191] : memref<17x17x8x128xf32, #tpu.memory_space<vmem>>, vector<1x16x8x128xf32>
    %258 = vector.shape_cast %257 : vector<1x16x8x128xf32> to vector<16x8x128xf32>
    %259 = vector.shape_cast %256 : vector<16x8x128xf32> to vector<1x16x8x128xf32>
    tpu.vector_store %arg7[%c16, %c1_189, %c0_190, %c0_191], %259 {strides = array<i32>} : memref<17x17x8x128xf32, #tpu.memory_space<vmem>>, vector<1x16x8x128xf32>,
    %cst_192 = arith.constant 0.000000e+00 : f32
    %260 = vector.broadcast %cst_192 : f32 to vector<128x128xf32>
    %c0_193 = arith.constant 0 : index
    %c0_194 = arith.constant 0 : index
    %c0_195 = arith.constant 0 : index
    %c0_196 = arith.constant 0 : index
    %261 = tpu.strided_load %arg7[%c0_193, %c0_194, %c0_195, %c0_196] {strides = array<i32: 2, 2, 1, 1>} : memref<17x17x8x128xf32, #tpu.memory_space<vmem>>, vector<2x8x8x128xf32>
    %262 = vector.shape_cast %261 : vector<2x8x8x128xf32> to vector<128x128xf32>
    %263 = arith.truncf %262 : vector<128x128xf32> to vector<128x128xbf16>
    %c0_197 = arith.constant 0 : index
    %c0_198 = arith.constant 0 : index
    %c0_199 = arith.constant 0 : index
    %c0_200 = arith.constant 0 : index
    %264 = vector.load %arg3[%c0_197, %c0_198, %c0_199, %c0_200] : memref<3x9x128x128xbf16, #tpu.memory_space<vmem>>, vector<1x1x128x128xbf16>
    %265 = vector.shape_cast %264 : vector<1x1x128x128xbf16> to vector<128x128xbf16>
    %cst_201 = arith.constant dense<0.000000e+00> : vector<128x128xf32>
    %266 = tpu.matmul %263, %265, %cst_201 {dimension_numbers = #tpu.dot_dimension_numbers<[1], [0], [0], [1], [0, 0, 1, 1], [], []>} : vector<128x128xbf16>, vector<128x128xbf16>, vector<128x128xf32> -> vector<128x128xf32>
    %267 = arith.addf %260, %266 : vector<128x128xf32>
    %c0_202 = arith.constant 0 : index
    %c1_203 = arith.constant 1 : index
    %c0_204 = arith.constant 0 : index
    %c0_205 = arith.constant 0 : index
    %268 = tpu.strided_load %arg7[%c0_202, %c1_203, %c0_204, %c0_205] {strides = array<i32: 2, 2, 1, 1>} : memref<17x17x8x128xf32, #tpu.memory_space<vmem>>, vector<2x8x8x128xf32>
    %269 = vector.shape_cast %268 : vector<2x8x8x128xf32> to vector<128x128xf32>
    %270 = arith.truncf %269 : vector<128x128xf32> to vector<128x128xbf16>
    %c0_206 = arith.constant 0 : index
    %c1_207 = arith.constant 1 : index
    %c0_208 = arith.constant 0 : index
    %c0_209 = arith.constant 0 : index
    %271 = vector.load %arg3[%c0_206, %c1_207, %c0_208, %c0_209] : memref<3x9x128x128xbf16, #tpu.memory_space<vmem>>, vector<1x1x128x128xbf16>
    %272 = vector.shape_cast %271 : vector<1x1x128x128xbf16> to vector<128x128xbf16>
    %cst_210 = arith.constant dense<0.000000e+00> : vector<128x128xf32>
    %273 = tpu.matmul %270, %272, %cst_210 {dimension_numbers = #tpu.dot_dimension_numbers<[1], [0], [0], [1], [0, 0, 1, 1], [], []>} : vector<128x128xbf16>, vector<128x128xbf16>, vector<128x128xf32> -> vector<128x128xf32>
    %274 = arith.addf %267, %273 : vector<128x128xf32>
    %c0_211 = arith.constant 0 : index
    %c2_212 = arith.constant 2 : index
    %c0_213 = arith.constant 0 : index
    %c0_214 = arith.constant 0 : index
    %275 = tpu.strided_load %arg7[%c0_211, %c2_212, %c0_213, %c0_214] {strides = array<i32: 2, 2, 1, 1>} : memref<17x17x8x128xf32, #tpu.memory_space<vmem>>, vector<2x8x8x128xf32>
    %276 = vector.shape_cast %275 : vector<2x8x8x128xf32> to vector<128x128xf32>
    %277 = arith.truncf %276 : vector<128x128xf32> to vector<128x128xbf16>
    %c0_215 = arith.constant 0 : index
    %c2_216 = arith.constant 2 : index
    %c0_217 = arith.constant 0 : index
    %c0_218 = arith.constant 0 : index
    %278 = vector.load %arg3[%c0_215, %c2_216, %c0_217, %c0_218] : memref<3x9x128x128xbf16, #tpu.memory_space<vmem>>, vector<1x1x128x128xbf16>
    %279 = vector.shape_cast %278 : vector<1x1x128x128xbf16> to vector<128x128xbf16>
    %cst_219 = arith.constant dense<0.000000e+00> : vector<128x128xf32>
    %280 = tpu.matmul %277, %279, %cst_219 {dimension_numbers = #tpu.dot_dimension_numbers<[1], [0], [0], [1], [0, 0, 1, 1], [], []>} : vector<128x128xbf16>, vector<128x128xbf16>, vector<128x128xf32> -> vector<128x128xf32>
    %281 = arith.addf %274, %280 : vector<128x128xf32>
    %c1_220 = arith.constant 1 : index
    %c0_221 = arith.constant 0 : index
    %c0_222 = arith.constant 0 : index
    %c0_223 = arith.constant 0 : index
    %282 = tpu.strided_load %arg7[%c1_220, %c0_221, %c0_222, %c0_223] {strides = array<i32: 2, 2, 1, 1>} : memref<17x17x8x128xf32, #tpu.memory_space<vmem>>, vector<2x8x8x128xf32>
    %283 = vector.shape_cast %282 : vector<2x8x8x128xf32> to vector<128x128xf32>
    %284 = arith.truncf %283 : vector<128x128xf32> to vector<128x128xbf16>
    %c0_224 = arith.constant 0 : index
    %c3_225 = arith.constant 3 : index
    %c0_226 = arith.constant 0 : index
    %c0_227 = arith.constant 0 : index
    %285 = vector.load %arg3[%c0_224, %c3_225, %c0_226, %c0_227] : memref<3x9x128x128xbf16, #tpu.memory_space<vmem>>, vector<1x1x128x128xbf16>
    %286 = vector.shape_cast %285 : vector<1x1x128x128xbf16> to vector<128x128xbf16>
    %cst_228 = arith.constant dense<0.000000e+00> : vector<128x128xf32>
    %287 = tpu.matmul %284, %286, %cst_228 {dimension_numbers = #tpu.dot_dimension_numbers<[1], [0], [0], [1], [0, 0, 1, 1], [], []>} : vector<128x128xbf16>, vector<128x128xbf16>, vector<128x128xf32> -> vector<128x128xf32>
    %288 = arith.addf %281, %287 : vector<128x128xf32>
    %c1_229 = arith.constant 1 : index
    %c1_230 = arith.constant 1 : index
    %c0_231 = arith.constant 0 : index
    %c0_232 = arith.constant 0 : index
    %289 = tpu.strided_load %arg7[%c1_229, %c1_230, %c0_231, %c0_232] {strides = array<i32: 2, 2, 1, 1>} : memref<17x17x8x128xf32, #tpu.memory_space<vmem>>, vector<2x8x8x128xf32>
    %290 = vector.shape_cast %289 : vector<2x8x8x128xf32> to vector<128x128xf32>
    %291 = arith.truncf %290 : vector<128x128xf32> to vector<128x128xbf16>
    %c0_233 = arith.constant 0 : index
    %c4_234 = arith.constant 4 : index
    %c0_235 = arith.constant 0 : index
    %c0_236 = arith.constant 0 : index
    %292 = vector.load %arg3[%c0_233, %c4_234, %c0_235, %c0_236] : memref<3x9x128x128xbf16, #tpu.memory_space<vmem>>, vector<1x1x128x128xbf16>
    %293 = vector.shape_cast %292 : vector<1x1x128x128xbf16> to vector<128x128xbf16>
    %cst_237 = arith.constant dense<0.000000e+00> : vector<128x128xf32>
    %294 = tpu.matmul %291, %293, %cst_237 {dimension_numbers = #tpu.dot_dimension_numbers<[1], [0], [0], [1], [0, 0, 1, 1], [], []>} : vector<128x128xbf16>, vector<128x128xbf16>, vector<128x128xf32> -> vector<128x128xf32>
    %295 = arith.addf %288, %294 : vector<128x128xf32>
    %c1_238 = arith.constant 1 : index
    %c2_239 = arith.constant 2 : index
    %c0_240 = arith.constant 0 : index
    %c0_241 = arith.constant 0 : index
    %296 = tpu.strided_load %arg7[%c1_238, %c2_239, %c0_240, %c0_241] {strides = array<i32: 2, 2, 1, 1>} : memref<17x17x8x128xf32, #tpu.memory_space<vmem>>, vector<2x8x8x128xf32>
    %297 = vector.shape_cast %296 : vector<2x8x8x128xf32> to vector<128x128xf32>
    %298 = arith.truncf %297 : vector<128x128xf32> to vector<128x128xbf16>
    %c0_242 = arith.constant 0 : index
    %c5_243 = arith.constant 5 : index
    %c0_244 = arith.constant 0 : index
    %c0_245 = arith.constant 0 : index
    %299 = vector.load %arg3[%c0_242, %c5_243, %c0_244, %c0_245] : memref<3x9x128x128xbf16, #tpu.memory_space<vmem>>, vector<1x1x128x128xbf16>
    %300 = vector.shape_cast %299 : vector<1x1x128x128xbf16> to vector<128x128xbf16>
    %cst_246 = arith.constant dense<0.000000e+00> : vector<128x128xf32>
    %301 = tpu.matmul %298, %300, %cst_246 {dimension_numbers = #tpu.dot_dimension_numbers<[1], [0], [0], [1], [0, 0, 1, 1], [], []>} : vector<128x128xbf16>, vector<128x128xbf16>, vector<128x128xf32> -> vector<128x128xf32>
    %302 = arith.addf %295, %301 : vector<128x128xf32>
    %c2_247 = arith.constant 2 : index
    %c0_248 = arith.constant 0 : index
    %c0_249 = arith.constant 0 : index
    %c0_250 = arith.constant 0 : index
    %303 = tpu.strided_load %arg7[%c2_247, %c0_248, %c0_249, %c0_250] {strides = array<i32: 2, 2, 1, 1>} : memref<17x17x8x128xf32, #tpu.memory_space<vmem>>, vector<2x8x8x128xf32>
    %304 = vector.shape_cast %303 : vector<2x8x8x128xf32> to vector<128x128xf32>
    %305 = arith.truncf %304 : vector<128x128xf32> to vector<128x128xbf16>
    %c0_251 = arith.constant 0 : index
    %c6_252 = arith.constant 6 : index
    %c0_253 = arith.constant 0 : index
    %c0_254 = arith.constant 0 : index
    %306 = vector.load %arg3[%c0_251, %c6_252, %c0_253, %c0_254] : memref<3x9x128x128xbf16, #tpu.memory_space<vmem>>, vector<1x1x128x128xbf16>
    %307 = vector.shape_cast %306 : vector<1x1x128x128xbf16> to vector<128x128xbf16>
    %cst_255 = arith.constant dense<0.000000e+00> : vector<128x128xf32>
    %308 = tpu.matmul %305, %307, %cst_255 {dimension_numbers = #tpu.dot_dimension_numbers<[1], [0], [0], [1], [0, 0, 1, 1], [], []>} : vector<128x128xbf16>, vector<128x128xbf16>, vector<128x128xf32> -> vector<128x128xf32>
    %309 = arith.addf %302, %308 : vector<128x128xf32>
    %c2_256 = arith.constant 2 : index
    %c1_257 = arith.constant 1 : index
    %c0_258 = arith.constant 0 : index
    %c0_259 = arith.constant 0 : index
    %310 = tpu.strided_load %arg7[%c2_256, %c1_257, %c0_258, %c0_259] {strides = array<i32: 2, 2, 1, 1>} : memref<17x17x8x128xf32, #tpu.memory_space<vmem>>, vector<2x8x8x128xf32>
    %311 = vector.shape_cast %310 : vector<2x8x8x128xf32> to vector<128x128xf32>
    %312 = arith.truncf %311 : vector<128x128xf32> to vector<128x128xbf16>
    %c0_260 = arith.constant 0 : index
    %c7_261 = arith.constant 7 : index
    %c0_262 = arith.constant 0 : index
    %c0_263 = arith.constant 0 : index
    %313 = vector.load %arg3[%c0_260, %c7_261, %c0_262, %c0_263] : memref<3x9x128x128xbf16, #tpu.memory_space<vmem>>, vector<1x1x128x128xbf16>
    %314 = vector.shape_cast %313 : vector<1x1x128x128xbf16> to vector<128x128xbf16>
    %cst_264 = arith.constant dense<0.000000e+00> : vector<128x128xf32>
    %315 = tpu.matmul %312, %314, %cst_264 {dimension_numbers = #tpu.dot_dimension_numbers<[1], [0], [0], [1], [0, 0, 1, 1], [], []>} : vector<128x128xbf16>, vector<128x128xbf16>, vector<128x128xf32> -> vector<128x128xf32>
    %316 = arith.addf %309, %315 : vector<128x128xf32>
    %c2_265 = arith.constant 2 : index
    %c2_266 = arith.constant 2 : index
    %c0_267 = arith.constant 0 : index
    %c0_268 = arith.constant 0 : index
    %317 = tpu.strided_load %arg7[%c2_265, %c2_266, %c0_267, %c0_268] {strides = array<i32: 2, 2, 1, 1>} : memref<17x17x8x128xf32, #tpu.memory_space<vmem>>, vector<2x8x8x128xf32>
    %318 = vector.shape_cast %317 : vector<2x8x8x128xf32> to vector<128x128xf32>
    %319 = arith.truncf %318 : vector<128x128xf32> to vector<128x128xbf16>
    %c0_269 = arith.constant 0 : index
    %c8_270 = arith.constant 8 : index
    %c0_271 = arith.constant 0 : index
    %c0_272 = arith.constant 0 : index
    %320 = vector.load %arg3[%c0_269, %c8_270, %c0_271, %c0_272] : memref<3x9x128x128xbf16, #tpu.memory_space<vmem>>, vector<1x1x128x128xbf16>
    %321 = vector.shape_cast %320 : vector<1x1x128x128xbf16> to vector<128x128xbf16>
    %cst_273 = arith.constant dense<0.000000e+00> : vector<128x128xf32>
    %322 = tpu.matmul %319, %321, %cst_273 {dimension_numbers = #tpu.dot_dimension_numbers<[1], [0], [0], [1], [0, 0, 1, 1], [], []>} : vector<128x128xbf16>, vector<128x128xbf16>, vector<128x128xf32> -> vector<128x128xf32>
    %323 = arith.addf %316, %322 : vector<128x128xf32>
    %c1_274 = arith.constant 1 : index
    %c0_275 = arith.constant 0 : index
    %c0_276 = arith.constant 0 : index
    %324 = vector.load %arg4[%c1_274, %c0_275, %c0_276] : memref<4x8x128xf32, #tpu.memory_space<vmem>>, vector<1x1x128xf32>
    %325 = vector.shape_cast %324 : vector<1x1x128xf32> to vector<1x128xf32>
    %326 = vector.broadcast %325 : vector<1x128xf32> to vector<128x128xf32>
    %327 = arith.addf %323, %326 : vector<128x128xf32>
    %cst_277 = arith.constant 2.000000e-01 : f32
    %328 = vector.broadcast %cst_277 : f32 to vector<128x128xf32>
    %329 = arith.mulf %328, %327 : vector<128x128xf32>
    %330 = arith.maximumf %327, %329 : vector<128x128xf32>
    %c1_278 = arith.constant 1 : index
    %c1_279 = arith.constant 1 : index
    %c0_280 = arith.constant 0 : index
    %331 = vector.load %arg4[%c1_278, %c1_279, %c0_280] : memref<4x8x128xf32, #tpu.memory_space<vmem>>, vector<1x1x128xf32>
    %332 = vector.shape_cast %331 : vector<1x1x128xf32> to vector<1x128xf32>
    %333 = vector.broadcast %332 : vector<1x128xf32> to vector<128x128xf32>
    %334 = arith.mulf %330, %333 : vector<128x128xf32>
    %c1_281 = arith.constant 1 : index
    %c2_282 = arith.constant 2 : index
    %c0_283 = arith.constant 0 : index
    %335 = vector.load %arg4[%c1_281, %c2_282, %c0_283] : memref<4x8x128xf32, #tpu.memory_space<vmem>>, vector<1x1x128xf32>
    %336 = vector.shape_cast %335 : vector<1x1x128xf32> to vector<1x128xf32>
    %337 = vector.broadcast %336 : vector<1x128xf32> to vector<128x128xf32>
    %338 = arith.addf %334, %337 : vector<128x128xf32>
    %339 = vector.shape_cast %338 : vector<128x128xf32> to vector<2x8x8x128xf32>
    %c1_284 = arith.constant 1 : index
    %c1_285 = arith.constant 1 : index
    %c0_286 = arith.constant 0 : index
    %c0_287 = arith.constant 0 : index
    %340 = vector.load %arg8[%c1_284, %c1_285, %c0_286, %c0_287] : memref<9x9x8x128xf32, #tpu.memory_space<vmem>>, vector<2x8x8x128xf32>
    tpu.vector_store %arg8[%c1_284, %c1_285, %c0_286, %c0_287], %339 {strides = array<i32>} : memref<9x9x8x128xf32, #tpu.memory_space<vmem>>, vector<2x8x8x128xf32>,
    %cst_288 = arith.constant 0.000000e+00 : f32
    %341 = vector.broadcast %cst_288 : f32 to vector<128x128xf32>
    %c4_289 = arith.constant 4 : index
    %c0_290 = arith.constant 0 : index
    %c0_291 = arith.constant 0 : index
    %c0_292 = arith.constant 0 : index
    %342 = tpu.strided_load %arg7[%c4_289, %c0_290, %c0_291, %c0_292] {strides = array<i32: 2, 2, 1, 1>} : memref<17x17x8x128xf32, #tpu.memory_space<vmem>>, vector<2x8x8x128xf32>
    %343 = vector.shape_cast %342 : vector<2x8x8x128xf32> to vector<128x128xf32>
    %344 = arith.truncf %343 : vector<128x128xf32> to vector<128x128xbf16>
    %c0_293 = arith.constant 0 : index
    %c0_294 = arith.constant 0 : index
    %c0_295 = arith.constant 0 : index
    %c0_296 = arith.constant 0 : index
    %345 = vector.load %arg3[%c0_293, %c0_294, %c0_295, %c0_296] : memref<3x9x128x128xbf16, #tpu.memory_space<vmem>>, vector<1x1x128x128xbf16>
    %346 = vector.shape_cast %345 : vector<1x1x128x128xbf16> to vector<128x128xbf16>
    %cst_297 = arith.constant dense<0.000000e+00> : vector<128x128xf32>
    %347 = tpu.matmul %344, %346, %cst_297 {dimension_numbers = #tpu.dot_dimension_numbers<[1], [0], [0], [1], [0, 0, 1, 1], [], []>} : vector<128x128xbf16>, vector<128x128xbf16>, vector<128x128xf32> -> vector<128x128xf32>
    %348 = arith.addf %341, %347 : vector<128x128xf32>
    %c4_298 = arith.constant 4 : index
    %c1_299 = arith.constant 1 : index
    %c0_300 = arith.constant 0 : index
    %c0_301 = arith.constant 0 : index
    %349 = tpu.strided_load %arg7[%c4_298, %c1_299, %c0_300, %c0_301] {strides = array<i32: 2, 2, 1, 1>} : memref<17x17x8x128xf32, #tpu.memory_space<vmem>>, vector<2x8x8x128xf32>
    %350 = vector.shape_cast %349 : vector<2x8x8x128xf32> to vector<128x128xf32>
    %351 = arith.truncf %350 : vector<128x128xf32> to vector<128x128xbf16>
    %c0_302 = arith.constant 0 : index
    %c1_303 = arith.constant 1 : index
    %c0_304 = arith.constant 0 : index
    %c0_305 = arith.constant 0 : index
    %352 = vector.load %arg3[%c0_302, %c1_303, %c0_304, %c0_305] : memref<3x9x128x128xbf16, #tpu.memory_space<vmem>>, vector<1x1x128x128xbf16>
    %353 = vector.shape_cast %352 : vector<1x1x128x128xbf16> to vector<128x128xbf16>
    %cst_306 = arith.constant dense<0.000000e+00> : vector<128x128xf32>
    %354 = tpu.matmul %351, %353, %cst_306 {dimension_numbers = #tpu.dot_dimension_numbers<[1], [0], [0], [1], [0, 0, 1, 1], [], []>} : vector<128x128xbf16>, vector<128x128xbf16>, vector<128x128xf32> -> vector<128x128xf32>
    %355 = arith.addf %348, %354 : vector<128x128xf32>
    %c4_307 = arith.constant 4 : index
    %c2_308 = arith.constant 2 : index
    %c0_309 = arith.constant 0 : index
    %c0_310 = arith.constant 0 : index
    %356 = tpu.strided_load %arg7[%c4_307, %c2_308, %c0_309, %c0_310] {strides = array<i32: 2, 2, 1, 1>} : memref<17x17x8x128xf32, #tpu.memory_space<vmem>>, vector<2x8x8x128xf32>
    %357 = vector.shape_cast %356 : vector<2x8x8x128xf32> to vector<128x128xf32>
    %358 = arith.truncf %357 : vector<128x128xf32> to vector<128x128xbf16>
    %c0_311 = arith.constant 0 : index
    %c2_312 = arith.constant 2 : index
    %c0_313 = arith.constant 0 : index
    %c0_314 = arith.constant 0 : index
    %359 = vector.load %arg3[%c0_311, %c2_312, %c0_313, %c0_314] : memref<3x9x128x128xbf16, #tpu.memory_space<vmem>>, vector<1x1x128x128xbf16>
    %360 = vector.shape_cast %359 : vector<1x1x128x128xbf16> to vector<128x128xbf16>
    %cst_315 = arith.constant dense<0.000000e+00> : vector<128x128xf32>
    %361 = tpu.matmul %358, %360, %cst_315 {dimension_numbers = #tpu.dot_dimension_numbers<[1], [0], [0], [1], [0, 0, 1, 1], [], []>} : vector<128x128xbf16>, vector<128x128xbf16>, vector<128x128xf32> -> vector<128x128xf32>
    %362 = arith.addf %355, %361 : vector<128x128xf32>
    %c5_316 = arith.constant 5 : index
    %c0_317 = arith.constant 0 : index
    %c0_318 = arith.constant 0 : index
    %c0_319 = arith.constant 0 : index
    %363 = tpu.strided_load %arg7[%c5_316, %c0_317, %c0_318, %c0_319] {strides = array<i32: 2, 2, 1, 1>} : memref<17x17x8x128xf32, #tpu.memory_space<vmem>>, vector<2x8x8x128xf32>
    %364 = vector.shape_cast %363 : vector<2x8x8x128xf32> to vector<128x128xf32>
    %365 = arith.truncf %364 : vector<128x128xf32> to vector<128x128xbf16>
    %c0_320 = arith.constant 0 : index
    %c3_321 = arith.constant 3 : index
    %c0_322 = arith.constant 0 : index
    %c0_323 = arith.constant 0 : index
    %366 = vector.load %arg3[%c0_320, %c3_321, %c0_322, %c0_323] : memref<3x9x128x128xbf16, #tpu.memory_space<vmem>>, vector<1x1x128x128xbf16>
    %367 = vector.shape_cast %366 : vector<1x1x128x128xbf16> to vector<128x128xbf16>
    %cst_324 = arith.constant dense<0.000000e+00> : vector<128x128xf32>
    %368 = tpu.matmul %365, %367, %cst_324 {dimension_numbers = #tpu.dot_dimension_numbers<[1], [0], [0], [1], [0, 0, 1, 1], [], []>} : vector<128x128xbf16>, vector<128x128xbf16>, vector<128x128xf32> -> vector<128x128xf32>
    %369 = arith.addf %362, %368 : vector<128x128xf32>
    %c5_325 = arith.constant 5 : index
    %c1_326 = arith.constant 1 : index
    %c0_327 = arith.constant 0 : index
    %c0_328 = arith.constant 0 : index
    %370 = tpu.strided_load %arg7[%c5_325, %c1_326, %c0_327, %c0_328] {strides = array<i32: 2, 2, 1, 1>} : memref<17x17x8x128xf32, #tpu.memory_space<vmem>>, vector<2x8x8x128xf32>
    %371 = vector.shape_cast %370 : vector<2x8x8x128xf32> to vector<128x128xf32>
    %372 = arith.truncf %371 : vector<128x128xf32> to vector<128x128xbf16>
    %c0_329 = arith.constant 0 : index
    %c4_330 = arith.constant 4 : index
    %c0_331 = arith.constant 0 : index
    %c0_332 = arith.constant 0 : index
    %373 = vector.load %arg3[%c0_329, %c4_330, %c0_331, %c0_332] : memref<3x9x128x128xbf16, #tpu.memory_space<vmem>>, vector<1x1x128x128xbf16>
    %374 = vector.shape_cast %373 : vector<1x1x128x128xbf16> to vector<128x128xbf16>
    %cst_333 = arith.constant dense<0.000000e+00> : vector<128x128xf32>
    %375 = tpu.matmul %372, %374, %cst_333 {dimension_numbers = #tpu.dot_dimension_numbers<[1], [0], [0], [1], [0, 0, 1, 1], [], []>} : vector<128x128xbf16>, vector<128x128xbf16>, vector<128x128xf32> -> vector<128x128xf32>
    %376 = arith.addf %369, %375 : vector<128x128xf32>
    %c5_334 = arith.constant 5 : index
    %c2_335 = arith.constant 2 : index
    %c0_336 = arith.constant 0 : index
    %c0_337 = arith.constant 0 : index
    %377 = tpu.strided_load %arg7[%c5_334, %c2_335, %c0_336, %c0_337] {strides = array<i32: 2, 2, 1, 1>} : memref<17x17x8x128xf32, #tpu.memory_space<vmem>>, vector<2x8x8x128xf32>
    %378 = vector.shape_cast %377 : vector<2x8x8x128xf32> to vector<128x128xf32>
    %379 = arith.truncf %378 : vector<128x128xf32> to vector<128x128xbf16>
    %c0_338 = arith.constant 0 : index
    %c5_339 = arith.constant 5 : index
    %c0_340 = arith.constant 0 : index
    %c0_341 = arith.constant 0 : index
    %380 = vector.load %arg3[%c0_338, %c5_339, %c0_340, %c0_341] : memref<3x9x128x128xbf16, #tpu.memory_space<vmem>>, vector<1x1x128x128xbf16>
    %381 = vector.shape_cast %380 : vector<1x1x128x128xbf16> to vector<128x128xbf16>
    %cst_342 = arith.constant dense<0.000000e+00> : vector<128x128xf32>
    %382 = tpu.matmul %379, %381, %cst_342 {dimension_numbers = #tpu.dot_dimension_numbers<[1], [0], [0], [1], [0, 0, 1, 1], [], []>} : vector<128x128xbf16>, vector<128x128xbf16>, vector<128x128xf32> -> vector<128x128xf32>
    %383 = arith.addf %376, %382 : vector<128x128xf32>
    %c6_343 = arith.constant 6 : index
    %c0_344 = arith.constant 0 : index
    %c0_345 = arith.constant 0 : index
    %c0_346 = arith.constant 0 : index
    %384 = tpu.strided_load %arg7[%c6_343, %c0_344, %c0_345, %c0_346] {strides = array<i32: 2, 2, 1, 1>} : memref<17x17x8x128xf32, #tpu.memory_space<vmem>>, vector<2x8x8x128xf32>
    %385 = vector.shape_cast %384 : vector<2x8x8x128xf32> to vector<128x128xf32>
    %386 = arith.truncf %385 : vector<128x128xf32> to vector<128x128xbf16>
    %c0_347 = arith.constant 0 : index
    %c6_348 = arith.constant 6 : index
    %c0_349 = arith.constant 0 : index
    %c0_350 = arith.constant 0 : index
    %387 = vector.load %arg3[%c0_347, %c6_348, %c0_349, %c0_350] : memref<3x9x128x128xbf16, #tpu.memory_space<vmem>>, vector<1x1x128x128xbf16>
    %388 = vector.shape_cast %387 : vector<1x1x128x128xbf16> to vector<128x128xbf16>
    %cst_351 = arith.constant dense<0.000000e+00> : vector<128x128xf32>
    %389 = tpu.matmul %386, %388, %cst_351 {dimension_numbers = #tpu.dot_dimension_numbers<[1], [0], [0], [1], [0, 0, 1, 1], [], []>} : vector<128x128xbf16>, vector<128x128xbf16>, vector<128x128xf32> -> vector<128x128xf32>
    %390 = arith.addf %383, %389 : vector<128x128xf32>
    %c6_352 = arith.constant 6 : index
    %c1_353 = arith.constant 1 : index
    %c0_354 = arith.constant 0 : index
    %c0_355 = arith.constant 0 : index
    %391 = tpu.strided_load %arg7[%c6_352, %c1_353, %c0_354, %c0_355] {strides = array<i32: 2, 2, 1, 1>} : memref<17x17x8x128xf32, #tpu.memory_space<vmem>>, vector<2x8x8x128xf32>
    %392 = vector.shape_cast %391 : vector<2x8x8x128xf32> to vector<128x128xf32>
    %393 = arith.truncf %392 : vector<128x128xf32> to vector<128x128xbf16>
    %c0_356 = arith.constant 0 : index
    %c7_357 = arith.constant 7 : index
    %c0_358 = arith.constant 0 : index
    %c0_359 = arith.constant 0 : index
    %394 = vector.load %arg3[%c0_356, %c7_357, %c0_358, %c0_359] : memref<3x9x128x128xbf16, #tpu.memory_space<vmem>>, vector<1x1x128x128xbf16>
    %395 = vector.shape_cast %394 : vector<1x1x128x128xbf16> to vector<128x128xbf16>
    %cst_360 = arith.constant dense<0.000000e+00> : vector<128x128xf32>
    %396 = tpu.matmul %393, %395, %cst_360 {dimension_numbers = #tpu.dot_dimension_numbers<[1], [0], [0], [1], [0, 0, 1, 1], [], []>} : vector<128x128xbf16>, vector<128x128xbf16>, vector<128x128xf32> -> vector<128x128xf32>
    %397 = arith.addf %390, %396 : vector<128x128xf32>
    %c6_361 = arith.constant 6 : index
    %c2_362 = arith.constant 2 : index
    %c0_363 = arith.constant 0 : index
    %c0_364 = arith.constant 0 : index
    %398 = tpu.strided_load %arg7[%c6_361, %c2_362, %c0_363, %c0_364] {strides = array<i32: 2, 2, 1, 1>} : memref<17x17x8x128xf32, #tpu.memory_space<vmem>>, vector<2x8x8x128xf32>
    %399 = vector.shape_cast %398 : vector<2x8x8x128xf32> to vector<128x128xf32>
    %400 = arith.truncf %399 : vector<128x128xf32> to vector<128x128xbf16>
    %c0_365 = arith.constant 0 : index
    %c8_366 = arith.constant 8 : index
    %c0_367 = arith.constant 0 : index
    %c0_368 = arith.constant 0 : index
    %401 = vector.load %arg3[%c0_365, %c8_366, %c0_367, %c0_368] : memref<3x9x128x128xbf16, #tpu.memory_space<vmem>>, vector<1x1x128x128xbf16>
    %402 = vector.shape_cast %401 : vector<1x1x128x128xbf16> to vector<128x128xbf16>
    %cst_369 = arith.constant dense<0.000000e+00> : vector<128x128xf32>
    %403 = tpu.matmul %400, %402, %cst_369 {dimension_numbers = #tpu.dot_dimension_numbers<[1], [0], [0], [1], [0, 0, 1, 1], [], []>} : vector<128x128xbf16>, vector<128x128xbf16>, vector<128x128xf32> -> vector<128x128xf32>
    %404 = arith.addf %397, %403 : vector<128x128xf32>
    %c1_370 = arith.constant 1 : index
    %c0_371 = arith.constant 0 : index
    %c0_372 = arith.constant 0 : index
    %405 = vector.load %arg4[%c1_370, %c0_371, %c0_372] : memref<4x8x128xf32, #tpu.memory_space<vmem>>, vector<1x1x128xf32>
    %406 = vector.shape_cast %405 : vector<1x1x128xf32> to vector<1x128xf32>
    %407 = vector.broadcast %406 : vector<1x128xf32> to vector<128x128xf32>
    %408 = arith.addf %404, %407 : vector<128x128xf32>
    %cst_373 = arith.constant 2.000000e-01 : f32
    %409 = vector.broadcast %cst_373 : f32 to vector<128x128xf32>
    %410 = arith.mulf %409, %408 : vector<128x128xf32>
    %411 = arith.maximumf %408, %410 : vector<128x128xf32>
    %c1_374 = arith.constant 1 : index
    %c1_375 = arith.constant 1 : index
    %c0_376 = arith.constant 0 : index
    %412 = vector.load %arg4[%c1_374, %c1_375, %c0_376] : memref<4x8x128xf32, #tpu.memory_space<vmem>>, vector<1x1x128xf32>
    %413 = vector.shape_cast %412 : vector<1x1x128xf32> to vector<1x128xf32>
    %414 = vector.broadcast %413 : vector<1x128xf32> to vector<128x128xf32>
    %415 = arith.mulf %411, %414 : vector<128x128xf32>
    %c1_377 = arith.constant 1 : index
    %c2_378 = arith.constant 2 : index
    %c0_379 = arith.constant 0 : index
    %416 = vector.load %arg4[%c1_377, %c2_378, %c0_379] : memref<4x8x128xf32, #tpu.memory_space<vmem>>, vector<1x1x128xf32>
    %417 = vector.shape_cast %416 : vector<1x1x128xf32> to vector<1x128xf32>
    %418 = vector.broadcast %417 : vector<1x128xf32> to vector<128x128xf32>
    %419 = arith.addf %415, %418 : vector<128x128xf32>
    %420 = vector.shape_cast %419 : vector<128x128xf32> to vector<2x8x8x128xf32>
    %c3_380 = arith.constant 3 : index
    %c1_381 = arith.constant 1 : index
    %c0_382 = arith.constant 0 : index
    %c0_383 = arith.constant 0 : index
    %421 = vector.load %arg8[%c3_380, %c1_381, %c0_382, %c0_383] : memref<9x9x8x128xf32, #tpu.memory_space<vmem>>, vector<2x8x8x128xf32>
    tpu.vector_store %arg8[%c3_380, %c1_381, %c0_382, %c0_383], %420 {strides = array<i32>} : memref<9x9x8x128xf32, #tpu.memory_space<vmem>>, vector<2x8x8x128xf32>,
    %cst_384 = arith.constant 0.000000e+00 : f32
    %422 = vector.broadcast %cst_384 : f32 to vector<128x128xf32>
    %c8_385 = arith.constant 8 : index
    %c0_386 = arith.constant 0 : index
    %c0_387 = arith.constant 0 : index
    %c0_388 = arith.constant 0 : index
    %423 = tpu.strided_load %arg7[%c8_385, %c0_386, %c0_387, %c0_388] {strides = array<i32: 2, 2, 1, 1>} : memref<17x17x8x128xf32, #tpu.memory_space<vmem>>, vector<2x8x8x128xf32>
    %424 = vector.shape_cast %423 : vector<2x8x8x128xf32> to vector<128x128xf32>
    %425 = arith.truncf %424 : vector<128x128xf32> to vector<128x128xbf16>
    %c0_389 = arith.constant 0 : index
    %c0_390 = arith.constant 0 : index
    %c0_391 = arith.constant 0 : index
    %c0_392 = arith.constant 0 : index
    %426 = vector.load %arg3[%c0_389, %c0_390, %c0_391, %c0_392] : memref<3x9x128x128xbf16, #tpu.memory_space<vmem>>, vector<1x1x128x128xbf16>
    %427 = vector.shape_cast %426 : vector<1x1x128x128xbf16> to vector<128x128xbf16>
    %cst_393 = arith.constant dense<0.000000e+00> : vector<128x128xf32>
    %428 = tpu.matmul %425, %427, %cst_393 {dimension_numbers = #tpu.dot_dimension_numbers<[1], [0], [0], [1], [0, 0, 1, 1], [], []>} : vector<128x128xbf16>, vector<128x128xbf16>, vector<128x128xf32> -> vector<128x128xf32>
    %429 = arith.addf %422, %428 : vector<128x128xf32>
    %c8_394 = arith.constant 8 : index
    %c1_395 = arith.constant 1 : index
    %c0_396 = arith.constant 0 : index
    %c0_397 = arith.constant 0 : index
    %430 = tpu.strided_load %arg7[%c8_394, %c1_395, %c0_396, %c0_397] {strides = array<i32: 2, 2, 1, 1>} : memref<17x17x8x128xf32, #tpu.memory_space<vmem>>, vector<2x8x8x128xf32>
    %431 = vector.shape_cast %430 : vector<2x8x8x128xf32> to vector<128x128xf32>
    %432 = arith.truncf %431 : vector<128x128xf32> to vector<128x128xbf16>
    %c0_398 = arith.constant 0 : index
    %c1_399 = arith.constant 1 : index
    %c0_400 = arith.constant 0 : index
    %c0_401 = arith.constant 0 : index
    %433 = vector.load %arg3[%c0_398, %c1_399, %c0_400, %c0_401] : memref<3x9x128x128xbf16, #tpu.memory_space<vmem>>, vector<1x1x128x128xbf16>
    %434 = vector.shape_cast %433 : vector<1x1x128x128xbf16> to vector<128x128xbf16>
    %cst_402 = arith.constant dense<0.000000e+00> : vector<128x128xf32>
    %435 = tpu.matmul %432, %434, %cst_402 {dimension_numbers = #tpu.dot_dimension_numbers<[1], [0], [0], [1], [0, 0, 1, 1], [], []>} : vector<128x128xbf16>, vector<128x128xbf16>, vector<128x128xf32> -> vector<128x128xf32>
    %436 = arith.addf %429, %435 : vector<128x128xf32>
    %c8_403 = arith.constant 8 : index
    %c2_404 = arith.constant 2 : index
    %c0_405 = arith.constant 0 : index
    %c0_406 = arith.constant 0 : index
    %437 = tpu.strided_load %arg7[%c8_403, %c2_404, %c0_405, %c0_406] {strides = array<i32: 2, 2, 1, 1>} : memref<17x17x8x128xf32, #tpu.memory_space<vmem>>, vector<2x8x8x128xf32>
    %438 = vector.shape_cast %437 : vector<2x8x8x128xf32> to vector<128x128xf32>
    %439 = arith.truncf %438 : vector<128x128xf32> to vector<128x128xbf16>
    %c0_407 = arith.constant 0 : index
    %c2_408 = arith.constant 2 : index
    %c0_409 = arith.constant 0 : index
    %c0_410 = arith.constant 0 : index
    %440 = vector.load %arg3[%c0_407, %c2_408, %c0_409, %c0_410] : memref<3x9x128x128xbf16, #tpu.memory_space<vmem>>, vector<1x1x128x128xbf16>
    %441 = vector.shape_cast %440 : vector<1x1x128x128xbf16> to vector<128x128xbf16>
    %cst_411 = arith.constant dense<0.000000e+00> : vector<128x128xf32>
    %442 = tpu.matmul %439, %441, %cst_411 {dimension_numbers = #tpu.dot_dimension_numbers<[1], [0], [0], [1], [0, 0, 1, 1], [], []>} : vector<128x128xbf16>, vector<128x128xbf16>, vector<128x128xf32> -> vector<128x128xf32>
    %443 = arith.addf %436, %442 : vector<128x128xf32>
    %c9_412 = arith.constant 9 : index
    %c0_413 = arith.constant 0 : index
    %c0_414 = arith.constant 0 : index
    %c0_415 = arith.constant 0 : index
    %444 = tpu.strided_load %arg7[%c9_412, %c0_413, %c0_414, %c0_415] {strides = array<i32: 2, 2, 1, 1>} : memref<17x17x8x128xf32, #tpu.memory_space<vmem>>, vector<2x8x8x128xf32>
    %445 = vector.shape_cast %444 : vector<2x8x8x128xf32> to vector<128x128xf32>
    %446 = arith.truncf %445 : vector<128x128xf32> to vector<128x128xbf16>
    %c0_416 = arith.constant 0 : index
    %c3_417 = arith.constant 3 : index
    %c0_418 = arith.constant 0 : index
    %c0_419 = arith.constant 0 : index
    %447 = vector.load %arg3[%c0_416, %c3_417, %c0_418, %c0_419] : memref<3x9x128x128xbf16, #tpu.memory_space<vmem>>, vector<1x1x128x128xbf16>
    %448 = vector.shape_cast %447 : vector<1x1x128x128xbf16> to vector<128x128xbf16>
    %cst_420 = arith.constant dense<0.000000e+00> : vector<128x128xf32>
    %449 = tpu.matmul %446, %448, %cst_420 {dimension_numbers = #tpu.dot_dimension_numbers<[1], [0], [0], [1], [0, 0, 1, 1], [], []>} : vector<128x128xbf16>, vector<128x128xbf16>, vector<128x128xf32> -> vector<128x128xf32>
    %450 = arith.addf %443, %449 : vector<128x128xf32>
    %c9_421 = arith.constant 9 : index
    %c1_422 = arith.constant 1 : index
    %c0_423 = arith.constant 0 : index
    %c0_424 = arith.constant 0 : index
    %451 = tpu.strided_load %arg7[%c9_421, %c1_422, %c0_423, %c0_424] {strides = array<i32: 2, 2, 1, 1>} : memref<17x17x8x128xf32, #tpu.memory_space<vmem>>, vector<2x8x8x128xf32>
    %452 = vector.shape_cast %451 : vector<2x8x8x128xf32> to vector<128x128xf32>
    %453 = arith.truncf %452 : vector<128x128xf32> to vector<128x128xbf16>
    %c0_425 = arith.constant 0 : index
    %c4_426 = arith.constant 4 : index
    %c0_427 = arith.constant 0 : index
    %c0_428 = arith.constant 0 : index
    %454 = vector.load %arg3[%c0_425, %c4_426, %c0_427, %c0_428] : memref<3x9x128x128xbf16, #tpu.memory_space<vmem>>, vector<1x1x128x128xbf16>
    %455 = vector.shape_cast %454 : vector<1x1x128x128xbf16> to vector<128x128xbf16>
    %cst_429 = arith.constant dense<0.000000e+00> : vector<128x128xf32>
    %456 = tpu.matmul %453, %455, %cst_429 {dimension_numbers = #tpu.dot_dimension_numbers<[1], [0], [0], [1], [0, 0, 1, 1], [], []>} : vector<128x128xbf16>, vector<128x128xbf16>, vector<128x128xf32> -> vector<128x128xf32>
    %457 = arith.addf %450, %456 : vector<128x128xf32>
    %c9_430 = arith.constant 9 : index
    %c2_431 = arith.constant 2 : index
    %c0_432 = arith.constant 0 : index
    %c0_433 = arith.constant 0 : index
    %458 = tpu.strided_load %arg7[%c9_430, %c2_431, %c0_432, %c0_433] {strides = array<i32: 2, 2, 1, 1>} : memref<17x17x8x128xf32, #tpu.memory_space<vmem>>, vector<2x8x8x128xf32>
    %459 = vector.shape_cast %458 : vector<2x8x8x128xf32> to vector<128x128xf32>
    %460 = arith.truncf %459 : vector<128x128xf32> to vector<128x128xbf16>
    %c0_434 = arith.constant 0 : index
    %c5_435 = arith.constant 5 : index
    %c0_436 = arith.constant 0 : index
    %c0_437 = arith.constant 0 : index
    %461 = vector.load %arg3[%c0_434, %c5_435, %c0_436, %c0_437] : memref<3x9x128x128xbf16, #tpu.memory_space<vmem>>, vector<1x1x128x128xbf16>
    %462 = vector.shape_cast %461 : vector<1x1x128x128xbf16> to vector<128x128xbf16>
    %cst_438 = arith.constant dense<0.000000e+00> : vector<128x128xf32>
    %463 = tpu.matmul %460, %462, %cst_438 {dimension_numbers = #tpu.dot_dimension_numbers<[1], [0], [0], [1], [0, 0, 1, 1], [], []>} : vector<128x128xbf16>, vector<128x128xbf16>, vector<128x128xf32> -> vector<128x128xf32>
    %464 = arith.addf %457, %463 : vector<128x128xf32>
    %c10_439 = arith.constant 10 : index
    %c0_440 = arith.constant 0 : index
    %c0_441 = arith.constant 0 : index
    %c0_442 = arith.constant 0 : index
    %465 = tpu.strided_load %arg7[%c10_439, %c0_440, %c0_441, %c0_442] {strides = array<i32: 2, 2, 1, 1>} : memref<17x17x8x128xf32, #tpu.memory_space<vmem>>, vector<2x8x8x128xf32>
    %466 = vector.shape_cast %465 : vector<2x8x8x128xf32> to vector<128x128xf32>
    %467 = arith.truncf %466 : vector<128x128xf32> to vector<128x128xbf16>
    %c0_443 = arith.constant 0 : index
    %c6_444 = arith.constant 6 : index
    %c0_445 = arith.constant 0 : index
    %c0_446 = arith.constant 0 : index
    %468 = vector.load %arg3[%c0_443, %c6_444, %c0_445, %c0_446] : memref<3x9x128x128xbf16, #tpu.memory_space<vmem>>, vector<1x1x128x128xbf16>
    %469 = vector.shape_cast %468 : vector<1x1x128x128xbf16> to vector<128x128xbf16>
    %cst_447 = arith.constant dense<0.000000e+00> : vector<128x128xf32>
    %470 = tpu.matmul %467, %469, %cst_447 {dimension_numbers = #tpu.dot_dimension_numbers<[1], [0], [0], [1], [0, 0, 1, 1], [], []>} : vector<128x128xbf16>, vector<128x128xbf16>, vector<128x128xf32> -> vector<128x128xf32>
    %471 = arith.addf %464, %470 : vector<128x128xf32>
    %c10_448 = arith.constant 10 : index
    %c1_449 = arith.constant 1 : index
    %c0_450 = arith.constant 0 : index
    %c0_451 = arith.constant 0 : index
    %472 = tpu.strided_load %arg7[%c10_448, %c1_449, %c0_450, %c0_451] {strides = array<i32: 2, 2, 1, 1>} : memref<17x17x8x128xf32, #tpu.memory_space<vmem>>, vector<2x8x8x128xf32>
    %473 = vector.shape_cast %472 : vector<2x8x8x128xf32> to vector<128x128xf32>
    %474 = arith.truncf %473 : vector<128x128xf32> to vector<128x128xbf16>
    %c0_452 = arith.constant 0 : index
    %c7_453 = arith.constant 7 : index
    %c0_454 = arith.constant 0 : index
    %c0_455 = arith.constant 0 : index
    %475 = vector.load %arg3[%c0_452, %c7_453, %c0_454, %c0_455] : memref<3x9x128x128xbf16, #tpu.memory_space<vmem>>, vector<1x1x128x128xbf16>
    %476 = vector.shape_cast %475 : vector<1x1x128x128xbf16> to vector<128x128xbf16>
    %cst_456 = arith.constant dense<0.000000e+00> : vector<128x128xf32>
    %477 = tpu.matmul %474, %476, %cst_456 {dimension_numbers = #tpu.dot_dimension_numbers<[1], [0], [0], [1], [0, 0, 1, 1], [], []>} : vector<128x128xbf16>, vector<128x128xbf16>, vector<128x128xf32> -> vector<128x128xf32>
    %478 = arith.addf %471, %477 : vector<128x128xf32>
    %c10_457 = arith.constant 10 : index
    %c2_458 = arith.constant 2 : index
    %c0_459 = arith.constant 0 : index
    %c0_460 = arith.constant 0 : index
    %479 = tpu.strided_load %arg7[%c10_457, %c2_458, %c0_459, %c0_460] {strides = array<i32: 2, 2, 1, 1>} : memref<17x17x8x128xf32, #tpu.memory_space<vmem>>, vector<2x8x8x128xf32>
    %480 = vector.shape_cast %479 : vector<2x8x8x128xf32> to vector<128x128xf32>
    %481 = arith.truncf %480 : vector<128x128xf32> to vector<128x128xbf16>
    %c0_461 = arith.constant 0 : index
    %c8_462 = arith.constant 8 : index
    %c0_463 = arith.constant 0 : index
    %c0_464 = arith.constant 0 : index
    %482 = vector.load %arg3[%c0_461, %c8_462, %c0_463, %c0_464] : memref<3x9x128x128xbf16, #tpu.memory_space<vmem>>, vector<1x1x128x128xbf16>
    %483 = vector.shape_cast %482 : vector<1x1x128x128xbf16> to vector<128x128xbf16>
    %cst_465 = arith.constant dense<0.000000e+00> : vector<128x128xf32>
    %484 = tpu.matmul %481, %483, %cst_465 {dimension_numbers = #tpu.dot_dimension_numbers<[1], [0], [0], [1], [0, 0, 1, 1], [], []>} : vector<128x128xbf16>, vector<128x128xbf16>, vector<128x128xf32> -> vector<128x128xf32>
    %485 = arith.addf %478, %484 : vector<128x128xf32>
    %c1_466 = arith.constant 1 : index
    %c0_467 = arith.constant 0 : index
    %c0_468 = arith.constant 0 : index
    %486 = vector.load %arg4[%c1_466, %c0_467, %c0_468] : memref<4x8x128xf32, #tpu.memory_space<vmem>>, vector<1x1x128xf32>
    %487 = vector.shape_cast %486 : vector<1x1x128xf32> to vector<1x128xf32>
    %488 = vector.broadcast %487 : vector<1x128xf32> to vector<128x128xf32>
    %489 = arith.addf %485, %488 : vector<128x128xf32>
    %cst_469 = arith.constant 2.000000e-01 : f32
    %490 = vector.broadcast %cst_469 : f32 to vector<128x128xf32>
    %491 = arith.mulf %490, %489 : vector<128x128xf32>
    %492 = arith.maximumf %489, %491 : vector<128x128xf32>
    %c1_470 = arith.constant 1 : index
    %c1_471 = arith.constant 1 : index
    %c0_472 = arith.constant 0 : index
    %493 = vector.load %arg4[%c1_470, %c1_471, %c0_472] : memref<4x8x128xf32, #tpu.memory_space<vmem>>, vector<1x1x128xf32>
    %494 = vector.shape_cast %493 : vector<1x1x128xf32> to vector<1x128xf32>
    %495 = vector.broadcast %494 : vector<1x128xf32> to vector<128x128xf32>
    %496 = arith.mulf %492, %495 : vector<128x128xf32>
    %c1_473 = arith.constant 1 : index
    %c2_474 = arith.constant 2 : index
    %c0_475 = arith.constant 0 : index
    %497 = vector.load %arg4[%c1_473, %c2_474, %c0_475] : memref<4x8x128xf32, #tpu.memory_space<vmem>>, vector<1x1x128xf32>
    %498 = vector.shape_cast %497 : vector<1x1x128xf32> to vector<1x128xf32>
    %499 = vector.broadcast %498 : vector<1x128xf32> to vector<128x128xf32>
    %500 = arith.addf %496, %499 : vector<128x128xf32>
    %501 = vector.shape_cast %500 : vector<128x128xf32> to vector<2x8x8x128xf32>
    %c5_476 = arith.constant 5 : index
    %c1_477 = arith.constant 1 : index
    %c0_478 = arith.constant 0 : index
    %c0_479 = arith.constant 0 : index
    %502 = vector.load %arg8[%c5_476, %c1_477, %c0_478, %c0_479] : memref<9x9x8x128xf32, #tpu.memory_space<vmem>>, vector<2x8x8x128xf32>
    tpu.vector_store %arg8[%c5_476, %c1_477, %c0_478, %c0_479], %501 {strides = array<i32>} : memref<9x9x8x128xf32, #tpu.memory_space<vmem>>, vector<2x8x8x128xf32>,
    %cst_480 = arith.constant 0.000000e+00 : f32
    %503 = vector.broadcast %cst_480 : f32 to vector<128x128xf32>
    %c12_481 = arith.constant 12 : index
    %c0_482 = arith.constant 0 : index
    %c0_483 = arith.constant 0 : index
    %c0_484 = arith.constant 0 : index
    %504 = tpu.strided_load %arg7[%c12_481, %c0_482, %c0_483, %c0_484] {strides = array<i32: 2, 2, 1, 1>} : memref<17x17x8x128xf32, #tpu.memory_space<vmem>>, vector<2x8x8x128xf32>
    %505 = vector.shape_cast %504 : vector<2x8x8x128xf32> to vector<128x128xf32>
    %506 = arith.truncf %505 : vector<128x128xf32> to vector<128x128xbf16>
    %c0_485 = arith.constant 0 : index
    %c0_486 = arith.constant 0 : index
    %c0_487 = arith.constant 0 : index
    %c0_488 = arith.constant 0 : index
    %507 = vector.load %arg3[%c0_485, %c0_486, %c0_487, %c0_488] : memref<3x9x128x128xbf16, #tpu.memory_space<vmem>>, vector<1x1x128x128xbf16>
    %508 = vector.shape_cast %507 : vector<1x1x128x128xbf16> to vector<128x128xbf16>
    %cst_489 = arith.constant dense<0.000000e+00> : vector<128x128xf32>
    %509 = tpu.matmul %506, %508, %cst_489 {dimension_numbers = #tpu.dot_dimension_numbers<[1], [0], [0], [1], [0, 0, 1, 1], [], []>} : vector<128x128xbf16>, vector<128x128xbf16>, vector<128x128xf32> -> vector<128x128xf32>
    %510 = arith.addf %503, %509 : vector<128x128xf32>
    %c12_490 = arith.constant 12 : index
    %c1_491 = arith.constant 1 : index
    %c0_492 = arith.constant 0 : index
    %c0_493 = arith.constant 0 : index
    %511 = tpu.strided_load %arg7[%c12_490, %c1_491, %c0_492, %c0_493] {strides = array<i32: 2, 2, 1, 1>} : memref<17x17x8x128xf32, #tpu.memory_space<vmem>>, vector<2x8x8x128xf32>
    %512 = vector.shape_cast %511 : vector<2x8x8x128xf32> to vector<128x128xf32>
    %513 = arith.truncf %512 : vector<128x128xf32> to vector<128x128xbf16>
    %c0_494 = arith.constant 0 : index
    %c1_495 = arith.constant 1 : index
    %c0_496 = arith.constant 0 : index
    %c0_497 = arith.constant 0 : index
    %514 = vector.load %arg3[%c0_494, %c1_495, %c0_496, %c0_497] : memref<3x9x128x128xbf16, #tpu.memory_space<vmem>>, vector<1x1x128x128xbf16>
    %515 = vector.shape_cast %514 : vector<1x1x128x128xbf16> to vector<128x128xbf16>
    %cst_498 = arith.constant dense<0.000000e+00> : vector<128x128xf32>
    %516 = tpu.matmul %513, %515, %cst_498 {dimension_numbers = #tpu.dot_dimension_numbers<[1], [0], [0], [1], [0, 0, 1, 1], [], []>} : vector<128x128xbf16>, vector<128x128xbf16>, vector<128x128xf32> -> vector<128x128xf32>
    %517 = arith.addf %510, %516 : vector<128x128xf32>
    %c12_499 = arith.constant 12 : index
    %c2_500 = arith.constant 2 : index
    %c0_501 = arith.constant 0 : index
    %c0_502 = arith.constant 0 : index
    %518 = tpu.strided_load %arg7[%c12_499, %c2_500, %c0_501, %c0_502] {strides = array<i32: 2, 2, 1, 1>} : memref<17x17x8x128xf32, #tpu.memory_space<vmem>>, vector<2x8x8x128xf32>
    %519 = vector.shape_cast %518 : vector<2x8x8x128xf32> to vector<128x128xf32>
    %520 = arith.truncf %519 : vector<128x128xf32> to vector<128x128xbf16>
    %c0_503 = arith.constant 0 : index
    %c2_504 = arith.constant 2 : index
    %c0_505 = arith.constant 0 : index
    %c0_506 = arith.constant 0 : index
    %521 = vector.load %arg3[%c0_503, %c2_504, %c0_505, %c0_506] : memref<3x9x128x128xbf16, #tpu.memory_space<vmem>>, vector<1x1x128x128xbf16>
    %522 = vector.shape_cast %521 : vector<1x1x128x128xbf16> to vector<128x128xbf16>
    %cst_507 = arith.constant dense<0.000000e+00> : vector<128x128xf32>
    %523 = tpu.matmul %520, %522, %cst_507 {dimension_numbers = #tpu.dot_dimension_numbers<[1], [0], [0], [1], [0, 0, 1, 1], [], []>} : vector<128x128xbf16>, vector<128x128xbf16>, vector<128x128xf32> -> vector<128x128xf32>
    %524 = arith.addf %517, %523 : vector<128x128xf32>
    %c13_508 = arith.constant 13 : index
    %c0_509 = arith.constant 0 : index
    %c0_510 = arith.constant 0 : index
    %c0_511 = arith.constant 0 : index
    %525 = tpu.strided_load %arg7[%c13_508, %c0_509, %c0_510, %c0_511] {strides = array<i32: 2, 2, 1, 1>} : memref<17x17x8x128xf32, #tpu.memory_space<vmem>>, vector<2x8x8x128xf32>
    %526 = vector.shape_cast %525 : vector<2x8x8x128xf32> to vector<128x128xf32>
    %527 = arith.truncf %526 : vector<128x128xf32> to vector<128x128xbf16>
    %c0_512 = arith.constant 0 : index
    %c3_513 = arith.constant 3 : index
    %c0_514 = arith.constant 0 : index
    %c0_515 = arith.constant 0 : index
    %528 = vector.load %arg3[%c0_512, %c3_513, %c0_514, %c0_515] : memref<3x9x128x128xbf16, #tpu.memory_space<vmem>>, vector<1x1x128x128xbf16>
    %529 = vector.shape_cast %528 : vector<1x1x128x128xbf16> to vector<128x128xbf16>
    %cst_516 = arith.constant dense<0.000000e+00> : vector<128x128xf32>
    %530 = tpu.matmul %527, %529, %cst_516 {dimension_numbers = #tpu.dot_dimension_numbers<[1], [0], [0], [1], [0, 0, 1, 1], [], []>} : vector<128x128xbf16>, vector<128x128xbf16>, vector<128x128xf32> -> vector<128x128xf32>
    %531 = arith.addf %524, %530 : vector<128x128xf32>
    %c13_517 = arith.constant 13 : index
    %c1_518 = arith.constant 1 : index
    %c0_519 = arith.constant 0 : index
    %c0_520 = arith.constant 0 : index
    %532 = tpu.strided_load %arg7[%c13_517, %c1_518, %c0_519, %c0_520] {strides = array<i32: 2, 2, 1, 1>} : memref<17x17x8x128xf32, #tpu.memory_space<vmem>>, vector<2x8x8x128xf32>
    %533 = vector.shape_cast %532 : vector<2x8x8x128xf32> to vector<128x128xf32>
    %534 = arith.truncf %533 : vector<128x128xf32> to vector<128x128xbf16>
    %c0_521 = arith.constant 0 : index
    %c4_522 = arith.constant 4 : index
    %c0_523 = arith.constant 0 : index
    %c0_524 = arith.constant 0 : index
    %535 = vector.load %arg3[%c0_521, %c4_522, %c0_523, %c0_524] : memref<3x9x128x128xbf16, #tpu.memory_space<vmem>>, vector<1x1x128x128xbf16>
    %536 = vector.shape_cast %535 : vector<1x1x128x128xbf16> to vector<128x128xbf16>
    %cst_525 = arith.constant dense<0.000000e+00> : vector<128x128xf32>
    %537 = tpu.matmul %534, %536, %cst_525 {dimension_numbers = #tpu.dot_dimension_numbers<[1], [0], [0], [1], [0, 0, 1, 1], [], []>} : vector<128x128xbf16>, vector<128x128xbf16>, vector<128x128xf32> -> vector<128x128xf32>
    %538 = arith.addf %531, %537 : vector<128x128xf32>
    %c13_526 = arith.constant 13 : index
    %c2_527 = arith.constant 2 : index
    %c0_528 = arith.constant 0 : index
    %c0_529 = arith.constant 0 : index
    %539 = tpu.strided_load %arg7[%c13_526, %c2_527, %c0_528, %c0_529] {strides = array<i32: 2, 2, 1, 1>} : memref<17x17x8x128xf32, #tpu.memory_space<vmem>>, vector<2x8x8x128xf32>
    %540 = vector.shape_cast %539 : vector<2x8x8x128xf32> to vector<128x128xf32>
    %541 = arith.truncf %540 : vector<128x128xf32> to vector<128x128xbf16>
    %c0_530 = arith.constant 0 : index
    %c5_531 = arith.constant 5 : index
    %c0_532 = arith.constant 0 : index
    %c0_533 = arith.constant 0 : index
    %542 = vector.load %arg3[%c0_530, %c5_531, %c0_532, %c0_533] : memref<3x9x128x128xbf16, #tpu.memory_space<vmem>>, vector<1x1x128x128xbf16>
    %543 = vector.shape_cast %542 : vector<1x1x128x128xbf16> to vector<128x128xbf16>
    %cst_534 = arith.constant dense<0.000000e+00> : vector<128x128xf32>
    %544 = tpu.matmul %541, %543, %cst_534 {dimension_numbers = #tpu.dot_dimension_numbers<[1], [0], [0], [1], [0, 0, 1, 1], [], []>} : vector<128x128xbf16>, vector<128x128xbf16>, vector<128x128xf32> -> vector<128x128xf32>
    %545 = arith.addf %538, %544 : vector<128x128xf32>
    %c14_535 = arith.constant 14 : index
    %c0_536 = arith.constant 0 : index
    %c0_537 = arith.constant 0 : index
    %c0_538 = arith.constant 0 : index
    %546 = tpu.strided_load %arg7[%c14_535, %c0_536, %c0_537, %c0_538] {strides = array<i32: 2, 2, 1, 1>} : memref<17x17x8x128xf32, #tpu.memory_space<vmem>>, vector<2x8x8x128xf32>
    %547 = vector.shape_cast %546 : vector<2x8x8x128xf32> to vector<128x128xf32>
    %548 = arith.truncf %547 : vector<128x128xf32> to vector<128x128xbf16>
    %c0_539 = arith.constant 0 : index
    %c6_540 = arith.constant 6 : index
    %c0_541 = arith.constant 0 : index
    %c0_542 = arith.constant 0 : index
    %549 = vector.load %arg3[%c0_539, %c6_540, %c0_541, %c0_542] : memref<3x9x128x128xbf16, #tpu.memory_space<vmem>>, vector<1x1x128x128xbf16>
    %550 = vector.shape_cast %549 : vector<1x1x128x128xbf16> to vector<128x128xbf16>
    %cst_543 = arith.constant dense<0.000000e+00> : vector<128x128xf32>
    %551 = tpu.matmul %548, %550, %cst_543 {dimension_numbers = #tpu.dot_dimension_numbers<[1], [0], [0], [1], [0, 0, 1, 1], [], []>} : vector<128x128xbf16>, vector<128x128xbf16>, vector<128x128xf32> -> vector<128x128xf32>
    %552 = arith.addf %545, %551 : vector<128x128xf32>
    %c14_544 = arith.constant 14 : index
    %c1_545 = arith.constant 1 : index
    %c0_546 = arith.constant 0 : index
    %c0_547 = arith.constant 0 : index
    %553 = tpu.strided_load %arg7[%c14_544, %c1_545, %c0_546, %c0_547] {strides = array<i32: 2, 2, 1, 1>} : memref<17x17x8x128xf32, #tpu.memory_space<vmem>>, vector<2x8x8x128xf32>
    %554 = vector.shape_cast %553 : vector<2x8x8x128xf32> to vector<128x128xf32>
    %555 = arith.truncf %554 : vector<128x128xf32> to vector<128x128xbf16>
    %c0_548 = arith.constant 0 : index
    %c7_549 = arith.constant 7 : index
    %c0_550 = arith.constant 0 : index
    %c0_551 = arith.constant 0 : index
    %556 = vector.load %arg3[%c0_548, %c7_549, %c0_550, %c0_551] : memref<3x9x128x128xbf16, #tpu.memory_space<vmem>>, vector<1x1x128x128xbf16>
    %557 = vector.shape_cast %556 : vector<1x1x128x128xbf16> to vector<128x128xbf16>
    %cst_552 = arith.constant dense<0.000000e+00> : vector<128x128xf32>
    %558 = tpu.matmul %555, %557, %cst_552 {dimension_numbers = #tpu.dot_dimension_numbers<[1], [0], [0], [1], [0, 0, 1, 1], [], []>} : vector<128x128xbf16>, vector<128x128xbf16>, vector<128x128xf32> -> vector<128x128xf32>
    %559 = arith.addf %552, %558 : vector<128x128xf32>
    %c14_553 = arith.constant 14 : index
    %c2_554 = arith.constant 2 : index
    %c0_555 = arith.constant 0 : index
    %c0_556 = arith.constant 0 : index
    %560 = tpu.strided_load %arg7[%c14_553, %c2_554, %c0_555, %c0_556] {strides = array<i32: 2, 2, 1, 1>} : memref<17x17x8x128xf32, #tpu.memory_space<vmem>>, vector<2x8x8x128xf32>
    %561 = vector.shape_cast %560 : vector<2x8x8x128xf32> to vector<128x128xf32>
    %562 = arith.truncf %561 : vector<128x128xf32> to vector<128x128xbf16>
    %c0_557 = arith.constant 0 : index
    %c8_558 = arith.constant 8 : index
    %c0_559 = arith.constant 0 : index
    %c0_560 = arith.constant 0 : index
    %563 = vector.load %arg3[%c0_557, %c8_558, %c0_559, %c0_560] : memref<3x9x128x128xbf16, #tpu.memory_space<vmem>>, vector<1x1x128x128xbf16>
    %564 = vector.shape_cast %563 : vector<1x1x128x128xbf16> to vector<128x128xbf16>
    %cst_561 = arith.constant dense<0.000000e+00> : vector<128x128xf32>
    %565 = tpu.matmul %562, %564, %cst_561 {dimension_numbers = #tpu.dot_dimension_numbers<[1], [0], [0], [1], [0, 0, 1, 1], [], []>} : vector<128x128xbf16>, vector<128x128xbf16>, vector<128x128xf32> -> vector<128x128xf32>
    %566 = arith.addf %559, %565 : vector<128x128xf32>
    %c1_562 = arith.constant 1 : index
    %c0_563 = arith.constant 0 : index
    %c0_564 = arith.constant 0 : index
    %567 = vector.load %arg4[%c1_562, %c0_563, %c0_564] : memref<4x8x128xf32, #tpu.memory_space<vmem>>, vector<1x1x128xf32>
    %568 = vector.shape_cast %567 : vector<1x1x128xf32> to vector<1x128xf32>
    %569 = vector.broadcast %568 : vector<1x128xf32> to vector<128x128xf32>
    %570 = arith.addf %566, %569 : vector<128x128xf32>
    %cst_565 = arith.constant 2.000000e-01 : f32
    %571 = vector.broadcast %cst_565 : f32 to vector<128x128xf32>
    %572 = arith.mulf %571, %570 : vector<128x128xf32>
    %573 = arith.maximumf %570, %572 : vector<128x128xf32>
    %c1_566 = arith.constant 1 : index
    %c1_567 = arith.constant 1 : index
    %c0_568 = arith.constant 0 : index
    %574 = vector.load %arg4[%c1_566, %c1_567, %c0_568] : memref<4x8x128xf32, #tpu.memory_space<vmem>>, vector<1x1x128xf32>
    %575 = vector.shape_cast %574 : vector<1x1x128xf32> to vector<1x128xf32>
    %576 = vector.broadcast %575 : vector<1x128xf32> to vector<128x128xf32>
    %577 = arith.mulf %573, %576 : vector<128x128xf32>
    %c1_569 = arith.constant 1 : index
    %c2_570 = arith.constant 2 : index
    %c0_571 = arith.constant 0 : index
    %578 = vector.load %arg4[%c1_569, %c2_570, %c0_571] : memref<4x8x128xf32, #tpu.memory_space<vmem>>, vector<1x1x128xf32>
    %579 = vector.shape_cast %578 : vector<1x1x128xf32> to vector<1x128xf32>
    %580 = vector.broadcast %579 : vector<1x128xf32> to vector<128x128xf32>
    %581 = arith.addf %577, %580 : vector<128x128xf32>
    %582 = vector.shape_cast %581 : vector<128x128xf32> to vector<2x8x8x128xf32>
    %c7_572 = arith.constant 7 : index
    %c1_573 = arith.constant 1 : index
    %c0_574 = arith.constant 0 : index
    %c0_575 = arith.constant 0 : index
    %583 = vector.load %arg8[%c7_572, %c1_573, %c0_574, %c0_575] : memref<9x9x8x128xf32, #tpu.memory_space<vmem>>, vector<2x8x8x128xf32>
    tpu.vector_store %arg8[%c7_572, %c1_573, %c0_574, %c0_575], %582 {strides = array<i32>} : memref<9x9x8x128xf32, #tpu.memory_space<vmem>>, vector<2x8x8x128xf32>,
    %cst_576 = arith.constant 0.000000e+00 : f32
    %584 = vector.broadcast %cst_576 : f32 to vector<128x128xf32>
    %c0_577 = arith.constant 0 : index
    %c0_578 = arith.constant 0 : index
    %c0_579 = arith.constant 0 : index
    %c0_580 = arith.constant 0 : index
    %585 = tpu.strided_load %arg8[%c0_577, %c0_578, %c0_579, %c0_580] {strides = array<i32: 2, 2, 1, 1>} : memref<9x9x8x128xf32, #tpu.memory_space<vmem>>, vector<4x4x8x128xf32>
    %586 = vector.shape_cast %585 : vector<4x4x8x128xf32> to vector<128x128xf32>
    %587 = arith.truncf %586 : vector<128x128xf32> to vector<128x128xbf16>
    %c1_581 = arith.constant 1 : index
    %c0_582 = arith.constant 0 : index
    %c0_583 = arith.constant 0 : index
    %c0_584 = arith.constant 0 : index
    %588 = vector.load %arg3[%c1_581, %c0_582, %c0_583, %c0_584] : memref<3x9x128x128xbf16, #tpu.memory_space<vmem>>, vector<1x1x128x128xbf16>
    %589 = vector.shape_cast %588 : vector<1x1x128x128xbf16> to vector<128x128xbf16>
    %cst_585 = arith.constant dense<0.000000e+00> : vector<128x128xf32>
    %590 = tpu.matmul %587, %589, %cst_585 {dimension_numbers = #tpu.dot_dimension_numbers<[1], [0], [0], [1], [0, 0, 1, 1], [], []>} : vector<128x128xbf16>, vector<128x128xbf16>, vector<128x128xf32> -> vector<128x128xf32>
    %591 = arith.addf %584, %590 : vector<128x128xf32>
    %c0_586 = arith.constant 0 : index
    %c1_587 = arith.constant 1 : index
    %c0_588 = arith.constant 0 : index
    %c0_589 = arith.constant 0 : index
    %592 = tpu.strided_load %arg8[%c0_586, %c1_587, %c0_588, %c0_589] {strides = array<i32: 2, 2, 1, 1>} : memref<9x9x8x128xf32, #tpu.memory_space<vmem>>, vector<4x4x8x128xf32>
    %593 = vector.shape_cast %592 : vector<4x4x8x128xf32> to vector<128x128xf32>
    %594 = arith.truncf %593 : vector<128x128xf32> to vector<128x128xbf16>
    %c1_590 = arith.constant 1 : index
    %c1_591 = arith.constant 1 : index
    %c0_592 = arith.constant 0 : index
    %c0_593 = arith.constant 0 : index
    %595 = vector.load %arg3[%c1_590, %c1_591, %c0_592, %c0_593] : memref<3x9x128x128xbf16, #tpu.memory_space<vmem>>, vector<1x1x128x128xbf16>
    %596 = vector.shape_cast %595 : vector<1x1x128x128xbf16> to vector<128x128xbf16>
    %cst_594 = arith.constant dense<0.000000e+00> : vector<128x128xf32>
    %597 = tpu.matmul %594, %596, %cst_594 {dimension_numbers = #tpu.dot_dimension_numbers<[1], [0], [0], [1], [0, 0, 1, 1], [], []>} : vector<128x128xbf16>, vector<128x128xbf16>, vector<128x128xf32> -> vector<128x128xf32>
    %598 = arith.addf %591, %597 : vector<128x128xf32>
    %c0_595 = arith.constant 0 : index
    %c2_596 = arith.constant 2 : index
    %c0_597 = arith.constant 0 : index
    %c0_598 = arith.constant 0 : index
    %599 = tpu.strided_load %arg8[%c0_595, %c2_596, %c0_597, %c0_598] {strides = array<i32: 2, 2, 1, 1>} : memref<9x9x8x128xf32, #tpu.memory_space<vmem>>, vector<4x4x8x128xf32>
    %600 = vector.shape_cast %599 : vector<4x4x8x128xf32> to vector<128x128xf32>
    %601 = arith.truncf %600 : vector<128x128xf32> to vector<128x128xbf16>
    %c1_599 = arith.constant 1 : index
    %c2_600 = arith.constant 2 : index
    %c0_601 = arith.constant 0 : index
    %c0_602 = arith.constant 0 : index
    %602 = vector.load %arg3[%c1_599, %c2_600, %c0_601, %c0_602] : memref<3x9x128x128xbf16, #tpu.memory_space<vmem>>, vector<1x1x128x128xbf16>
    %603 = vector.shape_cast %602 : vector<1x1x128x128xbf16> to vector<128x128xbf16>
    %cst_603 = arith.constant dense<0.000000e+00> : vector<128x128xf32>
    %604 = tpu.matmul %601, %603, %cst_603 {dimension_numbers = #tpu.dot_dimension_numbers<[1], [0], [0], [1], [0, 0, 1, 1], [], []>} : vector<128x128xbf16>, vector<128x128xbf16>, vector<128x128xf32> -> vector<128x128xf32>
    %605 = arith.addf %598, %604 : vector<128x128xf32>
    %c1_604 = arith.constant 1 : index
    %c0_605 = arith.constant 0 : index
    %c0_606 = arith.constant 0 : index
    %c0_607 = arith.constant 0 : index
    %606 = tpu.strided_load %arg8[%c1_604, %c0_605, %c0_606, %c0_607] {strides = array<i32: 2, 2, 1, 1>} : memref<9x9x8x128xf32, #tpu.memory_space<vmem>>, vector<4x4x8x128xf32>
    %607 = vector.shape_cast %606 : vector<4x4x8x128xf32> to vector<128x128xf32>
    %608 = arith.truncf %607 : vector<128x128xf32> to vector<128x128xbf16>
    %c1_608 = arith.constant 1 : index
    %c3_609 = arith.constant 3 : index
    %c0_610 = arith.constant 0 : index
    %c0_611 = arith.constant 0 : index
    %609 = vector.load %arg3[%c1_608, %c3_609, %c0_610, %c0_611] : memref<3x9x128x128xbf16, #tpu.memory_space<vmem>>, vector<1x1x128x128xbf16>
    %610 = vector.shape_cast %609 : vector<1x1x128x128xbf16> to vector<128x128xbf16>
    %cst_612 = arith.constant dense<0.000000e+00> : vector<128x128xf32>
    %611 = tpu.matmul %608, %610, %cst_612 {dimension_numbers = #tpu.dot_dimension_numbers<[1], [0], [0], [1], [0, 0, 1, 1], [], []>} : vector<128x128xbf16>, vector<128x128xbf16>, vector<128x128xf32> -> vector<128x128xf32>
    %612 = arith.addf %605, %611 : vector<128x128xf32>
    %c1_613 = arith.constant 1 : index
    %c1_614 = arith.constant 1 : index
    %c0_615 = arith.constant 0 : index
    %c0_616 = arith.constant 0 : index
    %613 = tpu.strided_load %arg8[%c1_613, %c1_614, %c0_615, %c0_616] {strides = array<i32: 2, 2, 1, 1>} : memref<9x9x8x128xf32, #tpu.memory_space<vmem>>, vector<4x4x8x128xf32>
    %614 = vector.shape_cast %613 : vector<4x4x8x128xf32> to vector<128x128xf32>
    %615 = arith.truncf %614 : vector<128x128xf32> to vector<128x128xbf16>
    %c1_617 = arith.constant 1 : index
    %c4_618 = arith.constant 4 : index
    %c0_619 = arith.constant 0 : index
    %c0_620 = arith.constant 0 : index
    %616 = vector.load %arg3[%c1_617, %c4_618, %c0_619, %c0_620] : memref<3x9x128x128xbf16, #tpu.memory_space<vmem>>, vector<1x1x128x128xbf16>
    %617 = vector.shape_cast %616 : vector<1x1x128x128xbf16> to vector<128x128xbf16>
    %cst_621 = arith.constant dense<0.000000e+00> : vector<128x128xf32>
    %618 = tpu.matmul %615, %617, %cst_621 {dimension_numbers = #tpu.dot_dimension_numbers<[1], [0], [0], [1], [0, 0, 1, 1], [], []>} : vector<128x128xbf16>, vector<128x128xbf16>, vector<128x128xf32> -> vector<128x128xf32>
    %619 = arith.addf %612, %618 : vector<128x128xf32>
    %c1_622 = arith.constant 1 : index
    %c2_623 = arith.constant 2 : index
    %c0_624 = arith.constant 0 : index
    %c0_625 = arith.constant 0 : index
    %620 = tpu.strided_load %arg8[%c1_622, %c2_623, %c0_624, %c0_625] {strides = array<i32: 2, 2, 1, 1>} : memref<9x9x8x128xf32, #tpu.memory_space<vmem>>, vector<4x4x8x128xf32>
    %621 = vector.shape_cast %620 : vector<4x4x8x128xf32> to vector<128x128xf32>
    %622 = arith.truncf %621 : vector<128x128xf32> to vector<128x128xbf16>
    %c1_626 = arith.constant 1 : index
    %c5_627 = arith.constant 5 : index
    %c0_628 = arith.constant 0 : index
    %c0_629 = arith.constant 0 : index
    %623 = vector.load %arg3[%c1_626, %c5_627, %c0_628, %c0_629] : memref<3x9x128x128xbf16, #tpu.memory_space<vmem>>, vector<1x1x128x128xbf16>
    %624 = vector.shape_cast %623 : vector<1x1x128x128xbf16> to vector<128x128xbf16>
    %cst_630 = arith.constant dense<0.000000e+00> : vector<128x128xf32>
    %625 = tpu.matmul %622, %624, %cst_630 {dimension_numbers = #tpu.dot_dimension_numbers<[1], [0], [0], [1], [0, 0, 1, 1], [], []>} : vector<128x128xbf16>, vector<128x128xbf16>, vector<128x128xf32> -> vector<128x128xf32>
    %626 = arith.addf %619, %625 : vector<128x128xf32>
    %c2_631 = arith.constant 2 : index
    %c0_632 = arith.constant 0 : index
    %c0_633 = arith.constant 0 : index
    %c0_634 = arith.constant 0 : index
    %627 = tpu.strided_load %arg8[%c2_631, %c0_632, %c0_633, %c0_634] {strides = array<i32: 2, 2, 1, 1>} : memref<9x9x8x128xf32, #tpu.memory_space<vmem>>, vector<4x4x8x128xf32>
    %628 = vector.shape_cast %627 : vector<4x4x8x128xf32> to vector<128x128xf32>
    %629 = arith.truncf %628 : vector<128x128xf32> to vector<128x128xbf16>
    %c1_635 = arith.constant 1 : index
    %c6_636 = arith.constant 6 : index
    %c0_637 = arith.constant 0 : index
    %c0_638 = arith.constant 0 : index
    %630 = vector.load %arg3[%c1_635, %c6_636, %c0_637, %c0_638] : memref<3x9x128x128xbf16, #tpu.memory_space<vmem>>, vector<1x1x128x128xbf16>
    %631 = vector.shape_cast %630 : vector<1x1x128x128xbf16> to vector<128x128xbf16>
    %cst_639 = arith.constant dense<0.000000e+00> : vector<128x128xf32>
    %632 = tpu.matmul %629, %631, %cst_639 {dimension_numbers = #tpu.dot_dimension_numbers<[1], [0], [0], [1], [0, 0, 1, 1], [], []>} : vector<128x128xbf16>, vector<128x128xbf16>, vector<128x128xf32> -> vector<128x128xf32>
    %633 = arith.addf %626, %632 : vector<128x128xf32>
    %c2_640 = arith.constant 2 : index
    %c1_641 = arith.constant 1 : index
    %c0_642 = arith.constant 0 : index
    %c0_643 = arith.constant 0 : index
    %634 = tpu.strided_load %arg8[%c2_640, %c1_641, %c0_642, %c0_643] {strides = array<i32: 2, 2, 1, 1>} : memref<9x9x8x128xf32, #tpu.memory_space<vmem>>, vector<4x4x8x128xf32>
    %635 = vector.shape_cast %634 : vector<4x4x8x128xf32> to vector<128x128xf32>
    %636 = arith.truncf %635 : vector<128x128xf32> to vector<128x128xbf16>
    %c1_644 = arith.constant 1 : index
    %c7_645 = arith.constant 7 : index
    %c0_646 = arith.constant 0 : index
    %c0_647 = arith.constant 0 : index
    %637 = vector.load %arg3[%c1_644, %c7_645, %c0_646, %c0_647] : memref<3x9x128x128xbf16, #tpu.memory_space<vmem>>, vector<1x1x128x128xbf16>
    %638 = vector.shape_cast %637 : vector<1x1x128x128xbf16> to vector<128x128xbf16>
    %cst_648 = arith.constant dense<0.000000e+00> : vector<128x128xf32>
    %639 = tpu.matmul %636, %638, %cst_648 {dimension_numbers = #tpu.dot_dimension_numbers<[1], [0], [0], [1], [0, 0, 1, 1], [], []>} : vector<128x128xbf16>, vector<128x128xbf16>, vector<128x128xf32> -> vector<128x128xf32>
    %640 = arith.addf %633, %639 : vector<128x128xf32>
    %c2_649 = arith.constant 2 : index
    %c2_650 = arith.constant 2 : index
    %c0_651 = arith.constant 0 : index
    %c0_652 = arith.constant 0 : index
    %641 = tpu.strided_load %arg8[%c2_649, %c2_650, %c0_651, %c0_652] {strides = array<i32: 2, 2, 1, 1>} : memref<9x9x8x128xf32, #tpu.memory_space<vmem>>, vector<4x4x8x128xf32>
    %642 = vector.shape_cast %641 : vector<4x4x8x128xf32> to vector<128x128xf32>
    %643 = arith.truncf %642 : vector<128x128xf32> to vector<128x128xbf16>
    %c1_653 = arith.constant 1 : index
    %c8_654 = arith.constant 8 : index
    %c0_655 = arith.constant 0 : index
    %c0_656 = arith.constant 0 : index
    %644 = vector.load %arg3[%c1_653, %c8_654, %c0_655, %c0_656] : memref<3x9x128x128xbf16, #tpu.memory_space<vmem>>, vector<1x1x128x128xbf16>
    %645 = vector.shape_cast %644 : vector<1x1x128x128xbf16> to vector<128x128xbf16>
    %cst_657 = arith.constant dense<0.000000e+00> : vector<128x128xf32>
    %646 = tpu.matmul %643, %645, %cst_657 {dimension_numbers = #tpu.dot_dimension_numbers<[1], [0], [0], [1], [0, 0, 1, 1], [], []>} : vector<128x128xbf16>, vector<128x128xbf16>, vector<128x128xf32> -> vector<128x128xf32>
    %647 = arith.addf %640, %646 : vector<128x128xf32>
    %c2_658 = arith.constant 2 : index
    %c0_659 = arith.constant 0 : index
    %c0_660 = arith.constant 0 : index
    %648 = vector.load %arg4[%c2_658, %c0_659, %c0_660] : memref<4x8x128xf32, #tpu.memory_space<vmem>>, vector<1x1x128xf32>
    %649 = vector.shape_cast %648 : vector<1x1x128xf32> to vector<1x128xf32>
    %650 = vector.broadcast %649 : vector<1x128xf32> to vector<128x128xf32>
    %651 = arith.addf %647, %650 : vector<128x128xf32>
    %cst_661 = arith.constant 2.000000e-01 : f32
    %652 = vector.broadcast %cst_661 : f32 to vector<128x128xf32>
    %653 = arith.mulf %652, %651 : vector<128x128xf32>
    %654 = arith.maximumf %651, %653 : vector<128x128xf32>
    %c2_662 = arith.constant 2 : index
    %c1_663 = arith.constant 1 : index
    %c0_664 = arith.constant 0 : index
    %655 = vector.load %arg4[%c2_662, %c1_663, %c0_664] : memref<4x8x128xf32, #tpu.memory_space<vmem>>, vector<1x1x128xf32>
    %656 = vector.shape_cast %655 : vector<1x1x128xf32> to vector<1x128xf32>
    %657 = vector.broadcast %656 : vector<1x128xf32> to vector<128x128xf32>
    %658 = arith.mulf %654, %657 : vector<128x128xf32>
    %c2_665 = arith.constant 2 : index
    %c2_666 = arith.constant 2 : index
    %c0_667 = arith.constant 0 : index
    %659 = vector.load %arg4[%c2_665, %c2_666, %c0_667] : memref<4x8x128xf32, #tpu.memory_space<vmem>>, vector<1x1x128xf32>
    %660 = vector.shape_cast %659 : vector<1x1x128xf32> to vector<1x128xf32>
    %661 = vector.broadcast %660 : vector<1x128xf32> to vector<128x128xf32>
    %662 = arith.addf %658, %661 : vector<128x128xf32>
    %663 = vector.shape_cast %662 : vector<128x128xf32> to vector<4x4x8x128xf32>
    %c1_668 = arith.constant 1 : index
    %c1_669 = arith.constant 1 : index
    %c0_670 = arith.constant 0 : index
    %c0_671 = arith.constant 0 : index
    %664 = vector.load %arg9[%c1_668, %c1_669, %c0_670, %c0_671] : memref<5x5x8x128xf32, #tpu.memory_space<vmem>>, vector<4x4x8x128xf32>
    tpu.vector_store %arg9[%c1_668, %c1_669, %c0_670, %c0_671], %663 {strides = array<i32>} : memref<5x5x8x128xf32, #tpu.memory_space<vmem>>, vector<4x4x8x128xf32>,
    %cst_672 = arith.constant 0.000000e+00 : f32
    %665 = vector.broadcast %cst_672 : f32 to vector<32x128xf32>
    %c0_673 = arith.constant 0 : index
    %c0_674 = arith.constant 0 : index
    %c0_675 = arith.constant 0 : index
    %c0_676 = arith.constant 0 : index
    %666 = tpu.strided_load %arg9[%c0_673, %c0_674, %c0_675, %c0_676] {strides = array<i32: 2, 2, 1, 1>} : memref<5x5x8x128xf32, #tpu.memory_space<vmem>>, vector<2x2x8x128xf32>
    %667 = vector.shape_cast %666 : vector<2x2x8x128xf32> to vector<32x128xf32>
    %668 = arith.truncf %667 : vector<32x128xf32> to vector<32x128xbf16>
    %c2_677 = arith.constant 2 : index
    %c0_678 = arith.constant 0 : index
    %c0_679 = arith.constant 0 : index
    %c0_680 = arith.constant 0 : index
    %669 = vector.load %arg3[%c2_677, %c0_678, %c0_679, %c0_680] : memref<3x9x128x128xbf16, #tpu.memory_space<vmem>>, vector<1x1x128x128xbf16>
    %670 = vector.shape_cast %669 : vector<1x1x128x128xbf16> to vector<128x128xbf16>
    %cst_681 = arith.constant dense<0.000000e+00> : vector<32x128xf32>
    %671 = tpu.matmul %668, %670, %cst_681 {dimension_numbers = #tpu.dot_dimension_numbers<[1], [0], [0], [1], [0, 0, 1, 1], [], []>} : vector<32x128xbf16>, vector<128x128xbf16>, vector<32x128xf32> -> vector<32x128xf32>
    %672 = arith.addf %665, %671 : vector<32x128xf32>
    %c0_682 = arith.constant 0 : index
    %c1_683 = arith.constant 1 : index
    %c0_684 = arith.constant 0 : index
    %c0_685 = arith.constant 0 : index
    %673 = tpu.strided_load %arg9[%c0_682, %c1_683, %c0_684, %c0_685] {strides = array<i32: 2, 2, 1, 1>} : memref<5x5x8x128xf32, #tpu.memory_space<vmem>>, vector<2x2x8x128xf32>
    %674 = vector.shape_cast %673 : vector<2x2x8x128xf32> to vector<32x128xf32>
    %675 = arith.truncf %674 : vector<32x128xf32> to vector<32x128xbf16>
    %c2_686 = arith.constant 2 : index
    %c1_687 = arith.constant 1 : index
    %c0_688 = arith.constant 0 : index
    %c0_689 = arith.constant 0 : index
    %676 = vector.load %arg3[%c2_686, %c1_687, %c0_688, %c0_689] : memref<3x9x128x128xbf16, #tpu.memory_space<vmem>>, vector<1x1x128x128xbf16>
    %677 = vector.shape_cast %676 : vector<1x1x128x128xbf16> to vector<128x128xbf16>
    %cst_690 = arith.constant dense<0.000000e+00> : vector<32x128xf32>
    %678 = tpu.matmul %675, %677, %cst_690 {dimension_numbers = #tpu.dot_dimension_numbers<[1], [0], [0], [1], [0, 0, 1, 1], [], []>} : vector<32x128xbf16>, vector<128x128xbf16>, vector<32x128xf32> -> vector<32x128xf32>
    %679 = arith.addf %672, %678 : vector<32x128xf32>
    %c0_691 = arith.constant 0 : index
    %c2_692 = arith.constant 2 : index
    %c0_693 = arith.constant 0 : index
    %c0_694 = arith.constant 0 : index
    %680 = tpu.strided_load %arg9[%c0_691, %c2_692, %c0_693, %c0_694] {strides = array<i32: 2, 2, 1, 1>} : memref<5x5x8x128xf32, #tpu.memory_space<vmem>>, vector<2x2x8x128xf32>
    %681 = vector.shape_cast %680 : vector<2x2x8x128xf32> to vector<32x128xf32>
    %682 = arith.truncf %681 : vector<32x128xf32> to vector<32x128xbf16>
    %c2_695 = arith.constant 2 : index
    %c2_696 = arith.constant 2 : index
    %c0_697 = arith.constant 0 : index
    %c0_698 = arith.constant 0 : index
    %683 = vector.load %arg3[%c2_695, %c2_696, %c0_697, %c0_698] : memref<3x9x128x128xbf16, #tpu.memory_space<vmem>>, vector<1x1x128x128xbf16>
    %684 = vector.shape_cast %683 : vector<1x1x128x128xbf16> to vector<128x128xbf16>
    %cst_699 = arith.constant dense<0.000000e+00> : vector<32x128xf32>
    %685 = tpu.matmul %682, %684, %cst_699 {dimension_numbers = #tpu.dot_dimension_numbers<[1], [0], [0], [1], [0, 0, 1, 1], [], []>} : vector<32x128xbf16>, vector<128x128xbf16>, vector<32x128xf32> -> vector<32x128xf32>
    %686 = arith.addf %679, %685 : vector<32x128xf32>
    %c1_700 = arith.constant 1 : index
    %c0_701 = arith.constant 0 : index
    %c0_702 = arith.constant 0 : index
    %c0_703 = arith.constant 0 : index
    %687 = tpu.strided_load %arg9[%c1_700, %c0_701, %c0_702, %c0_703] {strides = array<i32: 2, 2, 1, 1>} : memref<5x5x8x128xf32, #tpu.memory_space<vmem>>, vector<2x2x8x128xf32>
    %688 = vector.shape_cast %687 : vector<2x2x8x128xf32> to vector<32x128xf32>
    %689 = arith.truncf %688 : vector<32x128xf32> to vector<32x128xbf16>
    %c2_704 = arith.constant 2 : index
    %c3_705 = arith.constant 3 : index
    %c0_706 = arith.constant 0 : index
    %c0_707 = arith.constant 0 : index
    %690 = vector.load %arg3[%c2_704, %c3_705, %c0_706, %c0_707] : memref<3x9x128x128xbf16, #tpu.memory_space<vmem>>, vector<1x1x128x128xbf16>
    %691 = vector.shape_cast %690 : vector<1x1x128x128xbf16> to vector<128x128xbf16>
    %cst_708 = arith.constant dense<0.000000e+00> : vector<32x128xf32>
    %692 = tpu.matmul %689, %691, %cst_708 {dimension_numbers = #tpu.dot_dimension_numbers<[1], [0], [0], [1], [0, 0, 1, 1], [], []>} : vector<32x128xbf16>, vector<128x128xbf16>, vector<32x128xf32> -> vector<32x128xf32>
    %693 = arith.addf %686, %692 : vector<32x128xf32>
    %c1_709 = arith.constant 1 : index
    %c1_710 = arith.constant 1 : index
    %c0_711 = arith.constant 0 : index
    %c0_712 = arith.constant 0 : index
    %694 = tpu.strided_load %arg9[%c1_709, %c1_710, %c0_711, %c0_712] {strides = array<i32: 2, 2, 1, 1>} : memref<5x5x8x128xf32, #tpu.memory_space<vmem>>, vector<2x2x8x128xf32>
    %695 = vector.shape_cast %694 : vector<2x2x8x128xf32> to vector<32x128xf32>
    %696 = arith.truncf %695 : vector<32x128xf32> to vector<32x128xbf16>
    %c2_713 = arith.constant 2 : index
    %c4_714 = arith.constant 4 : index
    %c0_715 = arith.constant 0 : index
    %c0_716 = arith.constant 0 : index
    %697 = vector.load %arg3[%c2_713, %c4_714, %c0_715, %c0_716] : memref<3x9x128x128xbf16, #tpu.memory_space<vmem>>, vector<1x1x128x128xbf16>
    %698 = vector.shape_cast %697 : vector<1x1x128x128xbf16> to vector<128x128xbf16>
    %cst_717 = arith.constant dense<0.000000e+00> : vector<32x128xf32>
    %699 = tpu.matmul %696, %698, %cst_717 {dimension_numbers = #tpu.dot_dimension_numbers<[1], [0], [0], [1], [0, 0, 1, 1], [], []>} : vector<32x128xbf16>, vector<128x128xbf16>, vector<32x128xf32> -> vector<32x128xf32>
    %700 = arith.addf %693, %699 : vector<32x128xf32>
    %c1_718 = arith.constant 1 : index
    %c2_719 = arith.constant 2 : index
    %c0_720 = arith.constant 0 : index
    %c0_721 = arith.constant 0 : index
    %701 = tpu.strided_load %arg9[%c1_718, %c2_719, %c0_720, %c0_721] {strides = array<i32: 2, 2, 1, 1>} : memref<5x5x8x128xf32, #tpu.memory_space<vmem>>, vector<2x2x8x128xf32>
    %702 = vector.shape_cast %701 : vector<2x2x8x128xf32> to vector<32x128xf32>
    %703 = arith.truncf %702 : vector<32x128xf32> to vector<32x128xbf16>
    %c2_722 = arith.constant 2 : index
    %c5_723 = arith.constant 5 : index
    %c0_724 = arith.constant 0 : index
    %c0_725 = arith.constant 0 : index
    %704 = vector.load %arg3[%c2_722, %c5_723, %c0_724, %c0_725] : memref<3x9x128x128xbf16, #tpu.memory_space<vmem>>, vector<1x1x128x128xbf16>
    %705 = vector.shape_cast %704 : vector<1x1x128x128xbf16> to vector<128x128xbf16>
    %cst_726 = arith.constant dense<0.000000e+00> : vector<32x128xf32>
    %706 = tpu.matmul %703, %705, %cst_726 {dimension_numbers = #tpu.dot_dimension_numbers<[1], [0], [0], [1], [0, 0, 1, 1], [], []>} : vector<32x128xbf16>, vector<128x128xbf16>, vector<32x128xf32> -> vector<32x128xf32>
    %707 = arith.addf %700, %706 : vector<32x128xf32>
    %c2_727 = arith.constant 2 : index
    %c0_728 = arith.constant 0 : index
    %c0_729 = arith.constant 0 : index
    %c0_730 = arith.constant 0 : index
    %708 = tpu.strided_load %arg9[%c2_727, %c0_728, %c0_729, %c0_730] {strides = array<i32: 2, 2, 1, 1>} : memref<5x5x8x128xf32, #tpu.memory_space<vmem>>, vector<2x2x8x128xf32>
    %709 = vector.shape_cast %708 : vector<2x2x8x128xf32> to vector<32x128xf32>
    %710 = arith.truncf %709 : vector<32x128xf32> to vector<32x128xbf16>
    %c2_731 = arith.constant 2 : index
    %c6_732 = arith.constant 6 : index
    %c0_733 = arith.constant 0 : index
    %c0_734 = arith.constant 0 : index
    %711 = vector.load %arg3[%c2_731, %c6_732, %c0_733, %c0_734] : memref<3x9x128x128xbf16, #tpu.memory_space<vmem>>, vector<1x1x128x128xbf16>
    %712 = vector.shape_cast %711 : vector<1x1x128x128xbf16> to vector<128x128xbf16>
    %cst_735 = arith.constant dense<0.000000e+00> : vector<32x128xf32>
    %713 = tpu.matmul %710, %712, %cst_735 {dimension_numbers = #tpu.dot_dimension_numbers<[1], [0], [0], [1], [0, 0, 1, 1], [], []>} : vector<32x128xbf16>, vector<128x128xbf16>, vector<32x128xf32> -> vector<32x128xf32>
    %714 = arith.addf %707, %713 : vector<32x128xf32>
    %c2_736 = arith.constant 2 : index
    %c1_737 = arith.constant 1 : index
    %c0_738 = arith.constant 0 : index
    %c0_739 = arith.constant 0 : index
    %715 = tpu.strided_load %arg9[%c2_736, %c1_737, %c0_738, %c0_739] {strides = array<i32: 2, 2, 1, 1>} : memref<5x5x8x128xf32, #tpu.memory_space<vmem>>, vector<2x2x8x128xf32>
    %716 = vector.shape_cast %715 : vector<2x2x8x128xf32> to vector<32x128xf32>
    %717 = arith.truncf %716 : vector<32x128xf32> to vector<32x128xbf16>
    %c2_740 = arith.constant 2 : index
    %c7_741 = arith.constant 7 : index
    %c0_742 = arith.constant 0 : index
    %c0_743 = arith.constant 0 : index
    %718 = vector.load %arg3[%c2_740, %c7_741, %c0_742, %c0_743] : memref<3x9x128x128xbf16, #tpu.memory_space<vmem>>, vector<1x1x128x128xbf16>
    %719 = vector.shape_cast %718 : vector<1x1x128x128xbf16> to vector<128x128xbf16>
    %cst_744 = arith.constant dense<0.000000e+00> : vector<32x128xf32>
    %720 = tpu.matmul %717, %719, %cst_744 {dimension_numbers = #tpu.dot_dimension_numbers<[1], [0], [0], [1], [0, 0, 1, 1], [], []>} : vector<32x128xbf16>, vector<128x128xbf16>, vector<32x128xf32> -> vector<32x128xf32>
    %721 = arith.addf %714, %720 : vector<32x128xf32>
    %c2_745 = arith.constant 2 : index
    %c2_746 = arith.constant 2 : index
    %c0_747 = arith.constant 0 : index
    %c0_748 = arith.constant 0 : index
    %722 = tpu.strided_load %arg9[%c2_745, %c2_746, %c0_747, %c0_748] {strides = array<i32: 2, 2, 1, 1>} : memref<5x5x8x128xf32, #tpu.memory_space<vmem>>, vector<2x2x8x128xf32>
    %723 = vector.shape_cast %722 : vector<2x2x8x128xf32> to vector<32x128xf32>
    %724 = arith.truncf %723 : vector<32x128xf32> to vector<32x128xbf16>
    %c2_749 = arith.constant 2 : index
    %c8_750 = arith.constant 8 : index
    %c0_751 = arith.constant 0 : index
    %c0_752 = arith.constant 0 : index
    %725 = vector.load %arg3[%c2_749, %c8_750, %c0_751, %c0_752] : memref<3x9x128x128xbf16, #tpu.memory_space<vmem>>, vector<1x1x128x128xbf16>
    %726 = vector.shape_cast %725 : vector<1x1x128x128xbf16> to vector<128x128xbf16>
    %cst_753 = arith.constant dense<0.000000e+00> : vector<32x128xf32>
    %727 = tpu.matmul %724, %726, %cst_753 {dimension_numbers = #tpu.dot_dimension_numbers<[1], [0], [0], [1], [0, 0, 1, 1], [], []>} : vector<32x128xbf16>, vector<128x128xbf16>, vector<32x128xf32> -> vector<32x128xf32>
    %728 = arith.addf %721, %727 : vector<32x128xf32>
    %c3_754 = arith.constant 3 : index
    %c0_755 = arith.constant 0 : index
    %c0_756 = arith.constant 0 : index
    %729 = vector.load %arg4[%c3_754, %c0_755, %c0_756] : memref<4x8x128xf32, #tpu.memory_space<vmem>>, vector<1x1x128xf32>
    %730 = vector.shape_cast %729 : vector<1x1x128xf32> to vector<1x128xf32>
    %731 = vector.broadcast %730 : vector<1x128xf32> to vector<32x128xf32>
    %732 = arith.addf %728, %731 : vector<32x128xf32>
    %cst_757 = arith.constant 2.000000e-01 : f32
    %733 = vector.broadcast %cst_757 : f32 to vector<32x128xf32>
    %734 = arith.mulf %733, %732 : vector<32x128xf32>
    %735 = arith.maximumf %732, %734 : vector<32x128xf32>
    %c3_758 = arith.constant 3 : index
    %c1_759 = arith.constant 1 : index
    %c0_760 = arith.constant 0 : index
    %736 = vector.load %arg4[%c3_758, %c1_759, %c0_760] : memref<4x8x128xf32, #tpu.memory_space<vmem>>, vector<1x1x128xf32>
    %737 = vector.shape_cast %736 : vector<1x1x128xf32> to vector<1x128xf32>
    %738 = vector.broadcast %737 : vector<1x128xf32> to vector<32x128xf32>
    %739 = arith.mulf %735, %738 : vector<32x128xf32>
    %c3_761 = arith.constant 3 : index
    %c2_762 = arith.constant 2 : index
    %c0_763 = arith.constant 0 : index
    %740 = vector.load %arg4[%c3_761, %c2_762, %c0_763] : memref<4x8x128xf32, #tpu.memory_space<vmem>>, vector<1x1x128xf32>
    %741 = vector.shape_cast %740 : vector<1x1x128xf32> to vector<1x128xf32>
    %742 = vector.broadcast %741 : vector<1x128xf32> to vector<32x128xf32>
    %743 = arith.addf %739, %742 : vector<32x128xf32>
    %c0_764 = arith.constant 0 : index
    %c0_765 = arith.constant 0 : index
    %744 = vector.load %arg5[%c0_764, %c0_765] : memref<32x128xf32, #tpu.memory_space<vmem>>, vector<32x128xf32>
    %745 = arith.mulf %743, %744 : vector<32x128xf32>
    %746 = vector.shape_cast %745 : vector<32x128xf32> to vector<4x8x128xf32>
    %cst_766 = arith.constant dense<0.000000e+00> : vector<8x128xf32>
    %747 = vector.multi_reduction <add>, %746, %cst_766 [0] : vector<4x8x128xf32> to vector<8x128xf32>
    %cst_767 = arith.constant dense<0.000000e+00> : vector<8xf32>
    %748 = vector.multi_reduction <add>, %747, %cst_767 [1] : vector<8x128xf32> to vector<8xf32>
    %749 = vector.shape_cast %748 : vector<8xf32> to vector<8x1xf32>
    %c0_768 = arith.constant 0 : index
    %c3_769 = arith.constant 3 : index
    %c0_770 = arith.constant 0 : index
    %750 = vector.load %arg4[%c0_768, %c3_769, %c0_770] : memref<4x8x128xf32, #tpu.memory_space<vmem>>, vector<1x1x1xf32>
    %751 = vector.shape_cast %750 : vector<1x1x1xf32> to vector<1x1xf32>
    %752 = vector.broadcast %751 : vector<1x1xf32> to vector<8x1xf32>
    %753 = arith.addf %749, %752 : vector<8x1xf32>
    %754 = math.absf %753 : vector<8x1xf32>
    %cst_771 = arith.constant 0.000000e+00 : f32
    %755 = vector.broadcast %cst_771 : f32 to vector<8x1xf32>
    %756 = arith.subf %755, %754 : vector<8x1xf32>
    %757 = math.exp %756 : vector<8x1xf32>
    %cst_772 = arith.constant 1.000000e+00 : f32
    %758 = vector.broadcast %cst_772 : f32 to vector<8x1xf32>
    %759 = arith.addf %758, %757 : vector<8x1xf32>
    %cst_773 = arith.constant 1.000000e+00 : f32
    %760 = vector.broadcast %cst_773 : f32 to vector<8x1xf32>
    %761 = arith.divf %760, %759 : vector<8x1xf32>
    %cst_774 = arith.constant 0.000000e+00 : f32
    %762 = vector.broadcast %cst_774 : f32 to vector<8x1xf32>
    %763 = arith.cmpf oge, %753, %762 : vector<8x1xf32>
    %cst_775 = arith.constant 1.000000e+00 : f32
    %764 = vector.broadcast %cst_775 : f32 to vector<8x1xf32>
    %765 = arith.subf %764, %761 : vector<8x1xf32>
    %766 = arith.select %763, %761, %765 : vector<8x1xi1>, vector<8x1xf32>
    %767 = vector.shape_cast %766 : vector<8x1xf32> to vector<8x1xf32>
    %768 = vector.broadcast %767 : vector<8x1xf32> to vector<8x128xf32>
    %c0_776 = arith.constant 0 : index
    %c0_777 = arith.constant 0 : index
    %769 = vector.load %arg6[%c0_776, %c0_777] : memref<8x128xf32, #tpu.memory_space<vmem>>, vector<8x128xf32>
    tpu.vector_store %arg6[%c0_776, %c0_777], %768 {strides = array<i32>} : memref<8x128xf32, #tpu.memory_space<vmem>>, vector<8x128xf32>,
    return
  }
  func.func @transform_0(%arg0: i32) -> (i32, i32, i32) {
    %c0_i32 = arith.constant 0 : i32
    %c0_i32_0 = arith.constant 0 : i32
    %c0_i32_1 = arith.constant 0 : i32
    return %arg0, %c0_i32, %c0_i32_0 : i32, i32, i32
  }
  func.func @transform_1(%arg0: i32) -> (i32, i32) {
    %c0_i32 = arith.constant 0 : i32
    %c0_i32_0 = arith.constant 0 : i32
    %c0_i32_1 = arith.constant 0 : i32
    return %c0_i32, %c0_i32_0 : i32, i32
  }
  func.func @transform_2(%arg0: i32) -> (i32, i32, i32, i32) {
    %c0_i32 = arith.constant 0 : i32
    %c0_i32_0 = arith.constant 0 : i32
    %c0_i32_1 = arith.constant 0 : i32
    %c0_i32_2 = arith.constant 0 : i32
    %c0_i32_3 = arith.constant 0 : i32
    return %c0_i32, %c0_i32_0, %c0_i32_1, %c0_i32_2 : i32, i32, i32, i32
  }
  func.func @transform_3(%arg0: i32) -> (i32, i32, i32) {
    %c0_i32 = arith.constant 0 : i32
    %c0_i32_0 = arith.constant 0 : i32
    %c0_i32_1 = arith.constant 0 : i32
    %c0_i32_2 = arith.constant 0 : i32
    return %c0_i32, %c0_i32_0, %c0_i32_1 : i32, i32, i32
  }
  func.func @transform_4(%arg0: i32) -> (i32, i32) {
    %c0_i32 = arith.constant 0 : i32
    %c0_i32_0 = arith.constant 0 : i32
    %c0_i32_1 = arith.constant 0 : i32
    return %c0_i32, %c0_i32_0 : i32, i32
  }
  func.func @transform_5(%arg0: i32) -> (i32, i32) {
    %c0_i32 = arith.constant 0 : i32
    %c0_i32_0 = arith.constant 0 : i32
    return %arg0, %c0_i32 : i32, i32
  }
}

</mosaic_0001>

<bundles_post_ra>
// kernel: discriminator_forward.1
= control target key start
LH: loop header
LB: loop body
LE: loop exit
PB: predicated region body
PF: predicated region fallthrough
CT: control target
= control target key end

     0   :  { %vm155_vm0 = vcmask 130048   ;;  %s24829_s1 = inlined_call_operand.vmem [shape: bf16[128,128], index: 1, kind: input, shape index: {}]   ;;  %s24830_s0 = inlined_call_operand.vmem [shape: bf16[1,2048,16], index: 0, kind: input, shape index: {}]   ;;  %s24831_s2 = inlined_call_operand.vmem [shape: bf16[3,9,128,128], index: 2, kind: input, shape index: {}]   ;;  %s24832_s3 = inlined_call_operand.vmem [shape: f32[4,8,128], index: 3, kind: input, shape index: {}]   ;;  %s24833_s4 = inlined_call_operand.vmem [shape: f32[32,128], index: 4, kind: input, shape index: {}]   ;;  %s24834_s5 = inlined_call_operand.vmem [shape: f32[8,128], index: 5, kind: output, shape index: {}]  }
   0x1   :  { %v20575_v0 = vld [vmem:[%s24829_s1] sm:$0xff]   ;;  %v20580_v1 = vld [vmem:[%s24829_s1 + $0x8] sm:$0xff]   ;;  %v20591_v2 = vld [vmem:[%s24829_s1 + $0x10] sm:$0xff]  }
   0x2   :  { %17145 = vmatprep.subr.bf16.mxu0 %v20575_v0  ;;  %17177 = vmatprep.subr.bf16.mxu1 %v20575_v0  ;;  %v20598_v3 = vld [vmem:[%s24829_s1 + $0x18] sm:$0xff]   ;;  %v19961_v4 = vld [vmem:[%s24830_s0] sm:$0xff]   ;;  %v20626_v7 = vld [vmem:[%s24829_s1 + $0x28] sm:$0xff]  }
   0x3   :  { %17146 = vmatpush3.bf16.msra.mxu0 %v20575_v0  ;;  %17178 = vmatpush3.bf16.msra.mxu1 %v20575_v0  ;;  %v19962_v5 = vld [vmem:[%s24830_s0 + $0x40] sm:$0xff]   ;;  %v20635_v8 = vld [vmem:[%s24829_s1 + $0x30] sm:$0xff]   ;;  %v20644_v9 = vld [vmem:[%s24829_s1 + $0x38] sm:$0xff]  }
   0x4   :  { %17147 = vmatprep.subr.bf16.mxu0 %v20580_v1  ;;  %17179 = vmatprep.subr.bf16.mxu1 %v20580_v1  ;;  %v20616_v6 = vld [vmem:[%s24829_s1 + $0x20] sm:$0xff]   ;;  %v19963_v10 = vld [vmem:[%s24830_s0 + $0x8] sm:$0xff]   ;;  %v19965_v12 = vld [vmem:[%s24830_s0 + $0x10] sm:$0xff]  }
   0x5   :  { %17161 = vmatprep.mubr.msk.bf16.mxu0 %vm155_vm0, %v19961_v4  ;;  %17193 = vmatprep.mubr.msk.bf16.mxu1 %vm155_vm0, %v19962_v5  ;;  %v19964_v11 = vld [vmem:[%s24830_s0 + $0x48] sm:$0xff]   ;;  %v19966_v13 = vld [vmem:[%s24830_s0 + $0x50] sm:$0xff]   ;;  %v19967_v14 = vld [vmem:[%s24830_s0 + $0x18] sm:$0xff]  }
   0x6   :  { %v19968_v15 = vld [vmem:[%s24830_s0 + $0x58] sm:$0xff]   ;;  %v19969_v16 = vld [vmem:[%s24830_s0 + $0x20] sm:$0xff]   ;;  %v19971_v18 = vld [vmem:[%s24830_s0 + $0x28] sm:$0xff]  }
   0x7   :  { %17148 = vmatpush3.bf16.msra.mxu0 %v20580_v1  ;;  %17180 = vmatpush3.bf16.msra.mxu1 %v20580_v1  ;;  %v19970_v17 = vld [vmem:[%s24830_s0 + $0x60] sm:$0xff]   ;;  %v19972_v19 = vld [vmem:[%s24830_s0 + $0x68] sm:$0xff]   ;;  %v19973_v20 = vld [vmem:[%s24830_s0 + $0x30] sm:$0xff]  }
   0x8   :  { %17149 = vmatprep.subr.bf16.mxu0 %v20591_v2  ;;  %17181 = vmatprep.subr.bf16.mxu1 %v20591_v2  ;;  %v19974_v21 = vld [vmem:[%s24830_s0 + $0x70] sm:$0xff]   ;;  %v19975_v22 = vld [vmem:[%s24830_s0 + $0x38] sm:$0xff]   ;;  %v19977_v24 = vld [vmem:[%s24830_s0 + $0x80] sm:$0xff]  }
   0x9   :  { %v19976_v23 = vld [vmem:[%s24830_s0 + $0x78] sm:$0xff]   ;;  %v19978_v25 = vld [vmem:[%s24830_s0 + $0xc0] sm:$0xff]   ;;  %v19979_v26 = vld [vmem:[%s24830_s0 + $0x88] sm:$0xff]  }
   0xa   :  { %v19980_v27 = vld [vmem:[%s24830_s0 + $0xc8] sm:$0xff]   ;;  %v19981_v28 = vld [vmem:[%s24830_s0 + $0x90] sm:$0xff]   ;;  %v19983_v30 = vld [vmem:[%s24830_s0 + $0x98] sm:$0xff]  }
   0xb   :  { %17150 = vmatpush3.bf16.msra.mxu0 %v20591_v2  ;;  %17182 = vmatpush3.bf16.msra.mxu1 %v20591_v2  ;;  %v19982_v29 = vld [vmem:[%s24830_s0 + $0xd0] sm:$0xff]   ;;  %v19984_v31 = vld [vmem:[%s24830_s0 + $0xd8] sm:$0xff]   ;;  %v19985_v32 = vld [vmem:[%s24830_s0 + $0xa0] sm:$0xff]  }
   0xc   :  { %17151 = vmatprep.subr.bf16.mxu0 %v20598_v3  ;;  %17183 = vmatprep.subr.bf16.mxu1 %v20598_v3  ;;  %v19986_v33 = vld [vmem:[%s24830_s0 + $0xe0] sm:$0xff]   ;;  %v19987_v34 = vld [vmem:[%s24830_s0 + $0xa8] sm:$0xff]   ;;  %v19989_v36 = vld [vmem:[%s24830_s0 + $0xb0] sm:$0xff]  }
   0xd   :  { %v19988_v35 = vld [vmem:[%s24830_s0 + $0xe8] sm:$0xff]   ;;  %v19990_v37 = vld [vmem:[%s24830_s0 + $0xf0] sm:$0xff]   ;;  %v19991_v38 = vld [vmem:[%s24830_s0 + $0xb8] sm:$0xff]  }
   0xe   :  { %v19992_v39 = vld [vmem:[%s24830_s0 + $0xf8] sm:$0xff]   ;;  %v19993_v40 = vld [vmem:[%s24830_s0 + $0x100] sm:$0xff]   ;;  %v19995_v42 = vld [vmem:[%s24830_s0 + $0x108] sm:$0xff]  }
   0xf   :  { %17152 = vmatpush3.bf16.msra.mxu0 %v20598_v3  ;;  %17184 = vmatpush3.bf16.msra.mxu1 %v20598_v3  ;;  %v19994_v41 = vld [vmem:[%s24830_s0 + $0x140] sm:$0xff]   ;;  %v19996_v43 = vld [vmem:[%s24830_s0 + $0x148] sm:$0xff]   ;;  %v19997_v44 = vld [vmem:[%s24830_s0 + $0x110] sm:$0xff]  }
  0x10   :  { %17153 = vmatprep.subr.bf16.mxu0 %v20616_v6  ;;  %17185 = vmatprep.subr.bf16.mxu1 %v20616_v6  ;;  %v19998_v45 = vld [vmem:[%s24830_s0 + $0x150] sm:$0xff]   ;;  %v19999_v46 = vld [vmem:[%s24830_s0 + $0x118] sm:$0xff]   ;;  %v20001_v48 = vld [vmem:[%s24830_s0 + $0x120] sm:$0xff]  }
  0x11   :  { %v20000_v47 = vld [vmem:[%s24830_s0 + $0x158] sm:$0xff]   ;;  %v20002_v49 = vld [vmem:[%s24830_s0 + $0x160] sm:$0xff]   ;;  %v20003_v50 = vld [vmem:[%s24830_s0 + $0x128] sm:$0xff]  }
  0x12   :  { %v20004_v51 = vld [vmem:[%s24830_s0 + $0x168] sm:$0xff]   ;;  %v20005_v52 = vld [vmem:[%s24830_s0 + $0x130] sm:$0xff]   ;;  %v20007_v54 = vld [vmem:[%s24830_s0 + $0x138] sm:$0xff]  }
  0x13   :  { %17154 = vmatpush3.bf16.msra.mxu0 %v20616_v6  ;;  %17186 = vmatpush3.bf16.msra.mxu1 %v20616_v6  ;;  %v20006_v53 = vld [vmem:[%s24830_s0 + $0x170] sm:$0xff]   ;;  %v20008_v55 = vld [vmem:[%s24830_s0 + $0x178] sm:$0xff]   ;;  %v20009_v56 = vld [vmem:[%s24830_s0 + $0x180] sm:$0xff]  }
  0x14   :  { %17155 = vmatprep.subr.bf16.mxu0 %v20626_v7  ;;  %17187 = vmatprep.subr.bf16.mxu1 %v20626_v7  ;;  %v20017_v57 = vld [vmem:[%s24830_s0 + $0x1c0] sm:$0xff]   ;;  %v20010_v58 = vld [vmem:[%s24830_s0 + $0x188] sm:$0xff]   ;;  %v20011_v59 = vld [vmem:[%s24830_s0 + $0x190] sm:$0xff]  }
  0x15   :  { %v20950_v60 = vld [vmem:[%s24829_s1] sm:$0xff]   ;;  %v20957_v61 = vld [vmem:[%s24829_s1 + $0x8] sm:$0xff]   ;;  %v20012_v62 = vld [vmem:[%s24830_s0 + $0x198] sm:$0xff]  }
  0x16   :  { %v20018_v63 = vld [vmem:[%s24830_s0 + $0x1c8] sm:$0xff]   ;;  %v20022_v5 = vld [vmem:[%s24830_s0 + $0x1d8] sm:$0xff]  }
  0x17   :  { %17156 = vmatpush3.bf16.msra.mxu0 %v20626_v7  ;;  %17188 = vmatpush3.bf16.msra.mxu1 %v20626_v7  ;;  %v20014_v4 = vld [vmem:[%s24830_s0 + $0x1a8] sm:$0xff]  }
  0x18   :  { %17157 = vmatprep.subr.bf16.mxu0 %v20635_v8  ;;  %17189 = vmatprep.subr.bf16.mxu1 %v20635_v8 }
  0x1b   :  { %17158 = vmatpush3.bf16.msra.mxu0 %v20635_v8  ;;  %17190 = vmatpush3.bf16.msra.mxu1 %v20635_v8 }
  0x1c   :  { %17159 = vmatprep.subr.bf16.mxu0 %v20644_v9  ;;  %17191 = vmatprep.subr.bf16.mxu1 %v20644_v9 }
  0x1f   :  { %17160 = vmatpush3.bf16.msra.mxu0 %v20644_v9  ;;  %17192 = vmatpush3.bf16.msra.mxu1 %v20644_v9 }
  0x20   :  { %17209 = vmatprep.subr.bf16.mxu0 %v20575_v0  ;;  %17241 = vmatprep.subr.bf16.mxu1 %v20575_v0 }
  0x22   :  { %17162 = vmatmul.mubr.msk.bf16.vlgmr.msra.gmra.mrb[0].mxu0 %vm155_vm0, %v19963_v10  ;;  %17194 = vmatmul.mubr.msk.bf16.vlgmr.msra.gmra.mrb[0].mxu1 %vm155_vm0, %v19964_v11  ;;  %v20016_v10 = vld [vmem:[%s24830_s0 + $0x1b8] sm:$0xff]   ;;  %v20026_v11 = vld [vmem:[%s24830_s0 + $0x1e8] sm:$0xff]  }
  0x23   :  { %17210 = vmatpush3.bf16.msra.mxu0 %v20575_v0  ;;  %17242 = vmatpush3.bf16.msra.mxu1 %v20575_v0 }
  0x24   :  { %17211 = vmatprep.subr.bf16.mxu0 %v20580_v1  ;;  %17243 = vmatprep.subr.bf16.mxu1 %v20580_v1 }
  0x25   :  { %17165 = vmatprep.mubr.msk.bf16.mxu0 %vm155_vm0, %v19965_v12  ;;  %17197 = vmatprep.mubr.msk.bf16.mxu1 %vm155_vm0, %v19966_v13  ;;  %v20029_v12 = vld [vmem:[%s24830_s0 + $0x1f0] sm:$0xff]   ;;  %v20019_v13 = vld [vmem:[%s24830_s0 + $0x200] sm:$0xff]  }
  0x27   :  { %17212 = vmatpush3.bf16.msra.mxu0 %v20580_v1  ;;  %17244 = vmatpush3.bf16.msra.mxu1 %v20580_v1 }
  0x28   :  { %17213 = vmatprep.subr.bf16.mxu0 %v20591_v2  ;;  %17245 = vmatprep.subr.bf16.mxu1 %v20591_v2 }
  0x2a   :  { %17166 = vmatmul.mubr.msk.bf16.gmra.mrb[4].mxu0 %vm155_vm0, %v19967_v14  ;;  %17198 = vmatmul.mubr.msk.bf16.gmra.mrb[4].mxu1 %vm155_vm0, %v19968_v15  ;;  %v21046_v14 = vld [vmem:[%s24829_s1 + $0x30] sm:$0xff]   ;;  %v21059_v15 = vld [vmem:[%s24829_s1 + $0x38] sm:$0xff]  }
  0x2b   :  { %17214 = vmatpush3.bf16.msra.mxu0 %v20591_v2  ;;  %17246 = vmatpush3.bf16.msra.mxu1 %v20591_v2 }
  0x2c   :  { %17215 = vmatprep.subr.bf16.mxu0 %v20598_v3  ;;  %17247 = vmatprep.subr.bf16.mxu1 %v20598_v3 }
  0x2d   :  { %17169 = vmatprep.mubr.msk.bf16.mxu0 %vm155_vm0, %v19969_v16  ;;  %17201 = vmatprep.mubr.msk.bf16.mxu1 %vm155_vm0, %v19970_v17  ;;  %v20020_v16 = vld [vmem:[%s24830_s0 + $0x208] sm:$0xff]   ;;  %v20030_v17 = vld [vmem:[%s24830_s0 + $0x1f8] sm:$0xff]  }
  0x2f   :  { %17216 = vmatpush3.bf16.msra.mxu0 %v20598_v3  ;;  %17248 = vmatpush3.bf16.msra.mxu1 %v20598_v3 }
  0x30   :  { %17217 = vmatprep.subr.bf16.mxu0 %v20616_v6  ;;  %17249 = vmatprep.subr.bf16.mxu1 %v20616_v6 }
  0x32   :  { %17170 = vmatmul.mubr.msk.bf16.gmra.mrb[8].mxu0 %vm155_vm0, %v19971_v18  ;;  %17202 = vmatmul.mubr.msk.bf16.gmra.mrb[8].mxu1 %vm155_vm0, %v19972_v19  ;;  %v20023_v18 = vld [vmem:[%s24830_s0 + $0x210] sm:$0xff]   ;;  %v20033_v19 = vld [vmem:[%s24830_s0 + $0x240] sm:$0xff]  }
  0x33   :  { %17218 = vmatpush3.bf16.msra.mxu0 %v20616_v6  ;;  %17250 = vmatpush3.bf16.msra.mxu1 %v20616_v6 }
  0x34   :  { %17219 = vmatprep.subr.bf16.mxu0 %v20626_v7  ;;  %17251 = vmatprep.subr.bf16.mxu1 %v20626_v7 }
  0x35   :  { %17173 = vmatprep.mubr.msk.bf16.mxu0 %vm155_vm0, %v19973_v20  ;;  %17205 = vmatprep.mubr.msk.bf16.mxu1 %vm155_vm0, %v19974_v21  ;;  %v20024_v20 = vld [vmem:[%s24830_s0 + $0x218] sm:$0xff]   ;;  %v20034_v21 = vld [vmem:[%s24830_s0 + $0x248] sm:$0xff]  }
  0x37   :  { %17220 = vmatpush3.bf16.msra.mxu0 %v20626_v7  ;;  %17252 = vmatpush3.bf16.msra.mxu1 %v20626_v7 }
  0x38   :  { %17221 = vmatprep.subr.bf16.mxu0 %v20635_v8  ;;  %17253 = vmatprep.subr.bf16.mxu1 %v20635_v8 }
  0x3a   :  { %17174 = vmatmul.mubr.msk.bf16.gmra.mrb[12].mxu0 %vm155_vm0, %v19975_v22  ;;  %17206 = vmatmul.mubr.msk.bf16.gmra.mrb[12].mxu1 %vm155_vm0, %v19976_v23  ;;  %v20027_v22 = vld [vmem:[%s24830_s0 + $0x220] sm:$0xff]   ;;  %v20037_v23 = vld [vmem:[%s24830_s0 + $0x250] sm:$0xff]  }
  0x3b   :  { %17222 = vmatpush3.bf16.msra.mxu0 %v20635_v8  ;;  %17254 = vmatpush3.bf16.msra.mxu1 %v20635_v8 }
  0x3c   :  { %17223 = vmatprep.subr.bf16.mxu0 %v20644_v9  ;;  %17255 = vmatprep.subr.bf16.mxu1 %v20644_v9 }
  0x3d   :  { %17225 = vmatprep.mubr.msk.bf16.mxu0 %vm155_vm0, %v19977_v24  ;;  %17257 = vmatprep.mubr.msk.bf16.mxu1 %vm155_vm0, %v19978_v25  ;;  %v20028_v24 = vld [vmem:[%s24830_s0 + $0x228] sm:$0xff]   ;;  %v20038_v25 = vld [vmem:[%s24830_s0 + $0x258] sm:$0xff]  }
  0x3f   :  { %17224 = vmatpush3.bf16.msra.mxu0 %v20644_v9  ;;  %17256 = vmatpush3.bf16.msra.mxu1 %v20644_v9 }
  0x40   :  { %17273 = vmatprep.subr.bf16.mxu0 %v20575_v0  ;;  %17305 = vmatprep.subr.bf16.mxu1 %v20575_v0 }
  0x42   :  { %17226 = vmatmul.mubr.msk.bf16.vlgmr.msra.gmra.mrb[16].mxu0 %vm155_vm0, %v19979_v26  ;;  %17258 = vmatmul.mubr.msk.bf16.vlgmr.msra.gmra.mrb[16].mxu1 %vm155_vm0, %v19980_v27  ;;  %v20031_v26 = vld [vmem:[%s24830_s0 + $0x230] sm:$0xff]   ;;  %v20041_v27 = vld [vmem:[%s24830_s0 + $0x260] sm:$0xff]  }
  0x43   :  { %17274 = vmatpush3.bf16.msra.mxu0 %v20575_v0  ;;  %17306 = vmatpush3.bf16.msra.mxu1 %v20575_v0 }
  0x44   :  { %17275 = vmatprep.subr.bf16.mxu0 %v20580_v1  ;;  %17307 = vmatprep.subr.bf16.mxu1 %v20580_v1 }
  0x45   :  { %17229 = vmatprep.mubr.msk.bf16.mxu0 %vm155_vm0, %v19981_v28  ;;  %17261 = vmatprep.mubr.msk.bf16.mxu1 %vm155_vm0, %v19982_v29  ;;  %v20032_v28 = vld [vmem:[%s24830_s0 + $0x238] sm:$0xff]   ;;  %v20042_v29 = vld [vmem:[%s24830_s0 + $0x268] sm:$0xff]  }
  0x47   :  { %17276 = vmatpush3.bf16.msra.mxu0 %v20580_v1  ;;  %17308 = vmatpush3.bf16.msra.mxu1 %v20580_v1 }
  0x48   :  { %17277 = vmatprep.subr.bf16.mxu0 %v20591_v2  ;;  %17309 = vmatprep.subr.bf16.mxu1 %v20591_v2 }
  0x4a   :  { %17230 = vmatmul.mubr.msk.bf16.gmra.mrb[20].mxu0 %vm155_vm0, %v19983_v30  ;;  %17262 = vmatmul.mubr.msk.bf16.gmra.mrb[20].mxu1 %vm155_vm0, %v19984_v31  ;;  %v20035_v30 = vld [vmem:[%s24830_s0 + $0x280] sm:$0xff]   ;;  %v20045_v31 = vld [vmem:[%s24830_s0 + $0x270] sm:$0xff]  }
  0x4b   :  { %17278 = vmatpush3.bf16.msra.mxu0 %v20591_v2  ;;  %17310 = vmatpush3.bf16.msra.mxu1 %v20591_v2 }
  0x4c   :  { %17279 = vmatprep.subr.bf16.mxu0 %v20598_v3  ;;  %17311 = vmatprep.subr.bf16.mxu1 %v20598_v3 }
  0x4d   :  { %17233 = vmatprep.mubr.msk.bf16.mxu0 %vm155_vm0, %v19985_v32  ;;  %17265 = vmatprep.mubr.msk.bf16.mxu1 %vm155_vm0, %v19986_v33  ;;  %v20036_v32 = vld [vmem:[%s24830_s0 + $0x288] sm:$0xff]   ;;  %v20046_v33 = vld [vmem:[%s24830_s0 + $0x278] sm:$0xff]  }
  0x4f   :  { %17280 = vmatpush3.bf16.msra.mxu0 %v20598_v3  ;;  %17312 = vmatpush3.bf16.msra.mxu1 %v20598_v3 }
  0x50   :  { %17281 = vmatprep.subr.bf16.mxu0 %v20616_v6  ;;  %17313 = vmatprep.subr.bf16.mxu1 %v20616_v6 }
  0x52   :  { %17234 = vmatmul.mubr.msk.bf16.gmra.mrb[24].mxu0 %vm155_vm0, %v19987_v34  ;;  %17266 = vmatmul.mubr.msk.bf16.gmra.mrb[24].mxu1 %vm155_vm0, %v19988_v35  ;;  %v20039_v34 = vld [vmem:[%s24830_s0 + $0x290] sm:$0xff]   ;;  %v20049_v35 = vld [vmem:[%s24830_s0 + $0x2c0] sm:$0xff]  }
  0x53   :  { %17282 = vmatpush3.bf16.msra.mxu0 %v20616_v6  ;;  %17314 = vmatpush3.bf16.msra.mxu1 %v20616_v6 }
  0x54   :  { %17283 = vmatprep.subr.bf16.mxu0 %v20626_v7  ;;  %17315 = vmatprep.subr.bf16.mxu1 %v20626_v7 }
  0x55   :  { %17237 = vmatprep.mubr.msk.bf16.mxu0 %vm155_vm0, %v19989_v36  ;;  %17269 = vmatprep.mubr.msk.bf16.mxu1 %vm155_vm0, %v19990_v37  ;;  %v20040_v36 = vld [vmem:[%s24830_s0 + $0x298] sm:$0xff]   ;;  %v20050_v37 = vld [vmem:[%s24830_s0 + $0x2c8] sm:$0xff]  }
  0x57   :  { %17284 = vmatpush3.bf16.msra.mxu0 %v20626_v7  ;;  %17316 = vmatpush3.bf16.msra.mxu1 %v20626_v7 }
  0x58   :  { %17285 = vmatprep.subr.bf16.mxu0 %v20635_v8  ;;  %17317 = vmatprep.subr.bf16.mxu1 %v20635_v8 }
  0x5a   :  { %17238 = vmatmul.mubr.msk.bf16.gmra.mrb[28].mxu0 %vm155_vm0, %v19991_v38  ;;  %17270 = vmatmul.mubr.msk.bf16.gmra.mrb[28].mxu1 %vm155_vm0, %v19992_v39  ;;  %v20043_v38 = vld [vmem:[%s24830_s0 + $0x2a0] sm:$0xff]   ;;  %v20053_v39 = vld [vmem:[%s24830_s0 + $0x2d0] sm:$0xff]  }
  0x5b   :  { %17286 = vmatpush3.bf16.msra.mxu0 %v20635_v8  ;;  %17318 = vmatpush3.bf16.msra.mxu1 %v20635_v8 }
  0x5c   :  { %17287 = vmatprep.subr.bf16.mxu0 %v20644_v9  ;;  %17319 = vmatprep.subr.bf16.mxu1 %v20644_v9 }
  0x5d   :  { %17289 = vmatprep.mubr.msk.bf16.mxu0 %vm155_vm0, %v19993_v40  ;;  %17321 = vmatprep.mubr.msk.bf16.mxu1 %vm155_vm0, %v19994_v41  ;;  %v20044_v40 = vld [vmem:[%s24830_s0 + $0x2a8] sm:$0xff]   ;;  %v20054_v41 = vld [vmem:[%s24830_s0 + $0x2d8] sm:$0xff]  }
  0x5f   :  { %17288 = vmatpush3.bf16.msra.mxu0 %v20644_v9  ;;  %17320 = vmatpush3.bf16.msra.mxu1 %v20644_v9 }
  0x60   :  { %17337 = vmatprep.subr.bf16.mxu0 %v20575_v0  ;;  %17369 = vmatprep.subr.bf16.mxu1 %v20575_v0 }
  0x62   :  { %17290 = vmatmul.mubr.msk.bf16.vlgmr.msra.gmra.mrb[32].mxu0 %vm155_vm0, %v19995_v42  ;;  %17322 = vmatmul.mubr.msk.bf16.vlgmr.msra.gmra.mrb[32].mxu1 %vm155_vm0, %v19996_v43  ;;  %v20047_v42 = vld [vmem:[%s24830_s0 + $0x2b0] sm:$0xff]   ;;  %v20057_v43 = vld [vmem:[%s24830_s0 + $0x2e0] sm:$0xff]  }
  0x63   :  { %17338 = vmatpush3.bf16.msra.mxu0 %v20575_v0  ;;  %17293 = vmatprep.mubr.msk.bf16.mxu0 %vm155_vm0, %v19997_v44  ;;  %v20048_v44 = vld [vmem:[%s24830_s0 + $0x2b8] sm:$0xff]  }
  0x64   :  { %17339 = vmatprep.subr.bf16.mxu0 %v20580_v1  ;;  %17325 = vmatprep.mubr.msk.bf16.mxu1 %vm155_vm0, %v19998_v45  ;;  %v20058_v45 = vld [vmem:[%s24830_s0 + $0x2e8] sm:$0xff]  }
  0x65   :  { %17370 = vmatpush3.bf16.msra.mxu1 %v20575_v0 }
  0x66   :  { %17371 = vmatprep.subr.bf16.mxu1 %v20580_v1 }
  0x67   :  { %17340 = vmatpush3.bf16.msra.mxu0 %v20580_v1 }
  0x68   :  { %17341 = vmatprep.subr.bf16.mxu0 %v20591_v2 }
  0x69   :  { %17372 = vmatpush3.bf16.msra.mxu1 %v20580_v1  ;;  %v20013_v1 = vld [vmem:[%s24830_s0 + $0x1a0] sm:$0xff]  }
  0x6a   :  { %17294 = vmatmul.mubr.msk.bf16.gmra.mrb[36].mxu0 %vm155_vm0, %v19999_v46  ;;  %17326 = vmatmul.mubr.msk.bf16.gmra.mrb[36].mxu1 %vm155_vm0, %v20000_v47  ;;  %v20051_v46 = vld [vmem:[%s24830_s0 + $0x300] sm:$0xff]   ;;  %v20061_v47 = vld [vmem:[%s24830_s0 + $0x2f0] sm:$0xff]  }
  0x6b   :  { %17342 = vmatpush3.bf16.msra.mxu0 %v20591_v2  ;;  %17297 = vmatprep.mubr.msk.bf16.mxu0 %vm155_vm0, %v20001_v48  ;;  %v20052_v48 = vld [vmem:[%s24830_s0 + $0x308] sm:$0xff]  }
  0x6c   :  { %17343 = vmatprep.subr.bf16.mxu0 %v20598_v3  ;;  %17329 = vmatprep.mubr.msk.bf16.mxu1 %vm155_vm0, %v20002_v49  ;;  %v20062_v49 = vld [vmem:[%s24830_s0 + $0x2f8] sm:$0xff]  }
  0x6d   :  { %17373 = vmatprep.subr.bf16.mxu1 %v20591_v2 }
  0x6e   :  { %17374 = vmatpush3.bf16.msra.mxu1 %v20591_v2  ;;  %v20978_v2 = vld [vmem:[%s24829_s1 + $0x10] sm:$0xff]  }
  0x6f   :  { %17344 = vmatpush3.bf16.msra.mxu0 %v20598_v3  ;;  %17375 = vmatprep.subr.bf16.mxu1 %v20598_v3 }
  0x70   :  { %17345 = vmatprep.subr.bf16.mxu0 %v20616_v6 }
  0x72   :  { %17298 = vmatmul.mubr.msk.bf16.gmra.mrb[40].mxu0 %vm155_vm0, %v20003_v50  ;;  %17330 = vmatmul.mubr.msk.bf16.gmra.mrb[40].mxu1 %vm155_vm0, %v20004_v51  ;;  %v20055_v50 = vld [vmem:[%s24830_s0 + $0x310] sm:$0xff]   ;;  %v20065_v51 = vld [vmem:[%s24830_s0 + $0x340] sm:$0xff]  }
  0x73   :  { %17346 = vmatpush3.bf16.msra.mxu0 %v20616_v6  ;;  %17301 = vmatprep.mubr.msk.bf16.mxu0 %vm155_vm0, %v20005_v52  ;;  %v20056_v52 = vld [vmem:[%s24830_s0 + $0x318] sm:$0xff]  }
  0x74   :  { %17347 = vmatprep.subr.bf16.mxu0 %v20626_v7  ;;  %17333 = vmatprep.mubr.msk.bf16.mxu1 %vm155_vm0, %v20006_v53  ;;  %v20066_v53 = vld [vmem:[%s24830_s0 + $0x348] sm:$0xff]  }
  0x75   :  { %17376 = vmatpush3.bf16.msra.mxu1 %v20598_v3  ;;  %v20991_v3 = vld [vmem:[%s24829_s1 + $0x18] sm:$0xff]  }
  0x76   :  { %17377 = vmatprep.subr.bf16.mxu1 %v20616_v6 }
  0x77   :  { %17348 = vmatpush3.bf16.msra.mxu0 %v20626_v7 }
  0x78   :  { %17349 = vmatprep.subr.bf16.mxu0 %v20635_v8 }
  0x79   :  { %17378 = vmatpush3.bf16.msra.mxu1 %v20616_v6  ;;  %v20025_v6 = vld [vmem:[%s24830_s0 + $0x1e0] sm:$0xff]  }
  0x7a   :  { %17302 = vmatmul.mubr.msk.bf16.gmra.mrb[44].mxu0 %vm155_vm0, %v20007_v54  ;;  %17334 = vmatmul.mubr.msk.bf16.gmra.mrb[44].mxu1 %vm155_vm0, %v20008_v55  ;;  %v20059_v54 = vld [vmem:[%s24830_s0 + $0x320] sm:$0xff]   ;;  %v20070_v55 = vld [vmem:[%s24830_s0 + $0x350] sm:$0xff]  }
  0x7b   :  { %17350 = vmatpush3.bf16.msra.mxu0 %v20635_v8  ;;  %17353 = vmatprep.mubr.msk.bf16.mxu0 %vm155_vm0, %v20009_v56  ;;  %v20060_v56 = vld [vmem:[%s24830_s0 + $0x328] sm:$0xff]  }
  0x7c   :  { %17351 = vmatprep.subr.bf16.mxu0 %v20644_v9  ;;  %17379 = vmatprep.subr.bf16.mxu1 %v20626_v7 }
  0x7d   :  { %17380 = vmatpush3.bf16.msra.mxu1 %v20626_v7  ;;  %17385 = vmatprep.mubr.msk.bf16.mxu1 %vm155_vm0, %v20017_v57  ;;  %v20015_v7 = vld [vmem:[%s24830_s0 + $0x1b0] sm:$0xff]   ;;  %v20072_v57 = vld [vmem:[%s24830_s0 + $0x358] sm:$0xff]  }
  0x7e   :  { %17381 = vmatprep.subr.bf16.mxu1 %v20635_v8 }
  0x7f   :  { %17352 = vmatpush3.bf16.msra.mxu0 %v20644_v9 }
  0x80   :  { %17401 = vmatprep.subr.bf16.mxu0 %v20575_v0  ;;  %v20021_v0 = vld [vmem:[%s24830_s0 + $0x1d0] sm:$0xff]  }
  0x81   :  { %17382 = vmatpush3.bf16.msra.mxu1 %v20635_v8  ;;  %v21012_v8 = vld [vmem:[%s24829_s1 + $0x20] sm:$0xff]  }
  0x82   :  { %17354 = vmatmul.mubr.msk.bf16.vlgmr.msra.gmra.mrb[48].mxu0 %vm155_vm0, %v20010_v58  ;;  %17383 = vmatprep.subr.bf16.mxu1 %v20644_v9  ;;  %v20063_v58 = vld [vmem:[%s24830_s0 + $0x330] sm:$0xff]  }
  0x83   :  { %17402 = vmatpush3.bf16.msra.mxu0 %v20950_v60  ;;  %17357 = vmatprep.mubr.msk.bf16.mxu0 %vm155_vm0, %v20011_v59  ;;  %v20076_v59 = vld [vmem:[%s24830_s0 + $0x360] sm:$0xff]  }
  0x84   :  { %17403 = vmatprep.subr.bf16.mxu0 %v20957_v61 }
  0x85   :  { %17384 = vmatpush3.bf16.msra.mxu1 %v20644_v9  ;;  %v21025_v9 = vld [vmem:[%s24829_s1 + $0x28] sm:$0xff]  }
  0x86   :  { %17433 = vmatprep.subr.bf16.mxu1 %v20950_v60 }
  0x87   :  { %17404 = vmatpush3.bf16.msra.mxu0 %v20957_v61 }
  0x88   :  { %17405 = vmatprep.subr.bf16.mxu0 %v20978_v2  ;;  %17386 = vmatmul.mubr.msk.bf16.vlgmr.msra.gmra.mrb[48].mxu1 %vm155_vm0, %v20018_v63 }
  0x89   :  { %17434 = vmatpush3.bf16.msra.mxu1 %v20950_v60  ;;  %17389 = vmatprep.mubr.msk.bf16.mxu1 %vm155_vm0, %v20021_v0  ;;  %v20067_v0 = vld [vmem:[%s24830_s0 + $0x380] sm:$0xff]  }
  0x8a   :  { %17358 = vmatmul.mubr.msk.bf16.gmra.mrb[52].mxu0 %vm155_vm0, %v20012_v62  ;;  %17435 = vmatprep.subr.bf16.mxu1 %v20957_v61  ;;  %v20078_v62 = vld [vmem:[%s24830_s0 + $0x368] sm:$0xff]  }
  0x8b   :  { %17406 = vmatpush3.bf16.msra.mxu0 %v20978_v2  ;;  %17361 = vmatprep.mubr.msk.bf16.mxu0 %vm155_vm0, %v20013_v1 }
  0x8c   :  { %17407 = vmatprep.subr.bf16.mxu0 %v20991_v3 }
  0x8d   :  { %17436 = vmatpush3.bf16.msra.mxu1 %v20957_v61 }
  0x8e   :  { %17437 = vmatprep.subr.bf16.mxu1 %v20978_v2 }
  0x8f   :  { %17408 = vmatpush3.bf16.msra.mxu0 %v20991_v3 }
  0x90   :  { %17409 = vmatprep.subr.bf16.mxu0 %v21012_v8  ;;  %17390 = vmatmul.mubr.msk.bf16.gmra.mrb[52].mxu1 %vm155_vm0, %v20022_v5 }
  0x91   :  { %17438 = vmatpush3.bf16.msra.mxu1 %v20978_v2  ;;  %17393 = vmatprep.mubr.msk.bf16.mxu1 %vm155_vm0, %v20025_v6 }
  0x92   :  { %17362 = vmatmul.mubr.msk.bf16.gmra.mrb[56].mxu0 %vm155_vm0, %v20014_v4  ;;  %17439 = vmatprep.subr.bf16.mxu1 %v20991_v3 }
  0x93   :  { %17410 = vmatpush3.bf16.msra.mxu0 %v21012_v8  ;;  %17365 = vmatprep.mubr.msk.bf16.mxu0 %vm155_vm0, %v20015_v7 }
  0x94   :  { %17411 = vmatprep.subr.bf16.mxu0 %v21025_v9 }
  0x95   :  { %17440 = vmatpush3.bf16.msra.mxu1 %v20991_v3 }
  0x96   :  { %17441 = vmatprep.subr.bf16.mxu1 %v21012_v8 }
  0x97   :  { %17412 = vmatpush3.bf16.msra.mxu0 %v21025_v9 }
  0x98   :  { %17413 = vmatprep.subr.bf16.mxu0 %v21046_v14  ;;  %17394 = vmatmul.mubr.msk.bf16.gmra.mrb[56].mxu1 %vm155_vm0, %v20026_v11 }
  0x99   :  { %17442 = vmatpush3.bf16.msra.mxu1 %v21012_v8  ;;  %17397 = vmatprep.mubr.msk.bf16.mxu1 %vm155_vm0, %v20029_v12 }
  0x9a   :  { %17366 = vmatmul.mubr.msk.bf16.gmra.mrb[60].mxu0 %vm155_vm0, %v20016_v10  ;;  %17443 = vmatprep.subr.bf16.mxu1 %v21025_v9 }
  0x9b   :  { %17414 = vmatpush3.bf16.msra.mxu0 %v21046_v14  ;;  %17417 = vmatprep.mubr.msk.bf16.mxu0 %vm155_vm0, %v20019_v13 }
  0x9c   :  { %17415 = vmatprep.subr.bf16.mxu0 %v21059_v15 }
  0x9d   :  { %17444 = vmatpush3.bf16.msra.mxu1 %v21025_v9 }
  0x9e   :  { %17445 = vmatprep.subr.bf16.mxu1 %v21046_v14 }
  0x9f   :  { %17416 = vmatpush3.bf16.msra.mxu0 %v21059_v15 }
  0xa0   :  { %17465 = vmatprep.subr.bf16.mxu0 %v20950_v60  ;;  %17398 = vmatmul.mubr.msk.bf16.gmra.mrb[60].mxu1 %vm155_vm0, %v20030_v17 }
  0xa1   :  { %17446 = vmatpush3.bf16.msra.mxu1 %v21046_v14  ;;  %17449 = vmatprep.mubr.msk.bf16.mxu1 %vm155_vm0, %v20033_v19 }
  0xa2   :  { %17418 = vmatmul.mubr.msk.bf16.vlgmr.msra.gmra.mrb[64].mxu0 %vm155_vm0, %v20020_v16  ;;  %17447 = vmatprep.subr.bf16.mxu1 %v21059_v15 }
  0xa3   :  { %17466 = vmatpush3.bf16.msra.mxu0 %v20950_v60  ;;  %17421 = vmatprep.mubr.msk.bf16.mxu0 %vm155_vm0, %v20023_v18 }
  0xa4   :  { %17467 = vmatprep.subr.bf16.mxu0 %v20957_v61 }
  0xa5   :  { %17448 = vmatpush3.bf16.msra.mxu1 %v21059_v15 }
  0xa6   :  { %17497 = vmatprep.subr.bf16.mxu1 %v20950_v60 }
  0xa7   :  { %17468 = vmatpush3.bf16.msra.mxu0 %v20957_v61 }
  0xa8   :  { %17469 = vmatprep.subr.bf16.mxu0 %v20978_v2  ;;  %17450 = vmatmul.mubr.msk.bf16.vlgmr.msra.gmra.mrb[64].mxu1 %vm155_vm0, %v20034_v21 }
  0xa9   :  { %17498 = vmatpush3.bf16.msra.mxu1 %v20950_v60  ;;  %17453 = vmatprep.mubr.msk.bf16.mxu1 %vm155_vm0, %v20037_v23 }
  0xaa   :  { %17422 = vmatmul.mubr.msk.bf16.gmra.mrb[68].mxu0 %vm155_vm0, %v20024_v20  ;;  %17499 = vmatprep.subr.bf16.mxu1 %v20957_v61 }
  0xab   :  { %17470 = vmatpush3.bf16.msra.mxu0 %v20978_v2  ;;  %17425 = vmatprep.mubr.msk.bf16.mxu0 %vm155_vm0, %v20027_v22 }
  0xac   :  { %17471 = vmatprep.subr.bf16.mxu0 %v20991_v3 }
  0xad   :  { %17500 = vmatpush3.bf16.msra.mxu1 %v20957_v61 }
  0xae   :  { %17501 = vmatprep.subr.bf16.mxu1 %v20978_v2 }
  0xaf   :  { %17472 = vmatpush3.bf16.msra.mxu0 %v20991_v3 }
  0xb0   :  { %17473 = vmatprep.subr.bf16.mxu0 %v21012_v8  ;;  %17454 = vmatmul.mubr.msk.bf16.gmra.mrb[68].mxu1 %vm155_vm0, %v20038_v25 }
  0xb1   :  { %17502 = vmatpush3.bf16.msra.mxu1 %v20978_v2  ;;  %17457 = vmatprep.mubr.msk.bf16.mxu1 %vm155_vm0, %v20041_v27  ;;  %v20069_v27 = vld [vmem:[%s24831_s2 + $0x40] sm:$0xff]  }
  0xb2   :  { %17426 = vmatmul.mubr.msk.bf16.gmra.mrb[72].mxu0 %vm155_vm0, %v20028_v24  ;;  %17503 = vmatprep.subr.bf16.mxu1 %v20991_v3 }
  0xb3   :  { %17474 = vmatpush3.bf16.msra.mxu0 %v21012_v8  ;;  %17429 = vmatprep.mubr.msk.bf16.mxu0 %vm155_vm0, %v20031_v26 }
  0xb4   :  { %17475 = vmatprep.subr.bf16.mxu0 %v21025_v9 }
  0xb5   :  { %17504 = vmatpush3.bf16.msra.mxu1 %v20991_v3 }
  0xb6   :  { %17505 = vmatprep.subr.bf16.mxu1 %v21012_v8 }
  0xb7   :  { %17476 = vmatpush3.bf16.msra.mxu0 %v21025_v9 }
  0xb8   :  { %17477 = vmatprep.subr.bf16.mxu0 %v21046_v14  ;;  %17458 = vmatmul.mubr.msk.bf16.gmra.mrb[72].mxu1 %vm155_vm0, %v20042_v29 }
  0xb9   :  { %17506 = vmatpush3.bf16.msra.mxu1 %v21012_v8  ;;  %17461 = vmatprep.mubr.msk.bf16.mxu1 %vm155_vm0, %v20045_v31 }
  0xba   :  { %17430 = vmatmul.mubr.msk.bf16.gmra.mrb[76].mxu0 %vm155_vm0, %v20032_v28  ;;  %17507 = vmatprep.subr.bf16.mxu1 %v21025_v9 }
  0xbb   :  { %17478 = vmatpush3.bf16.msra.mxu0 %v21046_v14  ;;  %17481 = vmatprep.mubr.msk.bf16.mxu0 %vm155_vm0, %v20035_v30 }
  0xbc   :  { %17479 = vmatprep.subr.bf16.mxu0 %v21059_v15 }
  0xbd   :  { %17508 = vmatpush3.bf16.msra.mxu1 %v21025_v9 }
  0xbe   :  { %17509 = vmatprep.subr.bf16.mxu1 %v21046_v14 }
  0xbf   :  { %17480 = vmatpush3.bf16.msra.mxu0 %v21059_v15 }
  0xc0   :  { %17529 = vmatprep.subr.bf16.mxu0 %v20950_v60  ;;  %17462 = vmatmul.mubr.msk.bf16.gmra.mrb[76].mxu1 %vm155_vm0, %v20046_v33 }
  0xc1   :  { %17510 = vmatpush3.bf16.msra.mxu1 %v21046_v14  ;;  %17513 = vmatprep.mubr.msk.bf16.mxu1 %vm155_vm0, %v20049_v35 }
  0xc2   :  { %17482 = vmatmul.mubr.msk.bf16.vlgmr.msra.gmra.mrb[80].mxu0 %vm155_vm0, %v20036_v32  ;;  %17511 = vmatprep.subr.bf16.mxu1 %v21059_v15 }
  0xc3   :  { %17530 = vmatpush3.bf16.msra.mxu0 %v20950_v60  ;;  %17485 = vmatprep.mubr.msk.bf16.mxu0 %vm155_vm0, %v20039_v34  ;;  %v20068_v34 = vld [vmem:[%s24830_s0 + $0x388] sm:$0xff]  }
  0xc4   :  { %17531 = vmatprep.subr.bf16.mxu0 %v20957_v61 }
  0xc5   :  { %17512 = vmatpush3.bf16.msra.mxu1 %v21059_v15 }
  0xc6   :  { %17561 = vmatprep.subr.bf16.mxu1 %v20950_v60 }
  0xc7   :  { %17532 = vmatpush3.bf16.msra.mxu0 %v20957_v61 }
  0xc8   :  { %17533 = vmatprep.subr.bf16.mxu0 %v20978_v2  ;;  %17514 = vmatmul.mubr.msk.bf16.vlgmr.msra.gmra.mrb[80].mxu1 %vm155_vm0, %v20050_v37  ;;  %v20073_v37 = vld [vmem:[%s24830_s0 + $0x390] sm:$0xff]  }
  0xc9   :  { %17562 = vmatpush3.bf16.msra.mxu1 %v20950_v60  ;;  %17517 = vmatprep.mubr.msk.bf16.mxu1 %vm155_vm0, %v20053_v39 }
  0xca   :  { %17486 = vmatmul.mubr.msk.bf16.gmra.mrb[84].mxu0 %vm155_vm0, %v20040_v36  ;;  %17563 = vmatprep.subr.bf16.mxu1 %v20957_v61 }
  0xcb   :  { %17534 = vmatpush3.bf16.msra.mxu0 %v20978_v2  ;;  %17489 = vmatprep.mubr.msk.bf16.mxu0 %vm155_vm0, %v20043_v38 }
  0xcc   :  { %17535 = vmatprep.subr.bf16.mxu0 %v20991_v3 }
  0xcd   :  { %17564 = vmatpush3.bf16.msra.mxu1 %v20957_v61 }
  0xce   :  { %17565 = vmatprep.subr.bf16.mxu1 %v20978_v2 }
  0xcf   :  { %17536 = vmatpush3.bf16.msra.mxu0 %v20991_v3 }
  0xd0   :  { %17537 = vmatprep.subr.bf16.mxu0 %v21012_v8  ;;  %17518 = vmatmul.mubr.msk.bf16.gmra.mrb[84].mxu1 %vm155_vm0, %v20054_v41 }
  0xd1   :  { %17566 = vmatpush3.bf16.msra.mxu1 %v20978_v2  ;;  %17521 = vmatprep.mubr.msk.bf16.mxu1 %vm155_vm0, %v20057_v43 }
  0xd2   :  { %17490 = vmatmul.mubr.msk.bf16.gmra.mrb[88].mxu0 %vm155_vm0, %v20044_v40  ;;  %17567 = vmatprep.subr.bf16.mxu1 %v20991_v3  ;;  %v20088_v40 = vld [vmem:[%s24830_s0 + $0x3c0] sm:$0xff]  }
  0xd3   :  { %17538 = vmatpush3.bf16.msra.mxu0 %v21012_v8  ;;  %17493 = vmatprep.mubr.msk.bf16.mxu0 %vm155_vm0, %v20047_v42 }
  0xd4   :  { %17539 = vmatprep.subr.bf16.mxu0 %v21025_v9 }
  0xd5   :  { %17568 = vmatpush3.bf16.msra.mxu1 %v20991_v3 }
  0xd6   :  { %17569 = vmatprep.subr.bf16.mxu1 %v21012_v8 }
  0xd7   :  { %17540 = vmatpush3.bf16.msra.mxu0 %v21025_v9 }
  0xd8   :  { %17541 = vmatprep.subr.bf16.mxu0 %v21046_v14  ;;  %17522 = vmatmul.mubr.msk.bf16.gmra.mrb[88].mxu1 %vm155_vm0, %v20058_v45 }
  0xd9   :  { %17570 = vmatpush3.bf16.msra.mxu1 %v21012_v8  ;;  %17525 = vmatprep.mubr.msk.bf16.mxu1 %vm155_vm0, %v20061_v47 }
  0xda   :  { %17494 = vmatmul.mubr.msk.bf16.gmra.mrb[92].mxu0 %vm155_vm0, %v20048_v44  ;;  %17571 = vmatprep.subr.bf16.mxu1 %v21025_v9 }
  0xdb   :  { %17542 = vmatpush3.bf16.msra.mxu0 %v21046_v14  ;;  %17545 = vmatprep.mubr.msk.bf16.mxu0 %vm155_vm0, %v20051_v46  ;;  %v21393_v46 = vld [vmem:[%s24831_s2 + $0x48] sm:$0xff]  }
  0xdc   :  { %17543 = vmatprep.subr.bf16.mxu0 %v21059_v15 }
  0xdd   :  { %17572 = vmatpush3.bf16.msra.mxu1 %v21025_v9 }
  0xde   :  { %17573 = vmatprep.subr.bf16.mxu1 %v21046_v14 }
  0xdf   :  { %17544 = vmatpush3.bf16.msra.mxu0 %v21059_v15 }
  0xe0   :  { %17593 = vmatprep.subr.bf16.mxu0 %v20950_v60  ;;  %17526 = vmatmul.mubr.msk.bf16.gmra.mrb[92].mxu1 %vm155_vm0, %v20062_v49 }
  0xe1   :  { %17574 = vmatpush3.bf16.msra.mxu1 %v21046_v14  ;;  %17577 = vmatprep.mubr.msk.bf16.mxu1 %vm155_vm0, %v20065_v51 }
  0xe2   :  { %17546 = vmatmul.mubr.msk.bf16.vlgmr.msra.gmra.mrb[96].mxu0 %vm155_vm0, %v20052_v48  ;;  %17575 = vmatprep.subr.bf16.mxu1 %v21059_v15 }
  0xe3   :  { %17594 = vmatpush3.bf16.msra.mxu0 %v20950_v60  ;;  %17549 = vmatprep.mubr.msk.bf16.mxu0 %vm155_vm0, %v20055_v50 }
  0xe4   :  { %17595 = vmatprep.subr.bf16.mxu0 %v20957_v61 }
  0xe5   :  { %17576 = vmatpush3.bf16.msra.mxu1 %v21059_v15 }
  0xe6   :  { %17625 = vmatprep.subr.bf16.mxu1 %v20950_v60 }
  0xe7   :  { %17596 = vmatpush3.bf16.msra.mxu0 %v20957_v61 }
  0xe8   :  { %17597 = vmatprep.subr.bf16.mxu0 %v20978_v2  ;;  %17578 = vmatmul.mubr.msk.bf16.vlgmr.msra.gmra.mrb[96].mxu1 %vm155_vm0, %v20066_v53 }
  0xe9   :  { %17626 = vmatpush3.bf16.msra.mxu1 %v20950_v60  ;;  %17581 = vmatprep.mubr.msk.bf16.mxu1 %vm155_vm0, %v20070_v55  ;;  %v21322_v60 = vld [vmem:[%s24832_s3] ss:$0 sm:$0xff] }
  0xea   :  { %17550 = vmatmul.mubr.msk.bf16.gmra.mrb[100].mxu0 %vm155_vm0, %v20056_v52  ;;  %17627 = vmatprep.subr.bf16.mxu1 %v20957_v61 }
  0xeb   :  { %17598 = vmatpush3.bf16.msra.mxu0 %v20978_v2  ;;  %17553 = vmatprep.mubr.msk.bf16.mxu0 %vm155_vm0, %v20059_v54 }
  0xec   :  { %17599 = vmatprep.subr.bf16.mxu0 %v20991_v3 }
  0xed   :  { %17628 = vmatpush3.bf16.msra.mxu1 %v20957_v61  ;;  %v20064_v61 = vld [vmem:[%s24830_s0 + $0x338] sm:$0xff]  }
  0xee   :  { %17629 = vmatprep.subr.bf16.mxu1 %v20978_v2 }
  0xef   :  { %17600 = vmatpush3.bf16.msra.mxu0 %v20991_v3 }
  0xf0   :  { %17601 = vmatprep.subr.bf16.mxu0 %v21012_v8  ;;  %17582 = vmatmul.mubr.msk.bf16.gmra.mrb[100].mxu1 %vm155_vm0, %v20072_v57 }
  0xf1   :  { %17630 = vmatpush3.bf16.msra.mxu1 %v20978_v2  ;;  %17585 = vmatprep.mubr.msk.bf16.mxu1 %vm155_vm0, %v20076_v59  ;;  %v20082_v2 = vld [vmem:[%s24830_s0 + $0x370] sm:$0xff]  }
  0xf2   :  { %17554 = vmatmul.mubr.msk.bf16.gmra.mrb[104].mxu0 %vm155_vm0, %v20060_v56  ;;  %17631 = vmatprep.subr.bf16.mxu1 %v20991_v3 }
  0xf3   :  { %17602 = vmatpush3.bf16.msra.mxu0 %v21012_v8  ;;  %17557 = vmatprep.mubr.msk.bf16.mxu0 %vm155_vm0, %v20063_v58 }
  0xf4   :  { %17603 = vmatprep.subr.bf16.mxu0 %v21025_v9 }
  0xf5   :  { %v17163_v63 = vpop.f32.mrb[0].mxu0  ;;  %17632 = vmatpush3.bf16.msra.mxu1 %v20991_v3  ;;  %v17195_v1 = vpop.f32.mrb[0].mxu1 }
  0xf6   :  { %v277_v4 = vadd.f32 %v17163_v63, %v21322_v60  ;;  %v268_v5 = vpop.f32.mrb[1].mxu0  ;;  %17633 = vmatprep.subr.bf16.mxu1 %v21012_v8  ;;  %v508_v6 = vadd.f32 %v17195_v1, %v21322_v60  ;;  %v499_v7 = vpop.f32.mrb[1].mxu1 }
  0xf7   :  { %v269_v10 = vadd.f32 %v21322_v60, %v268_v5  ;;  %v17164_v11 = vpop.f32.mrb[2].mxu0  ;;  %17604 = vmatpush3.bf16.msra.mxu0 %v21025_v9  ;;  %v500_v3 = vadd.f32 %v21322_v60, %v499_v7  ;;  %v17196_v12 = vpop.f32.mrb[2].mxu1  ;;  %v20090_v7 = vld [vmem:[%s24830_s0 + $0x3c8] sm:$0xff]  }
  0xf8   :  { %v333_v13 = vmul.f32 0.2, %v277_v4  ;;  %v280_v16 = vadd.f32 %v17164_v11, %v21322_v60  ;;  %v271_v17 = vpop.f32.mrb[3].mxu0  ;;  %17605 = vmatprep.subr.bf16.mxu0 %v21046_v14  ;;  %17586 = vmatmul.mubr.msk.bf16.gmra.mrb[104].mxu1 %vm155_vm0, %v20078_v62  ;;  %v564_v18 = vmul.f32 0.2, %v508_v6  ;;  %v511_v19 = vadd.f32 %v17196_v12, %v21322_v60  ;;  %v502_v20 = vpop.f32.mrb[3].mxu1 }
  0xf9   :  { %v331_v21 = vmul.f32 0.2, %v269_v10  ;;  %v272_v22 = vadd.f32 %v21322_v60, %v271_v17  ;;  %17634 = vmatpush3.bf16.msra.mxu1 %v21012_v8  ;;  %v562_v23 = vmul.f32 0.2, %v500_v3  ;;  %v503_v24 = vadd.f32 %v21322_v60, %v502_v20  ;;  %17589 = vmatprep.mubr.msk.bf16.mxu1 %vm155_vm0, %v20082_v2  ;;  %v20084_v8 = vld [vmem:[%s24830_s0 + $0x378] sm:$0xff]  }
  0xfa   :  { %v349_v25 = vmax.f32 %v277_v4, %v333_v13  ;;  %v334_v26 = vmul.f32 0.2, %v280_v16  ;;  %17558 = vmatmul.mubr.msk.bf16.gmra.mrb[108].mxu0 %vm155_vm0, %v20064_v61  ;;  %v580_v28 = vmax.f32 %v508_v6, %v564_v18  ;;  %v565_v29 = vmul.f32 0.2, %v511_v19  ;;  %17635 = vmatprep.subr.bf16.mxu1 %v21025_v9  ;;  %v21417_v4 = vld [vmem:[%s24831_s2 + $0x50] sm:$0xff]  }
  0xfb   :  { %v347_v30 = vmax.f32 %v269_v10, %v331_v21  ;;  %v332_v31 = vmul.f32 0.2, %v272_v22  ;;  %17606 = vmatpush3.bf16.msra.mxu0 %v21046_v14  ;;  %17609 = vmatprep.mubr.msk.bf16.mxu0 %vm155_vm0, %v20067_v0  ;;  %v578_v32 = vmax.f32 %v500_v3, %v562_v23  ;;  %v563_v33 = vmul.f32 0.2, %v503_v24  ;;  %v20533_v21 = vld [vmem:[%s24829_s1 + $0x38] sm:$0xff]  }
  0xfc   :  { %17607 = vmatprep.subr.bf16.mxu0 %v21059_v15  ;;  %v21372_v35 = vmax.f32 %v511_v19, %v565_v29  ;;  %v21387_v43 = vmax.f32 %v280_v16, %v334_v26  ;;  %v20074_v19 = vld [vmem:[%s24830_s0 + $0x398] sm:$0xff]  }
  0xfd   :  { %v17167_v36 = vpop.f32.mrb[4].mxu0  ;;  %v21377_v38 = vmax.f32 %v503_v24, %v563_v33  ;;  %v17199_v39 = vpop.f32.mrb[4].mxu1  ;;  %17636 = vmatpush3.bf16.msra.mxu1 %v21025_v9  ;;  %v21383_v41 = vpack.c.bf16 %v580_v28, %v578_v32  ;;  %v21385_v42 = vpack.c.bf16 %v349_v25, %v347_v30  ;;  %v21397_v48 = vmax.f32 %v272_v22, %v332_v31  ;;  %v20094_v22 = vld [vmem:[%s24830_s0 + $0x3d0] sm:$0xff]   ;;  %v21451_v26 = vld [vmem:[%s24831_s2 + $0x58] sm:$0xff]   ;;  %v20093_v31 = vld [vmem:[%s24831_s2 + $0x48] sm:$0xff]  }
  0xfe   :  { %v293_v44 = vadd.f32 %v17167_v36, %v21322_v60  ;;  %v284_v45 = vpop.f32.mrb[5].mxu0  ;;  %v524_v9 = vadd.f32 %v17199_v39, %v21322_v60  ;;  %v515_v47 = vpop.f32.mrb[5].mxu1  ;;  %17637 = vmatprep.subr.bf16.mxu1 %v21046_v14 }
  0xff   :  { %24980 = vst [vmem:[#allocation5_spill] sm:$0xff] %v21383_v41  ;;  %24981 = vst [vmem:[#allocation6_spill] sm:$0xff] %v21385_v42  ;;  %v285_v49 = vadd.f32 %v21322_v60, %v284_v45  ;;  %v17168_v50 = vpop.f32.mrb[6].mxu0  ;;  %17608 = vmatpush3.bf16.msra.mxu0 %v21059_v15  ;;  %v516_v51 = vadd.f32 %v21322_v60, %v515_v47  ;;  %v17200_v52 = vpop.f32.mrb[6].mxu1  ;;  %v21404_v53 = vpack.c.bf16 %v21372_v35, %v21377_v38 }
 0x100   :  { %v337_v54 = vmul.f32 0.2, %v293_v44  ;;  %v296_v55 = vadd.f32 %v17168_v50, %v21322_v60  ;;  %v287_v56 = vpop.f32.mrb[7].mxu0  ;;  %17657 = vmatprep.subr.bf16.mxu0 %v20069_v27  ;;  %v568_v57 = vmul.f32 0.2, %v524_v9  ;;  %v527_v58 = vadd.f32 %v17200_v52, %v21322_v60  ;;  %v518_v59 = vpop.f32.mrb[7].mxu1  ;;  %17590 = vmatmul.mubr.msk.bf16.gmra.mrb[108].mxu1 %vm155_vm0, %v20084_v8 }
 0x101   :  { %24982 = vst [vmem:[#allocation7_spill] sm:$0xff] %v21404_v53  ;;  %v335_v61 = vmul.f32 0.2, %v285_v49  ;;  %v288_v62 = vadd.f32 %v21322_v60, %v287_v56  ;;  %v566_v63 = vmul.f32 0.2, %v516_v51  ;;  %v519_v0 = vadd.f32 %v21322_v60, %v518_v59  ;;  %17638 = vmatpush3.bf16.msra.mxu1 %v21046_v14  ;;  %17641 = vmatprep.mubr.msk.bf16.mxu1 %vm155_vm0, %v20088_v40  ;;  %v20091_v14 = vld [vmem:[%s24831_s2 + $0x40] sm:$0xff]  }
 0x102   :  { %v353_v1 = vmax.f32 %v293_v44, %v337_v54  ;;  %v338_v2 = vmul.f32 0.2, %v296_v55  ;;  %17610 = vmatmul.mubr.msk.bf16.vlgmr.msra.gmra.mrb[112].mxu0 %vm155_vm0, %v20068_v34  ;;  %v584_v5 = vmax.f32 %v524_v9, %v568_v57  ;;  %v569_v6 = vmul.f32 0.2, %v527_v58  ;;  %17639 = vmatprep.subr.bf16.mxu1 %v21059_v15  ;;  %v21480_v56 = vld [vmem:[%s24831_s2 + $0x60] sm:$0xff]   ;;  %v20096_v59 = vld [vmem:[%s24830_s0 + $0x3d8] sm:$0xff]  }
 0x103   :  { %v351_v10 = vmax.f32 %v285_v49, %v335_v61  ;;  %v336_v11 = vmul.f32 0.2, %v288_v62  ;;  %17658 = vmatpush3.bf16.msra.mxu0 %v20069_v27  ;;  %17613 = vmatprep.mubr.msk.bf16.mxu0 %vm155_vm0, %v20073_v37  ;;  %v582_v3 = vmax.f32 %v516_v51, %v566_v63  ;;  %v567_v12 = vmul.f32 0.2, %v519_v0  ;;  %v20079_v27 = vld [vmem:[%s24830_s0 + $0x3a0] sm:$0xff]   ;;  %v20097_v61 = vld [vmem:[%s24831_s2 + $0x50] sm:$0xff]  }
 0x104   :  { %v21427_v13 = vmax.f32 %v296_v55, %v338_v2  ;;  %17659 = vmatprep.subr.bf16.mxu0 %v21393_v46  ;;  %v21456_v28 = vmax.f32 %v527_v58, %v569_v6  ;;  %v20080_v2 = vld [vmem:[%s24830_s0 + $0x3a8] sm:$0xff]  }
 0x105   :  { %v21432_v16 = vpack.c.bf16 %v353_v1, %v351_v10  ;;  %v21434_v17 = vmax.f32 %v288_v62, %v336_v11  ;;  %v17171_v18 = vpop.f32.mrb[8].mxu0  ;;  %v17203_v20 = vpop.f32.mrb[8].mxu1  ;;  %17640 = vmatpush3.bf16.msra.mxu1 %v20533_v21  ;;  %v21445_v23 = vpack.c.bf16 %v584_v5, %v582_v3  ;;  %v583_v29 = vmax.f32 %v519_v0, %v567_v12  ;;  %v20099_v3 = vld [vmem:[%s24831_s2 + $0x58] sm:$0xff]  }
 0x106   :  { %v309_v24 = vadd.f32 %v17171_v18, %v21322_v60  ;;  %v300_v25 = vpop.f32.mrb[9].mxu0  ;;  %v540_v8 = vadd.f32 %v17203_v20, %v21322_v60  ;;  %v531_v30 = vpop.f32.mrb[9].mxu1  ;;  %17945 = vmatprep.subr.bf16.mxu1 %v20091_v14 }
 0x107   :  { %24983 = vst [vmem:[#allocation8_spill] sm:$0xff] %v21432_v16  ;;  %24984 = vst [vmem:[#allocation9_spill] sm:$0xff] %v21445_v23  ;;  %v301_v34 = vadd.f32 %v21322_v60, %v300_v25  ;;  %v17172_v36 = vpop.f32.mrb[10].mxu0  ;;  %17660 = vmatpush3.bf16.msra.mxu0 %v21393_v46  ;;  %v532_v37 = vadd.f32 %v21322_v60, %v531_v30  ;;  %v17204_v39 = vpop.f32.mrb[10].mxu1  ;;  %v21497_v6 = vpack.c.bf16 %v583_v29, %v21372_v35  ;;  %v20100_v35 = vld [vmem:[%s24830_s0 + $0x3e0] sm:$0xff]  }
 0x108   :  { %v341_v40 = vmul.f32 0.2, %v309_v24  ;;  %v312_v44 = vadd.f32 %v17172_v36, %v21322_v60  ;;  %v303_v45 = vpop.f32.mrb[11].mxu0  ;;  %17661 = vmatprep.subr.bf16.mxu0 %v21417_v4  ;;  %v572_v9 = vmul.f32 0.2, %v540_v8  ;;  %v543_v47 = vadd.f32 %v17204_v39, %v21322_v60  ;;  %v534_v49 = vpop.f32.mrb[11].mxu1  ;;  %17642 = vmatmul.mubr.msk.bf16.vlgmr.msra.gmra.mrb[112].mxu1 %vm155_vm0, %v20090_v7 }
 0x109   :  { %v339_v50 = vmul.f32 0.2, %v301_v34  ;;  %v304_v51 = vadd.f32 %v21322_v60, %v303_v45  ;;  %v570_v52 = vmul.f32 0.2, %v532_v37  ;;  %v535_v46 = vadd.f32 %v21322_v60, %v534_v49  ;;  %17946 = vmatpush3.bf16.msra.mxu1 %v20091_v14  ;;  %17645 = vmatprep.mubr.msk.bf16.mxu1 %vm155_vm0, %v20094_v22  ;;  %24985 = vst [vmem:[#allocation10_spill] sm:$0xff] %v21497_v6 }
 0x10a   :  { %v357_v54 = vmax.f32 %v309_v24, %v341_v40  ;;  %v342_v55 = vmul.f32 0.2, %v312_v44  ;;  %17614 = vmatmul.mubr.msk.bf16.gmra.mrb[116].mxu0 %vm155_vm0, %v20074_v19  ;;  %v588_v57 = vmax.f32 %v540_v8, %v572_v9  ;;  %v573_v58 = vmul.f32 0.2, %v543_v47  ;;  %17947 = vmatprep.subr.bf16.mxu1 %v20093_v31  ;;  %v20083_v24 = vld [vmem:[%s24831_s2 + $0x68] sm:$0xff]  }
 0x10b   :  { %v355_v62 = vmax.f32 %v301_v34, %v339_v50  ;;  %v340_v63 = vmul.f32 0.2, %v304_v51  ;;  %17662 = vmatpush3.bf16.msra.mxu0 %v21417_v4  ;;  %17617 = vmatprep.mubr.msk.bf16.mxu0 %vm155_vm0, %v20079_v27  ;;  %v586_v0 = vmax.f32 %v532_v37, %v570_v52  ;;  %v571_v1 = vmul.f32 0.2, %v535_v46  ;;  %v20085_v4 = vld [vmem:[%s24830_s0 + $0x3b0] sm:$0xff]  }
 0x10c   :  { %17663 = vmatprep.subr.bf16.mxu0 %v21451_v26  ;;  %v21494_v5 = vmax.f32 %v543_v47, %v573_v58  ;;  %v21500_v7 = vpack.c.bf16 %v21456_v28, %v583_v29  ;;  %v21515_v19 = vmax.f32 %v312_v44, %v342_v55  ;;  %v21549_v52 = vld [vmem:[%s24831_s2 + $0x70] sm:$0xff]   ;;  %v20102_v55 = vld [vmem:[%s24830_s0 + $0x3e8] sm:$0xff]  }
 0x10d   :  { %v17175_v14 = vpop.f32.mrb[12].mxu0  ;;  %v587_v10 = vmax.f32 %v535_v46, %v571_v1  ;;  %v17207_v11 = vpop.f32.mrb[12].mxu1  ;;  %17948 = vmatpush3.bf16.msra.mxu1 %v20093_v31  ;;  %v21511_v12 = vpack.c.bf16 %v588_v57, %v586_v0  ;;  %v21513_v18 = vpack.c.bf16 %v357_v54, %v355_v62  ;;  %v21517_v20 = vmax.f32 %v304_v51, %v340_v63  ;;  %v20103_v57 = vld [vmem:[%s24831_s2 + $0x60] sm:$0xff]   ;;  %v20117_v0 = vld [vmem:[%s24831_s2 + $0x10] sm:$0xff]  }
 0x10e   :  { %24986 = vst [vmem:[#allocation11_spill] sm:$0xff] %v21500_v7  ;;  %v325_v21 = vadd.f32 %v17175_v14, %v21322_v60  ;;  %v316_v22 = vpop.f32.mrb[13].mxu0  ;;  %v556_v25 = vadd.f32 %v17207_v11, %v21322_v60  ;;  %v547_v27 = vpop.f32.mrb[13].mxu1  ;;  %17949 = vmatprep.subr.bf16.mxu1 %v20097_v61  ;;  %v20086_v14 = vld [vmem:[%s24830_s0 + $0x3b8] sm:$0xff]   ;;  %v20106_v11 = vld [vmem:[%s24830_s0 + $0x3f0] sm:$0xff]  }
 0x10f   :  { %24987 = vst [vmem:[#allocation12_spill] sm:$0xff] %v21511_v12  ;;  %24988 = vst [vmem:[#allocation13_spill] sm:$0xff] %v21513_v18  ;;  %v317_v29 = vadd.f32 %v21322_v60, %v316_v22  ;;  %v17176_v8 = vpop.f32.mrb[14].mxu0  ;;  %17664 = vmatpush3.bf16.msra.mxu0 %v21451_v26  ;;  %v548_v30 = vadd.f32 %v21322_v60, %v547_v27  ;;  %v17208_v31 = vpop.f32.mrb[14].mxu1  ;;  %v21528_v34 = vpack.c.bf16 %v587_v10, %v21456_v28 }
 0x110   :  { %v21531_v36 = vpack.c.bf16 %v21494_v5, %v587_v10  ;;  %v345_v37 = vmul.f32 0.2, %v325_v21  ;;  %v21534_v39 = vadd.f32 %v17176_v8, %v21322_v60  ;;  %v319_v40 = vpop.f32.mrb[15].mxu0  ;;  %17665 = vmatprep.subr.bf16.mxu0 %v21480_v56  ;;  %v576_v44 = vmul.f32 0.2, %v556_v25  ;;  %v550_v26 = vpop.f32.mrb[15].mxu1  ;;  %17646 = vmatmul.mubr.msk.bf16.gmra.mrb[116].mxu1 %vm155_vm0, %v20096_v59 }
 0x111   :  { %24989 = vst [vmem:[#allocation14_spill] sm:$0xff] %v21528_v34  ;;  %v559_v45 = vadd.f32 %v17208_v31, %v21322_v60  ;;  %v343_v9 = vmul.f32 0.2, %v317_v29  ;;  %v320_v28 = vadd.f32 %v21322_v60, %v319_v40  ;;  %v574_v47 = vmul.f32 0.2, %v548_v30  ;;  %17950 = vmatpush3.bf16.msra.mxu1 %v20097_v61  ;;  %17649 = vmatprep.mubr.msk.bf16.mxu1 %vm155_vm0, %v20100_v35 }
 0x112   :  { %24990 = vst [vmem:[#allocation15_spill] sm:$0xff] %v21531_v36  ;;  %v551_v49 = vadd.f32 %v21322_v60, %v550_v26  ;;  %v361_v50 = vmax.f32 %v325_v21, %v345_v37  ;;  %v21543_v51 = vmul.f32 0.2, %v21534_v39  ;;  %17618 = vmatmul.mubr.msk.bf16.gmra.mrb[120].mxu0 %vm155_vm0, %v20080_v2  ;;  %v592_v46 = vmax.f32 %v556_v25, %v576_v44 }
 0x113   :  { %v577_v54 = vmul.f32 0.2, %v559_v45  ;;  %17951 = vmatprep.subr.bf16.mxu1 %v20099_v3  ;;  %v359_v58 = vmax.f32 %v317_v29, %v343_v9  ;;  %v344_v59 = vmul.f32 0.2, %v320_v28  ;;  %17666 = vmatpush3.bf16.msra.mxu0 %v21480_v56  ;;  %v590_v61 = vmax.f32 %v548_v30, %v574_v47  ;;  %v20089_v29 = vld [vmem:[%s24831_s2 + $0x78] sm:$0xff]  }
 0x114   :  { %17621 = vmatprep.mubr.msk.bf16.mxu0 %vm155_vm0, %v20085_v4  ;;  %v575_v62 = vmul.f32 0.2, %v551_v49  ;;  %17667 = vmatprep.subr.bf16.mxu0 %v20083_v24  ;;  %v20105_v4 = vld [vmem:[%s24831_s2 + $0x68] sm:$0xff]   ;;  %v362_v22 = vmax.f32 %v21534_v39, %v21543_v51 }
 0x115   :  { %v593_v63 = vmax.f32 %v559_v45, %v577_v54  ;;  %v17227_v2 = vpop.f32.mrb[16].mxu0  ;;  %17952 = vmatpush3.bf16.msra.mxu1 %v20099_v3  ;;  %v17259_v56 = vpop.f32.mrb[16].mxu1  ;;  %v21572_v35 = vpack.c.bf16 %v592_v46, %v590_v61  ;;  %v21574_v21 = vpack.c.bf16 %v361_v50, %v359_v58  ;;  %v21578_v25 = vmax.f32 %v320_v28, %v344_v59 }
 0x116   :  { %v591_v10 = vmax.f32 %v551_v49, %v575_v62  ;;  %v739_v3 = vadd.f32 %v17227_v2, %v21322_v60  ;;  %v730_v27 = vpop.f32.mrb[17].mxu0  ;;  %17953 = vmatprep.subr.bf16.mxu1 %v20103_v57  ;;  %v970_v8 = vadd.f32 %v17259_v56, %v21322_v60  ;;  %v961_v30 = vpop.f32.mrb[17].mxu1  ;;  %v20109_v62 = vld [vmem:[%s24831_s2 + $0x70] sm:$0xff]  }
 0x117   :  { %24991 = vst [vmem:[#allocation16_spill] sm:$0xff] %v21572_v35  ;;  %24992 = vst [vmem:[#allocation17_spill] sm:$0xff] %v21574_v21  ;;  %v731_v31 = vadd.f32 %v21322_v60, %v730_v27  ;;  %v17228_v37 = vpop.f32.mrb[18].mxu0  ;;  %17668 = vmatpush3.bf16.msra.mxu0 %v20083_v24  ;;  %v962_v40 = vadd.f32 %v21322_v60, %v961_v30  ;;  %v17260_v39 = vpop.f32.mrb[18].mxu1 }
 0x118   :  { %v21588_v44 = vpack.c.bf16 %v591_v10, %v21494_v5  ;;  %v21590_v45 = vpack.c.bf16 %v593_v63, %v591_v10  ;;  %v795_v26 = vmul.f32 0.2, %v739_v3  ;;  %v742_v9 = vadd.f32 %v17228_v37, %v21322_v60  ;;  %v733_v28 = vpop.f32.mrb[19].mxu0  ;;  %17669 = vmatprep.subr.bf16.mxu0 %v21549_v52  ;;  %17650 = vmatmul.mubr.msk.bf16.gmra.mrb[120].mxu1 %vm155_vm0, %v20102_v55  ;;  %v964_v24 = vpop.f32.mrb[19].mxu1  ;;  %v20092_v55 = vld [vmem:[%s24831_s2] sm:$0xff]  }
 0x119   :  { %v1026_v47 = vmul.f32 0.2, %v970_v8  ;;  %v973_v49 = vadd.f32 %v17260_v39, %v21322_v60  ;;  %v793_v50 = vmul.f32 0.2, %v731_v31  ;;  %v734_v51 = vadd.f32 %v21322_v60, %v733_v28  ;;  %17954 = vmatpush3.bf16.msra.mxu1 %v20103_v57  ;;  %17653 = vmatprep.mubr.msk.bf16.mxu1 %vm155_vm0, %v20106_v11  ;;  %v20108_v57 = vld [vmem:[%s24830_s0 + $0x3f8] sm:$0xff]   ;;  %v20095_v28 = vld [vmem:[%s24831_s2 + $0x8] sm:$0xff]  }
 0x11a   :  { %24993 = vst [vmem:[#allocation18_spill] sm:$0xff] %v21588_v44  ;;  %24994 = vst [vmem:[#allocation19_spill] sm:$0xff] %v21590_v45  ;;  %v1024_v5 = vmul.f32 0.2, %v962_v40  ;;  %v965_v46 = vadd.f32 %v21322_v60, %v964_v24  ;;  %v811_v54 = vmax.f32 %v739_v3, %v795_v26  ;;  %v796_v58 = vmul.f32 0.2, %v742_v9  ;;  %17622 = vmatmul.mubr.msk.bf16.gmra.mrb[124].mxu0 %vm155_vm0, %v20086_v14 }
 0x11b   :  { %v1042_v59 = vmax.f32 %v970_v8, %v1026_v47  ;;  %v1027_v61 = vmul.f32 0.2, %v973_v49  ;;  %17955 = vmatprep.subr.bf16.mxu1 %v20105_v4  ;;  %v809_v63 = vmax.f32 %v731_v31, %v793_v50  ;;  %v794_v2 = vmul.f32 0.2, %v734_v51  ;;  %17670 = vmatpush3.bf16.msra.mxu0 %v21549_v52  ;;  %v20111_v52 = vld [vmem:[%s24831_s2 + $0x78] sm:$0xff]  }
 0x11c   :  { %v24835_v14 = vmov 0.0|0.0   ;;  %v1040_v10 = vmax.f32 %v962_v40, %v1024_v5  ;;  %v1025_v56 = vmul.f32 0.2, %v965_v46  ;;  %17671 = vmatprep.subr.bf16.mxu0 %v20089_v29  ;;  %v21614_v3 = vpack.c.bf16 %v362_v22, %v21578_v25 }
 0x11d   :  { %17673 = vmatprep.mubr.bf16.mxu0 %v24835_v14  ;;  %v17231_v27 = vpop.f32.mrb[20].mxu0  ;;  %v21616_v8 = vmax.f32 %v973_v49, %v1027_v61  ;;  %17956 = vmatpush3.bf16.msra.mxu1 %v20105_v4  ;;  %v17263_v31 = vpop.f32.mrb[20].mxu1  ;;  %v21625_v40 = vpack.c.bf16 %v811_v54, %v809_v63  ;;  %v21627_v39 = vmax.f32 %v742_v9, %v796_v58 }
 0x11e   :  { %24995 = vst [vmem:[#allocation20_spill] sm:$0xff] %v21614_v3  ;;  %v21618_v30 = vmax.f32 %v965_v46, %v1025_v56  ;;  %v21623_v37 = vpack.c.bf16 %v1042_v59, %v1040_v10  ;;  %v755_v22 = vadd.f32 %v17231_v27, %v21322_v60  ;;  %v746_v26 = vpop.f32.mrb[21].mxu0  ;;  %v986_v4 = vadd.f32 %v17263_v31, %v21322_v60  ;;  %v977_v47 = vpop.f32.mrb[21].mxu1 }
 0x11f   :  { %24997 = vst [vmem:[#allocation22_spill] sm:$0xff] %v21625_v40  ;;  %24998 = vst [vmem:[#allocation23_spill] sm:$0xff] %v21627_v39  ;;  %17957 = vmatprep.subr.bf16.mxu1 %v20109_v62  ;;  %v21634_v49 = vmax.f32 %v734_v51, %v794_v2  ;;  %v747_v24 = vadd.f32 %v21322_v60, %v746_v26  ;;  %v17232_v50 = vpop.f32.mrb[22].mxu0  ;;  %17672 = vmatpush3.bf16.msra.mxu0 %v20089_v29  ;;  %v17264_v5 = vpop.f32.mrb[22].mxu1  ;;  %v20098_v26 = vld [vmem:[%s24831_s2 + $0x10] sm:$0xff]  }
 0x120   :  { %24996 = vst [vmem:[#allocation21_spill] sm:$0xff] %v21623_v37  ;;  %v978_v9 = vadd.f32 %v21322_v60, %v977_v47  ;;  %v21640_v46 = vpack.c.bf16 %v21616_v8, %v21618_v30  ;;  %v799_v54 = vmul.f32 0.2, %v755_v22  ;;  %v758_v58 = vadd.f32 %v17232_v50, %v21322_v60  ;;  %v749_v59 = vpop.f32.mrb[23].mxu0  ;;  %17689 = vmatprep.subr.bf16.mxu0 %v20092_v55  ;;  %v980_v63 = vpop.f32.mrb[23].mxu1  ;;  %v20113_v50 = vld [vmem:[%s24831_s2] sm:$0xff]  }
 0x121   :  { %v1030_v61 = vmul.f32 0.2, %v986_v4  ;;  %v989_v51 = vadd.f32 %v17264_v5, %v21322_v60  ;;  %17654 = vmatmul.mubr.msk.bf16.gmra.mrb[124].mxu1 %vm155_vm0, %v20108_v57  ;;  %v797_v2 = vmul.f32 0.2, %v747_v24  ;;  %v750_v29 = vadd.f32 %v21322_v60, %v749_v59 }
 0x122   :  { %24999 = vst [vmem:[#allocation24_spill] sm:$0xff] %v21640_v46  ;;  %v1028_v10 = vmul.f32 0.2, %v978_v9  ;;  %v981_v56 = vadd.f32 %v21322_v60, %v980_v63  ;;  %17958 = vmatpush3.bf16.msra.mxu1 %v20109_v62  ;;  %17961 = vmatprep.mubr.bf16.mxu1 %v21623_v37  ;;  %v815_v27 = vmax.f32 %v755_v22, %v799_v54  ;;  %v800_v31 = vmul.f32 0.2, %v758_v58 }
 0x123   :  { %17674 = vmatmul.mubr.bf16.vlgmr.msra.gmra.mrb[128].mxu0 %v24835_v14  ;;  %v1046_v47 = vmax.f32 %v986_v4, %v1030_v61  ;;  %v1031_v57 = vmul.f32 0.2, %v989_v51  ;;  %17959 = vmatprep.subr.bf16.mxu1 %v20111_v52  ;;  %v813_v5 = vmax.f32 %v747_v24, %v797_v2  ;;  %v798_v59 = vmul.f32 0.2, %v750_v29 }
 0x124   :  { %17690 = vmatpush3.bf16.msra.mxu0 %v20092_v55  ;;  %17677 = vmatprep.mubr.bf16.mxu0 %v24835_v14  ;;  %v1044_v62 = vmax.f32 %v978_v9, %v1028_v10  ;;  %v1029_v22 = vmul.f32 0.2, %v981_v56  ;;  %v20115_v55 = vld [vmem:[%s24831_s2 + $0x8] sm:$0xff]   ;;  %v21667_v9 = vmax.f32 %v758_v58, %v800_v31 }
 0x125   :  { %17691 = vmatprep.subr.bf16.mxu0 %v20095_v28  ;;  %v17235_v63 = vpop.f32.mrb[24].mxu0  ;;  %v21660_v4 = vmax.f32 %v989_v51, %v1031_v57  ;;  %v17267_v33 = vpop.f32.mrb[24].mxu1  ;;  %v21665_v24 = vpack.c.bf16 %v815_v27, %v813_v5  ;;  %v21669_v2 = vmax.f32 %v750_v29, %v798_v59  ;;  %v20101_v51 = vld [vmem:[%s24831_s2 + $0x18] sm:$0xff]  }
 0x126   :  { %v21658_v1 = vpack.c.bf16 %v1046_v47, %v1044_v62  ;;  %v1045_v61 = vmax.f32 %v981_v56, %v1029_v22  ;;  %17960 = vmatpush3.bf16.msra.mxu1 %v20111_v52  ;;  %25002 = vst [vmem:[#allocation27_spill] sm:$0xff] %v21667_v9  ;;  %v771_v10 = vadd.f32 %v17235_v63, %v21322_v60  ;;  %v762_v54 = vpop.f32.mrb[25].mxu0  ;;  %v993_v52 = vpop.f32.mrb[25].mxu1 }
 0x127   :  { %25001 = vst [vmem:[#allocation26_spill] sm:$0xff] %v21665_v24  ;;  %25003 = vst [vmem:[#allocation28_spill] sm:$0xff] %v21669_v2  ;;  %v1002_v56 = vadd.f32 %v17267_v33, %v21322_v60  ;;  %17977 = vmatprep.subr.bf16.mxu1 %v20113_v50  ;;  %v763_v47 = vadd.f32 %v21322_v60, %v762_v54  ;;  %v17236_v57 = vpop.f32.mrb[26].mxu0  ;;  %v994_v27 = vadd.f32 %v21322_v60, %v993_v52  ;;  %v17268_v31 = vpop.f32.mrb[26].mxu1 }
 0x128   :  { %25000 = vst [vmem:[#allocation25_spill] sm:$0xff] %v21658_v1  ;;  %17692 = vmatpush3.bf16.msra.mxu0 %v20095_v28  ;;  %v21678_v58 = vpack.c.bf16 %v1045_v61, %v21616_v8  ;;  %v21681_v29 = vpack.c.bf16 %v21660_v4, %v1045_v61  ;;  %v803_v5 = vmul.f32 0.2, %v771_v10  ;;  %v774_v59 = vadd.f32 %v17236_v57, %v21322_v60  ;;  %v765_v62 = vpop.f32.mrb[27].mxu0  ;;  %v996_v54 = vpop.f32.mrb[27].mxu1  ;;  %v20104_v57 = vld [vmem:[%s24831_s2 + $0x20] sm:$0xff]  }
 0x129   :  { %17693 = vmatprep.subr.bf16.mxu0 %v20098_v26  ;;  %v1034_v33 = vmul.f32 0.2, %v1002_v56  ;;  %v1005_v22 = vadd.f32 %v17268_v31, %v21322_v60  ;;  %17962 = vmatmul.mubr.bf16.vlgmr.msra.gmra.mrb[128].mxu1 %v21658_v1  ;;  %v801_v28 = vmul.f32 0.2, %v763_v47  ;;  %v766_v8 = vadd.f32 %v21322_v60, %v765_v62 }
 0x12a   :  { %25004 = vst [vmem:[#allocation29_spill] sm:$0xff] %v21678_v58  ;;  %25005 = vst [vmem:[#allocation30_spill] sm:$0xff] %v21681_v29  ;;  %v1032_v63 = vmul.f32 0.2, %v994_v27  ;;  %v997_v61 = vadd.f32 %v21322_v60, %v996_v54  ;;  %17978 = vmatpush3.bf16.msra.mxu1 %v20113_v50  ;;  %v819_v52 = vmax.f32 %v771_v10, %v803_v5  ;;  %v804_v15 = vmul.f32 0.2, %v774_v59 }
 0x12b   :  { %17678 = vmatmul.mubr.bf16.gmra.mrb[132].mxu0 %v24835_v14  ;;  %v1050_v11 = vmax.f32 %v1002_v56, %v1034_v33  ;;  %v1035_v31 = vmul.f32 0.2, %v1005_v22  ;;  %17979 = vmatprep.subr.bf16.mxu1 %v20115_v55  ;;  %v817_v62 = vmax.f32 %v763_v47, %v801_v28  ;;  %v802_v32 = vmul.f32 0.2, %v766_v8 }
 0x12c   :  { %17681 = vmatprep.mubr.bf16.mxu0 %v21383_v41  ;;  %17694 = vmatpush3.bf16.msra.mxu0 %v20098_v26  ;;  %v1048_v50 = vmax.f32 %v994_v27, %v1032_v63  ;;  %v1033_v10 = vmul.f32 0.2, %v997_v61  ;;  %v21701_v33 = vmax.f32 %v774_v59, %v804_v15  ;;  %v20119_v26 = vld [vmem:[%s24831_s2 + $0x18] sm:$0xff]   ;;  %v20107_v15 = vld [vmem:[%s24831_s2 + $0x28] sm:$0xff]  }
 0x12d   :  { %17695 = vmatprep.subr.bf16.mxu0 %v20101_v51  ;;  %v17239_v54 = vpop.f32.mrb[28].mxu0  ;;  %v17271_v1 = vpop.f32.mrb[28].mxu1  ;;  %v21708_v27 = vpack.c.bf16 %v819_v52, %v817_v62  ;;  %v21710_v28 = vmax.f32 %v766_v8, %v802_v32  ;;  %v21716_v59 = vmax.f32 %v1005_v22, %v1035_v31 }
 0x12e   :  { %25006 = vst [vmem:[#allocation31_spill] sm:$0xff] %v21701_v33  ;;  %v1049_v14 = vmax.f32 %v997_v61, %v1033_v10  ;;  %17980 = vmatpush3.bf16.msra.mxu1 %v20115_v55  ;;  %v21703_v47 = vpack.c.bf16 %v1050_v11, %v1048_v50  ;;  %v787_v63 = vadd.f32 %v17239_v54, %v21322_v60  ;;  %v778_v5 = vpop.f32.mrb[29].mxu0  ;;  %v1009_v55 = vpop.f32.mrb[29].mxu1 }
 0x12f   :  { %25008 = vst [vmem:[#allocation33_spill] sm:$0xff] %v21708_v27  ;;  %25009 = vst [vmem:[#allocation34_spill] sm:$0xff] %v21710_v28  ;;  %v1018_v11 = vadd.f32 %v17271_v1, %v21322_v60  ;;  %17981 = vmatprep.subr.bf16.mxu1 %v20117_v0  ;;  %v779_v61 = vadd.f32 %v21322_v60, %v778_v5  ;;  %v17240_v50 = vpop.f32.mrb[30].mxu0  ;;  %v1010_v32 = vadd.f32 %v21322_v60, %v1009_v55  ;;  %v17272_v8 = vpop.f32.mrb[30].mxu1 }
 0x130   :  { %25007 = vst [vmem:[#allocation32_spill] sm:$0xff] %v21703_v47  ;;  %17696 = vmatpush3.bf16.msra.mxu0 %v20101_v51  ;;  %17965 = vmatprep.mubr.bf16.mxu1 %v21703_v47  ;;  %v21723_v52 = vpack.c.bf16 %v1049_v14, %v21660_v4  ;;  %v807_v62 = vmul.f32 0.2, %v787_v63  ;;  %v21726_v22 = vadd.f32 %v17240_v50, %v21322_v60  ;;  %v781_v31 = vpop.f32.mrb[31].mxu0  ;;  %v1012_v5 = vpop.f32.mrb[31].mxu1 }
 0x131   :  { %17697 = vmatprep.subr.bf16.mxu0 %v20104_v57  ;;  %v1038_v1 = vmul.f32 0.2, %v1018_v11  ;;  %v21729_v10 = vadd.f32 %v17272_v8, %v21322_v60  ;;  %v805_v51 = vmul.f32 0.2, %v779_v61  ;;  %v782_v54 = vadd.f32 %v21322_v60, %v781_v31  ;;  %v21736_v4 = vld [vmem:[%s24832_s3] ss:$0 sm:$0xff] }
 0x132   :  { %25010 = vst [vmem:[#allocation35_spill] sm:$0xff] %v21723_v52  ;;  %v1036_v55 = vmul.f32 0.2, %v1010_v32  ;;  %v1013_v56 = vadd.f32 %v21322_v60, %v1012_v5  ;;  %17982 = vmatpush3.bf16.msra.mxu1 %v20117_v0  ;;  %v823_v50 = vmax.f32 %v787_v63, %v807_v62  ;;  %v21739_v47 = vmul.f32 0.2, %v21726_v22  ;;  %v20110_v8 = vld [vmem:[%s24831_s2 + $0x30] sm:$0xff]  }
 0x133   :  { %17682 = vmatmul.mubr.bf16.gmra.mrb[136].mxu0 %v21445_v23  ;;  %v1054_v31 = vmax.f32 %v1018_v11, %v1038_v1  ;;  %v21746_v37 = vmul.f32 0.2, %v21729_v10  ;;  %17983 = vmatprep.subr.bf16.mxu1 %v20119_v26  ;;  %v20121_v60 = vld [vmem:[%s24831_s2 + $0x20] sm:$0xff]   ;;  %v821_v0 = vmax.f32 %v779_v61, %v805_v51  ;;  %v806_v63 = vmul.f32 0.2, %v782_v54 }
 0x134   :  { %17685 = vmatprep.mubr.bf16.mxu0 %v21511_v12  ;;  %17698 = vmatpush3.bf16.msra.mxu0 %v20104_v57  ;;  %v1052_v62 = vmax.f32 %v1010_v32, %v1036_v55  ;;  %v1037_v5 = vmul.f32 0.2, %v1013_v56  ;;  %v21755_v11 = vpack.c.bf16 %v21716_v59, %v1049_v14  ;;  %v20123_v57 = vld [vmem:[%s24831_s2 + $0x28] sm:$0xff]   ;;  %v21773_v55 = vld [vmem:[%s24832_s3] ss:$0 sm:$0xff] }
 0x135   :  { %17699 = vmatprep.subr.bf16.mxu0 %v20107_v15  ;;  %v17291_v41 = vpop.f32.mrb[32].mxu0  ;;  %v1055_v61 = vmax.f32 %v21729_v10, %v21746_v37  ;;  %v17323_v3 = vpop.f32.mrb[32].mxu1  ;;  %v21766_v32 = vpack.c.bf16 %v823_v50, %v821_v0  ;;  %v21768_v14 = vmax.f32 %v782_v54, %v806_v63 }
 0x136   :  { %25011 = vst [vmem:[#allocation36_spill] sm:$0xff] %v21755_v11  ;;  %v1053_v51 = vmax.f32 %v1013_v56, %v1037_v5  ;;  %v21761_v12 = vpack.c.bf16 %v1054_v31, %v1052_v62  ;;  %17984 = vmatpush3.bf16.msra.mxu1 %v20119_v26  ;;  %v1201_v37 = vadd.f32 %v21773_v55, %v17291_v41  ;;  %v1192_v56 = vpop.f32.mrb[33].mxu0  ;;  %v20112_v26 = vld [vmem:[%s24831_s2 + $0x38] sm:$0xff]   ;;  %v1423_v31 = vpop.f32.mrb[33].mxu1 }
 0x137   :  { %25013 = vst [vmem:[#allocation38_spill] sm:$0xff] %v21766_v32  ;;  %25014 = vst [vmem:[#allocation39_spill] sm:$0xff] %v21768_v14  ;;  %v1432_v10 = vadd.f32 %v17323_v3, %v21736_v4  ;;  %17985 = vmatprep.subr.bf16.mxu1 %v20121_v60  ;;  %v1193_v50 = vadd.f32 %v21773_v55, %v1192_v56  ;;  %v17292_v0 = vpop.f32.mrb[34].mxu0  ;;  %v1424_v63 = vadd.f32 %v21736_v4, %v1423_v31  ;;  %v17324_v62 = vpop.f32.mrb[34].mxu1 }
 0x138   :  { %25012 = vst [vmem:[#allocation37_spill] sm:$0xff] %v21761_v12  ;;  %17700 = vmatpush3.bf16.msra.mxu0 %v20107_v15  ;;  %17966 = vmatmul.mubr.bf16.gmra.mrb[132].mxu1 %v21761_v12  ;;  %v21786_v41 = vpack.c.bf16 %v1053_v51, %v21716_v59  ;;  %v1257_v5 = vmul.f32 0.2, %v1201_v37  ;;  %v1204_v3 = vadd.f32 %v21773_v55, %v17292_v0  ;;  %v1195_v1 = vpop.f32.mrb[35].mxu0  ;;  %v1426_v32 = vpop.f32.mrb[35].mxu1  ;;  %v20114_v0 = vld [vmem:[%s24831_s2 + $0x80] sm:$0xff]  }
 0x139   :  { %17701 = vmatprep.subr.bf16.mxu0 %v20110_v8  ;;  %v1488_v23 = vmul.f32 0.2, %v1432_v10  ;;  %v1435_v54 = vadd.f32 %v17324_v62, %v21736_v4  ;;  %v1255_v56 = vmul.f32 0.2, %v1193_v50  ;;  %v1196_v15 = vadd.f32 %v21773_v55, %v1195_v1  ;;  %v20125_v62 = vld [vmem:[%s24831_s2 + $0x30] sm:$0xff]  }
 0x13a   :  { %25015 = vst [vmem:[#allocation40_spill] sm:$0xff] %v21786_v41  ;;  %v1486_v27 = vmul.f32 0.2, %v1424_v63  ;;  %v1427_v31 = vadd.f32 %v21736_v4, %v1426_v32  ;;  %17986 = vmatpush3.bf16.msra.mxu1 %v20121_v60  ;;  %v1273_v12 = vmax.f32 %v1201_v37, %v1257_v5  ;;  %v1258_v24 = vmul.f32 0.2, %v1204_v3 }
 0x13b   :  { %17686 = vmatmul.mubr.bf16.gmra.mrb[140].mxu0 %v21572_v35  ;;  %v1504_v59 = vmax.f32 %v1432_v10, %v1488_v23  ;;  %v1489_v40 = vmul.f32 0.2, %v1435_v54  ;;  %17987 = vmatprep.subr.bf16.mxu1 %v20123_v57  ;;  %v1271_v1 = vmax.f32 %v1193_v50, %v1255_v56  ;;  %v1256_v21 = vmul.f32 0.2, %v1196_v15 }
 0x13c   :  { %17702 = vmatpush3.bf16.msra.mxu0 %v20110_v8  ;;  %v25016_v32 = vmov 0.0|0.0   ;;  %v1502_v60 = vmax.f32 %v1424_v63, %v1486_v27  ;;  %v1487_v37 = vmul.f32 0.2, %v1427_v31  ;;  %v21800_v5 = vpack.c.bf16 %v1055_v61, %v1053_v51  ;;  %v20127_v27 = vld [vmem:[%s24831_s2 + $0x38] sm:$0xff]  }
 0x13d   :  { %17705 = vmatprep.mubr.bf16.mxu0 %v25016_v32  ;;  %17703 = vmatprep.subr.bf16.mxu0 %v20112_v26  ;;  %v21804_v10 = vmax.f32 %v1204_v3, %v1258_v24  ;;  %v17295_v35 = vpop.f32.mrb[36].mxu0  ;;  %v21806_v18 = vmax.f32 %v1435_v54, %v1489_v40  ;;  %v17327_v16 = vpop.f32.mrb[36].mxu1  ;;  %v21813_v8 = vpack.c.bf16 %v1273_v12, %v1271_v1  ;;  %v20116_v40 = vld [vmem:[%s24831_s2 + $0x88] sm:$0xff]  }
 0x13e   :  { %25017 = vst [vmem:[#allocation41_spill] sm:$0xff] %v21800_v5  ;;  %v21808_v42 = vpack.c.bf16 %v1504_v59, %v1502_v60  ;;  %17988 = vmatpush3.bf16.msra.mxu1 %v20123_v57  ;;  %v21815_v61 = vmax.f32 %v1196_v15, %v1256_v21  ;;  %v1217_v51 = vadd.f32 %v21773_v55, %v17295_v35  ;;  %v1208_v50 = vpop.f32.mrb[37].mxu0  ;;  %v1439_v63 = vpop.f32.mrb[37].mxu1 }
 0x13f   :  { %25018 = vst [vmem:[#allocation42_spill] sm:$0xff] %v21804_v10  ;;  %25020 = vst [vmem:[#allocation44_spill] sm:$0xff] %v21813_v8  ;;  %v1448_v24 = vadd.f32 %v17327_v16, %v21736_v4  ;;  %17989 = vmatprep.subr.bf16.mxu1 %v20125_v62  ;;  %v25021_v57 = vmax.f32 %v21726_v22, %v21739_v47  ;;  %v1209_v12 = vadd.f32 %v21773_v55, %v1208_v50  ;;  %v17296_v21 = vpop.f32.mrb[38].mxu0  ;;  %v17328_v3 = vpop.f32.mrb[38].mxu1 }
 0x140   :  { %25019 = vst [vmem:[#allocation43_spill] sm:$0xff] %v21808_v42  ;;  %17704 = vmatpush3.bf16.msra.mxu0 %v20112_v26  ;;  %v21829_v35 = vmax.f32 %v1427_v31, %v1487_v37  ;;  %v1440_v16 = vadd.f32 %v21736_v4, %v1439_v63  ;;  %17969 = vmatprep.mubr.bf16.mxu1 %v21808_v42  ;;  %v1261_v56 = vmul.f32 0.2, %v1217_v51  ;;  %v1211_v59 = vpop.f32.mrb[39].mxu0  ;;  %v1442_v22 = vpop.f32.mrb[39].mxu1 }
 0x141   :  { %v21826_v54 = vpack.c.bf16 %v25021_v57, %v21768_v14  ;;  %v1220_v15 = vadd.f32 %v21773_v55, %v17296_v21  ;;  %17721 = vmatprep.subr.bf16.mxu0 %v20114_v0  ;;  %v1492_v1 = vmul.f32 0.2, %v1448_v24  ;;  %v1451_v47 = vadd.f32 %v17328_v3, %v21736_v4  ;;  %v20118_v21 = vld [vmem:[%s24831_s2 + $0x90] sm:$0xff]   ;;  %v21844_v3 = vld [vmem:[%s24831_s2 + $0x80] sm:$0xff]  }
 0x142   :  { %v1259_v60 = vmul.f32 0.2, %v1209_v12  ;;  %v1212_v50 = vadd.f32 %v21773_v55, %v1211_v59  ;;  %v1490_v26 = vmul.f32 0.2, %v1440_v16  ;;  %v1443_v31 = vadd.f32 %v21736_v4, %v1442_v22  ;;  %17990 = vmatpush3.bf16.msra.mxu1 %v20125_v62 }
 0x143   :  { %25022 = vst [vmem:[#allocation45_spill] sm:$0xff] %v21826_v54  ;;  %v1277_v37 = vmax.f32 %v1217_v51, %v1261_v56  ;;  %v1262_v63 = vmul.f32 0.2, %v1220_v15  ;;  %17706 = vmatmul.mubr.bf16.vlgmr.msra.gmra.mrb[128].mxu0 %v25016_v32  ;;  %v1508_v57 = vmax.f32 %v1448_v24, %v1492_v1  ;;  %v1493_v23 = vmul.f32 0.2, %v1451_v47  ;;  %17991 = vmatprep.subr.bf16.mxu1 %v20127_v27 }
 0x144   :  { %v1275_v59 = vmax.f32 %v1209_v12, %v1259_v60  ;;  %v1260_v42 = vmul.f32 0.2, %v1212_v50  ;;  %17722 = vmatpush3.bf16.msra.mxu0 %v20114_v0  ;;  %v1506_v62 = vmax.f32 %v1440_v16, %v1490_v26  ;;  %v1491_v51 = vmul.f32 0.2, %v1443_v31  ;;  %17709 = vmatprep.mubr.bf16.mxu0 %v25016_v32 }
 0x145   :  { %v21847_v56 = vmax.f32 %v1220_v15, %v1262_v63  ;;  %17723 = vmatprep.subr.bf16.mxu0 %v20116_v40  ;;  %v24846_v24 = vmov 0.0   ;;  %v21855_v22 = vpack.c.bf16 %v21806_v18, %v21829_v35  ;;  %v17299_v0 = vpop.f32.mrb[40].mxu0  ;;  %v21861_v16 = vmax.f32 %v1451_v47, %v1493_v23  ;;  %v17331_v60 = vpop.f32.mrb[40].mxu1 }
 0x146   :  { %v21851_v1 = vpack.c.bf16 %v21377_v38, %v24846_v24  ;;  %v21857_v54 = vpack.c.bf16 %v1277_v37, %v1275_v59  ;;  %v21859_v12 = vmax.f32 %v1212_v50, %v1260_v42  ;;  %v21863_v15 = vpack.c.bf16 %v1508_v57, %v1506_v62  ;;  %17992 = vmatpush3.bf16.msra.mxu1 %v20127_v27  ;;  %v1224_v63 = vpop.f32.mrb[41].mxu0  ;;  %v1455_v8 = vpop.f32.mrb[41].mxu1  ;;  %v20120_v37 = vld [vmem:[%s24831_s2 + $0x98] sm:$0xff]  }
 0x147   :  { %25024 = vst [vmem:[#allocation47_spill] sm:$0xff] %v21855_v22  ;;  %v1233_v26 = vadd.f32 %v21773_v55, %v17299_v0  ;;  %v1507_v38 = vmax.f32 %v1443_v31, %v1491_v51  ;;  %v1464_v24 = vadd.f32 %v17331_v60, %v21736_v4  ;;  %18009 = vmatprep.subr.bf16.mxu1 %v21844_v3  ;;  %v17300_v50 = vpop.f32.mrb[42].mxu0  ;;  %v17332_v57 = vpop.f32.mrb[42].mxu1 }
 0x148   :  { %25023 = vst [vmem:[#allocation46_spill] sm:$0xff] %v21851_v1  ;;  %25025 = vst [vmem:[#allocation48_spill] sm:$0xff] %v21857_v54  ;;  %v1225_v47 = vadd.f32 %v21773_v55, %v1224_v63  ;;  %17724 = vmatpush3.bf16.msra.mxu0 %v20116_v40  ;;  %v1456_v31 = vadd.f32 %v21736_v4, %v1455_v8  ;;  %v1236_v62 = vadd.f32 %v21773_v55, %v17300_v50  ;;  %v1227_v51 = vpop.f32.mrb[43].mxu0  ;;  %v1458_v42 = vpop.f32.mrb[43].mxu1 }
 0x149   :  { %25026 = vst [vmem:[#allocation49_spill] sm:$0xff] %v21859_v12  ;;  %25027 = vst [vmem:[#allocation50_spill] sm:$0xff] %v21863_v15  ;;  %v1265_v59 = vmul.f32 0.2, %v1233_v26  ;;  %v1496_v0 = vmul.f32 0.2, %v1464_v24  ;;  %17725 = vmatprep.subr.bf16.mxu0 %v20118_v21  ;;  %v1467_v60 = vadd.f32 %v17332_v57, %v21736_v4  ;;  %17970 = vmatmul.mubr.bf16.gmra.mrb[136].mxu1 %v21863_v15 }
 0x14a   :  { %v1263_v23 = vmul.f32 0.2, %v1225_v47  ;;  %v1228_v27 = vadd.f32 %v21773_v55, %v1227_v51  ;;  %v1494_v63 = vmul.f32 0.2, %v1456_v31  ;;  %v1459_v40 = vadd.f32 %v21736_v4, %v1458_v42  ;;  %v20122_v12 = vld [vmem:[%s24831_s2 + $0xa0] sm:$0xff]  }
 0x14b   :  { %v1281_v54 = vmax.f32 %v1233_v26, %v1265_v59  ;;  %v1266_v8 = vmul.f32 0.2, %v1236_v62  ;;  %v1512_v10 = vmax.f32 %v1464_v24, %v1496_v0  ;;  %17710 = vmatmul.mubr.bf16.gmra.mrb[132].mxu0 %v25016_v32  ;;  %v1497_v50 = vmul.f32 0.2, %v1467_v60 }
 0x14c   :  { %v1279_v57 = vmax.f32 %v1225_v47, %v1263_v23  ;;  %v1264_v33 = vmul.f32 0.2, %v1228_v27  ;;  %v1510_v14 = vmax.f32 %v1456_v31, %v1494_v63  ;;  %17713 = vmatprep.mubr.bf16.mxu0 %v21851_v1  ;;  %17726 = vmatpush3.bf16.msra.mxu0 %v20118_v21  ;;  %v1495_v51 = vmul.f32 0.2, %v1459_v40 }
 0x14d   :  { %17727 = vmatprep.subr.bf16.mxu0 %v20120_v37  ;;  %v25028_v15 = vmov 0.0   ;;  %v21894_v24 = vpack.c.bf16 %v1507_v38, %v21806_v18  ;;  %v21897_v42 = vpack.c.bf16 %v21861_v16, %v1507_v38  ;;  %v21899_v59 = vmax.f32 %v1236_v62, %v1266_v8  ;;  %v17303_v47 = vpop.f32.mrb[44].mxu0  ;;  %v17335_v31 = vpop.f32.mrb[44].mxu1  ;;  %v20124_v38 = vld [vmem:[%s24831_s2 + $0xa8] sm:$0xff]  }
 0x14e   :  { %v21891_v26 = vpack.c.bf16 %v21618_v30, %v25028_v15  ;;  %v1511_v23 = vmax.f32 %v1459_v40, %v1495_v51  ;;  %v21901_v0 = vpack.c.bf16 %v1512_v10, %v1510_v14  ;;  %v21903_v21 = vpack.c.bf16 %v1281_v54, %v1279_v57  ;;  %v1240_v9 = vpop.f32.mrb[45].mxu0  ;;  %v1471_v28 = vpop.f32.mrb[45].mxu1 }
 0x14f   :  { %25030 = vst [vmem:[#allocation52_spill] sm:$0xff] %v21897_v42  ;;  %v21905_v63 = vmax.f32 %v1228_v27, %v1264_v33  ;;  %v1513_v1 = vmax.f32 %v1467_v60, %v1497_v50  ;;  %v1249_v30 = vadd.f32 %v21773_v55, %v17303_v47  ;;  %v1480_v18 = vadd.f32 %v17335_v31, %v21736_v4  ;;  %v17304_v10 = vpop.f32.mrb[46].mxu0  ;;  %v17336_v33 = vpop.f32.mrb[46].mxu1 }
 0x150   :  { %25029 = vst [vmem:[#allocation51_spill] sm:$0xff] %v21891_v26  ;;  %25031 = vst [vmem:[#allocation53_spill] sm:$0xff] %v21901_v0  ;;  %v1241_v62 = vadd.f32 %v21773_v55, %v1240_v9  ;;  %v1472_v14 = vadd.f32 %v21736_v4, %v1471_v28  ;;  %17728 = vmatpush3.bf16.msra.mxu0 %v20120_v37  ;;  %17973 = vmatprep.mubr.bf16.mxu1 %v21901_v0  ;;  %v1243_v8 = vpop.f32.mrb[47].mxu0  ;;  %v1474_v57 = vpop.f32.mrb[47].mxu1 }
 0x151   :  { %25032 = vst [vmem:[#allocation54_spill] sm:$0xff] %v21903_v21  ;;  %v21916_v54 = vpack.c.bf16 %v1511_v23, %v21861_v16  ;;  %v1269_v27 = vmul.f32 0.2, %v1249_v30  ;;  %v1500_v60 = vmul.f32 0.2, %v1480_v18  ;;  %v1252_v40 = vadd.f32 %v21773_v55, %v17304_v10  ;;  %17729 = vmatprep.subr.bf16.mxu0 %v20122_v12  ;;  %v20126_v16 = vld [vmem:[%s24831_s2 + $0xb0] sm:$0xff]  }
 0x152   :  { %v1483_v50 = vadd.f32 %v17336_v33, %v21736_v4  ;;  %v1267_v9 = vmul.f32 0.2, %v1241_v62  ;;  %v1498_v51 = vmul.f32 0.2, %v1472_v14  ;;  %v1244_v28 = vadd.f32 %v21773_v55, %v1243_v8 }
 0x153   :  { %25033 = vst [vmem:[#allocation55_spill] sm:$0xff] %v21916_v54  ;;  %v1475_v37 = vadd.f32 %v21736_v4, %v1474_v57  ;;  %v1285_v47 = vmax.f32 %v1249_v30, %v1269_v27  ;;  %v1516_v31 = vmax.f32 %v1480_v18, %v1500_v60  ;;  %v1270_v0 = vmul.f32 0.2, %v1252_v40  ;;  %17714 = vmatmul.mubr.bf16.gmra.mrb[136].mxu0 %v21497_v6 }
 0x154   :  { %v1501_v10 = vmul.f32 0.2, %v1483_v50  ;;  %v1283_v21 = vmax.f32 %v1241_v62, %v1267_v9  ;;  %v1514_v39 = vmax.f32 %v1472_v14, %v1498_v51  ;;  %v1268_v33 = vmul.f32 0.2, %v1244_v28  ;;  %17717 = vmatprep.mubr.bf16.mxu0 %v21528_v34  ;;  %17730 = vmatpush3.bf16.msra.mxu0 %v20122_v12 }
 0x155   :  { %v1499_v2 = vmul.f32 0.2, %v1475_v37  ;;  %v1286_v55 = vmax.f32 %v1252_v40, %v1270_v0  ;;  %17731 = vmatprep.subr.bf16.mxu0 %v20124_v38  ;;  %v21927_v30 = vpack.c.bf16 %v1513_v1, %v1511_v23  ;;  %v17355_v60 = vpop.f32.mrb[48].mxu0 }
 0x156   :  { %v1517_v8 = vmax.f32 %v1483_v50, %v1501_v10  ;;  %v21931_v27 = vmax.f32 %v1244_v28, %v1268_v33  ;;  %v21933_v57 = vpack.c.bf16 %v1516_v31, %v1514_v39  ;;  %v21935_v14 = vpack.c.bf16 %v1285_v47, %v1283_v21  ;;  %v1654_v12 = vpop.f32.mrb[49].mxu0  ;;  %v20128_v28 = vld [vmem:[%s24831_s2 + $0xb8] sm:$0xff]   ;;  %v21960_v31 = vld [vmem:[%s24832_s3] ss:$0 sm:$0xff] }
 0x157   :  { %25034 = vst [vmem:[#allocation56_spill] sm:$0xff] %v21927_v30  ;;  %v1515_v62 = vmax.f32 %v1475_v37, %v1499_v2  ;;  %v1663_v9 = vadd.f32 %v17355_v60, %v21736_v4  ;;  %v1655_v23 = vadd.f32 %v21736_v4, %v1654_v12  ;;  %v17356_v40 = vpop.f32.mrb[50].mxu0 }
 0x158   :  { %25035 = vst [vmem:[#allocation57_spill] sm:$0xff] %v21933_v57  ;;  %25036 = vst [vmem:[#allocation58_spill] sm:$0xff] %v21935_v14  ;;  %17732 = vmatpush3.bf16.msra.mxu0 %v20124_v38  ;;  %17974 = vmatmul.mubr.bf16.gmra.mrb[140].mxu1 %v21933_v57  ;;  %v1666_v2 = vadd.f32 %v17356_v40, %v21736_v4  ;;  %v1657_v21 = vpop.f32.mrb[51].mxu0  ;;  %v21954_v37 = vpack.c.bf16 %v1286_v55, %v21931_v27  ;;  %v20130_v55 = vld [vmem:[%s24831_s2 + $0xc0] sm:$0xff]  }
 0x159   :  { %v21942_v50 = vpack.c.bf16 %v1515_v62, %v1513_v1  ;;  %v21944_v51 = vpack.c.bf16 %v1517_v8, %v1515_v62  ;;  %v1719_v39 = vmul.f32 0.2, %v1663_v9  ;;  %17733 = vmatprep.subr.bf16.mxu0 %v20126_v16  ;;  %17993 = vmatprep.mubr.bf16.mxu1 %v21891_v26  ;;  %v1717_v1 = vmul.f32 0.2, %v1655_v23 }
 0x15a   :  { %25039 = vst [vmem:[#allocation61_spill] sm:$0xff] %v21954_v37  ;;  %v1658_v47 = vadd.f32 %v21736_v4, %v1657_v21  ;;  %v1720_v33 = vmul.f32 0.2, %v1666_v2 }
 0x15b   :  { %25037 = vst [vmem:[#allocation59_spill] sm:$0xff] %v21942_v50  ;;  %25038 = vst [vmem:[#allocation60_spill] sm:$0xff] %v21944_v51  ;;  %v1735_v10 = vmax.f32 %v1663_v9, %v1719_v39  ;;  %17718 = vmatmul.mubr.bf16.gmra.mrb[140].mxu0 %v21588_v44  ;;  %v1733_v8 = vmax.f32 %v1655_v23, %v1717_v1  ;;  %v17387_v62 = vpop.f32.mrb[48].mxu1  ;;  %v20131_v23 = vld [vmem:[%s24831_s2 + $0x88] sm:$0xff]  }
 0x15c   :  { %v1718_v60 = vmul.f32 0.2, %v1658_v47  ;;  %17734 = vmatpush3.bf16.msra.mxu0 %v20126_v16  ;;  %17737 = vmatprep.mubr.bf16.mxu0 %v25016_v32  ;;  %v1894_v12 = vadd.f32 %v17387_v62, %v21960_v31  ;;  %v1885_v40 = vpop.f32.mrb[49].mxu1  ;;  %v21968_v21 = vmax.f32 %v1666_v2, %v1720_v33 }
 0x15d   :  { %17735 = vmatprep.subr.bf16.mxu0 %v20128_v28  ;;  %v17359_v9 = vpop.f32.mrb[52].mxu0  ;;  %v1886_v16 = vadd.f32 %v21960_v31, %v1885_v40  ;;  %v17388_v39 = vpop.f32.mrb[50].mxu1  ;;  %v21974_v1 = vpack.c.bf16 %v1735_v10, %v1733_v8  ;;  %v20132_v10 = vld [vmem:[%s24831_s2 + $0xc8] sm:$0xff]  }
 0x15e   :  { %25040 = vst [vmem:[#allocation62_spill] sm:$0xff] %v21968_v21  ;;  %v21976_v0 = vmax.f32 %v1658_v47, %v1718_v60  ;;  %v1679_v38 = vadd.f32 %v17359_v9, %v21736_v4  ;;  %v1670_v18 = vpop.f32.mrb[53].mxu0  ;;  %v1950_v57 = vmul.f32 0.2, %v1894_v12  ;;  %v1897_v62 = vadd.f32 %v17388_v39, %v21960_v31  ;;  %v1888_v2 = vpop.f32.mrb[51].mxu1 }
 0x15f   :  { %25041 = vst [vmem:[#allocation63_spill] sm:$0xff] %v21974_v1  ;;  %v1671_v33 = vadd.f32 %v21736_v4, %v1670_v18  ;;  %v17360_v26 = vpop.f32.mrb[54].mxu0  ;;  %v1948_v8 = vmul.f32 0.2, %v1886_v16  ;;  %v1889_v47 = vadd.f32 %v21960_v31, %v1888_v2  ;;  %v20133_v18 = vld [vmem:[%s24831_s2 + $0x90] sm:$0xff]  }
 0x160   :  { %17736 = vmatpush3.bf16.msra.mxu0 %v20128_v28  ;;  %17994 = vmatmul.mubr.bf16.vlgmr.msra.gmra.mrb[128].mxu1 %v21678_v58  ;;  %v1723_v60 = vmul.f32 0.2, %v1679_v38  ;;  %v1682_v40 = vadd.f32 %v17360_v26, %v21736_v4  ;;  %v1673_v9 = vpop.f32.mrb[55].mxu0  ;;  %v1966_v28 = vmax.f32 %v1894_v12, %v1950_v57  ;;  %v1951_v39 = vmul.f32 0.2, %v1897_v62 }
 0x161   :  { %18010 = vmatpush3.bf16.msra.mxu1 %v21844_v3  ;;  %17753 = vmatprep.subr.bf16.mxu0 %v20130_v55  ;;  %v1721_v58 = vmul.f32 0.2, %v1671_v33  ;;  %v1674_v44 = vadd.f32 %v21736_v4, %v1673_v9  ;;  %v1964_v2 = vmax.f32 %v1886_v16, %v1948_v8  ;;  %v1949_v37 = vmul.f32 0.2, %v1889_v47 }
 0x162   :  { %18011 = vmatprep.subr.bf16.mxu1 %v20131_v23  ;;  %17997 = vmatprep.mubr.bf16.mxu1 %v21723_v52  ;;  %v1739_v34 = vmax.f32 %v1679_v38, %v1723_v60  ;;  %v1724_v26 = vmul.f32 0.2, %v1682_v40  ;;  %v21994_v3 = vmax.f32 %v1897_v62, %v1951_v39  ;;  %v20134_v38 = vld [vmem:[%s24831_s2 + $0xd0] sm:$0xff]   ;;  %v22008_v16 = vpack.c.bf16 %v21829_v35, %v25028_v15 }
 0x163   :  { %17738 = vmatmul.mubr.bf16.vlgmr.msra.gmra.mrb[128].mxu0 %v25016_v32  ;;  %v1737_v1 = vmax.f32 %v1671_v33, %v1721_v58  ;;  %v1722_v57 = vmul.f32 0.2, %v1674_v44  ;;  %v21999_v12 = vmax.f32 %v1889_v47, %v1949_v37  ;;  %v17391_v9 = vpop.f32.mrb[52].mxu1  ;;  %v22001_v52 = vpack.c.bf16 %v1966_v28, %v1964_v2 }
 0x164   :  { %17754 = vmatpush3.bf16.msra.mxu0 %v20130_v55  ;;  %17741 = vmatprep.mubr.bf16.mxu0 %v25016_v32  ;;  %v1910_v58 = vadd.f32 %v17391_v9, %v21960_v31  ;;  %v1901_v55 = vpop.f32.mrb[53].mxu1  ;;  %v22011_v62 = vmax.f32 %v1682_v40, %v1724_v26 }
 0x165   :  { %25042 = vst [vmem:[#allocation64_spill] sm:$0xff] %v21999_v12  ;;  %25043 = vst [vmem:[#allocation65_spill] sm:$0xff] %v22001_v52  ;;  %18012 = vmatpush3.bf16.msra.mxu1 %v20131_v23  ;;  %17755 = vmatprep.subr.bf16.mxu0 %v20132_v10  ;;  %v22013_v37 = vmax.f32 %v1674_v44, %v1722_v57  ;;  %v17363_v33 = vpop.f32.mrb[56].mxu0  ;;  %v20135_v23 = vld [vmem:[%s24831_s2 + $0x98] sm:$0xff]   ;;  %v1902_v8 = vadd.f32 %v21960_v31, %v1901_v55  ;;  %v17392_v47 = vpop.f32.mrb[54].mxu1 }
 0x166   :  { %18013 = vmatprep.subr.bf16.mxu1 %v20133_v18  ;;  %v22019_v60 = vpack.c.bf16 %v1739_v34, %v1737_v1  ;;  %v1695_v35 = vadd.f32 %v17363_v33, %v21736_v4  ;;  %v1686_v28 = vpop.f32.mrb[57].mxu0  ;;  %v1954_v39 = vmul.f32 0.2, %v1910_v58  ;;  %v1913_v40 = vadd.f32 %v17392_v47, %v21960_v31  ;;  %v1904_v2 = vpop.f32.mrb[55].mxu1  ;;  %v20136_v34 = vld [vmem:[%s24831_s2 + $0xd8] sm:$0xff]  }
 0x167   :  { %v22025_v44 = vpack.c.bf16 %v21994_v3, %v21999_v12  ;;  %v1687_v26 = vadd.f32 %v21736_v4, %v1686_v28  ;;  %v17364_v57 = vpop.f32.mrb[58].mxu0  ;;  %v1952_v9 = vmul.f32 0.2, %v1902_v8  ;;  %v1905_v55 = vadd.f32 %v21960_v31, %v1904_v2 }
 0x168   :  { %25044 = vst [vmem:[#allocation66_spill] sm:$0xff] %v22019_v60  ;;  %17756 = vmatpush3.bf16.msra.mxu0 %v20132_v10  ;;  %17998 = vmatmul.mubr.bf16.gmra.mrb[132].mxu1 %v21786_v41  ;;  %v1727_v33 = vmul.f32 0.2, %v1695_v35  ;;  %v1698_v47 = vadd.f32 %v17364_v57, %v21736_v4  ;;  %v1689_v6 = vpop.f32.mrb[59].mxu0  ;;  %v20137_v10 = vld [vmem:[%s24831_s2 + $0xa0] sm:$0xff]   ;;  %v1970_v28 = vmax.f32 %v1910_v58, %v1954_v39 }
 0x169   :  { %25045 = vst [vmem:[#allocation67_spill] sm:$0xff] %v22025_v44  ;;  %18014 = vmatpush3.bf16.msra.mxu1 %v20133_v18  ;;  %17757 = vmatprep.subr.bf16.mxu0 %v20134_v38  ;;  %v1955_v44 = vmul.f32 0.2, %v1913_v40  ;;  %v1725_v52 = vmul.f32 0.2, %v1687_v26  ;;  %v1690_v12 = vadd.f32 %v21736_v4, %v1689_v6  ;;  %v1968_v1 = vmax.f32 %v1902_v8, %v1952_v9 }
 0x16a   :  { %18015 = vmatprep.subr.bf16.mxu1 %v20135_v23  ;;  %18001 = vmatprep.mubr.bf16.mxu1 %v22008_v16  ;;  %v1953_v2 = vmul.f32 0.2, %v1905_v55  ;;  %v1743_v41 = vmax.f32 %v1695_v35, %v1727_v33  ;;  %v1728_v60 = vmul.f32 0.2, %v1698_v47  ;;  %v20138_v35 = vld [vmem:[%s24831_s2 + $0xe0] sm:$0xff]  }
 0x16b   :  { %17742 = vmatmul.mubr.bf16.gmra.mrb[132].mxu0 %v25016_v32  ;;  %v22042_v18 = vmax.f32 %v1913_v40, %v1955_v44  ;;  %v1741_v14 = vmax.f32 %v1687_v26, %v1725_v52  ;;  %v1726_v58 = vmul.f32 0.2, %v1690_v12  ;;  %v17395_v39 = vpop.f32.mrb[56].mxu1  ;;  %v22047_v21 = vpack.c.bf16 %v1970_v28, %v1968_v1 }
 0x16c   :  { %17745 = vmatprep.mubr.bf16.mxu0 %v21404_v53  ;;  %17758 = vmatpush3.bf16.msra.mxu0 %v20134_v38  ;;  %v1969_v6 = vmax.f32 %v1905_v55, %v1953_v2  ;;  %v22049_v8 = vmax.f32 %v1698_v47, %v1728_v60  ;;  %v1926_v40 = vadd.f32 %v17395_v39, %v21960_v31  ;;  %v1917_v44 = vpop.f32.mrb[57].mxu1  ;;  %v20139_v38 = vld [vmem:[%s24831_s2 + $0xa8] sm:$0xff]  }
 0x16d   :  { %25046 = vst [vmem:[#allocation68_spill] sm:$0xff] %v22047_v21  ;;  %18016 = vmatpush3.bf16.msra.mxu1 %v20135_v23  ;;  %17759 = vmatprep.subr.bf16.mxu0 %v20136_v34  ;;  %v22055_v52 = vmax.f32 %v1690_v12, %v1726_v58  ;;  %v17367_v26 = vpop.f32.mrb[60].mxu0  ;;  %v1918_v60 = vadd.f32 %v21960_v31, %v1917_v44  ;;  %v17396_v1 = vpop.f32.mrb[58].mxu1 }
 0x16e   :  { %18017 = vmatprep.subr.bf16.mxu1 %v20137_v10  ;;  %v22061_v23 = vpack.c.bf16 %v1743_v41, %v1741_v14  ;;  %v22064_v9 = vpack.c.bf16 %v1969_v6, %v21994_v3  ;;  %v1711_v55 = vadd.f32 %v17367_v26, %v21736_v4  ;;  %v1702_v33 = vpop.f32.mrb[61].mxu0  ;;  %v1958_v47 = vmul.f32 0.2, %v1926_v40  ;;  %v1920_v28 = vpop.f32.mrb[59].mxu1  ;;  %v20140_v41 = vld [vmem:[%s24831_s2 + $0xe8] sm:$0xff]  }
 0x16f   :  { %v1929_v12 = vadd.f32 %v17396_v1, %v21960_v31  ;;  %v22069_v2 = vpack.c.bf16 %v22042_v18, %v1969_v6  ;;  %v1703_v58 = vadd.f32 %v21736_v4, %v1702_v33  ;;  %v17368_v39 = vpop.f32.mrb[62].mxu0  ;;  %v1956_v3 = vmul.f32 0.2, %v1918_v60 }
 0x170   :  { %25047 = vst [vmem:[#allocation69_spill] sm:$0xff] %v22064_v9  ;;  %17760 = vmatpush3.bf16.msra.mxu0 %v20136_v34  ;;  %18002 = vmatmul.mubr.bf16.gmra.mrb[136].mxu1 %v21894_v24  ;;  %v1921_v44 = vadd.f32 %v21960_v31, %v1920_v28  ;;  %v1731_v26 = vmul.f32 0.2, %v1711_v55  ;;  %v22080_v6 = vadd.f32 %v17368_v39, %v21736_v4  ;;  %v1705_v1 = vpop.f32.mrb[63].mxu0  ;;  %v20141_v34 = vld [vmem:[%s24831_s2 + $0xb0] sm:$0xff]  }
 0x171   :  { %25048 = vst [vmem:[#allocation70_spill] sm:$0xff] %v22069_v2  ;;  %18018 = vmatpush3.bf16.msra.mxu1 %v20137_v10  ;;  %17761 = vmatprep.subr.bf16.mxu0 %v20138_v35  ;;  %v1974_v33 = vmax.f32 %v1926_v40, %v1958_v47  ;;  %v1959_v57 = vmul.f32 0.2, %v1929_v12  ;;  %v1729_v32 = vmul.f32 0.2, %v1703_v58  ;;  %v1706_v2 = vadd.f32 %v21736_v4, %v1705_v1 }
 0x172   :  { %18019 = vmatprep.subr.bf16.mxu1 %v20139_v38  ;;  %18005 = vmatprep.mubr.bf16.mxu1 %v21916_v54  ;;  %v1972_v28 = vmax.f32 %v1918_v60, %v1956_v3  ;;  %v1957_v14 = vmul.f32 0.2, %v1921_v44  ;;  %v1747_v21 = vmax.f32 %v1711_v55, %v1731_v26  ;;  %v1732_v39 = vmul.f32 0.2, %v22080_v6 }
 0x173   :  { %17746 = vmatmul.mubr.bf16.gmra.mrb[136].mxu0 %v21500_v7  ;;  %v22089_v10 = vmax.f32 %v1929_v12, %v1959_v57  ;;  %v1745_v40 = vmax.f32 %v1703_v58, %v1729_v32  ;;  %v1730_v47 = vmul.f32 0.2, %v1706_v2  ;;  %v17399_v9 = vpop.f32.mrb[60].mxu1  ;;  %v4437_v57 = vpack.c.bf16 %v21397_v48, %v25028_v15  ;;  %v20143_v58 = vld [vmem:[%s24831_s2 + $0xb8] sm:$0xff]  }
 0x174   :  { %17749 = vmatprep.mubr.bf16.mxu0 %v21531_v36  ;;  %17762 = vmatpush3.bf16.msra.mxu0 %v20138_v35  ;;  %v1973_v1 = vmax.f32 %v1921_v44, %v1957_v14  ;;  %v22094_v54 = vpack.c.bf16 %v1974_v33, %v1972_v28  ;;  %v1748_v60 = vmax.f32 %v22080_v6, %v1732_v39  ;;  %v1933_v12 = vpop.f32.mrb[61].mxu1  ;;  %v20142_v35 = vld [vmem:[%s24831_s2 + $0xf0] sm:$0xff]  }
 0x175   :  { %18020 = vmatpush3.bf16.msra.mxu1 %v20139_v38  ;;  %17763 = vmatprep.subr.bf16.mxu0 %v20140_v41  ;;  %v1942_v55 = vadd.f32 %v17399_v9, %v21960_v31  ;;  %v22100_v3 = vmax.f32 %v1706_v2, %v1730_v47  ;;  %v17419_v32 = vpop.f32.mrb[64].mxu0  ;;  %v1934_v38 = vadd.f32 %v21960_v31, %v1933_v12  ;;  %v17400_v14 = vpop.f32.mrb[62].mxu1  ;;  %v22122_v47 = vld [vmem:[%s24832_s3] ss:$0 sm:$0xff] }
 0x176   :  { %25049 = vst [vmem:[#allocation71_spill] sm:$0xff] %v22094_v54  ;;  %18021 = vmatprep.subr.bf16.mxu1 %v20141_v34  ;;  %v22109_v44 = vpack.c.bf16 %v1747_v21, %v1745_v40  ;;  %v22112_v9 = vpack.c.bf16 %v1973_v1, %v22042_v18  ;;  %v2125_v2 = vadd.f32 %v17419_v32, %v21736_v4  ;;  %v2116_v26 = vpop.f32.mrb[65].mxu0  ;;  %v1936_v28 = vpop.f32.mrb[63].mxu1  ;;  %v20144_v4 = vld [vmem:[%s24831_s2 + $0xf8] sm:$0xff]  }
 0x177   :  { %v1962_v6 = vmul.f32 0.2, %v1942_v55  ;;  %v1945_v33 = vadd.f32 %v17400_v14, %v21960_v31  ;;  %v22117_v39 = vpack.c.bf16 %v22089_v10, %v1973_v1  ;;  %v2117_v21 = vadd.f32 %v22122_v47, %v2116_v26  ;;  %v17420_v40 = vpop.f32.mrb[66].mxu0 }
 0x178   :  { %25050 = vst [vmem:[#allocation72_spill] sm:$0xff] %v22112_v9  ;;  %17764 = vmatpush3.bf16.msra.mxu0 %v20140_v41  ;;  %18006 = vmatmul.mubr.bf16.gmra.mrb[140].mxu1 %v21942_v50  ;;  %v1960_v1 = vmul.f32 0.2, %v1934_v38  ;;  %v1937_v12 = vadd.f32 %v21960_v31, %v1936_v28  ;;  %v2181_v32 = vmul.f32 0.2, %v2125_v2  ;;  %v2128_v14 = vadd.f32 %v22122_v47, %v17420_v40  ;;  %v2119_v53 = vpop.f32.mrb[67].mxu0 }
 0x179   :  { %25051 = vst [vmem:[#allocation73_spill] sm:$0xff] %v22117_v39  ;;  %18022 = vmatpush3.bf16.msra.mxu1 %v20141_v34  ;;  %18025 = vmatprep.mubr.bf16.mxu1 %v21640_v46  ;;  %v20145_v41 = vld [vmem:[%s24831_s2 + $0xc0] sm:$0xff]   ;;  %v1978_v26 = vmax.f32 %v1942_v55, %v1962_v6  ;;  %v1963_v39 = vmul.f32 0.2, %v1945_v33  ;;  %v2179_v54 = vmul.f32 0.2, %v2117_v21  ;;  %v2120_v36 = vadd.f32 %v22122_v47, %v2119_v53 }
 0x17a   :  { %17765 = vmatprep.subr.bf16.mxu0 %v20142_v35  ;;  %18023 = vmatprep.subr.bf16.mxu1 %v20143_v58  ;;  %v1976_v18 = vmax.f32 %v1934_v38, %v1960_v1  ;;  %v1961_v28 = vmul.f32 0.2, %v1937_v12  ;;  %v2197_v7 = vmax.f32 %v2125_v2, %v2181_v32  ;;  %v2182_v9 = vmul.f32 0.2, %v2128_v14  ;;  %v20146_v53 = vld [vmem:[%s24831_s2 + $0x100] sm:$0xff]  }
 0x17b   :  { %17750 = vmatmul.mubr.bf16.gmra.mrb[140].mxu0 %v21590_v45  ;;  %v1979_v34 = vmax.f32 %v1945_v33, %v1963_v39  ;;  %v22140_v40 = vpack.c.bf16 %v1748_v60, %v22100_v3  ;;  %v2195_v46 = vmax.f32 %v2117_v21, %v2179_v54  ;;  %v2180_v50 = vmul.f32 0.2, %v2120_v36  ;;  %v17451_v6 = vpop.f32.mrb[64].mxu1  ;;  %v20147_v60 = vld [vmem:[%s24831_s2 + $0xc8] sm:$0xff]  }
 0x17c   :  { %17766 = vmatpush3.bf16.msra.mxu0 %v20142_v35  ;;  %17769 = vmatprep.mubr.bf16.mxu0 %v4437_v57  ;;  %v1977_v55 = vmax.f32 %v1937_v12, %v1961_v28  ;;  %v22145_v38 = vpack.c.bf16 %v1978_v26, %v1976_v18  ;;  %v22147_v2 = vmax.f32 %v2128_v14, %v2182_v9  ;;  %v2347_v35 = vpop.f32.mrb[65].mxu1 }
 0x17d   :  { %18024 = vmatpush3.bf16.msra.mxu1 %v20143_v58  ;;  %17767 = vmatprep.subr.bf16.mxu0 %v20144_v4  ;;  %v2356_v54 = vadd.f32 %v17451_v6, %v21960_v31  ;;  %v22153_v57 = vmax.f32 %v2120_v36, %v2180_v50  ;;  %v17423_v33 = vpop.f32.mrb[68].mxu0  ;;  %v2348_v39 = vadd.f32 %v21960_v31, %v2347_v35  ;;  %v17452_v21 = vpop.f32.mrb[66].mxu1 }
 0x17e   :  { %25052 = vst [vmem:[#allocation74_spill] sm:$0xff] %v22145_v38  ;;  %25053 = vst [vmem:[#allocation75_spill] sm:$0xff] %v22147_v2  ;;  %18041 = vmatprep.subr.bf16.mxu1 %v20145_v41  ;;  %v22157_v18 = vpack.c.bf16 %v1977_v55, %v22089_v10  ;;  %v22159_v9 = vpack.c.bf16 %v1979_v34, %v1977_v55  ;;  %v2141_v58 = vadd.f32 %v22122_v47, %v17423_v33  ;;  %v2132_v1 = vpop.f32.mrb[69].mxu0  ;;  %v2350_v14 = vpop.f32.mrb[67].mxu1  ;;  %v20148_v10 = vld [vmem:[%s24831_s2 + $0x108] sm:$0xff]  }
 0x17f   :  { %25054 = vst [vmem:[#allocation76_spill] sm:$0xff] %v22153_v57  ;;  %v2412_v12 = vmul.f32 0.2, %v2356_v54  ;;  %v2359_v32 = vadd.f32 %v17452_v21, %v21960_v31  ;;  %v22163_v26 = vpack.c.bf16 %v2197_v7, %v2195_v46  ;;  %v2133_v36 = vadd.f32 %v22122_v47, %v2132_v1  ;;  %v17424_v50 = vpop.f32.mrb[70].mxu0  ;;  %v20149_v7 = vld [vmem:[%s24831_s2 + $0xd0] sm:$0xff]  }
 0x180   :  { %25055 = vst [vmem:[#allocation77_spill] sm:$0xff] %v22157_v18  ;;  %25056 = vst [vmem:[#allocation78_spill] sm:$0xff] %v22159_v9  ;;  %17768 = vmatpush3.bf16.msra.mxu0 %v20144_v4  ;;  %18026 = vmatmul.mubr.bf16.vlgmr.msra.gmra.mrb[128].mxu1 %v21681_v29  ;;  %v2410_v28 = vmul.f32 0.2, %v2348_v39  ;;  %v2351_v34 = vadd.f32 %v21960_v31, %v2350_v14  ;;  %v2185_v55 = vmul.f32 0.2, %v2141_v58 }
 0x181   :  { %25057 = vst [vmem:[#allocation79_spill] sm:$0xff] %v22163_v26  ;;  %v2144_v6 = vadd.f32 %v22122_v47, %v17424_v50  ;;  %v2135_v35 = vpop.f32.mrb[71].mxu0  ;;  %18029 = vmatprep.mubr.bf16.mxu1 %v21755_v11  ;;  %18042 = vmatpush3.bf16.msra.mxu1 %v20145_v41  ;;  %v2428_v46 = vmax.f32 %v2356_v54, %v2412_v12  ;;  %v2413_v4 = vmul.f32 0.2, %v2359_v32  ;;  %v2183_v33 = vmul.f32 0.2, %v2133_v36 }
 0x182   :  { %v2136_v21 = vadd.f32 %v22122_v47, %v2135_v35  ;;  %17785 = vmatprep.subr.bf16.mxu0 %v20146_v53  ;;  %18043 = vmatprep.subr.bf16.mxu1 %v20147_v60  ;;  %v2426_v1 = vmax.f32 %v2348_v39, %v2410_v28  ;;  %v2411_v14 = vmul.f32 0.2, %v2351_v34  ;;  %v2201_v26 = vmax.f32 %v2141_v58, %v2185_v55  ;;  %v20150_v39 = vld [vmem:[%s24831_s2 + $0x110] sm:$0xff]   ;;  %v25087_v18 = vld [vmem:[#allocation6_spill] sm:$0xff] }
 0x183   :  { %v2186_v9 = vmul.f32 0.2, %v2144_v6  ;;  %v25058_v50 = vpack.c.bf16 %v21434_v17, %v21387_v43  ;;  %v22180_v41 = vmax.f32 %v2359_v32, %v2413_v4  ;;  %v2199_v54 = vmax.f32 %v2133_v36, %v2183_v33  ;;  %v17455_v28 = vpop.f32.mrb[68].mxu1  ;;  %v20151_v36 = vld [vmem:[%s24831_s2 + $0xd8] sm:$0xff]   ;;  %v25077_v29 = vld [vmem:[#allocation27_spill] sm:$0xff] }
 0x184   :  { %v2184_v12 = vmul.f32 0.2, %v2136_v21  ;;  %v25059_v35 = vpack.c.bf16 %v21517_v20, %v21427_v13  ;;  %v22190_v58 = vmax.f32 %v2351_v34, %v2411_v14  ;;  %v22192_v55 = vpack.c.bf16 %v2428_v46, %v2426_v1 }
 0x185   :  { %17770 = vmatmul.mubr.bf16.vlgmr.msra.gmra.mrb[128].mxu0 %v25058_v50  ;;  %v22194_v32 = vmax.f32 %v2144_v6, %v2186_v9  ;;  %18044 = vmatpush3.bf16.msra.mxu1 %v20147_v60  ;;  %v2372_v4 = vadd.f32 %v17455_v28, %v21960_v31  ;;  %v22200_v33 = vpack.c.bf16 %v2201_v26, %v2199_v54  ;;  %v17427_v34 = vpop.f32.mrb[72].mxu0  ;;  %v20153_v54 = vld [vmem:[%s24831_s2 + $0xe0] sm:$0xff]  }
 0x186   :  { %17773 = vmatprep.mubr.bf16.mxu0 %v25059_v35  ;;  %17786 = vmatpush3.bf16.msra.mxu0 %v20146_v53  ;;  %25060 = vst [vmem:[#allocation80_spill] sm:$0xff] %v22190_v58  ;;  %25061 = vst [vmem:[#allocation81_spill] sm:$0xff] %v22192_v55  ;;  %v2363_v53 = vpop.f32.mrb[69].mxu1  ;;  %v22202_v50 = vmax.f32 %v2136_v21, %v2184_v12  ;;  %v4441_v46 = vpack.c.bf16 %v21634_v49, %v25028_v15  ;;  %v2148_v1 = vpop.f32.mrb[73].mxu0 }
 0x187   :  { %25062 = vst [vmem:[#allocation82_spill] sm:$0xff] %v22194_v32  ;;  %17787 = vmatprep.subr.bf16.mxu0 %v20148_v10  ;;  %25063 = vst [vmem:[#allocation83_spill] sm:$0xff] %v22200_v33  ;;  %18045 = vmatprep.subr.bf16.mxu1 %v20149_v7  ;;  %v2364_v9 = vadd.f32 %v21960_v31, %v2363_v53  ;;  %v17456_v60 = vpop.f32.mrb[70].mxu1  ;;  %v2157_v6 = vadd.f32 %v22122_v47, %v17427_v34  ;;  %v2416_v14 = vmul.f32 0.2, %v2372_v4  ;;  %v17428_v53 = vpop.f32.mrb[74].mxu0 }
 0x188   :  { %25064 = vst [vmem:[#allocation84_spill] sm:$0xff] %v22202_v50  ;;  %v2375_v35 = vadd.f32 %v17456_v60, %v21960_v31  ;;  %v2366_v28 = vpop.f32.mrb[71].mxu1  ;;  %v22211_v26 = vpack.c.bf16 %v22180_v41, %v22190_v58  ;;  %v2149_v12 = vadd.f32 %v22122_v47, %v2148_v1  ;;  %18030 = vmatmul.mubr.bf16.gmra.mrb[132].mxu1 %v21800_v5  ;;  %v20152_v34 = vld [vmem:[%s24831_s2 + $0x118] sm:$0xff]   ;;  %v2151_v57 = vpop.f32.mrb[75].mxu0 }
 0x189   :  { %v2414_v60 = vmul.f32 0.2, %v2364_v9  ;;  %v2189_v38 = vmul.f32 0.2, %v2157_v6  ;;  %v2160_v33 = vadd.f32 %v22122_v47, %v17428_v53  ;;  %18046 = vmatpush3.bf16.msra.mxu1 %v20149_v7  ;;  %v2432_v1 = vmax.f32 %v2372_v4, %v2416_v14  ;;  %18033 = vmatprep.mubr.bf16.mxu1 %v21855_v22 }
 0x18a   :  { %25065 = vst [vmem:[#allocation85_spill] sm:$0xff] %v22211_v26  ;;  %17788 = vmatpush3.bf16.msra.mxu0 %v20148_v10  ;;  %v2417_v21 = vmul.f32 0.2, %v2375_v35  ;;  %v2187_v10 = vmul.f32 0.2, %v2149_v12  ;;  %v2152_v2 = vadd.f32 %v22122_v47, %v2151_v57  ;;  %18047 = vmatprep.subr.bf16.mxu1 %v20151_v36  ;;  %v2367_v26 = vadd.f32 %v21960_v31, %v2366_v28  ;;  %v20154_v57 = vld [vmem:[%s24831_s2 + $0x120] sm:$0xff]  }
 0x18b   :  { %17789 = vmatprep.subr.bf16.mxu0 %v20150_v39  ;;  %v2430_v50 = vmax.f32 %v2364_v9, %v2414_v60  ;;  %v2205_v58 = vmax.f32 %v2157_v6, %v2189_v38  ;;  %v2190_v53 = vmul.f32 0.2, %v2160_v33  ;;  %v25066_v7 = vpack.c.bf16 %v21578_v25, %v21515_v19  ;;  %v17459_v14 = vpop.f32.mrb[72].mxu1  ;;  %v20155_v38 = vld [vmem:[%s24831_s2 + $0xe8] sm:$0xff]  }
 0x18c   :  { %v2203_v55 = vmax.f32 %v2149_v12, %v2187_v10  ;;  %v2188_v5 = vmul.f32 0.2, %v2152_v2  ;;  %v2415_v4 = vmul.f32 0.2, %v2367_v26  ;;  %v22242_v25 = vpack.c.bf16 %v21815_v61, %v25028_v15  ;;  %v2379_v9 = vpop.f32.mrb[73].mxu1 }
 0x18d   :  { %17774 = vmatmul.mubr.bf16.gmra.mrb[132].mxu0 %v25066_v7  ;;  %v22235_v22 = vpack.c.bf16 %v2432_v1, %v2430_v50  ;;  %18048 = vmatpush3.bf16.msra.mxu1 %v20151_v36  ;;  %v22247_v6 = vmax.f32 %v2160_v33, %v2190_v53  ;;  %v17431_v28 = vpop.f32.mrb[76].mxu0  ;;  %v2380_v36 = vadd.f32 %v21960_v31, %v2379_v9  ;;  %v17460_v12 = vpop.f32.mrb[74].mxu1 }
 0x18e   :  { %17777 = vmatprep.mubr.bf16.mxu0 %v4441_v46  ;;  %17790 = vmatpush3.bf16.msra.mxu0 %v20150_v39  ;;  %v22244_v46 = vmax.f32 %v2375_v35, %v2417_v21  ;;  %v2388_v39 = vadd.f32 %v17459_v14, %v21960_v31  ;;  %v2431_v50 = vmax.f32 %v2367_v26, %v2415_v4  ;;  %v2164_v7 = vpop.f32.mrb[77].mxu0  ;;  %v2382_v14 = vpop.f32.mrb[75].mxu1 }
 0x18f   :  { %25067 = vst [vmem:[#allocation86_spill] sm:$0xff] %v22235_v22  ;;  %17791 = vmatprep.subr.bf16.mxu0 %v20152_v34  ;;  %25068 = vst [vmem:[#allocation87_spill] sm:$0xff] %v22247_v6  ;;  %18049 = vmatprep.subr.bf16.mxu1 %v20153_v54  ;;  %v22250_v60 = vpack.c.bf16 %v2205_v58, %v2203_v55  ;;  %v22252_v1 = vmax.f32 %v2152_v2, %v2188_v5  ;;  %v17432_v53 = vpop.f32.mrb[78].mxu0  ;;  %v20156_v58 = vld [vmem:[%s24831_s2 + $0x128] sm:$0xff]   ;;  %v2418_v55 = vmul.f32 0.2, %v2380_v36 }
 0x190   :  { %v2173_v10 = vadd.f32 %v22122_v47, %v17431_v28  ;;  %v2420_v35 = vmul.f32 0.2, %v2388_v39  ;;  %v2391_v21 = vadd.f32 %v17460_v12, %v21960_v31  ;;  %v2165_v33 = vadd.f32 %v22122_v47, %v2164_v7  ;;  %18034 = vmatmul.mubr.bf16.gmra.mrb[136].mxu1 %v21897_v42  ;;  %v2167_v9 = vpop.f32.mrb[79].mxu0  ;;  %v25073_v22 = vld [vmem:[#allocation23_spill] sm:$0xff] }
 0x191   :  { %25069 = vst [vmem:[#allocation88_spill] sm:$0xff] %v22250_v60  ;;  %25070 = vst [vmem:[#allocation89_spill] sm:$0xff] %v22252_v1  ;;  %v2383_v5 = vadd.f32 %v21960_v31, %v2382_v14  ;;  %v22263_v2 = vpack.c.bf16 %v2431_v50, %v22180_v41  ;;  %v22266_v4 = vadd.f32 %v22122_v47, %v17432_v53  ;;  %18050 = vmatpush3.bf16.msra.mxu1 %v20153_v54  ;;  %v25072_v54 = vld [vmem:[#allocation28_spill] sm:$0xff] }
 0x192   :  { %17792 = vmatpush3.bf16.msra.mxu0 %v20152_v34  ;;  %v2193_v26 = vmul.f32 0.2, %v2173_v10  ;;  %v20157_v34 = vld [vmem:[%s24831_s2 + $0xf0] sm:$0xff]   ;;  %v2436_v28 = vmax.f32 %v2388_v39, %v2420_v35  ;;  %v2421_v12 = vmul.f32 0.2, %v2391_v21  ;;  %v2168_v60 = vadd.f32 %v22122_v47, %v2167_v9  ;;  %18051 = vmatprep.subr.bf16.mxu1 %v20155_v38  ;;  %v25076_v9 = vld [vmem:[#allocation34_spill] sm:$0xff] }
 0x193   :  { %25071 = vst [vmem:[#allocation90_spill] sm:$0xff] %v22263_v2  ;;  %17793 = vmatprep.subr.bf16.mxu0 %v20154_v57  ;;  %v2191_v7 = vmul.f32 0.2, %v2165_v33  ;;  %18037 = vmatprep.mubr.bf16.mxu1 %v21927_v30  ;;  %v2434_v41 = vmax.f32 %v2380_v36, %v2418_v55  ;;  %v2419_v14 = vmul.f32 0.2, %v2383_v5  ;;  %v25074_v42 = vpack.c.bf16 %v25072_v54, %v25073_v22  ;;  %v20158_v36 = vld [vmem:[%s24831_s2 + $0x130] sm:$0xff]  }
 0x194   :  { %v2209_v2 = vmax.f32 %v2173_v10, %v2193_v26  ;;  %v22274_v53 = vmul.f32 0.2, %v22266_v4  ;;  %v22279_v11 = vmax.f32 %v2391_v21, %v2421_v12  ;;  %v22282_v39 = vpack.c.bf16 %v22244_v46, %v2431_v50  ;;  %v17463_v55 = vpop.f32.mrb[76].mxu1  ;;  %v20159_v50 = vld [vmem:[%s24831_s2 + $0xf8] sm:$0xff]  }
 0x195   :  { %17778 = vmatmul.mubr.bf16.gmra.mrb[136].mxu0 %v25074_v42  ;;  %v2207_v35 = vmax.f32 %v2165_v33, %v2191_v7  ;;  %v2192_v47 = vmul.f32 0.2, %v2168_v60  ;;  %v25078_v30 = vpack.c.bf16 %v25076_v9, %v25077_v29  ;;  %v2435_v10 = vmax.f32 %v2383_v5, %v2419_v14  ;;  %18052 = vmatpush3.bf16.msra.mxu1 %v20155_v38  ;;  %v17483_v5 = vpop.f32.mrb[80].mxu0  ;;  %v25099_v1 = vld [vmem:[#allocation8_spill] sm:$0xff] }
 0x196   :  { %25075 = vst [vmem:[#allocation28_spill] sm:$0xff] %v22282_v39  ;;  %17794 = vmatpush3.bf16.msra.mxu0 %v20154_v57  ;;  %v22290_v26 = vpack.c.bf16 %v2436_v28, %v2434_v41  ;;  %v2210_v42 = vmax.f32 %v22266_v4, %v22274_v53  ;;  %v2395_v57 = vpop.f32.mrb[77].mxu1  ;;  %18053 = vmatprep.subr.bf16.mxu1 %v20157_v34  ;;  %v2578_v41 = vpop.f32.mrb[81].mxu0 }
 0x197   :  { %17781 = vmatprep.mubr.bf16.mxu0 %v25078_v30  ;;  %17795 = vmatprep.subr.bf16.mxu0 %v20156_v58  ;;  %v2404_v30 = vadd.f32 %v17463_v55, %v21960_v31  ;;  %v22300_v33 = vmax.f32 %v2168_v60, %v2192_v47  ;;  %v2396_v28 = vadd.f32 %v21960_v31, %v2395_v57  ;;  %v17464_v12 = vpop.f32.mrb[78].mxu1  ;;  %v17484_v57 = vpop.f32.mrb[82].mxu0 }
 0x198   :  { %25079 = vst [vmem:[#allocation23_spill] sm:$0xff] %v22290_v26  ;;  %v22304_v38 = vpack.c.bf16 %v2435_v10, %v22244_v46  ;;  %v22307_v4 = vpack.c.bf16 %v22279_v11, %v2435_v10  ;;  %v22310_v7 = vadd.f32 %v17483_v5, %v21960_v31  ;;  %v2407_v53 = vadd.f32 %v17464_v12, %v21960_v31  ;;  %v2398_v60 = vpop.f32.mrb[79].mxu1  ;;  %v20160_v46 = vld [vmem:[%s24831_s2 + $0x138] sm:$0xff]   ;;  %v22324_v12 = vld [vmem:[%s24832_s3] ss:$0 sm:$0xff]  ;;  %v25084_v26 = vld [vmem:[#allocation39_spill] sm:$0xff] }
 0x199   :  { %25080 = vst [vmem:[#allocation34_spill] sm:$0xff] %v22300_v33  ;;  %v2424_v14 = vmul.f32 0.2, %v2404_v30  ;;  %v22313_v47 = vpack.c.bf16 %v2209_v2, %v2207_v35  ;;  %v2579_v55 = vadd.f32 %v21960_v31, %v2578_v41  ;;  %18038 = vmatmul.mubr.bf16.gmra.mrb[140].mxu1 %v21944_v51  ;;  %v2422_v10 = vmul.f32 0.2, %v2396_v28  ;;  %v2581_v41 = vpop.f32.mrb[83].mxu0 }
 0x19a   :  { %25081 = vst [vmem:[#allocation27_spill] sm:$0xff] %v22304_v38  ;;  %25082 = vst [vmem:[#allocation91_spill] sm:$0xff] %v22307_v4  ;;  %17796 = vmatpush3.bf16.msra.mxu0 %v20156_v58  ;;  %v2399_v5 = vadd.f32 %v21960_v31, %v2398_v60  ;;  %v2643_v35 = vmul.f32 0.2, %v22310_v7  ;;  %v2590_v58 = vadd.f32 %v17484_v57, %v21960_v31  ;;  %18054 = vmatpush3.bf16.msra.mxu1 %v20157_v34  ;;  %v20161_v60 = vld [vmem:[%s24831_s2 + $0x100] sm:$0xff]   ;;  %v25085_v34 = vld [vmem:[#allocation31_spill] sm:$0xff] }
 0x19b   :  { %25083 = vst [vmem:[#allocation92_spill] sm:$0xff] %v22313_v47  ;;  %18057 = vmatprep.mubr.bf16.mxu1 %v22242_v25  ;;  %v2440_v21 = vmax.f32 %v2404_v30, %v2424_v14  ;;  %v2425_v47 = vmul.f32 0.2, %v2407_v53  ;;  %v2641_v32 = vmul.f32 0.2, %v2579_v55  ;;  %v2582_v4 = vadd.f32 %v21960_v31, %v2581_v41  ;;  %17797 = vmatprep.subr.bf16.mxu0 %v20158_v36  ;;  %v20162_v31 = vld [vmem:[%s24831_s2 + $0x140] sm:$0xff]  }
 0x19c   :  { %18055 = vmatprep.subr.bf16.mxu1 %v20159_v50  ;;  %v2438_v2 = vmax.f32 %v2396_v28, %v2422_v10  ;;  %v2423_v39 = vmul.f32 0.2, %v2399_v5  ;;  %v2659_v38 = vmax.f32 %v22310_v7, %v2643_v35  ;;  %v2644_v57 = vmul.f32 0.2, %v2590_v58  ;;  %v17515_v7 = vpop.f32.mrb[80].mxu1 }
 0x19d   :  { %v25086_v51 = vpack.c.bf16 %v25084_v26, %v25085_v34  ;;  %v2441_v25 = vmax.f32 %v2407_v53, %v2425_v47  ;;  %v2657_v30 = vmax.f32 %v2579_v55, %v2641_v32  ;;  %v2642_v14 = vmul.f32 0.2, %v2582_v4  ;;  %v22367_v55 = vld [vmem:[%s24832_s3] ss:$0 sm:$0xff] }
 0x19e   :  { %17798 = vmatpush3.bf16.msra.mxu0 %v20158_v36  ;;  %v2439_v28 = vmax.f32 %v2399_v5, %v2423_v39  ;;  %v22345_v10 = vpack.c.bf16 %v2440_v21, %v2438_v2  ;;  %v22347_v35 = vmax.f32 %v2590_v58, %v2644_v57  ;;  %18056 = vmatpush3.bf16.msra.mxu1 %v20159_v50  ;;  %v2809_v36 = vpop.f32.mrb[81].mxu1  ;;  %v17487_v39 = vpop.f32.mrb[84].mxu0 }
 0x19f   :  { %17782 = vmatmul.mubr.bf16.gmra.mrb[140].mxu0 %v25086_v51  ;;  %17799 = vmatprep.subr.bf16.mxu0 %v20160_v46  ;;  %v20163_v51 = vld [vmem:[%s24831_s2 + $0x108] sm:$0xff]   ;;  %v2818_v32 = vadd.f32 %v17515_v7, %v22324_v12  ;;  %v22356_v26 = vmax.f32 %v2582_v4, %v2642_v14  ;;  %v2810_v21 = vadd.f32 %v22324_v12, %v2809_v36  ;;  %v17516_v53 = vpop.f32.mrb[82].mxu1  ;;  %v2594_v5 = vpop.f32.mrb[85].mxu0 }
 0x1a0   :  { %17801 = vmatprep.mubr.bf16.mxu0 %v25087_v18  ;;  %25088 = vst [vmem:[#allocation39_spill] sm:$0xff] %v22345_v10  ;;  %25089 = vst [vmem:[#allocation31_spill] sm:$0xff] %v22347_v35  ;;  %v22354_v18 = vpack.c.bf16 %v2210_v42, %v22300_v33  ;;  %18073 = vmatprep.subr.bf16.mxu1 %v20161_v60  ;;  %v22360_v50 = vpack.c.bf16 %v2439_v28, %v22279_v11  ;;  %v2812_v58 = vpop.f32.mrb[83].mxu1  ;;  %v17488_v11 = vpop.f32.mrb[86].mxu0  ;;  %v25096_v14 = vld [vmem:[#allocation42_spill] sm:$0xff] }
 0x1a1   :  { %25091 = vst [vmem:[#allocation93_spill] sm:$0xff] %v22356_v26  ;;  %v22362_v47 = vpack.c.bf16 %v2441_v25, %v2439_v28  ;;  %v2603_v42 = vadd.f32 %v22367_v55, %v17487_v39  ;;  %v2874_v4 = vmul.f32 0.2, %v2818_v32  ;;  %v2821_v2 = vadd.f32 %v17516_v53, %v22324_v12  ;;  %v25095_v25 = vld [vmem:[#allocation49_spill] sm:$0xff]  ;;  %v20164_v7 = vld [vmem:[%s24831_s2 + $0x148] sm:$0xff]  }
 0x1a2   :  { %25090 = vst [vmem:[#allocation6_spill] sm:$0xff] %v22354_v18  ;;  %25092 = vst [vmem:[#allocation94_spill] sm:$0xff] %v22360_v50  ;;  %v22371_v41 = vpack.c.bf16 %v2659_v38, %v2657_v30  ;;  %v2595_v57 = vadd.f32 %v22367_v55, %v2594_v5  ;;  %17800 = vmatpush3.bf16.msra.mxu0 %v20160_v46  ;;  %v25097_v28 = vpack.c.bf16 %v25095_v25, %v25096_v14  ;;  %v2597_v38 = vpop.f32.mrb[87].mxu0  ;;  %v20165_v46 = vld [vmem:[%s24831_s2 + $0x110] sm:$0xff]  }
 0x1a3   :  { %25093 = vst [vmem:[#allocation95_spill] sm:$0xff] %v22362_v47  ;;  %v2872_v36 = vmul.f32 0.2, %v2810_v21  ;;  %v2813_v39 = vadd.f32 %v22324_v12, %v2812_v58  ;;  %v2647_v45 = vmul.f32 0.2, %v2603_v42  ;;  %v2606_v53 = vadd.f32 %v22367_v55, %v17488_v11  ;;  %17817 = vmatprep.subr.bf16.mxu0 %v20162_v31 }
 0x1a4   :  { %25094 = vst [vmem:[#allocation96_spill] sm:$0xff] %v22371_v41  ;;  %18058 = vmatmul.mubr.bf16.vlgmr.msra.gmra.mrb[128].mxu1 %v25097_v28  ;;  %v25098_v30 = vpack.c.bf16 %v21905_v63, %v21847_v56  ;;  %v2890_v5 = vmax.f32 %v2818_v32, %v2874_v4  ;;  %v2875_v28 = vmul.f32 0.2, %v2821_v2  ;;  %v2645_v18 = vmul.f32 0.2, %v2595_v57  ;;  %v25100_v32 = vld [vmem:[#allocation13_spill] sm:$0xff] }
 0x1a5   :  { %18074 = vmatpush3.bf16.msra.mxu1 %v20161_v60  ;;  %v2598_v41 = vadd.f32 %v22367_v55, %v2597_v38  ;;  %v2888_v58 = vmax.f32 %v2810_v21, %v2872_v36  ;;  %v2873_v6 = vmul.f32 0.2, %v2813_v39  ;;  %v2663_v11 = vmax.f32 %v2603_v42, %v2647_v45  ;;  %v20166_v4 = vld [vmem:[%s24831_s2 + $0x150] sm:$0xff]   ;;  %v17519_v45 = vpop.f32.mrb[84].mxu1 }
 0x1a6   :  { %18061 = vmatprep.mubr.bf16.mxu1 %v25098_v30  ;;  %18075 = vmatprep.subr.bf16.mxu1 %v20163_v51  ;;  %v2648_v33 = vmul.f32 0.2, %v2606_v53  ;;  %v22390_v47 = vmax.f32 %v2821_v2, %v2875_v28  ;;  %v2661_v30 = vmax.f32 %v2595_v57, %v2645_v18  ;;  %v20167_v18 = vld [vmem:[%s24831_s2 + $0x118] sm:$0xff]   ;;  %v2825_v2 = vpop.f32.mrb[85].mxu1 }
 0x1a7   :  { %17802 = vmatmul.mubr.bf16.vlgmr.msra.gmra.mrb[128].mxu0 %v25099_v1  ;;  %v2646_v50 = vmul.f32 0.2, %v2598_v41  ;;  %v22398_v21 = vmax.f32 %v2813_v39, %v2873_v6  ;;  %v22400_v42 = vpack.c.bf16 %v2890_v5, %v2888_v58  ;;  %v6343_v1 = vpack.c.bf16 %v21976_v0, %v25028_v15  ;;  %v17491_v6 = vpop.f32.mrb[88].mxu0 }
 0x1a8   :  { %17805 = vmatprep.mubr.bf16.mxu0 %v25100_v32  ;;  %17818 = vmatpush3.bf16.msra.mxu0 %v20162_v31  ;;  %v2834_v31 = vadd.f32 %v17519_v45, %v22324_v12  ;;  %v22408_v57 = vmax.f32 %v2606_v53, %v2648_v33  ;;  %v2826_v39 = vadd.f32 %v22324_v12, %v2825_v2  ;;  %v2610_v28 = vpop.f32.mrb[89].mxu0  ;;  %v20168_v2 = vld [vmem:[%s24831_s2 + $0x158] sm:$0xff]  }
 0x1a9   :  { %25101 = vst [vmem:[#allocation49_spill] sm:$0xff] %v22398_v21  ;;  %18076 = vmatpush3.bf16.msra.mxu1 %v20163_v51  ;;  %17819 = vmatprep.subr.bf16.mxu0 %v20164_v7  ;;  %v22410_v36 = vmax.f32 %v2598_v41, %v2646_v50  ;;  %v17520_v51 = vpop.f32.mrb[86].mxu1  ;;  %v22415_v38 = vpack.c.bf16 %v22390_v47, %v22398_v21  ;;  %v17492_v41 = vpop.f32.mrb[90].mxu0  ;;  %v25107_v21 = vld [vmem:[#allocation17_spill] sm:$0xff] }
 0x1aa   :  { %25102 = vst [vmem:[#allocation42_spill] sm:$0xff] %v22408_v57  ;;  %18077 = vmatprep.subr.bf16.mxu1 %v20165_v46  ;;  %v2619_v5 = vadd.f32 %v22367_v55, %v17491_v6  ;;  %v2878_v58 = vmul.f32 0.2, %v2834_v31  ;;  %v2837_v32 = vadd.f32 %v17520_v51, %v22324_v12  ;;  %v2828_v45 = vpop.f32.mrb[87].mxu1  ;;  %v22419_v33 = vpack.c.bf16 %v2663_v11, %v2661_v30 }
 0x1ab   :  { %25103 = vst [vmem:[#allocation8_spill] sm:$0xff] %v22410_v36  ;;  %25104 = vst [vmem:[#allocation13_spill] sm:$0xff] %v22415_v38  ;;  %v2611_v50 = vadd.f32 %v22367_v55, %v2610_v28  ;;  %v25106_v53 = vpack.c.bf16 %v21931_v27, %v21899_v59  ;;  %v2876_v6 = vmul.f32 0.2, %v2826_v39  ;;  %v2829_v60 = vadd.f32 %v22324_v12, %v2828_v45  ;;  %v2613_v28 = vpop.f32.mrb[91].mxu0  ;;  %v20169_v27 = vld [vmem:[%s24831_s2 + $0x120] sm:$0xff]  }
 0x1ac   :  { %25105 = vst [vmem:[#allocation97_spill] sm:$0xff] %v22419_v33  ;;  %17820 = vmatpush3.bf16.msra.mxu0 %v20164_v7  ;;  %v2651_v11 = vmul.f32 0.2, %v2619_v5  ;;  %v2622_v30 = vadd.f32 %v22367_v55, %v17492_v41  ;;  %v2894_v7 = vmax.f32 %v2834_v31, %v2878_v58  ;;  %v2614_v26 = vadd.f32 %v22367_v55, %v2613_v28  ;;  %v25108_v31 = vld [vmem:[#allocation22_spill] sm:$0xff]  ;;  %v20170_v58 = vld [vmem:[%s24831_s2 + $0x160] sm:$0xff]  }
 0x1ad   :  { %18062 = vmatmul.mubr.bf16.gmra.mrb[132].mxu1 %v25106_v53  ;;  %v2879_v53 = vmul.f32 0.2, %v2837_v32  ;;  %v2649_v33 = vmul.f32 0.2, %v2611_v50  ;;  %17821 = vmatprep.subr.bf16.mxu0 %v20166_v4  ;;  %v2892_v45 = vmax.f32 %v2826_v39, %v2876_v6  ;;  %v2877_v38 = vmul.f32 0.2, %v2829_v60 }
 0x1ae   :  { %18065 = vmatprep.mubr.bf16.mxu1 %v6343_v1  ;;  %18078 = vmatpush3.bf16.msra.mxu1 %v20165_v46  ;;  %v2667_v51 = vmax.f32 %v2619_v5, %v2651_v11  ;;  %v2652_v35 = vmul.f32 0.2, %v2622_v30  ;;  %v2650_v10 = vmul.f32 0.2, %v2614_v26  ;;  %v17523_v6 = vpop.f32.mrb[88].mxu1 }
 0x1af   :  { %18079 = vmatprep.subr.bf16.mxu1 %v20167_v18  ;;  %17806 = vmatmul.mubr.bf16.gmra.mrb[132].mxu0 %v25107_v21  ;;  %v22437_v41 = vmax.f32 %v2837_v32, %v2879_v53  ;;  %v2665_v1 = vmax.f32 %v2611_v50, %v2649_v33  ;;  %v22445_v39 = vpack.c.bf16 %v2894_v7, %v2892_v45  ;;  %v20171_v21 = vld [vmem:[%s24831_s2 + $0x128] sm:$0xff]   ;;  %v2841_v33 = vpop.f32.mrb[89].mxu1  ;;  %v17495_v50 = vpop.f32.mrb[92].mxu0 }
 0x1b0   :  { %17809 = vmatprep.mubr.bf16.mxu0 %v25108_v31  ;;  %17822 = vmatpush3.bf16.msra.mxu0 %v20166_v4  ;;  %v2893_v5 = vmax.f32 %v2829_v60, %v2877_v38  ;;  %v22447_v11 = vmax.f32 %v2622_v30, %v2652_v35  ;;  %v2850_v32 = vadd.f32 %v17523_v6, %v22324_v12  ;;  %v2626_v30 = vpop.f32.mrb[93].mxu0  ;;  %v20172_v6 = vld [vmem:[%s24831_s2 + $0x168] sm:$0xff]  }
 0x1b1   :  { %25109 = vst [vmem:[#allocation17_spill] sm:$0xff] %v22445_v39  ;;  %17823 = vmatprep.subr.bf16.mxu0 %v20168_v2  ;;  %v22453_v4 = vmax.f32 %v2614_v26, %v2650_v10  ;;  %v2842_v35 = vadd.f32 %v22324_v12, %v2841_v33  ;;  %v2635_v38 = vadd.f32 %v22367_v55, %v17495_v50  ;;  %v17496_v31 = vpop.f32.mrb[94].mxu0 }
 0x1b2   :  { %25110 = vst [vmem:[#allocation22_spill] sm:$0xff] %v22447_v11  ;;  %18080 = vmatpush3.bf16.msra.mxu1 %v20167_v18  ;;  %v22456_v28 = vpack.c.bf16 %v2893_v5, %v22390_v47  ;;  %v22459_v60 = vpack.c.bf16 %v22437_v41, %v2893_v5  ;;  %v17524_v18 = vpop.f32.mrb[90].mxu1  ;;  %v2882_v7 = vmul.f32 0.2, %v2850_v32  ;;  %v22464_v10 = vpack.c.bf16 %v2667_v51, %v2665_v1  ;;  %v25115_v47 = vld [vmem:[#allocation62_spill] sm:$0xff] }
 0x1b3   :  { %25111 = vst [vmem:[#allocation98_spill] sm:$0xff] %v22453_v4  ;;  %18081 = vmatprep.subr.bf16.mxu1 %v20169_v27  ;;  %v2853_v53 = vadd.f32 %v17524_v18, %v22324_v12  ;;  %v2844_v45 = vpop.f32.mrb[91].mxu1  ;;  %v2627_v26 = vadd.f32 %v22367_v55, %v2626_v30  ;;  %v25116_v5 = vpack.c.bf16 %v22013_v37, %v25115_v47  ;;  %v2880_v33 = vmul.f32 0.2, %v2842_v35  ;;  %v2629_v30 = vpop.f32.mrb[95].mxu0 }
 0x1b4   :  { %25112 = vst [vmem:[#allocation99_spill] sm:$0xff] %v22456_v28  ;;  %25113 = vst [vmem:[#allocation100_spill] sm:$0xff] %v22459_v60  ;;  %17824 = vmatpush3.bf16.msra.mxu0 %v20168_v2  ;;  %v2845_v50 = vadd.f32 %v22324_v12, %v2844_v45  ;;  %v2655_v51 = vmul.f32 0.2, %v2635_v38  ;;  %v22477_v1 = vadd.f32 %v22367_v55, %v17496_v31  ;;  %v25118_v28 = vld [vmem:[#allocation26_spill] sm:$0xff] }
 0x1b5   :  { %25114 = vst [vmem:[#allocation101_spill] sm:$0xff] %v22464_v10  ;;  %18066 = vmatmul.mubr.bf16.gmra.mrb[136].mxu1 %v25116_v5  ;;  %v25117_v2 = vpack.c.bf16 %v22055_v52, %v22011_v62  ;;  %v20173_v5 = vld [vmem:[%s24831_s2 + $0x130] sm:$0xff]   ;;  %v2898_v46 = vmax.f32 %v2850_v32, %v2882_v7  ;;  %v2883_v10 = vmul.f32 0.2, %v2853_v53  ;;  %v2653_v45 = vmul.f32 0.2, %v2627_v26  ;;  %17825 = vmatprep.subr.bf16.mxu0 %v20170_v58 }
 0x1b6   :  { %18082 = vmatpush3.bf16.msra.mxu1 %v20169_v27  ;;  %v2630_v36 = vadd.f32 %v22367_v55, %v2629_v30  ;;  %v2896_v18 = vmax.f32 %v2842_v35, %v2880_v33  ;;  %v2881_v31 = vmul.f32 0.2, %v2845_v50  ;;  %v2671_v57 = vmax.f32 %v2635_v38, %v2655_v51  ;;  %v25119_v7 = vld [vmem:[#allocation33_spill] sm:$0xff]  ;;  %v20174_v35 = vld [vmem:[%s24831_s2 + $0x170] sm:$0xff]   ;;  %v17527_v38 = vpop.f32.mrb[92].mxu1  ;;  %v17547_v30 = vpop.f32.mrb[96].mxu0 }
 0x1b7   :  { %18069 = vmatprep.mubr.bf16.mxu1 %v25117_v2  ;;  %18083 = vmatprep.subr.bf16.mxu1 %v20171_v21  ;;  %v2656_v60 = vmul.f32 0.2, %v22477_v1  ;;  %v22488_v2 = vmax.f32 %v2853_v53, %v2883_v10  ;;  %v2669_v39 = vmax.f32 %v2627_v26, %v2653_v45  ;;  %v20175_v53 = vld [vmem:[%s24831_s2 + $0x138] sm:$0xff]   ;;  %v2866_v10 = vadd.f32 %v17527_v38, %v22324_v12  ;;  %v2857_v26 = vpop.f32.mrb[93].mxu1 }
 0x1b8   :  { %17810 = vmatmul.mubr.bf16.gmra.mrb[136].mxu0 %v25118_v28  ;;  %v2654_v32 = vmul.f32 0.2, %v2630_v36  ;;  %v2897_v33 = vmax.f32 %v2845_v50, %v2881_v31  ;;  %v22496_v51 = vpack.c.bf16 %v2898_v46, %v2896_v18  ;;  %v2858_v50 = vadd.f32 %v22324_v12, %v2857_v26  ;;  %v17528_v45 = vpop.f32.mrb[94].mxu1  ;;  %v3040_v18 = vpop.f32.mrb[97].mxu0 }
 0x1b9   :  { %17813 = vmatprep.mubr.bf16.mxu0 %v25119_v7  ;;  %17826 = vmatpush3.bf16.msra.mxu0 %v20170_v58  ;;  %v2672_v28 = vmax.f32 %v22477_v1, %v2656_v60  ;;  %v3049_v60 = vadd.f32 %v22367_v55, %v17547_v30  ;;  %v2886_v1 = vmul.f32 0.2, %v2866_v10  ;;  %v2869_v31 = vadd.f32 %v17528_v45, %v22324_v12  ;;  %v2860_v7 = vpop.f32.mrb[95].mxu1  ;;  %v17548_v38 = vpop.f32.mrb[98].mxu0 }
 0x1ba   :  { %25120 = vst [vmem:[#allocation62_spill] sm:$0xff] %v22496_v51  ;;  %18084 = vmatpush3.bf16.msra.mxu1 %v20171_v21  ;;  %17827 = vmatprep.subr.bf16.mxu0 %v20172_v6  ;;  %v22503_v58 = vmax.f32 %v2630_v36, %v2654_v32  ;;  %v22507_v46 = vpack.c.bf16 %v2897_v33, %v22437_v41  ;;  %v2884_v26 = vmul.f32 0.2, %v2858_v50 }
 0x1bb   :  { %18085 = vmatprep.subr.bf16.mxu1 %v20173_v5  ;;  %v22510_v21 = vpack.c.bf16 %v22488_v2, %v2897_v33  ;;  %v22514_v36 = vpack.c.bf16 %v2671_v57, %v2669_v39  ;;  %v3041_v32 = vadd.f32 %v22367_v55, %v3040_v18  ;;  %v25125_v41 = vpack.c.bf16 %v22100_v3, %v22049_v8  ;;  %v20176_v33 = vld [vmem:[%s24831_s2 + $0x178] sm:$0xff]   ;;  %v3043_v18 = vpop.f32.mrb[99].mxu0  ;;  %v20177_v3 = vld [vmem:[%s24831_s2 + $0x140] sm:$0xff]  }
 0x1bc   :  { %25121 = vst [vmem:[#allocation26_spill] sm:$0xff] %v22503_v58  ;;  %25122 = vst [vmem:[#allocation33_spill] sm:$0xff] %v22507_v46  ;;  %v2861_v30 = vadd.f32 %v22324_v12, %v2860_v7  ;;  %v3105_v57 = vmul.f32 0.2, %v3049_v60  ;;  %v3052_v39 = vadd.f32 %v22367_v55, %v17548_v38  ;;  %v2887_v27 = vmul.f32 0.2, %v2869_v31 }
 0x1bd   :  { %25123 = vst [vmem:[#allocation102_spill] sm:$0xff] %v22510_v21  ;;  %25124 = vst [vmem:[#allocation103_spill] sm:$0xff] %v22514_v36  ;;  %17828 = vmatpush3.bf16.msra.mxu0 %v20172_v6  ;;  %18070 = vmatmul.mubr.bf16.gmra.mrb[140].mxu1 %v25125_v41  ;;  %v25126_v6 = vld [vmem:[#allocation44_spill] sm:$0xff]  ;;  %v2902_v41 = vmax.f32 %v2866_v10, %v2886_v1  ;;  %v3103_v36 = vmul.f32 0.2, %v3041_v32  ;;  %v3044_v4 = vadd.f32 %v22367_v55, %v3043_v18  ;;  %v25127_v38 = vld [vmem:[#allocation38_spill] sm:$0xff] }
 0x1be   :  { %18086 = vmatpush3.bf16.msra.mxu1 %v20173_v5  ;;  %18089 = vmatprep.mubr.bf16.mxu1 %v25126_v6  ;;  %v2900_v7 = vmax.f32 %v2858_v50, %v2884_v26  ;;  %v2885_v45 = vmul.f32 0.2, %v2861_v30  ;;  %v3121_v11 = vmax.f32 %v3049_v60, %v3105_v57  ;;  %v3106_v21 = vmul.f32 0.2, %v3052_v39  ;;  %v20178_v50 = vld [vmem:[%s24831_s2 + $0x180] sm:$0xff]   ;;  %v17579_v60 = vpop.f32.mrb[96].mxu1 }
 0x1bf   :  { %17829 = vmatprep.subr.bf16.mxu0 %v20174_v35  ;;  %18087 = vmatprep.subr.bf16.mxu1 %v20175_v53  ;;  %v2903_v5 = vmax.f32 %v2869_v31, %v2887_v27  ;;  %v22534_v6 = vpack.c.bf16 %v2672_v28, %v22503_v58  ;;  %v3119_v46 = vmax.f32 %v3041_v32, %v3103_v36  ;;  %v3104_v51 = vmul.f32 0.2, %v3044_v4  ;;  %v20179_v27 = vld [vmem:[%s24831_s2 + $0x148] sm:$0xff]   ;;  %v17551_v28 = vpop.f32.mrb[100].mxu0 }
 0x1c0   :  { %17814 = vmatmul.mubr.bf16.gmra.mrb[140].mxu0 %v25127_v38  ;;  %v25129_v10 = vpack.c.bf16 %v21387_v43, %v21397_v48  ;;  %v2901_v1 = vmax.f32 %v2861_v30, %v2885_v45  ;;  %v22542_v26 = vpack.c.bf16 %v2902_v41, %v2900_v7  ;;  %v22544_v57 = vmax.f32 %v3052_v39, %v3106_v21  ;;  %v3271_v43 = vpop.f32.mrb[97].mxu1  ;;  %v3056_v30 = vpop.f32.mrb[101].mxu0  ;;  %v25134_v7 = vld [vmem:[#allocation48_spill] sm:$0xff] }
 0x1c1   :  { %25128 = vst [vmem:[#allocation44_spill] sm:$0xff] %v22534_v6  ;;  %17830 = vmatpush3.bf16.msra.mxu0 %v20174_v35  ;;  %v3280_v35 = vadd.f32 %v17579_v60, %v22324_v12  ;;  %v22550_v48 = vmax.f32 %v3044_v4, %v3104_v51  ;;  %v3272_v31 = vadd.f32 %v22324_v12, %v3271_v43  ;;  %v17580_v36 = vpop.f32.mrb[98].mxu1  ;;  %v17552_v51 = vpop.f32.mrb[102].mxu0  ;;  %v25135_v43 = vld [vmem:[#allocation54_spill] sm:$0xff] }
 0x1c2   :  { %17833 = vmatprep.mubr.bf16.mxu0 %v25129_v10  ;;  %25130 = vst [vmem:[#allocation38_spill] sm:$0xff] %v22542_v26  ;;  %25131 = vst [vmem:[#allocation104_spill] sm:$0xff] %v22544_v57  ;;  %18088 = vmatpush3.bf16.msra.mxu1 %v20175_v53  ;;  %v22554_v32 = vpack.c.bf16 %v2901_v1, %v22488_v2  ;;  %v22556_v21 = vpack.c.bf16 %v2903_v5, %v2901_v1  ;;  %v3274_v18 = vpop.f32.mrb[99].mxu1  ;;  %v20180_v2 = vld [vmem:[%s24831_s2 + $0x188] sm:$0xff]   ;;  %v3059_v60 = vpop.f32.mrb[103].mxu0  ;;  %v25144_v57 = vld [vmem:[#allocation20_spill] sm:$0xff] }
 0x1c3   :  { %17831 = vmatprep.subr.bf16.mxu0 %v20176_v33  ;;  %18105 = vmatprep.subr.bf16.mxu1 %v20177_v3  ;;  %v3065_v53 = vadd.f32 %v22367_v55, %v17551_v28  ;;  %v3336_v45 = vmul.f32 0.2, %v3280_v35  ;;  %v3283_v39 = vadd.f32 %v17580_v36, %v22324_v12  ;;  %v22560_v41 = vpack.c.bf16 %v3121_v11, %v3119_v46  ;;  %v20181_v11 = vld [vmem:[%s24831_s2 + $0x150] sm:$0xff]  }
 0x1c4   :  { %25132 = vst [vmem:[#allocation105_spill] sm:$0xff] %v22556_v21  ;;  %v3057_v4 = vadd.f32 %v22367_v55, %v3056_v30  ;;  %v3334_v38 = vmul.f32 0.2, %v3272_v31  ;;  %v3275_v5 = vadd.f32 %v22324_v12, %v3274_v18  ;;  %v3068_v1 = vadd.f32 %v22367_v55, %v17552_v51 }
 0x1c5   :  { %25133 = vst [vmem:[#allocation106_spill] sm:$0xff] %v22560_v41  ;;  %17832 = vmatpush3.bf16.msra.mxu0 %v20176_v33  ;;  %18090 = vmatmul.mubr.bf16.vlgmr.msra.gmra.mrb[128].mxu1 %v25134_v7  ;;  %v3109_v10 = vmul.f32 0.2, %v3065_v53  ;;  %v3352_v46 = vmax.f32 %v3280_v35, %v3336_v45  ;;  %v3337_v33 = vmul.f32 0.2, %v3283_v39  ;;  %v3060_v36 = vadd.f32 %v22367_v55, %v3059_v60 }
 0x1c6   :  { %18093 = vmatprep.mubr.bf16.mxu1 %v25135_v43  ;;  %18106 = vmatpush3.bf16.msra.mxu1 %v20177_v3  ;;  %v3107_v28 = vmul.f32 0.2, %v3057_v4  ;;  %v3350_v30 = vmax.f32 %v3272_v31, %v3334_v38  ;;  %v3335_v18 = vmul.f32 0.2, %v3275_v5  ;;  %v3110_v6 = vmul.f32 0.2, %v3068_v1 }
 0x1c7   :  { %17849 = vmatprep.subr.bf16.mxu0 %v20178_v50  ;;  %18107 = vmatprep.subr.bf16.mxu1 %v20179_v27  ;;  %v3125_v7 = vmax.f32 %v3065_v53, %v3109_v10  ;;  %v25136_v51 = vpack.c.bf16 %v21427_v13, %v21434_v17  ;;  %v22577_v3 = vmax.f32 %v3283_v39, %v3337_v33  ;;  %v3108_v45 = vmul.f32 0.2, %v3060_v36  ;;  %v20182_v31 = vld [vmem:[%s24831_s2 + $0x190] sm:$0xff]   ;;  %v17583_v13 = vpop.f32.mrb[100].mxu1 }
 0x1c8   :  { %v3123_v35 = vmax.f32 %v3057_v4, %v3107_v28  ;;  %v25137_v60 = vpack.c.bf16 %v21515_v19, %v21517_v20  ;;  %v22587_v53 = vmax.f32 %v3275_v5, %v3335_v18  ;;  %v22589_v17 = vpack.c.bf16 %v3352_v46, %v3350_v30  ;;  %v20183_v4 = vld [vmem:[%s24831_s2 + $0x158] sm:$0xff]   ;;  %v3287_v20 = vpop.f32.mrb[101].mxu1  ;;  %v17555_v5 = vpop.f32.mrb[104].mxu0 }
 0x1c9   :  { %17834 = vmatmul.mubr.bf16.vlgmr.msra.gmra.mrb[128].mxu0 %v25136_v51  ;;  %v22591_v39 = vmax.f32 %v3068_v1, %v3110_v6  ;;  %v3296_v19 = vadd.f32 %v17583_v13, %v22324_v12  ;;  %v22599_v38 = vmax.f32 %v3060_v36, %v3108_v45  ;;  %v3288_v10 = vadd.f32 %v22324_v12, %v3287_v20  ;;  %v17584_v46 = vpop.f32.mrb[102].mxu1  ;;  %v20184_v45 = vld [vmem:[%s24831_s2 + $0x198] sm:$0xff]  }
 0x1ca   :  { %17837 = vmatprep.mubr.bf16.mxu0 %v25137_v60  ;;  %17850 = vmatpush3.bf16.msra.mxu0 %v20178_v50  ;;  %25138 = vst [vmem:[#allocation48_spill] sm:$0xff] %v22589_v17  ;;  %v22597_v50 = vpack.c.bf16 %v3125_v7, %v3123_v35  ;;  %v3081_v6 = vadd.f32 %v22367_v55, %v17555_v5  ;;  %v3290_v28 = vpop.f32.mrb[103].mxu1  ;;  %v25142_v35 = vld [vmem:[#allocation58_spill] sm:$0xff] }
 0x1cb   :  { %18108 = vmatpush3.bf16.msra.mxu1 %v20179_v27  ;;  %17851 = vmatprep.subr.bf16.mxu0 %v20180_v2  ;;  %25140 = vst [vmem:[#allocation107_spill] sm:$0xff] %v22599_v38  ;;  %v3072_v27 = vpop.f32.mrb[105].mxu0  ;;  %v3340_v1 = vmul.f32 0.2, %v3296_v19  ;;  %v3299_v33 = vadd.f32 %v17584_v46, %v22324_v12  ;;  %v22606_v30 = vpack.c.bf16 %v22577_v3, %v22587_v53  ;;  %v3338_v60 = vmul.f32 0.2, %v3288_v10 }
 0x1cc   :  { %25139 = vst [vmem:[#allocation54_spill] sm:$0xff] %v22597_v50  ;;  %18109 = vmatprep.subr.bf16.mxu1 %v20181_v11  ;;  %v3073_v7 = vadd.f32 %v22367_v55, %v3072_v27  ;;  %v17556_v51 = vpop.f32.mrb[106].mxu0  ;;  %v3113_v13 = vmul.f32 0.2, %v3081_v6  ;;  %v25143_v46 = vld [vmem:[#allocation63_spill] sm:$0xff]  ;;  %v20185_v27 = vld [vmem:[%s24831_s2 + $0x160] sm:$0xff]   ;;  %v3291_v50 = vadd.f32 %v22324_v12, %v3290_v28  ;;  %v25145_v38 = vpack.c.bf16 %v25073_v22, %v21634_v49 }
 0x1cd   :  { %25141 = vst [vmem:[#allocation108_spill] sm:$0xff] %v22606_v30  ;;  %18094 = vmatmul.mubr.bf16.gmra.mrb[132].mxu1 %v25142_v35  ;;  %v3084_v20 = vadd.f32 %v22367_v55, %v17556_v51  ;;  %v3075_v5 = vpop.f32.mrb[107].mxu0  ;;  %v3356_v18 = vmax.f32 %v3296_v19, %v3340_v1  ;;  %v3354_v36 = vmax.f32 %v3288_v10, %v3338_v60  ;;  %v20186_v19 = vld [vmem:[%s24831_s2 + $0x1a0] sm:$0xff]  }
 0x1ce   :  { %17852 = vmatpush3.bf16.msra.mxu0 %v20180_v2  ;;  %18097 = vmatprep.mubr.bf16.mxu1 %v25143_v46  ;;  %v3341_v2 = vmul.f32 0.2, %v3299_v33  ;;  %v3111_v43 = vmul.f32 0.2, %v3073_v7  ;;  %v3076_v35 = vadd.f32 %v22367_v55, %v3075_v5  ;;  %v3129_v41 = vmax.f32 %v3081_v6, %v3113_v13  ;;  %v17587_v5 = vpop.f32.mrb[104].mxu1 }
 0x1cf   :  { %18110 = vmatpush3.bf16.msra.mxu1 %v20181_v11  ;;  %17853 = vmatprep.subr.bf16.mxu0 %v20182_v31  ;;  %v3114_v51 = vmul.f32 0.2, %v3084_v20  ;;  %v3339_v1 = vmul.f32 0.2, %v3291_v50  ;;  %v22631_v10 = vpack.c.bf16 %v3356_v18, %v3354_v36  ;;  %v3312_v49 = vadd.f32 %v17587_v5, %v22324_v12  ;;  %v3303_v22 = vpop.f32.mrb[105].mxu1  ;;  %v25148_v5 = vld [vmem:[#allocation66_spill] sm:$0xff] }
 0x1d0   :  { %18111 = vmatprep.subr.bf16.mxu1 %v20183_v4  ;;  %v3127_v46 = vmax.f32 %v3073_v7, %v3111_v43  ;;  %v3112_v11 = vmul.f32 0.2, %v3076_v35  ;;  %v22636_v43 = vmax.f32 %v3299_v33, %v3341_v2  ;;  %v3304_v28 = vadd.f32 %v22324_v12, %v3303_v22  ;;  %v17588_v36 = vpop.f32.mrb[106].mxu1 }
 0x1d1   :  { %17838 = vmatmul.mubr.bf16.gmra.mrb[132].mxu0 %v25144_v57  ;;  %25146 = vst [vmem:[#allocation58_spill] sm:$0xff] %v22631_v10  ;;  %v20187_v57 = vld [vmem:[%s24831_s2 + $0x168] sm:$0xff]   ;;  %v3355_v6 = vmax.f32 %v3291_v50, %v3339_v1  ;;  %v3344_v33 = vmul.f32 0.2, %v3312_v49  ;;  %v3315_v13 = vadd.f32 %v17588_v36, %v22324_v12  ;;  %v3306_v2 = vpop.f32.mrb[107].mxu1 }
 0x1d2   :  { %17841 = vmatprep.mubr.bf16.mxu0 %v25145_v38  ;;  %17854 = vmatpush3.bf16.msra.mxu0 %v20182_v31  ;;  %v22639_v31 = vmax.f32 %v3084_v20, %v3114_v51  ;;  %v17559_v38 = vpop.f32.mrb[108].mxu0  ;;  %v22642_v18 = vpack.c.bf16 %v3129_v41, %v3127_v46  ;;  %v20188_v41 = vld [vmem:[%s24831_s2 + $0x1a8] sm:$0xff]   ;;  %v3342_v50 = vmul.f32 0.2, %v3304_v28 }
 0x1d3   :  { %18112 = vmatpush3.bf16.msra.mxu1 %v20183_v4  ;;  %17855 = vmatprep.subr.bf16.mxu0 %v20184_v45  ;;  %v22644_v4 = vmax.f32 %v3076_v35, %v3112_v11  ;;  %v3097_v7 = vadd.f32 %v22367_v55, %v17559_v38  ;;  %v3088_v60 = vpop.f32.mrb[109].mxu0  ;;  %v3307_v35 = vadd.f32 %v22324_v12, %v3306_v2  ;;  %v3345_v36 = vmul.f32 0.2, %v3315_v13 }
 0x1d4   :  { %18113 = vmatprep.subr.bf16.mxu1 %v20185_v27  ;;  %25147 = vst [vmem:[#allocation63_spill] sm:$0xff] %v22642_v18  ;;  %v3089_v20 = vadd.f32 %v22367_v55, %v3088_v60  ;;  %v17560_v51 = vpop.f32.mrb[110].mxu0  ;;  %v22655_v46 = vpack.c.bf16 %v3355_v6, %v22577_v3  ;;  %v3360_v38 = vmax.f32 %v3312_v49, %v3344_v33 }
 0x1d5   :  { %18098 = vmatmul.mubr.bf16.gmra.mrb[136].mxu1 %v25148_v5  ;;  %v3117_v11 = vmul.f32 0.2, %v3097_v7  ;;  %v22658_v1 = vadd.f32 %v22367_v55, %v17560_v51  ;;  %v3091_v22 = vpop.f32.mrb[111].mxu0  ;;  %v3358_v3 = vmax.f32 %v3304_v28, %v3342_v50  ;;  %v3343_v5 = vmul.f32 0.2, %v3307_v35  ;;  %v20190_v28 = vld [vmem:[%s24831_s2 + $0x1b0] sm:$0xff]  }
 0x1d6   :  { %17856 = vmatpush3.bf16.msra.mxu0 %v20184_v45  ;;  %18101 = vmatprep.mubr.bf16.mxu1 %v22061_v23  ;;  %v20189_v45 = vld [vmem:[%s24831_s2 + $0x170] sm:$0xff]   ;;  %v3115_v60 = vmul.f32 0.2, %v3089_v20  ;;  %v3092_v2 = vadd.f32 %v22367_v55, %v3091_v22  ;;  %v25149_v23 = vpack.c.bf16 %v25077_v29, %v25072_v54  ;;  %v22674_v49 = vpack.c.bf16 %v22636_v43, %v3355_v6  ;;  %v17591_v50 = vpop.f32.mrb[108].mxu1  ;;  %v20191_v6 = vld [vmem:[%s24831_s2 + $0x178] sm:$0xff]  }
 0x1d7   :  { %18114 = vmatpush3.bf16.msra.mxu1 %v20185_v27  ;;  %17857 = vmatprep.subr.bf16.mxu0 %v20186_v19  ;;  %v3133_v18 = vmax.f32 %v3097_v7, %v3117_v11  ;;  %v22666_v51 = vmul.f32 0.2, %v22658_v1  ;;  %v22671_v27 = vmax.f32 %v3315_v13, %v3345_v36  ;;  %v25151_v22 = vpack.c.bf16 %v25085_v34, %v25076_v9  ;;  %v3319_v34 = vpop.f32.mrb[109].mxu1 }
 0x1d8   :  { %18115 = vmatprep.subr.bf16.mxu1 %v20187_v57  ;;  %25150 = vst [vmem:[#allocation20_spill] sm:$0xff] %v22674_v49  ;;  %v3131_v33 = vmax.f32 %v3089_v20, %v3115_v60  ;;  %v3116_v58 = vmul.f32 0.2, %v3092_v2  ;;  %v3359_v7 = vmax.f32 %v3307_v35, %v3343_v5  ;;  %v22682_v29 = vpack.c.bf16 %v3360_v38, %v3358_v3  ;;  %v17611_v20 = vpop.f32.mrb[112].mxu0  ;;  %v17592_v11 = vpop.f32.mrb[110].mxu1 }
 0x1d9   :  { %17842 = vmatmul.mubr.bf16.gmra.mrb[136].mxu0 %v25149_v23  ;;  %v3134_v54 = vmax.f32 %v22658_v1, %v22666_v51  ;;  %v3328_v9 = vadd.f32 %v17591_v50, %v22324_v12  ;;  %v3320_v35 = vadd.f32 %v22324_v12, %v3319_v34  ;;  %v3511_v38 = vadd.f32 %v22367_v55, %v17611_v20  ;;  %v3502_v36 = vpop.f32.mrb[113].mxu0  ;;  %v3322_v5 = vpop.f32.mrb[111].mxu1 }
 0x1da   :  { %17845 = vmatprep.mubr.bf16.mxu0 %v25151_v22  ;;  %17858 = vmatpush3.bf16.msra.mxu0 %v20186_v19  ;;  %25152 = vst [vmem:[#allocation66_spill] sm:$0xff] %v22682_v29  ;;  %v22692_v13 = vmax.f32 %v3092_v2, %v3116_v58  ;;  %v22699_v1 = vpack.c.bf16 %v22671_v27, %v3359_v7  ;;  %v17612_v51 = vpop.f32.mrb[114].mxu0 }
 0x1db   :  { %18116 = vmatpush3.bf16.msra.mxu1 %v20187_v57  ;;  %17859 = vmatprep.subr.bf16.mxu0 %v20188_v41  ;;  %v22696_v57 = vpack.c.bf16 %v3359_v7, %v22636_v43  ;;  %v3348_v60 = vmul.f32 0.2, %v3328_v9  ;;  %v3331_v3 = vadd.f32 %v17592_v11, %v22324_v12  ;;  %v22703_v58 = vpack.c.bf16 %v3133_v18, %v3131_v33  ;;  %v20192_v43 = vld [vmem:[%s24831_s2 + $0x1b8] sm:$0xff]   ;;  %v3505_v33 = vpop.f32.mrb[115].mxu0 }
 0x1dc   :  { %18117 = vmatprep.subr.bf16.mxu1 %v20189_v45  ;;  %25153 = vst [vmem:[#allocation109_spill] sm:$0xff] %v22699_v1  ;;  %v3503_v2 = vadd.f32 %v22367_v55, %v3502_v36  ;;  %v3346_v23 = vmul.f32 0.2, %v3320_v35  ;;  %v3323_v22 = vadd.f32 %v22324_v12, %v3322_v5  ;;  %v3567_v50 = vmul.f32 0.2, %v3511_v38 }
 0x1dd   :  { %25154 = vst [vmem:[#allocation110_spill] sm:$0xff] %v22703_v58  ;;  %18102 = vmatmul.mubr.bf16.gmra.mrb[140].mxu1 %v22109_v44  ;;  %v3514_v18 = vadd.f32 %v22367_v55, %v17612_v51  ;;  %v20193_v44 = vld [vmem:[%s24831_s2 + $0x180] sm:$0xff]   ;;  %v3364_v34 = vmax.f32 %v3328_v9, %v3348_v60  ;;  %v3349_v20 = vmul.f32 0.2, %v3331_v3  ;;  %v3506_v12 = vadd.f32 %v22367_v55, %v3505_v33  ;;  %v25157_v9 = vld [vmem:[#allocation46_spill] sm:$0xff] }
 0x1de   :  { %17860 = vmatpush3.bf16.msra.mxu0 %v20188_v41  ;;  %v25155_v41 = vpack.c.bf16 %v25096_v14, %v21815_v61  ;;  %v3565_v11 = vmul.f32 0.2, %v3503_v2  ;;  %v3362_v36 = vmax.f32 %v3320_v35, %v3346_v23  ;;  %v3347_v5 = vmul.f32 0.2, %v3323_v22  ;;  %v20194_v60 = vld [vmem:[%s24831_s2 + $0x1c0] sm:$0xff]   ;;  %v17643_v35 = vpop.f32.mrb[112].mxu1 }
 0x1df   :  { %18118 = vmatpush3.bf16.msra.mxu1 %v20189_v45  ;;  %17861 = vmatprep.subr.bf16.mxu0 %v20190_v28  ;;  %v3583_v51 = vmax.f32 %v3511_v38, %v3567_v50  ;;  %v3568_v7 = vmul.f32 0.2, %v3514_v18  ;;  %v25156_v45 = vld [vmem:[#allocation45_spill] sm:$0xff]  ;;  %v3365_v19 = vmax.f32 %v3331_v3, %v3349_v20  ;;  %v20195_v3 = vld [vmem:[%s24831_s2 + $0x188] sm:$0xff]   ;;  %v3733_v50 = vpop.f32.mrb[113].mxu1 }
 0x1e0   :  { %18121 = vmatprep.mubr.bf16.mxu1 %v25155_v41  ;;  %18119 = vmatprep.subr.bf16.mxu1 %v20191_v6  ;;  %v3581_v14 = vmax.f32 %v3503_v2, %v3565_v11  ;;  %v3566_v41 = vmul.f32 0.2, %v3506_v12  ;;  %v3363_v33 = vmax.f32 %v3323_v22, %v3347_v5  ;;  %v22728_v23 = vpack.c.bf16 %v3364_v34, %v3362_v36  ;;  %v25172_v58 = vld [vmem:[#allocation18_spill] sm:$0xff] }
 0x1e1   :  { %17846 = vmatmul.mubr.bf16.gmra.mrb[140].mxu0 %v25156_v45  ;;  %v22730_v38 = vmax.f32 %v3514_v18, %v3568_v7  ;;  %v22742_v22 = vpack.c.bf16 %v3134_v54, %v22692_v13  ;;  %v17615_v7 = vpop.f32.mrb[116].mxu0  ;;  %v17644_v18 = vpop.f32.mrb[114].mxu1 }
 0x1e2   :  { %17862 = vmatpush3.bf16.msra.mxu0 %v20190_v28  ;;  %17865 = vmatprep.mubr.bf16.mxu0 %v25157_v9  ;;  %25158 = vst [vmem:[#allocation45_spill] sm:$0xff] %v22728_v23  ;;  %v22738_v28 = vld [vmem:[%s24832_s3] ss:$0 sm:$0xff]  ;;  %v22744_v34 = vmax.f32 %v3506_v12, %v3566_v41  ;;  %v22748_v20 = vpack.c.bf16 %v3363_v33, %v22671_v27  ;;  %v3518_v5 = vpop.f32.mrb[117].mxu0  ;;  %v3736_v54 = vpop.f32.mrb[115].mxu1  ;;  %v20196_v27 = vld [vmem:[%s24831_s2 + $0x1c8] sm:$0xff]  }
 0x1e3   :  { %18120 = vmatpush3.bf16.msra.mxu1 %v20191_v6  ;;  %17863 = vmatprep.subr.bf16.mxu0 %v20192_v43  ;;  %v3742_v2 = vadd.f32 %v22738_v28, %v17643_v35  ;;  %25159 = vst [vmem:[#allocation46_spill] sm:$0xff] %v22742_v22  ;;  %v3734_v6 = vadd.f32 %v22738_v28, %v3733_v50  ;;  %v17616_v41 = vpop.f32.mrb[118].mxu0 }
 0x1e4   :  { %18137 = vmatprep.subr.bf16.mxu1 %v20193_v44  ;;  %v22750_v11 = vpack.c.bf16 %v3365_v19, %v3363_v33  ;;  %v3527_v36 = vadd.f32 %v22367_v55, %v17615_v7  ;;  %v3745_v9 = vadd.f32 %v22738_v28, %v17644_v18  ;;  %v22754_v35 = vpack.c.bf16 %v3583_v51, %v3581_v14  ;;  %v22767_v51 = vld [vmem:[%s24832_s3] ss:$0 sm:$0xff] }
 0x1e5   :  { %v3798_v45 = vmul.f32 0.2, %v3742_v2  ;;  %v3519_v12 = vadd.f32 %v22367_v55, %v3518_v5  ;;  %v25162_v50 = vpack.c.bf16 %v21847_v56, %v25095_v25  ;;  %v3796_v19 = vmul.f32 0.2, %v3734_v6  ;;  %v20197_v25 = vld [vmem:[%s24831_s2 + $0x190] sm:$0xff]  }
 0x1e6   :  { %25160 = vst [vmem:[#allocation111_spill] sm:$0xff] %v22750_v11  ;;  %25161 = vst [vmem:[#allocation112_spill] sm:$0xff] %v22754_v35  ;;  %17864 = vmatpush3.bf16.msra.mxu0 %v20192_v43  ;;  %v3737_v33 = vadd.f32 %v22738_v28, %v3736_v54  ;;  %v3571_v7 = vmul.f32 0.2, %v3527_v36  ;;  %v3530_v55 = vadd.f32 %v22767_v51, %v17616_v41  ;;  %v3521_v43 = vpop.f32.mrb[119].mxu0  ;;  %v25164_v35 = vld [vmem:[#allocation10_spill] sm:$0xff] }
 0x1e7   :  { %18122 = vmatmul.mubr.bf16.vlgmr.msra.gmra.mrb[128].mxu1 %v25162_v50  ;;  %v25163_v56 = vpack.c.bf16 %v21899_v59, %v21905_v63  ;;  %v3814_v14 = vmax.f32 %v3742_v2, %v3798_v45  ;;  %v3799_v18 = vmul.f32 0.2, %v3745_v9  ;;  %v3569_v5 = vmul.f32 0.2, %v3519_v12  ;;  %17881 = vmatprep.subr.bf16.mxu0 %v20194_v60  ;;  %v25166_v2 = vld [vmem:[#allocation14_spill] sm:$0xff]  ;;  %v20198_v45 = vld [vmem:[%s24831_s2 + $0x1d0] sm:$0xff]  }
 0x1e8   :  { %18138 = vmatpush3.bf16.msra.mxu1 %v20193_v44  ;;  %v3522_v54 = vadd.f32 %v22767_v51, %v3521_v43  ;;  %v3812_v50 = vmax.f32 %v3734_v6, %v3796_v19  ;;  %v3797_v61 = vmul.f32 0.2, %v3737_v33  ;;  %v3587_v41 = vmax.f32 %v3527_v36, %v3571_v7  ;;  %v17647_v36 = vpop.f32.mrb[116].mxu1  ;;  %v17619_v43 = vpop.f32.mrb[120].mxu0 }
 0x1e9   :  { %18125 = vmatprep.mubr.bf16.mxu1 %v25163_v56  ;;  %18139 = vmatprep.subr.bf16.mxu1 %v20195_v3  ;;  %v3572_v22 = vmul.f32 0.2, %v3530_v55  ;;  %v22778_v59 = vmax.f32 %v3745_v9, %v3799_v18  ;;  %v3585_v44 = vmax.f32 %v3519_v12, %v3569_v5  ;;  %v20199_v9 = vld [vmem:[%s24831_s2 + $0x198] sm:$0xff]   ;;  %v3749_v12 = vpop.f32.mrb[117].mxu1  ;;  %v3534_v18 = vpop.f32.mrb[121].mxu0 }
 0x1ea   :  { %17866 = vmatmul.mubr.bf16.vlgmr.msra.gmra.mrb[128].mxu0 %v25164_v35  ;;  %v3570_v56 = vmul.f32 0.2, %v3522_v54  ;;  %v22786_v6 = vmax.f32 %v3737_v33, %v3797_v61  ;;  %v22788_v19 = vpack.c.bf16 %v3814_v14, %v3812_v50  ;;  %v3758_v35 = vadd.f32 %v22738_v28, %v17647_v36  ;;  %v17648_v33 = vpop.f32.mrb[118].mxu1 }
 0x1eb   :  { %25165 = vst [vmem:[#allocation10_spill] sm:$0xff] %v22778_v59  ;;  %17869 = vmatprep.mubr.bf16.mxu0 %v25166_v2  ;;  %17882 = vmatpush3.bf16.msra.mxu0 %v20194_v60  ;;  %v22794_v7 = vmax.f32 %v3530_v55, %v3572_v22  ;;  %v3750_v61 = vadd.f32 %v22738_v28, %v3749_v12  ;;  %v3752_v2 = vpop.f32.mrb[119].mxu1  ;;  %v25177_v59 = vld [vmem:[#allocation29_spill] sm:$0xff] }
 0x1ec   :  { %25167 = vst [vmem:[#allocation14_spill] sm:$0xff] %v22786_v6  ;;  %25168 = vst [vmem:[#allocation113_spill] sm:$0xff] %v22788_v19  ;;  %18140 = vmatpush3.bf16.msra.mxu1 %v20195_v3  ;;  %17883 = vmatprep.subr.bf16.mxu0 %v20196_v27  ;;  %v22796_v60 = vmax.f32 %v3522_v54, %v3570_v56  ;;  %v22799_v14 = vpack.c.bf16 %v3587_v41, %v3585_v44  ;;  %v3802_v5 = vmul.f32 0.2, %v3758_v35  ;;  %v17620_v54 = vpop.f32.mrb[122].mxu0  ;;  %v25170_v56 = vld [vmem:[#allocation61_spill] sm:$0xff] }
 0x1ed   :  { %18141 = vmatprep.subr.bf16.mxu1 %v20197_v25  ;;  %v3543_v3 = vadd.f32 %v22767_v51, %v17619_v43  ;;  %v3761_v50 = vadd.f32 %v22738_v28, %v17648_v33  ;;  %v3535_v55 = vadd.f32 %v22767_v51, %v3534_v18  ;;  %v20200_v41 = vld [vmem:[%s24831_s2 + $0x1d8] sm:$0xff]   ;;  %v3800_v44 = vmul.f32 0.2, %v3750_v61  ;;  %v3537_v22 = vpop.f32.mrb[123].mxu0 }
 0x1ee   :  { %25169 = vst [vmem:[#allocation114_spill] sm:$0xff] %v22799_v14  ;;  %v3753_v36 = vadd.f32 %v22738_v28, %v3752_v2  ;;  %v3546_v33 = vadd.f32 %v22767_v51, %v17620_v54  ;;  %v25171_v18 = vpack.c.bf16 %v25115_v47, %v21976_v0  ;;  %v3538_v2 = vadd.f32 %v22767_v51, %v3537_v22 }
 0x1ef   :  { %17884 = vmatpush3.bf16.msra.mxu0 %v20196_v27  ;;  %18126 = vmatmul.mubr.bf16.gmra.mrb[132].mxu1 %v25170_v56  ;;  %v3575_v43 = vmul.f32 0.2, %v3543_v3  ;;  %v20201_v27 = vld [vmem:[%s24831_s2 + $0x1a0] sm:$0xff]   ;;  %v3818_v56 = vmax.f32 %v3758_v35, %v3802_v5  ;;  %v3803_v63 = vmul.f32 0.2, %v3761_v50  ;;  %v3816_v12 = vmax.f32 %v3750_v61, %v3800_v44  ;;  %v25173_v35 = vld [vmem:[#allocation51_spill] sm:$0xff] }
 0x1f0   :  { %18129 = vmatprep.mubr.bf16.mxu1 %v25171_v18  ;;  %18142 = vmatpush3.bf16.msra.mxu1 %v20197_v25  ;;  %v3573_v19 = vmul.f32 0.2, %v3535_v55  ;;  %v3801_v6 = vmul.f32 0.2, %v3753_v36  ;;  %v3576_v14 = vmul.f32 0.2, %v3546_v33 }
 0x1f1   :  { %17885 = vmatprep.subr.bf16.mxu0 %v20198_v45  ;;  %18143 = vmatprep.subr.bf16.mxu1 %v20199_v9  ;;  %v3591_v54 = vmax.f32 %v3543_v3, %v3575_v43  ;;  %v22822_v0 = vmax.f32 %v3761_v50, %v3803_v63  ;;  %v3574_v18 = vmul.f32 0.2, %v3538_v2  ;;  %v20202_v5 = vld [vmem:[%s24831_s2 + $0x1e0] sm:$0xff]   ;;  %v17651_v3 = vpop.f32.mrb[120].mxu1  ;;  %v22832_v22 = vpack.c.bf16 %v3818_v56, %v3816_v12  ;;  %v20203_v63 = vld [vmem:[%s24831_s2 + $0x1a8] sm:$0xff]  }
 0x1f2   :  { %17870 = vmatmul.mubr.bf16.gmra.mrb[132].mxu0 %v25172_v58  ;;  %v3589_v25 = vmax.f32 %v3535_v55, %v3573_v19  ;;  %v22830_v61 = vmax.f32 %v3753_v36, %v3801_v6  ;;  %v22834_v58 = vmax.f32 %v3546_v33, %v3576_v14  ;;  %v3774_v19 = vadd.f32 %v22738_v28, %v17651_v3  ;;  %v17623_v55 = vpop.f32.mrb[124].mxu0 }
 0x1f3   :  { %17873 = vmatprep.mubr.bf16.mxu0 %v25173_v35  ;;  %17886 = vmatpush3.bf16.msra.mxu0 %v20198_v45  ;;  %25174 = vst [vmem:[#allocation61_spill] sm:$0xff] %v22832_v22  ;;  %v3765_v45 = vpop.f32.mrb[121].mxu1  ;;  %v22840_v50 = vmax.f32 %v3538_v2, %v3574_v18  ;;  %v3559_v14 = vadd.f32 %v22767_v51, %v17623_v55  ;;  %v3550_v12 = vpop.f32.mrb[125].mxu0 }
 0x1f4   :  { %18144 = vmatpush3.bf16.msra.mxu1 %v20199_v9  ;;  %17887 = vmatprep.subr.bf16.mxu0 %v20200_v41  ;;  %v3766_v6 = vadd.f32 %v22738_v28, %v3765_v45  ;;  %v17652_v44 = vpop.f32.mrb[122].mxu1  ;;  %v22843_v36 = vpack.c.bf16 %v3591_v54, %v3589_v25  ;;  %v3806_v43 = vmul.f32 0.2, %v3774_v19  ;;  %v3551_v18 = vadd.f32 %v22767_v51, %v3550_v12  ;;  %v17624_v35 = vpop.f32.mrb[126].mxu0  ;;  %v20204_v25 = vld [vmem:[%s24831_s2 + $0x1e8] sm:$0xff]  }
 0x1f5   :  { %18145 = vmatprep.subr.bf16.mxu1 %v20201_v27  ;;  %v3777_v33 = vadd.f32 %v22738_v28, %v17652_v44  ;;  %v3768_v56 = vpop.f32.mrb[123].mxu1  ;;  %v25175_v54 = vpack.c.bf16 %v22011_v62, %v22013_v37  ;;  %v3579_v44 = vmul.f32 0.2, %v3559_v14  ;;  %v3562_v2 = vadd.f32 %v22767_v51, %v17624_v35  ;;  %v3553_v12 = vpop.f32.mrb[127].mxu0  ;;  %v20205_v62 = vld [vmem:[%s24831_s2 + $0x1b0] sm:$0xff]  }
 0x1f6   :  { %v3804_v3 = vmul.f32 0.2, %v3766_v6  ;;  %v3769_v45 = vadd.f32 %v22738_v28, %v3768_v56  ;;  %v3822_v37 = vmax.f32 %v3774_v19, %v3806_v43  ;;  %v3577_v9 = vmul.f32 0.2, %v3551_v18  ;;  %v25178_v19 = vld [vmem:[#allocation35_spill] sm:$0xff] }
 0x1f7   :  { %17888 = vmatpush3.bf16.msra.mxu0 %v20200_v41  ;;  %18130 = vmatmul.mubr.bf16.gmra.mrb[136].mxu1 %v25175_v54  ;;  %v25176_v41 = vpack.c.bf16 %v22049_v8, %v22055_v52  ;;  %v3807_v54 = vmul.f32 0.2, %v3777_v33  ;;  %v3554_v56 = vadd.f32 %v22767_v51, %v3553_v12  ;;  %v3595_v35 = vmax.f32 %v3559_v14, %v3579_v44  ;;  %v17655_v51 = vpop.f32.mrb[124].mxu1  ;;  %v20208_v44 = vld [vmem:[%s24831_s2 + $0x1f8] sm:$0xff]   ;;  %v25233_v52 = vld [vmem:[#allocation33_spill] sm:$0xff] }
 0x1f8   :  { %18146 = vmatpush3.bf16.msra.mxu1 %v20201_v27  ;;  %17889 = vmatprep.subr.bf16.mxu0 %v20202_v5  ;;  %v3820_v47 = vmax.f32 %v3766_v6, %v3804_v3  ;;  %v3805_v55 = vmul.f32 0.2, %v3769_v45  ;;  %v3580_v22 = vmul.f32 0.2, %v3562_v2  ;;  %v3593_v27 = vmax.f32 %v3551_v18, %v3577_v9 }
 0x1f9   :  { %18133 = vmatprep.mubr.bf16.mxu1 %v25176_v41  ;;  %18147 = vmatprep.subr.bf16.mxu1 %v20203_v63  ;;  %v22870_v8 = vmax.f32 %v3777_v33, %v3807_v54  ;;  %v3578_v41 = vmul.f32 0.2, %v3554_v56  ;;  %v3790_v14 = vadd.f32 %v22738_v28, %v17655_v51  ;;  %v3781_v33 = vpop.f32.mrb[125].mxu1  ;;  %v25180_v51 = vld [vmem:[#allocation40_spill] sm:$0xff] }
 0x1fa   :  { %17874 = vmatmul.mubr.bf16.gmra.mrb[136].mxu0 %v25177_v59  ;;  %v22875_v43 = vmax.f32 %v3769_v45, %v3805_v55  ;;  %v22877_v12 = vpack.c.bf16 %v3822_v37, %v3820_v47  ;;  %v3596_v6 = vmax.f32 %v3562_v2, %v3580_v22  ;;  %v20206_v59 = vld [vmem:[%s24831_s2 + $0x1f0] sm:$0xff]   ;;  %v3782_v47 = vadd.f32 %v22738_v28, %v3781_v33  ;;  %v17656_v18 = vpop.f32.mrb[126].mxu1  ;;  %v20209_v37 = vld [vmem:[%s24831_s2 + $0x1c0] sm:$0xff]  }
 0x1fb   :  { %17877 = vmatprep.mubr.bf16.mxu0 %v25178_v19  ;;  %17890 = vmatpush3.bf16.msra.mxu0 %v20202_v5  ;;  %v22883_v9 = vmax.f32 %v3554_v56, %v3578_v41  ;;  %v20207_v5 = vld [vmem:[%s24831_s2 + $0x1b8] sm:$0xff]   ;;  %v22889_v22 = vpack.c.bf16 %v3595_v35, %v3593_v27  ;;  %v3810_v2 = vmul.f32 0.2, %v3790_v14  ;;  %v3793_v3 = vadd.f32 %v22738_v28, %v17656_v18  ;;  %v3784_v45 = vpop.f32.mrb[127].mxu1  ;;  %v25225_v55 = vld [vmem:[#allocation17_spill] sm:$0xff] }
 0x1fc   :  { %25179 = vst [vmem:[#allocation18_spill] sm:$0xff] %v22877_v12  ;;  %18148 = vmatpush3.bf16.msra.mxu1 %v20203_v63  ;;  %17891 = vmatprep.subr.bf16.mxu0 %v20204_v25  ;;  %v3808_v54 = vmul.f32 0.2, %v3782_v47  ;;  %v3785_v56 = vadd.f32 %v22738_v28, %v3784_v45  ;;  %v25181_v28 = vld [vmem:[#allocation5_spill] sm:$0xff]  ;;  %v25186_v45 = vld [vmem:[#allocation12_spill] sm:$0xff]  ;;  %v25231_v63 = vld [vmem:[#allocation94_spill] sm:$0xff] }
 0x1fd   :  { %18149 = vmatprep.subr.bf16.mxu1 %v20205_v62  ;;  %v22907_v27 = vpack.c.bf16 %v3596_v6, %v22883_v9  ;;  %v20210_v6 = vld [vmem:[%s24831_s2 + $0x200] sm:$0xff]   ;;  %v25240_v12 = vld [vmem:[#allocation100_spill] sm:$0xff] }
 0x1fe   :  { %v3824_v41 = vmax.f32 %v3782_v47, %v3808_v54  ;;  %v3809_v19 = vmul.f32 0.2, %v3785_v56  ;;  %v20212_v47 = vld [vmem:[%s24831_s2 + $0x208] sm:$0xff]  }
 0x1ff   :  { %17892 = vmatpush3.bf16.msra.mxu0 %v20204_v25  ;;  %18134 = vmatmul.mubr.bf16.gmra.mrb[140].mxu1 %v22140_v40  ;;  %v3826_v40 = vmax.f32 %v3790_v14, %v3810_v2  ;;  %v3811_v25 = vmul.f32 0.2, %v3793_v3  ;;  %v25184_v2 = vld [vmem:[#allocation55_spill] sm:$0xff] }
 0x200   :  { %18150 = vmatpush3.bf16.msra.mxu1 %v20205_v62  ;;  %18153 = vmatprep.mubr.bf16.mxu1 %v22008_v16  ;;  %v22915_v18 = vmax.f32 %v3785_v56, %v3809_v19  ;;  %v20211_v16 = vld [vmem:[%s24831_s2 + $0x1c8] sm:$0xff]   ;;  %v20216_v56 = vld [vmem:[%s24831_s2 + $0x218] sm:$0xff]   ;;  %v25190_v19 = vld [vmem:[#allocation21_spill] sm:$0xff] }
 0x201   :  { %17893 = vmatprep.subr.bf16.mxu0 %v20206_v59  ;;  %18151 = vmatprep.subr.bf16.mxu1 %v20207_v5  ;;  %v3827_v33 = vmax.f32 %v3793_v3, %v3811_v25  ;;  %v22917_v62 = vpack.c.bf16 %v3826_v40, %v3824_v41  ;;  %v25185_v3 = vld [vmem:[#allocation9_spill] sm:$0xff]  ;;  %v25188_v40 = vld [vmem:[#allocation59_spill] sm:$0xff]  ;;  %v25189_v41 = vld [vmem:[#allocation16_spill] sm:$0xff] }
 0x202   :  { %17878 = vmatmul.mubr.bf16.gmra.mrb[140].mxu0 %v25180_v51  ;;  %v20217_v25 = vld [vmem:[%s24831_s2 + $0x1e0] sm:$0xff]  }
 0x203   :  { %17894 = vmatpush3.bf16.msra.mxu0 %v20206_v59  ;;  %17897 = vmatprep.mubr.bf16.mxu0 %v25181_v28  ;;  %25182 = vst [vmem:[#allocation51_spill] sm:$0xff] %v22917_v62  ;;  %v22925_v14 = vpack.c.bf16 %v3827_v33, %v22915_v18  ;;  %v20218_v51 = vld [vmem:[%s24831_s2 + $0x220] sm:$0xff]   ;;  %v20219_v33 = vld [vmem:[%s24831_s2 + $0x1e8] sm:$0xff]   ;;  %v25239_v62 = vld [vmem:[#allocation95_spill] sm:$0xff] }
 0x204   :  { %18152 = vmatpush3.bf16.msra.mxu1 %v20207_v5  ;;  %17895 = vmatprep.subr.bf16.mxu0 %v20208_v44  ;;  %v20213_v5 = vld [vmem:[%s24831_s2 + $0x1d0] sm:$0xff]   ;;  %v20220_v28 = vld [vmem:[%s24831_s2 + $0x228] sm:$0xff]  }
 0x205   :  { %18169 = vmatprep.subr.bf16.mxu1 %v20209_v37  ;;  %25183 = vst [vmem:[#allocation29_spill] sm:$0xff] %v22925_v14  ;;  %v20289_v14 = vld [vmem:[%s24831_s2 + $0xc0] sm:$0xff]  }
 0x207   :  { %17896 = vmatpush3.bf16.msra.mxu0 %v20208_v44  ;;  %18154 = vmatmul.mubr.bf16.vlgmr.msra.gmra.mrb[128].mxu1 %v21894_v24  ;;  %v20214_v44 = vld [vmem:[%s24831_s2 + $0x210] sm:$0xff]   ;;  %v20215_v24 = vld [vmem:[%s24831_s2 + $0x1d8] sm:$0xff]  }
 0x208   :  { %18157 = vmatprep.mubr.bf16.mxu1 %v25184_v2  ;;  %18170 = vmatpush3.bf16.msra.mxu1 %v20209_v37  ;;  %v25187_v37 = vld [vmem:[#allocation64_spill] sm:$0xff] }
 0x209   :  { %17913 = vmatprep.subr.bf16.mxu0 %v20210_v6  ;;  %18171 = vmatprep.subr.bf16.mxu1 %v20211_v16  ;;  %v22945_v54 = vpack.c.bf16 %v25187_v37, %v25028_v15  ;;  %v25194_v2 = vld [vmem:[#allocation32_spill] sm:$0xff]  ;;  %v20225_v37 = vld [vmem:[%s24831_s2 + $0x200] sm:$0xff]  }
 0x20a   :  { %17898 = vmatmul.mubr.bf16.vlgmr.msra.gmra.mrb[128].mxu0 %v25185_v3  ;;  %v20222_v3 = vld [vmem:[%s24831_s2 + $0x230] sm:$0xff]  }
 0x20b   :  { %17901 = vmatprep.mubr.bf16.mxu0 %v25186_v45  ;;  %17914 = vmatpush3.bf16.msra.mxu0 %v20210_v6  ;;  %v25191_v6 = vld [vmem:[#allocation69_spill] sm:$0xff]  ;;  %v20223_v45 = vld [vmem:[%s24831_s2 + $0x1f8] sm:$0xff]  }
 0x20c   :  { %18172 = vmatpush3.bf16.msra.mxu1 %v20211_v16  ;;  %17915 = vmatprep.subr.bf16.mxu0 %v20212_v47  ;;  %v20221_v16 = vld [vmem:[%s24831_s2 + $0x1f0] sm:$0xff]  }
 0x20d   :  { %18173 = vmatprep.subr.bf16.mxu1 %v20213_v5 }
 0x20f   :  { %17916 = vmatpush3.bf16.msra.mxu0 %v20212_v47  ;;  %18158 = vmatmul.mubr.bf16.gmra.mrb[132].mxu1 %v25188_v40  ;;  %v25192_v47 = vld [vmem:[#allocation72_spill] sm:$0xff]  ;;  %v25197_v40 = vld [vmem:[#allocation37_spill] sm:$0xff] }
 0x210   :  { %18161 = vmatprep.mubr.bf16.mxu1 %v22945_v54  ;;  %18174 = vmatpush3.bf16.msra.mxu1 %v20213_v5  ;;  %v25193_v5 = vld [vmem:[#allocation25_spill] sm:$0xff] }
 0x211   :  { %17917 = vmatprep.subr.bf16.mxu0 %v20214_v44  ;;  %18175 = vmatprep.subr.bf16.mxu1 %v20215_v24 }
 0x212   :  { %17902 = vmatmul.mubr.bf16.gmra.mrb[132].mxu0 %v25189_v41  ;;  %v20226_v41 = vld [vmem:[%s24831_s2 + $0x40] sm:$0xff]  }
 0x213   :  { %17905 = vmatprep.mubr.bf16.mxu0 %v25190_v19  ;;  %17918 = vmatpush3.bf16.msra.mxu0 %v20214_v44  ;;  %v20224_v44 = vld [vmem:[%s24831_s2 + $0x238] sm:$0xff]   ;;  %v20227_v19 = vld [vmem:[%s24831_s2 + $0x208] sm:$0xff]  }
 0x214   :  { %18176 = vmatpush3.bf16.msra.mxu1 %v20215_v24  ;;  %17919 = vmatprep.subr.bf16.mxu0 %v20216_v56  ;;  %v25195_v24 = vld [vmem:[#allocation77_spill] sm:$0xff] }
 0x215   :  { %18177 = vmatprep.subr.bf16.mxu1 %v20217_v25 }
 0x217   :  { %17920 = vmatpush3.bf16.msra.mxu0 %v20216_v56  ;;  %18162 = vmatmul.mubr.bf16.gmra.mrb[136].mxu1 %v25191_v6  ;;  %v25196_v56 = vld [vmem:[#allocation43_spill] sm:$0xff] }
 0x218   :  { %18165 = vmatprep.mubr.bf16.mxu1 %v25192_v47  ;;  %18178 = vmatpush3.bf16.msra.mxu1 %v20217_v25  ;;  %v25198_v25 = vld [vmem:[#allocation7_spill] sm:$0xff] }
 0x219   :  { %17921 = vmatprep.subr.bf16.mxu0 %v20218_v51  ;;  %18179 = vmatprep.subr.bf16.mxu1 %v20219_v33 }
 0x21a   :  { %17906 = vmatmul.mubr.bf16.gmra.mrb[136].mxu0 %v25193_v5  ;;  %v25201_v5 = vld [vmem:[#allocation11_spill] sm:$0xff] }
 0x21b   :  { %17909 = vmatprep.mubr.bf16.mxu0 %v25194_v2  ;;  %17922 = vmatpush3.bf16.msra.mxu0 %v20218_v51  ;;  %v20228_v51 = vld [vmem:[%s24831_s2 + $0x48] sm:$0xff]   ;;  %v25202_v2 = vld [vmem:[#allocation15_spill] sm:$0xff] }
 0x21c   :  { %18180 = vmatpush3.bf16.msra.mxu1 %v20219_v33  ;;  %17923 = vmatprep.subr.bf16.mxu0 %v20220_v28  ;;  %v25199_v33 = vld [vmem:[#allocation50_spill] sm:$0xff] }
 0x21d   :  { %18181 = vmatprep.subr.bf16.mxu1 %v20221_v16 }
 0x21f   :  { %17924 = vmatpush3.bf16.msra.mxu0 %v20220_v28  ;;  %18166 = vmatmul.mubr.bf16.gmra.mrb[140].mxu1 %v25195_v24  ;;  %v20229_v28 = vld [vmem:[%s24831_s2 + $0x210] sm:$0xff]  }
 0x220   :  { %18182 = vmatpush3.bf16.msra.mxu1 %v20221_v16  ;;  %18185 = vmatprep.mubr.bf16.mxu1 %v25196_v56  ;;  %v25200_v16 = vld [vmem:[#allocation53_spill] sm:$0xff] }
 0x221   :  { %17925 = vmatprep.subr.bf16.mxu0 %v20222_v3  ;;  %18183 = vmatprep.subr.bf16.mxu1 %v20223_v45  ;;  %v20233_v56 = vld [vmem:[%s24831_s2 + $0x220] sm:$0xff]  }
 0x222   :  { %17910 = vmatmul.mubr.bf16.gmra.mrb[140].mxu0 %v25197_v40  ;;  %v25204_v40 = vld [vmem:[#allocation65_spill] sm:$0xff] }
 0x223   :  { %17926 = vmatpush3.bf16.msra.mxu0 %v20222_v3  ;;  %17929 = vmatprep.mubr.bf16.mxu0 %v25198_v25  ;;  %v20230_v3 = vld [vmem:[%s24831_s2 + $0x50] sm:$0xff]  }
 0x224   :  { %18184 = vmatpush3.bf16.msra.mxu1 %v20223_v45  ;;  %17927 = vmatprep.subr.bf16.mxu0 %v20224_v44  ;;  %v20231_v45 = vld [vmem:[%s24831_s2 + $0x218] sm:$0xff]   ;;  %v25205_v25 = vld [vmem:[#allocation19_spill] sm:$0xff] }
 0x225   :  { %18201 = vmatprep.subr.bf16.mxu1 %v20225_v37 }
 0x227   :  { %17928 = vmatpush3.bf16.msra.mxu0 %v20224_v44  ;;  %18186 = vmatmul.mubr.bf16.vlgmr.msra.gmra.mrb[128].mxu1 %v25199_v33  ;;  %v20232_v44 = vld [vmem:[%s24831_s2 + $0x58] sm:$0xff]   ;;  %v20236_v33 = vld [vmem:[%s24831_s2 + $0x68] sm:$0xff]  }
 0x228   :  { %18189 = vmatprep.mubr.bf16.mxu1 %v25200_v16  ;;  %18202 = vmatpush3.bf16.msra.mxu1 %v20225_v37  ;;  %v25203_v37 = vld [vmem:[#allocation57_spill] sm:$0xff]  ;;  %v20237_v16 = vld [vmem:[%s24831_s2 + $0x230] sm:$0xff]  }
 0x229   :  { %18233 = vmatprep.subr.bf16.mxu0 %v20226_v41  ;;  %18203 = vmatprep.subr.bf16.mxu1 %v20227_v19 }
 0x22a   :  { %17930 = vmatmul.mubr.bf16.vlgmr.msra.gmra.mrb[128].mxu0 %v25201_v5  ;;  %v25208_v5 = vld [vmem:[#allocation71_spill] sm:$0xff] }
 0x22b   :  { %17933 = vmatprep.mubr.bf16.mxu0 %v25202_v2  ;;  %18234 = vmatpush3.bf16.msra.mxu0 %v20226_v41  ;;  %v25206_v41 = vld [vmem:[#allocation24_spill] sm:$0xff]  ;;  %v25209_v2 = vld [vmem:[#allocation30_spill] sm:$0xff] }
 0x22c   :  { %18204 = vmatpush3.bf16.msra.mxu1 %v20227_v19  ;;  %18235 = vmatprep.subr.bf16.mxu0 %v20228_v51  ;;  %v20234_v19 = vld [vmem:[%s24831_s2 + $0x60] sm:$0xff]  }
 0x22d   :  { %18205 = vmatprep.subr.bf16.mxu1 %v20229_v28 }
 0x22f   :  { %18190 = vmatmul.mubr.bf16.gmra.mrb[132].mxu1 %v25203_v37  ;;  %18236 = vmatpush3.bf16.msra.mxu0 %v20228_v51  ;;  %v20235_v51 = vld [vmem:[%s24831_s2 + $0x228] sm:$0xff]   ;;  %v20240_v37 = vld [vmem:[%s24831_s2 + $0x78] sm:$0xff]  }
 0x230   :  { %18193 = vmatprep.mubr.bf16.mxu1 %v25204_v40  ;;  %18206 = vmatpush3.bf16.msra.mxu1 %v20229_v28  ;;  %v25207_v28 = vld [vmem:[#allocation68_spill] sm:$0xff] }
 0x231   :  { %18237 = vmatprep.subr.bf16.mxu0 %v20230_v3  ;;  %18207 = vmatprep.subr.bf16.mxu1 %v20231_v45 }
 0x232   :  { %17934 = vmatmul.mubr.bf16.gmra.mrb[132].mxu0 %v25205_v25  ;;  %v20241_v25 = vld [vmem:[%s24831_s2 + $0x40] sm:$0xff]  }
 0x233   :  { %17937 = vmatprep.mubr.bf16.mxu0 %v25206_v41  ;;  %18238 = vmatpush3.bf16.msra.mxu0 %v20230_v3  ;;  %v25210_v3 = vld [vmem:[#allocation36_spill] sm:$0xff]  ;;  %v25212_v41 = vld [vmem:[#allocation47_spill] sm:$0xff] }
 0x234   :  { %18208 = vmatpush3.bf16.msra.mxu1 %v20231_v45  ;;  %18239 = vmatprep.subr.bf16.mxu0 %v20232_v44  ;;  %v20238_v45 = vld [vmem:[%s24831_s2 + $0x70] sm:$0xff]  }
 0x235   :  { %18209 = vmatprep.subr.bf16.mxu1 %v20233_v56 }
 0x237   :  { %18194 = vmatmul.mubr.bf16.gmra.mrb[136].mxu1 %v25207_v28  ;;  %18240 = vmatpush3.bf16.msra.mxu0 %v20232_v44  ;;  %v20239_v44 = vld [vmem:[%s24831_s2 + $0x238] sm:$0xff]  }
 0x238   :  { %18197 = vmatprep.mubr.bf16.mxu1 %v25208_v5  ;;  %18210 = vmatpush3.bf16.msra.mxu1 %v20233_v56  ;;  %v25211_v56 = vld [vmem:[#allocation74_spill] sm:$0xff] }
 0x239   :  { %18241 = vmatprep.subr.bf16.mxu0 %v20234_v19  ;;  %18211 = vmatprep.subr.bf16.mxu1 %v20235_v51 }
 0x23a   :  { %17938 = vmatmul.mubr.bf16.gmra.mrb[136].mxu0 %v25209_v2  ;;  %v25214_v2 = vld [vmem:[#allocation52_spill] sm:$0xff] }
 0x23b   :  { %17941 = vmatprep.mubr.bf16.mxu0 %v25210_v3  ;;  %18242 = vmatpush3.bf16.msra.mxu0 %v20234_v19  ;;  %v25213_v19 = vld [vmem:[#allocation41_spill] sm:$0xff]  ;;  %v25215_v3 = vld [vmem:[#allocation56_spill] sm:$0xff] }
 0x23c   :  { %18212 = vmatpush3.bf16.msra.mxu1 %v20235_v51  ;;  %18243 = vmatprep.subr.bf16.mxu0 %v20236_v33  ;;  %v20242_v51 = vld [vmem:[%s24831_s2] sm:$0xff]  }
 0x23d   :  { %18213 = vmatprep.subr.bf16.mxu1 %v20237_v16 }
 0x23f   :  { %18198 = vmatmul.mubr.bf16.gmra.mrb[140].mxu1 %v25211_v56  ;;  %18244 = vmatpush3.bf16.msra.mxu0 %v20236_v33  ;;  %v20243_v33 = vld [vmem:[%s24831_s2 + $0x48] sm:$0xff]  }
 0x240   :  { %18214 = vmatpush3.bf16.msra.mxu1 %v20237_v16  ;;  %18217 = vmatprep.mubr.bf16.mxu1 %v25212_v41  ;;  %v20244_v16 = vld [vmem:[%s24831_s2 + $0x8] sm:$0xff]   ;;  %v25218_v41 = vld [vmem:[#allocation81_spill] sm:$0xff] }
 0x241   :  { %18245 = vmatprep.subr.bf16.mxu0 %v20238_v45  ;;  %18215 = vmatprep.subr.bf16.mxu1 %v20239_v44 }
 0x242   :  { %17942 = vmatmul.mubr.bf16.gmra.mrb[140].mxu0 %v25213_v19  ;;  %v20250_v19 = vld [vmem:[%s24831_s2 + $0x20] sm:$0xff]  }
 0x243   :  { %18246 = vmatpush3.bf16.msra.mxu0 %v20238_v45  ;;  %18249 = vmatprep.mubr.bf16.mxu0 %v25204_v40  ;;  %v20245_v40 = vld [vmem:[%s24831_s2 + $0x50] sm:$0xff]  }
 0x244   :  { %18216 = vmatpush3.bf16.msra.mxu1 %v20239_v44  ;;  %18247 = vmatprep.subr.bf16.mxu0 %v20240_v37  ;;  %v20246_v45 = vld [vmem:[%s24831_s2 + $0x10] sm:$0xff]   ;;  %v20247_v44 = vld [vmem:[%s24831_s2 + $0x58] sm:$0xff]  }
 0x245   :  { %18521 = vmatprep.subr.bf16.mxu1 %v20241_v25 }
 0x247   :  { %18218 = vmatmul.mubr.bf16.vlgmr.msra.gmra.mrb[128].mxu1 %v25214_v2  ;;  %18248 = vmatpush3.bf16.msra.mxu0 %v20240_v37  ;;  %v20248_v37 = vld [vmem:[%s24831_s2 + $0x18] sm:$0xff]   ;;  %v25220_v2 = vld [vmem:[#allocation73_spill] sm:$0xff] }
 0x248   :  { %18221 = vmatprep.mubr.bf16.mxu1 %v25215_v3  ;;  %18522 = vmatpush3.bf16.msra.mxu1 %v20241_v25  ;;  %v25216_v25 = vld [vmem:[#allocation60_spill] sm:$0xff]  ;;  %v25222_v3 = vld [vmem:[#allocation23_spill] sm:$0xff] }
 0x249   :  { %18265 = vmatprep.subr.bf16.mxu0 %v20242_v51  ;;  %18523 = vmatprep.subr.bf16.mxu1 %v20243_v33 }
 0x24a   :  { %18250 = vmatmul.mubr.bf16.vlgmr.msra.gmra.mrb[144].mxu0 %v25207_v28  ;;  %v20249_v28 = vld [vmem:[%s24831_s2 + $0x60] sm:$0xff]  }
 0x24b   :  { %18253 = vmatprep.mubr.bf16.mxu0 %v25208_v5  ;;  %18266 = vmatpush3.bf16.msra.mxu0 %v20242_v51  ;;  %v25217_v5 = vld [vmem:[#allocation67_spill] sm:$0xff]  ;;  %v20251_v51 = vld [vmem:[%s24831_s2 + $0x68] sm:$0xff]  }
 0x24c   :  { %18524 = vmatpush3.bf16.msra.mxu1 %v20243_v33  ;;  %18267 = vmatprep.subr.bf16.mxu0 %v20244_v16  ;;  %v20252_v33 = vld [vmem:[%s24831_s2 + $0x28] sm:$0xff]  }
 0x24d   :  { %18525 = vmatprep.subr.bf16.mxu1 %v20245_v40 }
 0x24f   :  { %18222 = vmatmul.mubr.bf16.gmra.mrb[132].mxu1 %v25216_v25  ;;  %18268 = vmatpush3.bf16.msra.mxu0 %v20244_v16  ;;  %v25219_v16 = vld [vmem:[#allocation70_spill] sm:$0xff] }
 0x250   :  { %18225 = vmatprep.mubr.bf16.mxu1 %v25217_v5  ;;  %18526 = vmatpush3.bf16.msra.mxu1 %v20245_v40  ;;  %v25221_v40 = vld [vmem:[#allocation86_spill] sm:$0xff] }
 0x251   :  { %18269 = vmatprep.subr.bf16.mxu0 %v20246_v45  ;;  %18527 = vmatprep.subr.bf16.mxu1 %v20247_v44  ;;  %v25223_v25 = vld [vmem:[#allocation78_spill] sm:$0xff] }
 0x252   :  { %18254 = vmatmul.mubr.bf16.gmra.mrb[148].mxu0 %v25211_v56  ;;  %v20253_v56 = vld [vmem:[%s24831_s2 + $0x70] sm:$0xff]  }
 0x253   :  { %18257 = vmatprep.mubr.bf16.mxu0 %v25218_v41  ;;  %18270 = vmatpush3.bf16.msra.mxu0 %v20246_v45  ;;  %v20254_v45 = vld [vmem:[%s24831_s2 + $0x30] sm:$0xff]  }
 0x254   :  { %18528 = vmatpush3.bf16.msra.mxu1 %v20247_v44  ;;  %18271 = vmatprep.subr.bf16.mxu0 %v20248_v37  ;;  %v20255_v44 = vld [vmem:[%s24831_s2 + $0x78] sm:$0xff]  }
 0x255   :  { %18529 = vmatprep.subr.bf16.mxu1 %v20249_v28 }
 0x257   :  { %18226 = vmatmul.mubr.bf16.gmra.mrb[136].mxu1 %v25219_v16  ;;  %18272 = vmatpush3.bf16.msra.mxu0 %v20248_v37  ;;  %v20256_v37 = vld [vmem:[%s24831_s2 + $0x38] sm:$0xff]  }
 0x258   :  { %18229 = vmatprep.mubr.bf16.mxu1 %v25220_v2  ;;  %18530 = vmatpush3.bf16.msra.mxu1 %v20249_v28  ;;  %v20257_v28 = vld [vmem:[%s24831_s2] sm:$0xff]  }
 0x259   :  { %18273 = vmatprep.subr.bf16.mxu0 %v20250_v19  ;;  %18531 = vmatprep.subr.bf16.mxu1 %v20251_v51 }
 0x25a   :  { %18258 = vmatmul.mubr.bf16.gmra.mrb[152].mxu0 %v25221_v40 }
 0x25b   :  { %18261 = vmatprep.mubr.bf16.mxu0 %v25222_v3  ;;  %18274 = vmatpush3.bf16.msra.mxu0 %v20250_v19  ;;  %v25224_v19 = vld [vmem:[#allocation39_spill] sm:$0xff] }
 0x25c   :  { %18532 = vmatpush3.bf16.msra.mxu1 %v20251_v51  ;;  %18275 = vmatprep.subr.bf16.mxu0 %v20252_v33  ;;  %v20258_v51 = vld [vmem:[%s24831_s2 + $0x80] sm:$0xff]  }
 0x25d   :  { %18533 = vmatprep.subr.bf16.mxu1 %v20253_v56 }
 0x25f   :  { %18230 = vmatmul.mubr.bf16.gmra.mrb[140].mxu1 %v25223_v25  ;;  %18276 = vmatpush3.bf16.msra.mxu0 %v20252_v33  ;;  %v20259_v33 = vld [vmem:[%s24831_s2 + $0x8] sm:$0xff]  }
 0x260   :  { %18534 = vmatpush3.bf16.msra.mxu1 %v20253_v56  ;;  %18537 = vmatprep.mubr.bf16.mxu1 %v22400_v42  ;;  %v20260_v56 = vld [vmem:[%s24831_s2 + $0x88] sm:$0xff]  }
 0x261   :  { %18277 = vmatprep.subr.bf16.mxu0 %v20254_v45  ;;  %18535 = vmatprep.subr.bf16.mxu1 %v20255_v44 }
 0x262   :  { %18262 = vmatmul.mubr.bf16.gmra.mrb[156].mxu0 %v25224_v19 }
 0x263   :  { %18278 = vmatpush3.bf16.msra.mxu0 %v20254_v45  ;;  %18281 = vmatprep.mubr.bf16.mxu0 %v22945_v54  ;;  %v20261_v54 = vld [vmem:[%s24831_s2 + $0x10] sm:$0xff]   ;;  %v25226_v45 = vld [vmem:[#allocation62_spill] sm:$0xff] }
 0x264   :  { %18536 = vmatpush3.bf16.msra.mxu1 %v20255_v44  ;;  %18279 = vmatprep.subr.bf16.mxu0 %v20256_v37  ;;  %v20262_v44 = vld [vmem:[%s24831_s2 + $0x90] sm:$0xff]  }
 0x265   :  { %18553 = vmatprep.subr.bf16.mxu1 %v20257_v28 }
 0x267   :  { %18280 = vmatpush3.bf16.msra.mxu0 %v20256_v37  ;;  %18538 = vmatmul.mubr.bf16.vlgmr.msra.gmra.mrb[144].mxu1 %v25225_v55  ;;  %v20263_v37 = vld [vmem:[%s24831_s2 + $0x18] sm:$0xff]  }
 0x268   :  { %18541 = vmatprep.mubr.bf16.mxu1 %v25226_v45  ;;  %18554 = vmatpush3.bf16.msra.mxu1 %v20257_v28  ;;  %v20264_v28 = vld [vmem:[%s24831_s2 + $0x98] sm:$0xff]  }
 0x269   :  { %18297 = vmatprep.subr.bf16.mxu0 %v20258_v51  ;;  %18555 = vmatprep.subr.bf16.mxu1 %v20259_v33 }
 0x26a   :  { %18282 = vmatmul.mubr.bf16.vlgmr.msra.gmra.mrb[144].mxu0 %v25191_v6  ;;  %v20265_v6 = vld [vmem:[%s24831_s2 + $0x20] sm:$0xff]  }
 0x26b   :  { %18285 = vmatprep.mubr.bf16.mxu0 %v25192_v47  ;;  %18298 = vmatpush3.bf16.msra.mxu0 %v20258_v51  ;;  %v25227_v47 = vld [vmem:[#allocation80_spill] sm:$0xff] }
 0x26c   :  { %18556 = vmatpush3.bf16.msra.mxu1 %v20259_v33  ;;  %18299 = vmatprep.subr.bf16.mxu0 %v20260_v56  ;;  %v23149_v51 = vpack.c.bf16 %v25227_v47, %v25028_v15  ;;  %v20266_v33 = vld [vmem:[%s24831_s2 + $0xa0] sm:$0xff]  }
 0x26d   :  { %18557 = vmatprep.subr.bf16.mxu1 %v20261_v54  ;;  %v25230_v47 = vld [vmem:[#allocation49_spill] sm:$0xff] }
 0x26e   :  { %v23177_v59 = vpack.c.bf16 %v25230_v47, %v25028_v15  ;;  %v25232_v47 = vld [vmem:[#allocation99_spill] sm:$0xff] }
 0x26f   :  { %18300 = vmatpush3.bf16.msra.mxu0 %v20260_v56  ;;  %18542 = vmatmul.mubr.bf16.gmra.mrb[148].mxu1 %v22542_v26  ;;  %v20267_v56 = vld [vmem:[%s24831_s2 + $0x28] sm:$0xff]   ;;  %v25263_v26 = vld [vmem:[#allocation104_spill] sm:$0xff] }
 0x270   :  { %18545 = vmatprep.mubr.bf16.mxu1 %v22589_v17  ;;  %18558 = vmatpush3.bf16.msra.mxu1 %v20261_v54  ;;  %v20269_v54 = vld [vmem:[%s24831_s2 + $0x30] sm:$0xff]  }
 0x271   :  { %18301 = vmatprep.subr.bf16.mxu0 %v20262_v44  ;;  %18559 = vmatprep.subr.bf16.mxu1 %v20263_v37 }
 0x272   :  { %18286 = vmatmul.mubr.bf16.gmra.mrb[148].mxu0 %v25195_v24  ;;  %v20268_v24 = vld [vmem:[%s24831_s2 + $0xa8] sm:$0xff]  }
 0x273   :  { %18289 = vmatprep.mubr.bf16.mxu0 %v23149_v51  ;;  %18302 = vmatpush3.bf16.msra.mxu0 %v20262_v44  ;;  %v25228_v44 = vld [vmem:[#allocation90_spill] sm:$0xff] }
 0x274   :  { %18560 = vmatpush3.bf16.msra.mxu1 %v20263_v37  ;;  %18303 = vmatprep.subr.bf16.mxu0 %v20264_v28  ;;  %v25229_v37 = vld [vmem:[#allocation27_spill] sm:$0xff] }
 0x275   :  { %18561 = vmatprep.subr.bf16.mxu1 %v20265_v6 }
 0x277   :  { %18304 = vmatpush3.bf16.msra.mxu0 %v20264_v28  ;;  %18546 = vmatmul.mubr.bf16.gmra.mrb[152].mxu1 %v22631_v10  ;;  %v20270_v28 = vld [vmem:[%s24831_s2 + $0xb0] sm:$0xff]   ;;  %v10129_v10 = vpack.c.bf16 %v22550_v48, %v25028_v15 }
 0x278   :  { %18549 = vmatprep.mubr.bf16.mxu1 %v22682_v29  ;;  %18562 = vmatpush3.bf16.msra.mxu1 %v20265_v6  ;;  %v20271_v6 = vld [vmem:[%s24831_s2 + $0x38] sm:$0xff]  }
 0x279   :  { %18305 = vmatprep.subr.bf16.mxu0 %v20266_v33  ;;  %18563 = vmatprep.subr.bf16.mxu1 %v20267_v56 }
 0x27a   :  { %18290 = vmatmul.mubr.bf16.gmra.mrb[152].mxu0 %v25228_v44 }
 0x27b   :  { %18293 = vmatprep.mubr.bf16.mxu0 %v25229_v37  ;;  %18306 = vmatpush3.bf16.msra.mxu0 %v20266_v33  ;;  %v20272_v33 = vld [vmem:[%s24831_s2 + $0xb8] sm:$0xff]  }
 0x27c   :  { %18564 = vmatpush3.bf16.msra.mxu1 %v20267_v56  ;;  %18307 = vmatprep.subr.bf16.mxu0 %v20268_v24  ;;  %v20273_v56 = vld [vmem:[%s24831_s2 + $0x80] sm:$0xff]  }
 0x27d   :  { %18565 = vmatprep.subr.bf16.mxu1 %v20269_v54 }
 0x27f   :  { %18308 = vmatpush3.bf16.msra.mxu0 %v20268_v24  ;;  %18550 = vmatmul.mubr.bf16.gmra.mrb[156].mxu1 %v22728_v23  ;;  %v20274_v24 = vld [vmem:[%s24831_s2 + $0xc0] sm:$0xff]  }
 0x280   :  { %18566 = vmatpush3.bf16.msra.mxu1 %v20269_v54  ;;  %18569 = vmatprep.mubr.bf16.mxu1 %v23177_v59  ;;  %v20275_v54 = vld [vmem:[%s24831_s2 + $0x88] sm:$0xff]  }
 0x281   :  { %18309 = vmatprep.subr.bf16.mxu0 %v20270_v28  ;;  %18567 = vmatprep.subr.bf16.mxu1 %v20271_v6 }
 0x282   :  { %18294 = vmatmul.mubr.bf16.gmra.mrb[156].mxu0 %v25231_v63 }
 0x283   :  { %18310 = vmatpush3.bf16.msra.mxu0 %v20270_v28  ;;  %18313 = vmatprep.mubr.bf16.mxu0 %v25217_v5  ;;  %v20276_v5 = vld [vmem:[%s24831_s2 + $0xc8] sm:$0xff]   ;;  %v20277_v28 = vld [vmem:[%s24831_s2 + $0x90] sm:$0xff]  }
 0x284   :  { %18568 = vmatpush3.bf16.msra.mxu1 %v20271_v6  ;;  %18311 = vmatprep.subr.bf16.mxu0 %v20272_v33  ;;  %v20278_v6 = vld [vmem:[%s24831_s2 + $0xd0] sm:$0xff]  }
 0x285   :  { %18585 = vmatprep.subr.bf16.mxu1 %v20273_v56 }
 0x287   :  { %18312 = vmatpush3.bf16.msra.mxu0 %v20272_v33  ;;  %18570 = vmatmul.mubr.bf16.vlgmr.msra.gmra.mrb[144].mxu1 %v25232_v47  ;;  %v20279_v33 = vld [vmem:[%s24831_s2 + $0x98] sm:$0xff]  }
 0x288   :  { %18573 = vmatprep.mubr.bf16.mxu1 %v25233_v52  ;;  %18586 = vmatpush3.bf16.msra.mxu1 %v20273_v56  ;;  %v23213_v56 = vpack.c.bf16 %v22587_v53, %v25028_v15  ;;  %v25234_v53 = vld [vmem:[#allocation85_spill] sm:$0xff] }
 0x289   :  { %18329 = vmatprep.subr.bf16.mxu0 %v20274_v24  ;;  %18587 = vmatprep.subr.bf16.mxu1 %v20275_v54 }
 0x28a   :  { %18314 = vmatmul.mubr.bf16.vlgmr.msra.gmra.mrb[144].mxu0 %v25219_v16  ;;  %v20280_v16 = vld [vmem:[%s24831_s2 + $0xd8] sm:$0xff]  }
 0x28b   :  { %18317 = vmatprep.mubr.bf16.mxu0 %v25220_v2  ;;  %18330 = vmatpush3.bf16.msra.mxu0 %v20274_v24  ;;  %v20281_v2 = vld [vmem:[%s24831_s2 + $0xa0] sm:$0xff]  }
 0x28c   :  { %18588 = vmatpush3.bf16.msra.mxu1 %v20275_v54  ;;  %18331 = vmatprep.subr.bf16.mxu0 %v20276_v5  ;;  %v20282_v24 = vld [vmem:[%s24831_s2 + $0xe0] sm:$0xff]   ;;  %v20283_v54 = vld [vmem:[%s24831_s2 + $0xa8] sm:$0xff]  }
 0x28d   :  { %18589 = vmatprep.subr.bf16.mxu1 %v20277_v28 }
 0x28f   :  { %18332 = vmatpush3.bf16.msra.mxu0 %v20276_v5  ;;  %18574 = vmatmul.mubr.bf16.gmra.mrb[148].mxu1 %v22554_v32  ;;  %v20285_v5 = vld [vmem:[%s24831_s2 + $0xb0] sm:$0xff]  }
 0x290   :  { %18577 = vmatprep.mubr.bf16.mxu1 %v23213_v56  ;;  %18590 = vmatpush3.bf16.msra.mxu1 %v20277_v28  ;;  %v25235_v28 = vld [vmem:[#allocation28_spill] sm:$0xff] }
 0x291   :  { %18333 = vmatprep.subr.bf16.mxu0 %v20278_v6  ;;  %18591 = vmatprep.subr.bf16.mxu1 %v20279_v33 }
 0x292   :  { %18318 = vmatmul.mubr.bf16.gmra.mrb[148].mxu0 %v25223_v25  ;;  %v20284_v25 = vld [vmem:[%s24831_s2 + $0xe8] sm:$0xff]  }
 0x293   :  { %18321 = vmatprep.mubr.bf16.mxu0 %v25234_v53  ;;  %18334 = vmatpush3.bf16.msra.mxu0 %v20278_v6  ;;  %v25236_v6 = vld [vmem:[#allocation91_spill] sm:$0xff] }
 0x294   :  { %18592 = vmatpush3.bf16.msra.mxu1 %v20279_v33  ;;  %18335 = vmatprep.subr.bf16.mxu0 %v20280_v16  ;;  %v20286_v33 = vld [vmem:[%s24831_s2 + $0xf0] sm:$0xff]  }
 0x295   :  { %18593 = vmatprep.subr.bf16.mxu1 %v20281_v2 }
 0x297   :  { %18336 = vmatpush3.bf16.msra.mxu0 %v20280_v16  ;;  %18578 = vmatmul.mubr.bf16.gmra.mrb[152].mxu1 %v22655_v46  ;;  %v20287_v16 = vld [vmem:[%s24831_s2 + $0xb8] sm:$0xff]  }
 0x298   :  { %18581 = vmatprep.mubr.bf16.mxu1 %v22696_v57  ;;  %18594 = vmatpush3.bf16.msra.mxu1 %v20281_v2  ;;  %v25237_v2 = vld [vmem:[#allocation13_spill] sm:$0xff] }
 0x299   :  { %18337 = vmatprep.subr.bf16.mxu0 %v20282_v24  ;;  %18595 = vmatprep.subr.bf16.mxu1 %v20283_v54 }
 0x29a   :  { %18322 = vmatmul.mubr.bf16.gmra.mrb[152].mxu0 %v25235_v28  ;;  %v25249_v28 = vld [vmem:[#allocation34_spill] sm:$0xff] }
 0x29b   :  { %18325 = vmatprep.mubr.bf16.mxu0 %v25236_v6  ;;  %18338 = vmatpush3.bf16.msra.mxu0 %v20282_v24  ;;  %v20288_v24 = vld [vmem:[%s24831_s2 + $0xf8] sm:$0xff]   ;;  %v25246_v6 = vld [vmem:[#allocation82_spill] sm:$0xff] }
 0x29c   :  { %18596 = vmatpush3.bf16.msra.mxu1 %v20283_v54  ;;  %18339 = vmatprep.subr.bf16.mxu0 %v20284_v25  ;;  %v25238_v54 = vld [vmem:[#allocation76_spill] sm:$0xff] }
 0x29d   :  { %18597 = vmatprep.subr.bf16.mxu1 %v20285_v5  ;;  %v8234_v35 = vpack.c.bf16 %v25238_v54, %v25028_v15 }
 0x29f   :  { %18340 = vmatpush3.bf16.msra.mxu0 %v20284_v25  ;;  %18582 = vmatmul.mubr.bf16.gmra.mrb[156].mxu1 %v22748_v20  ;;  %v20290_v25 = vld [vmem:[%s24831_s2 + $0x100] sm:$0xff]  }
 0x2a0   :  { %18598 = vmatpush3.bf16.msra.mxu1 %v20285_v5  ;;  %18601 = vmatprep.mubr.bf16.mxu1 %v25237_v2  ;;  %v20291_v5 = vld [vmem:[%s24831_s2 + $0xc8] sm:$0xff]  }
 0x2a1   :  { %18341 = vmatprep.subr.bf16.mxu0 %v20286_v33  ;;  %18599 = vmatprep.subr.bf16.mxu1 %v20287_v16  ;;  %v25241_v2 = vld [vmem:[#allocation102_spill] sm:$0xff] }
 0x2a2   :  { %18326 = vmatmul.mubr.bf16.gmra.mrb[156].mxu0 %v25239_v62  ;;  %v25243_v62 = vld [vmem:[#allocation75_spill] sm:$0xff] }
 0x2a3   :  { %18342 = vmatpush3.bf16.msra.mxu0 %v20286_v33  ;;  %18345 = vmatprep.mubr.bf16.mxu0 %v8234_v35  ;;  %v20292_v35 = vld [vmem:[%s24831_s2 + $0x108] sm:$0xff]   ;;  %v20293_v33 = vld [vmem:[%s24831_s2 + $0xd0] sm:$0xff]  }
 0x2a4   :  { %18600 = vmatpush3.bf16.msra.mxu1 %v20287_v16  ;;  %18343 = vmatprep.subr.bf16.mxu0 %v20288_v24  ;;  %v25242_v16 = vld [vmem:[#allocation84_spill] sm:$0xff] }
 0x2a5   :  { %18617 = vmatprep.subr.bf16.mxu1 %v20289_v14  ;;  %v25244_v23 = vpack.c.bf16 %v25242_v16, %v25243_v62 }
 0x2a7   :  { %18344 = vmatpush3.bf16.msra.mxu0 %v20288_v24  ;;  %18602 = vmatmul.mubr.bf16.vlgmr.msra.gmra.mrb[144].mxu1 %v25240_v12  ;;  %v25245_v24 = vld [vmem:[#allocation89_spill] sm:$0xff] }
 0x2a8   :  { %18605 = vmatprep.mubr.bf16.mxu1 %v25241_v2  ;;  %18618 = vmatpush3.bf16.msra.mxu1 %v20289_v14  ;;  %v25247_v12 = vpack.c.bf16 %v25245_v24, %v25246_v6  ;;  %v20294_v14 = vld [vmem:[%s24831_s2 + $0x110] sm:$0xff]   ;;  %v20295_v2 = vld [vmem:[%s24831_s2 + $0xd8] sm:$0xff]  }
 0x2a9   :  { %18361 = vmatprep.subr.bf16.mxu0 %v20290_v25  ;;  %18619 = vmatprep.subr.bf16.mxu1 %v20291_v5 }
 0x2aa   :  { %18346 = vmatmul.mubr.bf16.vlgmr.msra.gmra.mrb[144].mxu0 %v25244_v23  ;;  %v20296_v23 = vld [vmem:[%s24831_s2 + $0x118] sm:$0xff]  }
 0x2ab   :  { %18349 = vmatprep.mubr.bf16.mxu0 %v25247_v12  ;;  %18362 = vmatpush3.bf16.msra.mxu0 %v20290_v25  ;;  %v25248_v12 = vld [vmem:[#allocation93_spill] sm:$0xff] }
 0x2ac   :  { %18620 = vmatpush3.bf16.msra.mxu1 %v20291_v5  ;;  %18363 = vmatprep.subr.bf16.mxu0 %v20292_v35  ;;  %v8238_v25 = vpack.c.bf16 %v25248_v12, %v25028_v15  ;;  %v20297_v5 = vld [vmem:[%s24831_s2 + $0xe0] sm:$0xff]  }
 0x2ad   :  { %18621 = vmatprep.subr.bf16.mxu1 %v20293_v33 }
 0x2af   :  { %18364 = vmatpush3.bf16.msra.mxu0 %v20292_v35  ;;  %18606 = vmatmul.mubr.bf16.gmra.mrb[148].mxu1 %v22556_v21  ;;  %v25250_v35 = vld [vmem:[#allocation87_spill] sm:$0xff]  ;;  %v20299_v21 = vld [vmem:[%s24831_s2 + $0xe8] sm:$0xff]  }
 0x2b0   :  { %18609 = vmatprep.mubr.bf16.mxu1 %v22606_v30  ;;  %18622 = vmatpush3.bf16.msra.mxu1 %v20293_v33  ;;  %v25251_v29 = vpack.c.bf16 %v25249_v28, %v25250_v35  ;;  %v20298_v33 = vld [vmem:[%s24831_s2 + $0x120] sm:$0xff]   ;;  %v20301_v28 = vld [vmem:[%s24831_s2 + $0xf0] sm:$0xff]   ;;  %v25256_v30 = vld [vmem:[#allocation42_spill] sm:$0xff] }
 0x2b1   :  { %18365 = vmatprep.subr.bf16.mxu0 %v20294_v14  ;;  %18623 = vmatprep.subr.bf16.mxu1 %v20295_v2 }
 0x2b2   :  { %18350 = vmatmul.mubr.bf16.gmra.mrb[148].mxu0 %v25251_v29  ;;  %v20300_v29 = vld [vmem:[%s24831_s2 + $0x128] sm:$0xff]  }
 0x2b3   :  { %18353 = vmatprep.mubr.bf16.mxu0 %v8238_v25  ;;  %18366 = vmatpush3.bf16.msra.mxu0 %v20294_v14  ;;  %v25253_v14 = vld [vmem:[#allocation31_spill] sm:$0xff] }
 0x2b4   :  { %18624 = vmatpush3.bf16.msra.mxu1 %v20295_v2  ;;  %18367 = vmatprep.subr.bf16.mxu0 %v20296_v23  ;;  %v25252_v2 = vld [vmem:[#allocation8_spill] sm:$0xff] }
 0x2b5   :  { %18625 = vmatprep.subr.bf16.mxu1 %v20297_v5  ;;  %v25254_v25 = vpack.c.bf16 %v25252_v2, %v25253_v14 }
 0x2b7   :  { %18368 = vmatpush3.bf16.msra.mxu0 %v20296_v23  ;;  %18610 = vmatmul.mubr.bf16.gmra.mrb[152].mxu1 %v22674_v49  ;;  %v25255_v23 = vld [vmem:[#allocation98_spill] sm:$0xff] }
 0x2b8   :  { %18613 = vmatprep.mubr.bf16.mxu1 %v22699_v1  ;;  %18626 = vmatpush3.bf16.msra.mxu1 %v20297_v5  ;;  %v25257_v49 = vpack.c.bf16 %v25255_v23, %v25256_v30  ;;  %v20302_v5 = vld [vmem:[%s24831_s2 + $0x130] sm:$0xff]   ;;  %v20303_v1 = vld [vmem:[%s24831_s2 + $0xf8] sm:$0xff]  }
 0x2b9   :  { %18369 = vmatprep.subr.bf16.mxu0 %v20298_v33  ;;  %18627 = vmatprep.subr.bf16.mxu1 %v20299_v21 }
 0x2ba   :  { %18354 = vmatmul.mubr.bf16.gmra.mrb[152].mxu0 %v25254_v25  ;;  %v25259_v25 = vld [vmem:[#allocation22_spill] sm:$0xff] }
 0x2bb   :  { %18357 = vmatprep.mubr.bf16.mxu0 %v25257_v49  ;;  %18370 = vmatpush3.bf16.msra.mxu0 %v20298_v33  ;;  %v20305_v49 = vld [vmem:[%s24831_s2 + $0x100] sm:$0xff]   ;;  %v25258_v33 = vld [vmem:[#allocation26_spill] sm:$0xff] }
 0x2bc   :  { %18628 = vmatpush3.bf16.msra.mxu1 %v20299_v21  ;;  %18371 = vmatprep.subr.bf16.mxu0 %v20300_v29  ;;  %v20304_v21 = vld [vmem:[%s24831_s2 + $0x138] sm:$0xff]   ;;  %v25260_v53 = vpack.c.bf16 %v25258_v33, %v25259_v25 }
 0x2bd   :  { %18629 = vmatprep.subr.bf16.mxu1 %v20301_v28  ;;  %v25267_v33 = vld [vmem:[#allocation88_spill] sm:$0xff] }
 0x2bf   :  { %18372 = vmatpush3.bf16.msra.mxu0 %v20300_v29  ;;  %18614 = vmatmul.mubr.bf16.gmra.mrb[156].mxu1 %v22750_v11  ;;  %v25261_v29 = vld [vmem:[#allocation79_spill] sm:$0xff] }
 0x2c0   :  { %18630 = vmatpush3.bf16.msra.mxu1 %v20301_v28  ;;  %18633 = vmatprep.mubr.bf16.mxu1 %v10129_v10  ;;  %v20306_v10 = vld [vmem:[%s24831_s2 + $0x140] sm:$0xff]   ;;  %v20307_v28 = vld [vmem:[%s24831_s2 + $0x108] sm:$0xff]   ;;  %v25262_v11 = vld [vmem:[#allocation107_spill] sm:$0xff] }
 0x2c1   :  { %18373 = vmatprep.subr.bf16.mxu0 %v20302_v5  ;;  %18631 = vmatprep.subr.bf16.mxu1 %v20303_v1  ;;  %v25264_v17 = vpack.c.bf16 %v25262_v11, %v25263_v26 }
 0x2c2   :  { %18358 = vmatmul.mubr.bf16.gmra.mrb[156].mxu0 %v25260_v53  ;;  %v25265_v53 = vpack.c.bf16 %v22644_v4, %v22591_v39 }
 0x2c3   :  { %18374 = vmatpush3.bf16.msra.mxu0 %v20302_v5  ;;  %18377 = vmatprep.mubr.bf16.mxu0 %v25261_v29  ;;  %v20309_v5 = vld [vmem:[%s24831_s2 + $0x110] sm:$0xff]   ;;  %v10133_v29 = vpack.c.bf16 %v22744_v34, %v25028_v15 }
 0x2c4   :  { %18632 = vmatpush3.bf16.msra.mxu1 %v20303_v1  ;;  %18375 = vmatprep.subr.bf16.mxu0 %v20304_v21  ;;  %v20308_v1 = vld [vmem:[%s24831_s2 + $0x148] sm:$0xff]  }
 0x2c5   :  { %18649 = vmatprep.subr.bf16.mxu1 %v20305_v49 }
 0x2c7   :  { %18376 = vmatpush3.bf16.msra.mxu0 %v20304_v21  ;;  %18634 = vmatmul.mubr.bf16.vlgmr.msra.gmra.mrb[144].mxu1 %v25264_v17  ;;  %v25266_v21 = vld [vmem:[#allocation83_spill] sm:$0xff] }
 0x2c8   :  { %18637 = vmatprep.mubr.bf16.mxu1 %v25265_v53  ;;  %18650 = vmatpush3.bf16.msra.mxu1 %v20305_v49  ;;  %v20310_v17 = vld [vmem:[%s24831_s2 + $0x150] sm:$0xff]   ;;  %v20311_v49 = vld [vmem:[%s24831_s2 + $0x118] sm:$0xff]   ;;  %v25268_v53 = vpack.c.bf16 %v22692_v13, %v22639_v31  ;;  %v20314_v13 = vld [vmem:[%s24831_s2 + $0x160] sm:$0xff]  }
 0x2c9   :  { %18393 = vmatprep.subr.bf16.mxu0 %v20306_v10  ;;  %18651 = vmatprep.subr.bf16.mxu1 %v20307_v28 }
 0x2ca   :  { %18378 = vmatmul.mubr.bf16.vlgmr.msra.gmra.mrb[144].mxu0 %v25266_v21  ;;  %v25269_v21 = vld [vmem:[#allocation92_spill] sm:$0xff] }
 0x2cb   :  { %18381 = vmatprep.mubr.bf16.mxu0 %v25267_v33  ;;  %18394 = vmatpush3.bf16.msra.mxu0 %v20306_v10  ;;  %v20312_v10 = vld [vmem:[%s24831_s2 + $0x158] sm:$0xff]  }
 0x2cc   :  { %18652 = vmatpush3.bf16.msra.mxu1 %v20307_v28  ;;  %18395 = vmatprep.subr.bf16.mxu0 %v20308_v1  ;;  %v20313_v28 = vld [vmem:[%s24831_s2 + $0x120] sm:$0xff]   ;;  %v25270_v33 = vld [vmem:[#allocation96_spill] sm:$0xff] }
 0x2cd   :  { %18653 = vmatprep.subr.bf16.mxu1 %v20309_v5 }
 0x2cf   :  { %18396 = vmatpush3.bf16.msra.mxu0 %v20308_v1  ;;  %18638 = vmatmul.mubr.bf16.gmra.mrb[148].mxu1 %v25268_v53  ;;  %v20315_v1 = vld [vmem:[%s24831_s2 + $0x128] sm:$0xff]   ;;  %v25273_v53 = vld [vmem:[#allocation97_spill] sm:$0xff] }
 0x2d0   :  { %18641 = vmatprep.mubr.bf16.mxu1 %v10133_v29  ;;  %18654 = vmatpush3.bf16.msra.mxu1 %v20309_v5  ;;  %v25271_v5 = vpack.c.bf16 %v22796_v60, %v22730_v38  ;;  %v25272_v29 = vpack.c.bf16 %v22840_v50, %v22794_v7 }
 0x2d1   :  { %18397 = vmatprep.subr.bf16.mxu0 %v20310_v17  ;;  %18655 = vmatprep.subr.bf16.mxu1 %v20311_v49 }
 0x2d2   :  { %18382 = vmatmul.mubr.bf16.gmra.mrb[148].mxu0 %v25269_v21  ;;  %v20319_v21 = vld [vmem:[%s24831_s2 + $0x138] sm:$0xff]  }
 0x2d3   :  { %18385 = vmatprep.mubr.bf16.mxu0 %v25270_v33  ;;  %18398 = vmatpush3.bf16.msra.mxu0 %v20310_v17  ;;  %v20316_v17 = vld [vmem:[%s24831_s2 + $0x168] sm:$0xff]   ;;  %v25275_v33 = vpack.c.bf16 %v22883_v9, %v22834_v58  ;;  %v25278_v9 = vpack.c.bf16 %v25243_v62, %v25238_v54  ;;  %v20325_v54 = vld [vmem:[%s24831_s2 + $0x150] sm:$0xff]  }
 0x2d4   :  { %18656 = vmatpush3.bf16.msra.mxu1 %v20311_v49  ;;  %18399 = vmatprep.subr.bf16.mxu0 %v20312_v10  ;;  %v20317_v49 = vld [vmem:[%s24831_s2 + $0x130] sm:$0xff]   ;;  %v20324_v62 = vld [vmem:[%s24831_s2 + $0x188] sm:$0xff]  }
 0x2d5   :  { %18657 = vmatprep.subr.bf16.mxu1 %v20313_v28 }
 0x2d7   :  { %18400 = vmatpush3.bf16.msra.mxu0 %v20312_v10  ;;  %18642 = vmatmul.mubr.bf16.gmra.mrb[152].mxu1 %v25271_v5  ;;  %v25274_v10 = vld [vmem:[#allocation101_spill] sm:$0xff]  ;;  %v25276_v5 = vld [vmem:[#allocation106_spill] sm:$0xff] }
 0x2d8   :  { %18645 = vmatprep.mubr.bf16.mxu1 %v25272_v29  ;;  %18658 = vmatpush3.bf16.msra.mxu1 %v20313_v28  ;;  %v20318_v28 = vld [vmem:[%s24831_s2 + $0x170] sm:$0xff]  }
 0x2d9   :  { %18401 = vmatprep.subr.bf16.mxu0 %v20314_v13  ;;  %18659 = vmatprep.subr.bf16.mxu1 %v20315_v1  ;;  %v25277_v29 = vld [vmem:[#allocation103_spill] sm:$0xff] }
 0x2da   :  { %18386 = vmatmul.mubr.bf16.gmra.mrb[152].mxu0 %v25273_v53  ;;  %v25279_v53 = vld [vmem:[#allocation54_spill] sm:$0xff] }
 0x2db   :  { %18389 = vmatprep.mubr.bf16.mxu0 %v25274_v10  ;;  %18402 = vmatpush3.bf16.msra.mxu0 %v20314_v13  ;;  %v20320_v13 = vld [vmem:[%s24831_s2 + $0x178] sm:$0xff]   ;;  %v25280_v10 = vld [vmem:[#allocation63_spill] sm:$0xff] }
 0x2dc   :  { %18660 = vmatpush3.bf16.msra.mxu1 %v20315_v1  ;;  %18403 = vmatprep.subr.bf16.mxu0 %v20316_v17  ;;  %v20321_v1 = vld [vmem:[%s24831_s2 + $0x140] sm:$0xff]  }
 0x2dd   :  { %18661 = vmatprep.subr.bf16.mxu1 %v20317_v49 }
 0x2df   :  { %18404 = vmatpush3.bf16.msra.mxu0 %v20316_v17  ;;  %18646 = vmatmul.mubr.bf16.gmra.mrb[156].mxu1 %v25275_v33  ;;  %v20322_v17 = vld [vmem:[%s24831_s2 + $0x180] sm:$0xff]   ;;  %v20326_v33 = vld [vmem:[%s24831_s2 + $0x190] sm:$0xff]  }
 0x2e0   :  { %18662 = vmatpush3.bf16.msra.mxu1 %v20317_v49  ;;  %18665 = vmatprep.mubr.bf16.mxu1 %v25276_v5  ;;  %v20323_v49 = vld [vmem:[%s24831_s2 + $0x148] sm:$0xff]   ;;  %v20327_v5 = vld [vmem:[%s24831_s2 + $0x158] sm:$0xff]  }
 0x2e1   :  { %18405 = vmatprep.subr.bf16.mxu0 %v20318_v28  ;;  %18663 = vmatprep.subr.bf16.mxu1 %v20319_v21 }
 0x2e2   :  { %18390 = vmatmul.mubr.bf16.gmra.mrb[156].mxu0 %v25277_v29  ;;  %v20330_v29 = vld [vmem:[%s24831_s2 + $0x1a0] sm:$0xff]  }
 0x2e3   :  { %18406 = vmatpush3.bf16.msra.mxu0 %v20318_v28  ;;  %18409 = vmatprep.mubr.bf16.mxu0 %v25278_v9  ;;  %v25281_v28 = vpack.c.bf16 %v25246_v6, %v25242_v16  ;;  %v25284_v6 = vld [vmem:[#allocation112_spill] sm:$0xff]  ;;  %v20331_v9 = vld [vmem:[%s24831_s2 + $0x168] sm:$0xff]  }
 0x2e4   :  { %18664 = vmatpush3.bf16.msra.mxu1 %v20319_v21  ;;  %18407 = vmatprep.subr.bf16.mxu0 %v20320_v13  ;;  %v25282_v21 = vpack.c.bf16 %v25250_v35, %v25245_v24  ;;  %v20328_v16 = vld [vmem:[%s24831_s2 + $0x198] sm:$0xff]   ;;  %v20329_v24 = vld [vmem:[%s24831_s2 + $0x160] sm:$0xff]   ;;  %v25285_v35 = vld [vmem:[#allocation6_spill] sm:$0xff] }
 0x2e5   :  { %18681 = vmatprep.subr.bf16.mxu1 %v20321_v1 }
 0x2e7   :  { %18408 = vmatpush3.bf16.msra.mxu0 %v20320_v13  ;;  %18666 = vmatmul.mubr.bf16.vlgmr.msra.gmra.mrb[144].mxu1 %v25279_v53  ;;  %v25283_v13 = vld [vmem:[#allocation110_spill] sm:$0xff]  ;;  %v25289_v53 = vpack.c.bf16 %v25259_v25, %v25255_v23 }
 0x2e8   :  { %18669 = vmatprep.mubr.bf16.mxu1 %v25280_v10  ;;  %18682 = vmatpush3.bf16.msra.mxu1 %v20321_v1  ;;  %v25286_v1 = vpack.c.bf16 %v25253_v14, %v25248_v12  ;;  %v20332_v12 = vld [vmem:[%s24831_s2 + $0x1a8] sm:$0xff]   ;;  %v20333_v14 = vld [vmem:[%s24831_s2 + $0x170] sm:$0xff]  }
 0x2e9   :  { %18425 = vmatprep.subr.bf16.mxu0 %v20322_v17  ;;  %18683 = vmatprep.subr.bf16.mxu1 %v20323_v49 }
 0x2ea   :  { %18410 = vmatmul.mubr.bf16.vlgmr.msra.gmra.mrb[144].mxu0 %v25281_v28 }
 0x2eb   :  { %18413 = vmatprep.mubr.bf16.mxu0 %v25282_v21  ;;  %18426 = vmatpush3.bf16.msra.mxu0 %v20322_v17  ;;  %v25287_v17 = vld [vmem:[#allocation114_spill] sm:$0xff] }
 0x2ec   :  { %18684 = vmatpush3.bf16.msra.mxu1 %v20323_v49  ;;  %18427 = vmatprep.subr.bf16.mxu0 %v20324_v62  ;;  %v25288_v49 = vpack.c.bf16 %v25256_v30, %v25252_v2  ;;  %v20335_v30 = vld [vmem:[%s24831_s2 + $0x178] sm:$0xff]  }
 0x2ed   :  { %18685 = vmatprep.subr.bf16.mxu1 %v20325_v54 }
 0x2ef   :  { %18428 = vmatpush3.bf16.msra.mxu0 %v20324_v62  ;;  %18670 = vmatmul.mubr.bf16.gmra.mrb[148].mxu1 %v25283_v13  ;;  %v20334_v62 = vld [vmem:[%s24831_s2 + $0x1b0] sm:$0xff]   ;;  %v20336_v13 = vld [vmem:[%s24831_s2 + $0x1b8] sm:$0xff]  }
 0x2f0   :  { %18673 = vmatprep.mubr.bf16.mxu1 %v25284_v6  ;;  %18686 = vmatpush3.bf16.msra.mxu1 %v20325_v54  ;;  %v23497_v6 = vld [vmem:[%s24832_s3 + $0x9] ss:$0 sm:$0xff] }
 0x2f1   :  { %18429 = vmatprep.subr.bf16.mxu0 %v20326_v33  ;;  %18687 = vmatprep.subr.bf16.mxu1 %v20327_v5 }
 0x2f2   :  { %18414 = vmatmul.mubr.bf16.gmra.mrb[148].mxu0 %v25285_v35  ;;  %v25291_v35 = vld [vmem:[#allocation44_spill] sm:$0xff] }
 0x2f3   :  { %18417 = vmatprep.mubr.bf16.mxu0 %v25286_v1  ;;  %18430 = vmatpush3.bf16.msra.mxu0 %v20326_v33 }
 0x2f4   :  { %18688 = vmatpush3.bf16.msra.mxu1 %v20327_v5  ;;  %18431 = vmatprep.subr.bf16.mxu0 %v20328_v16  ;;  %v25290_v5 = vpack.c.bf16 %v25263_v26, %v22550_v48 }
 0x2f5   :  { %18689 = vmatprep.subr.bf16.mxu1 %v20329_v24 }
 0x2f7   :  { %18432 = vmatpush3.bf16.msra.mxu0 %v20328_v16  ;;  %18674 = vmatmul.mubr.bf16.gmra.mrb[152].mxu1 %v25287_v17 }
 0x2f8   :  { %18677 = vmatprep.mubr.bf16.mxu1 %v22843_v36  ;;  %18690 = vmatpush3.bf16.msra.mxu1 %v20329_v24  ;;  %v23476_v36 = vld [vmem:[%s24832_s3 + $0x8] ss:$0 sm:$0xff]  ;;  %v20337_v24 = vld [vmem:[%s24831_s2 + $0x180] sm:$0xff]  }
 0x2f9   :  { %18433 = vmatprep.subr.bf16.mxu0 %v20330_v29  ;;  %18691 = vmatprep.subr.bf16.mxu1 %v20331_v9 }
 0x2fa   :  { %18418 = vmatmul.mubr.bf16.gmra.mrb[152].mxu0 %v25288_v49 }
 0x2fb   :  { %18421 = vmatprep.mubr.bf16.mxu0 %v25289_v53  ;;  %18434 = vmatpush3.bf16.msra.mxu0 %v20330_v29  ;;  %v23507_v29 = vld [vmem:[%s24832_s3 + $0xa] ss:$0 sm:$0xff] }
 0x2fc   :  { %18692 = vmatpush3.bf16.msra.mxu1 %v20331_v9  ;;  %18435 = vmatprep.subr.bf16.mxu0 %v20332_v12 }
 0x2fd   :  { %v17931_v10 = vpop.f32.mrb[128].mxu0  ;;  %18693 = vmatprep.subr.bf16.mxu1 %v20333_v14 }
 0x2fe   :  { %v5644_v2 = vadd.f32 %v17931_v10, %v23476_v36  ;;  %v5557_v23 = vpop.f32.mrb[129].mxu0  ;;  %v20338_v10 = vld [vmem:[%s24831_s2 + $0x1c0] sm:$0xff]  }
 0x2ff   :  { %v5642_v25 = vadd.f32 %v23476_v36, %v5557_v23  ;;  %v17932_v54 = vpop.f32.mrb[130].mxu0  ;;  %18436 = vmatpush3.bf16.msra.mxu0 %v20332_v12  ;;  %18678 = vmatmul.mubr.bf16.gmra.mrb[156].mxu1 %v22889_v22 }
 0x300   :  { %v5660_v28 = vmul.f32 0.2, %v5644_v2  ;;  %v5645_v21 = vadd.f32 %v17932_v54, %v23476_v36  ;;  %v5560_v33 = vpop.f32.mrb[131].mxu0  ;;  %18694 = vmatpush3.bf16.msra.mxu1 %v20333_v14  ;;  %18697 = vmatprep.mubr.bf16.mxu1 %v25290_v5 }
 0x301   :  { %v5658_v16 = vmul.f32 0.2, %v5642_v25  ;;  %v5643_v22 = vadd.f32 %v23476_v36, %v5560_v33  ;;  %18437 = vmatprep.subr.bf16.mxu0 %v20334_v62  ;;  %18695 = vmatprep.subr.bf16.mxu1 %v20335_v30 }
 0x302   :  { %v5676_v26 = vmax.f32 %v5644_v2, %v5660_v28  ;;  %v5661_v48 = vmul.f32 0.2, %v5645_v21  ;;  %18422 = vmatmul.mubr.bf16.gmra.mrb[156].mxu0 %v25291_v35  ;;  %v20341_v35 = vld [vmem:[%s24831_s2 + $0x190] sm:$0xff]  }
 0x303   :  { %v5674_v1 = vmax.f32 %v5642_v25, %v5658_v16  ;;  %v5659_v9 = vmul.f32 0.2, %v5643_v22  ;;  %18438 = vmatpush3.bf16.msra.mxu0 %v20334_v62  ;;  %18441 = vmatprep.mubr.bf16.mxu0 %v23149_v51  ;;  %v20339_v62 = vld [vmem:[%s24831_s2 + $0x188] sm:$0xff]  }
 0x304   :  { %v5697_v17 = vmul.f32 %v23497_v6, %v5676_v26  ;;  %v5677_v12 = vmax.f32 %v5645_v21, %v5661_v48  ;;  %18696 = vmatpush3.bf16.msra.mxu1 %v20335_v30  ;;  %18439 = vmatprep.subr.bf16.mxu0 %v20336_v13  ;;  %v25292_v21 = vpack.c.bf16 %v22591_v39, %v25262_v11  ;;  %v20340_v39 = vld [vmem:[%s24831_s2 + $0x1c8] sm:$0xff]  }
 0x305   :  { %v5695_v14 = vmul.f32 %v23497_v6, %v5674_v1  ;;  %v5675_v49 = vmax.f32 %v5643_v22, %v5659_v9  ;;  %v17935_v53 = vpop.f32.mrb[132].mxu0  ;;  %18713 = vmatprep.subr.bf16.mxu1 %v20337_v24  ;;  %v25293_v48 = vpack.c.bf16 %v22639_v31, %v22644_v4 }
 0x306   :  { %v5698_v51 = vmul.f32 %v23497_v6, %v5677_v12  ;;  %v5648_v2 = vadd.f32 %v17935_v53, %v23476_v36  ;;  %v5573_v23 = vpop.f32.mrb[133].mxu0  ;;  %v23521_v30 = vadd.f32 %v23507_v29, %v5697_v17 }
 0x307   :  { %v5696_v25 = vmul.f32 %v23497_v6, %v5675_v49  ;;  %v5646_v54 = vadd.f32 %v23476_v36, %v5573_v23  ;;  %v17936_v28 = vpop.f32.mrb[134].mxu0  ;;  %18440 = vmatpush3.bf16.msra.mxu0 %v20336_v13  ;;  %18698 = vmatmul.mubr.bf16.vlgmr.msra.gmra.mrb[144].mxu1 %v25292_v21  ;;  %v23529_v33 = vadd.f32 %v23507_v29, %v5695_v14 }
 0x308   :  { %v23532_v5 = vadd.f32 %v23507_v29, %v5698_v51  ;;  %v5664_v16 = vmul.f32 0.2, %v5648_v2  ;;  %v5649_v22 = vadd.f32 %v17936_v28, %v23476_v36  ;;  %v5576_v26 = vpop.f32.mrb[135].mxu0  ;;  %18701 = vmatprep.mubr.bf16.mxu1 %v25293_v48  ;;  %18714 = vmatpush3.bf16.msra.mxu1 %v20337_v24 }
 0x309   :  { %v5662_v11 = vmul.f32 0.2, %v5646_v54  ;;  %v5647_v13 = vadd.f32 %v23476_v36, %v5576_v26  ;;  %18457 = vmatprep.subr.bf16.mxu0 %v20338_v10  ;;  %18715 = vmatprep.subr.bf16.mxu1 %v20339_v62  ;;  %v23546_v1 = vadd.f32 %v23507_v29, %v5696_v25 }
 0x30a   :  { %v5680_v4 = vmax.f32 %v5648_v2, %v5664_v16  ;;  %v5665_v24 = vmul.f32 0.2, %v5649_v22  ;;  %18442 = vmatmul.mubr.bf16.vlgmr.msra.gmra.mrb[144].mxu0 %v25228_v44  ;;  %v20342_v44 = vld [vmem:[%s24831_s2 + $0x1d0] sm:$0xff]  }
 0x30b   :  { %v5678_v9 = vmax.f32 %v5646_v54, %v5662_v11  ;;  %v5663_v17 = vmul.f32 0.2, %v5647_v13  ;;  %18445 = vmatprep.mubr.bf16.mxu0 %v25229_v37  ;;  %18458 = vmatpush3.bf16.msra.mxu0 %v20338_v10  ;;  %v20343_v37 = vld [vmem:[%s24831_s2 + $0x198] sm:$0xff]  }
 0x30c   :  { %v5701_v14 = vmul.f32 %v23497_v6, %v5680_v4  ;;  %v5681_v49 = vmax.f32 %v5649_v22, %v5665_v24  ;;  %18716 = vmatpush3.bf16.msra.mxu1 %v20339_v62  ;;  %18459 = vmatprep.subr.bf16.mxu0 %v20340_v39  ;;  %v25294_v22 = vld [vmem:[#allocation46_spill] sm:$0xff]  ;;  %v25296_v4 = vpack.c.bf16 %v22730_v38, %v22744_v34  ;;  %v20344_v24 = vld [vmem:[%s24831_s2 + $0x1d8] sm:$0xff]   ;;  %v20345_v38 = vld [vmem:[%s24831_s2 + $0x1a0] sm:$0xff]  }
 0x30d   :  { %v5699_v53 = vmul.f32 %v23497_v6, %v5678_v9  ;;  %v5679_v51 = vmax.f32 %v5647_v13, %v5663_v17  ;;  %v17939_v2 = vpop.f32.mrb[136].mxu0  ;;  %18717 = vmatprep.subr.bf16.mxu1 %v20341_v35 }
 0x30e   :  { %v23563_v10 = vadd.f32 %v23507_v29, %v5701_v14  ;;  %v5702_v23 = vmul.f32 %v23497_v6, %v5681_v49  ;;  %v5652_v62 = vadd.f32 %v17939_v2, %v23476_v36  ;;  %v5589_v25 = vpop.f32.mrb[137].mxu0 }
 0x30f   :  { %v23568_v54 = vadd.f32 %v23507_v29, %v5699_v53  ;;  %v5700_v28 = vmul.f32 %v23497_v6, %v5679_v51  ;;  %v5650_v21 = vadd.f32 %v23476_v36, %v5589_v25  ;;  %v17940_v16 = vpop.f32.mrb[138].mxu0  ;;  %18460 = vmatpush3.bf16.msra.mxu0 %v20340_v39  ;;  %18702 = vmatmul.mubr.bf16.gmra.mrb[148].mxu1 %v25294_v22 }
 0x310   :  { %v23574_v26 = vadd.f32 %v23507_v29, %v5702_v23  ;;  %v5668_v48 = vmul.f32 0.2, %v5652_v62  ;;  %v5653_v11 = vadd.f32 %v17940_v16, %v23476_v36  ;;  %v5592_v13 = vpop.f32.mrb[139].mxu0  ;;  %18705 = vmatprep.mubr.bf16.mxu1 %v25296_v4  ;;  %18718 = vmatpush3.bf16.msra.mxu1 %v20341_v35  ;;  %v20346_v16 = vld [vmem:[%s24831_s2 + $0x1e0] sm:$0xff]   ;;  %v25297_v4 = vpack.c.bf16 %v22794_v7, %v22796_v60 }
 0x311   :  { %v23586_v9 = vadd.f32 %v23507_v29, %v5700_v28  ;;  %v5666_v17 = vmul.f32 0.2, %v5650_v21  ;;  %v5651_v14 = vadd.f32 %v23476_v36, %v5592_v13  ;;  %18461 = vmatprep.subr.bf16.mxu0 %v20342_v44  ;;  %18719 = vmatprep.subr.bf16.mxu1 %v20343_v37 }
 0x312   :  { %25295 = vst [vmem:[#allocation35_spill] sm:$0xff] %v23574_v26  ;;  %v5684_v34 = vmax.f32 %v5652_v62, %v5668_v48  ;;  %v5669_v35 = vmul.f32 0.2, %v5653_v11  ;;  %18446 = vmatmul.mubr.bf16.gmra.mrb[148].mxu0 %v25231_v63 }
 0x313   :  { %v5682_v51 = vmax.f32 %v5650_v21, %v5666_v17  ;;  %v5667_v2 = vmul.f32 0.2, %v5651_v14  ;;  %18449 = vmatprep.mubr.bf16.mxu0 %v23177_v59  ;;  %18462 = vmatpush3.bf16.msra.mxu0 %v20342_v44  ;;  %v20347_v21 = vld [vmem:[%s24831_s2 + $0x1a8] sm:$0xff]  }
 0x314   :  { %v5705_v23 = vmul.f32 %v23497_v6, %v5684_v34  ;;  %v5685_v25 = vmax.f32 %v5653_v11, %v5669_v35  ;;  %18720 = vmatpush3.bf16.msra.mxu1 %v20343_v37  ;;  %18463 = vmatprep.subr.bf16.mxu0 %v20344_v24 }
 0x315   :  { %v5703_v62 = vmul.f32 %v23497_v6, %v5682_v51  ;;  %v5683_v28 = vmax.f32 %v5651_v14, %v5667_v2  ;;  %v17943_v63 = vpop.f32.mrb[140].mxu0  ;;  %18721 = vmatprep.subr.bf16.mxu1 %v20345_v38  ;;  %v25298_v51 = vpack.c.bf16 %v22834_v58, %v22840_v50  ;;  %v20348_v2 = vld [vmem:[%s24831_s2 + $0x1e8] sm:$0xff]  }
 0x316   :  { %v5706_v59 = vmul.f32 %v23497_v6, %v5685_v25  ;;  %v5656_v44 = vadd.f32 %v17943_v63, %v23476_v36  ;;  %v5605_v22 = vpop.f32.mrb[141].mxu0  ;;  %v5726_v37 = vadd.f32 %v23507_v29, %v5705_v23  ;;  %v20349_v23 = vld [vmem:[%s24831_s2 + $0x1b0] sm:$0xff]  }
 0x317   :  { %v5704_v48 = vmul.f32 %v23497_v6, %v5683_v28  ;;  %v5654_v11 = vadd.f32 %v23476_v36, %v5605_v22  ;;  %v17944_v13 = vpop.f32.mrb[142].mxu0  ;;  %18464 = vmatpush3.bf16.msra.mxu0 %v20344_v24  ;;  %18706 = vmatmul.mubr.bf16.gmra.mrb[152].mxu1 %v25297_v4  ;;  %v5724_v17 = vadd.f32 %v23507_v29, %v5703_v62 }
 0x318   :  { %v5672_v14 = vmul.f32 0.2, %v5656_v44  ;;  %v5657_v34 = vadd.f32 %v17944_v13, %v23476_v36  ;;  %v5608_v35 = vpop.f32.mrb[143].mxu0  ;;  %18709 = vmatprep.mubr.bf16.mxu1 %v25298_v51  ;;  %18722 = vmatpush3.bf16.msra.mxu1 %v20345_v38  ;;  %v23623_v24 = vadd.f32 %v23507_v29, %v5706_v59 }
 0x319   :  { %v5670_v7 = vmul.f32 0.2, %v5654_v11  ;;  %v5655_v60 = vadd.f32 %v23476_v36, %v5608_v35  ;;  %18465 = vmatprep.subr.bf16.mxu0 %v20346_v16  ;;  %18723 = vmatprep.subr.bf16.mxu1 %v20347_v21  ;;  %v23629_v25 = vpack.c.bf16 %v5726_v37, %v5724_v17  ;;  %v23632_v58 = vadd.f32 %v23507_v29, %v5704_v48 }
 0x31a   :  { %v5688_v50 = vmax.f32 %v5656_v44, %v5672_v14  ;;  %v5673_v38 = vmul.f32 0.2, %v5657_v34  ;;  %v18219_v62 = vpop.f32.mrb[128].mxu1  ;;  %18450 = vmatmul.mubr.bf16.gmra.mrb[152].mxu0 %v25232_v47 }
 0x31b   :  { %25299 = vst [vmem:[#allocation40_spill] sm:$0xff] %v23629_v25  ;;  %v5686_v28 = vmax.f32 %v5654_v11, %v5670_v7  ;;  %v5671_v63 = vmul.f32 0.2, %v5655_v60  ;;  %v7539_v59 = vadd.f32 %v18219_v62, %v23476_v36  ;;  %v7453_v22 = vpop.f32.mrb[129].mxu1  ;;  %18453 = vmatprep.mubr.bf16.mxu0 %v25233_v52  ;;  %18466 = vmatpush3.bf16.msra.mxu0 %v20346_v16  ;;  %v20350_v52 = vld [vmem:[%s24831_s2 + $0x1f0] sm:$0xff]   ;;  %v20351_v16 = vld [vmem:[%s24831_s2 + $0x1b8] sm:$0xff]  }
 0x31c   :  { %v5709_v13 = vmul.f32 %v23497_v6, %v5688_v50  ;;  %v5689_v37 = vmax.f32 %v5657_v34, %v5673_v38  ;;  %v7537_v4 = vadd.f32 %v23476_v36, %v7453_v22  ;;  %v18220_v48 = vpop.f32.mrb[130].mxu1  ;;  %18724 = vmatpush3.bf16.msra.mxu1 %v20347_v21  ;;  %18467 = vmatprep.subr.bf16.mxu0 %v20348_v2 }
 0x31d   :  { %v5707_v44 = vmul.f32 %v23497_v6, %v5686_v28  ;;  %v5687_v17 = vmax.f32 %v5655_v60, %v5671_v63  ;;  %v7555_v47 = vmul.f32 0.2, %v7539_v59  ;;  %v7540_v11 = vadd.f32 %v18220_v48, %v23476_v36  ;;  %v7456_v14 = vpop.f32.mrb[131].mxu1  ;;  %18725 = vmatprep.subr.bf16.mxu1 %v20349_v23  ;;  %v20352_v63 = vld [vmem:[%s24831_s2 + $0x1f8] sm:$0xff]  }
 0x31e   :  { %v5710_v34 = vmul.f32 %v23497_v6, %v5689_v37  ;;  %v7553_v21 = vmul.f32 0.2, %v7537_v4  ;;  %v7538_v35 = vadd.f32 %v23476_v36, %v7456_v14  ;;  %v5730_v51 = vadd.f32 %v23507_v29, %v5709_v13 }
 0x31f   :  { %v5708_v7 = vmul.f32 %v23497_v6, %v5687_v17  ;;  %v7571_v60 = vmax.f32 %v7539_v59, %v7555_v47  ;;  %v7556_v50 = vmul.f32 0.2, %v7540_v11  ;;  %18468 = vmatpush3.bf16.msra.mxu0 %v20348_v2  ;;  %18710 = vmatmul.mubr.bf16.gmra.mrb[156].mxu1 %v22907_v27  ;;  %v5728_v38 = vadd.f32 %v23507_v29, %v5707_v44 }
 0x320   :  { %v7569_v62 = vmax.f32 %v7537_v4, %v7553_v21  ;;  %v7554_v28 = vmul.f32 0.2, %v7538_v35  ;;  %18726 = vmatpush3.bf16.msra.mxu1 %v20349_v23  ;;  %18729 = vmatprep.mubr.bf16.mxu1 %v23213_v56  ;;  %v23659_v22 = vpack.c.bf16 %v23623_v24, %v23632_v58  ;;  %v5731_v59 = vadd.f32 %v23507_v29, %v5710_v34  ;;  %v20353_v23 = vld [vmem:[%s24831_s2 + $0x1c0] sm:$0xff]  }
 0x321   :  { %v7592_v2 = vmul.f32 %v23497_v6, %v7571_v60  ;;  %v7572_v27 = vmax.f32 %v7540_v11, %v7556_v50  ;;  %18469 = vmatprep.subr.bf16.mxu0 %v20350_v52  ;;  %18727 = vmatprep.subr.bf16.mxu1 %v20351_v16  ;;  %v23666_v56 = vpack.c.bf16 %v5730_v51, %v5728_v38 }
 0x322   :  { %v7590_v13 = vmul.f32 %v23497_v6, %v7569_v62  ;;  %v7570_v37 = vmax.f32 %v7538_v35, %v7554_v28  ;;  %v18223_v4 = vpop.f32.mrb[132].mxu1  ;;  %18454 = vmatmul.mubr.bf16.gmra.mrb[156].mxu0 %v22554_v32  ;;  %v5729_v48 = vadd.f32 %v23507_v29, %v5708_v7 }
 0x323   :  { %25300 = vst [vmem:[#allocation5_spill] sm:$0xff] %v23666_v56  ;;  %v7593_v44 = vmul.f32 %v23497_v6, %v7572_v27  ;;  %v7543_v17 = vadd.f32 %v18223_v4, %v23476_v36  ;;  %v7469_v47 = vpop.f32.mrb[133].mxu1  ;;  %18470 = vmatpush3.bf16.msra.mxu0 %v20350_v52  ;;  %18473 = vmatprep.mubr.bf16.mxu0 %v25218_v41  ;;  %v20354_v41 = vld [vmem:[%s24831_s2 + $0x200] sm:$0xff]   ;;  %v20355_v52 = vld [vmem:[%s24831_s2 + $0x1c8] sm:$0xff]  }
 0x324   :  { %v23675_v11 = vadd.f32 %v23507_v29, %v7592_v2  ;;  %v7591_v14 = vmul.f32 %v23497_v6, %v7570_v37  ;;  %v7541_v34 = vadd.f32 %v23476_v36, %v7469_v47  ;;  %v18224_v21 = vpop.f32.mrb[134].mxu1  ;;  %18728 = vmatpush3.bf16.msra.mxu1 %v20351_v16  ;;  %18471 = vmatprep.subr.bf16.mxu0 %v20352_v63  ;;  %v20356_v37 = vld [vmem:[%s24831_s2 + $0x208] sm:$0xff]  }
 0x325   :  { %v23680_v32 = vpack.c.bf16 %v5729_v48, %v23623_v24  ;;  %v7559_v35 = vmul.f32 0.2, %v7543_v17  ;;  %v7544_v51 = vadd.f32 %v18224_v21, %v23476_v36  ;;  %v7472_v7 = vpop.f32.mrb[135].mxu1  ;;  %18745 = vmatprep.subr.bf16.mxu1 %v20353_v23  ;;  %v23689_v60 = vpack.c.bf16 %v5731_v59, %v5729_v48 }
 0x326   :  { %v23692_v16 = vadd.f32 %v23507_v29, %v7593_v44  ;;  %v7557_v24 = vmul.f32 0.2, %v7541_v34  ;;  %v7542_v50 = vadd.f32 %v23476_v36, %v7472_v7  ;;  %v23696_v38 = vadd.f32 %v23507_v29, %v7591_v14 }
 0x327   :  { %25301 = vst [vmem:[#allocation55_spill] sm:$0xff] %v23680_v32  ;;  %v23699_v62 = vadd.f32 %v23507_v29, %v7590_v13  ;;  %v7575_v28 = vmax.f32 %v7543_v17, %v7559_v35  ;;  %v7560_v2 = vmul.f32 0.2, %v7544_v51  ;;  %18472 = vmatpush3.bf16.msra.mxu0 %v20352_v63  ;;  %18730 = vmatmul.mubr.bf16.vlgmr.msra.gmra.mrb[144].mxu1 %v22655_v46  ;;  %v20357_v46 = vld [vmem:[%s24831_s2 + $0x1d0] sm:$0xff]  }
 0x328   :  { %v7573_v27 = vmax.f32 %v7541_v34, %v7557_v24  ;;  %v7558_v59 = vmul.f32 0.2, %v7542_v50  ;;  %18733 = vmatprep.mubr.bf16.mxu1 %v22696_v57  ;;  %18746 = vmatpush3.bf16.msra.mxu1 %v20353_v23 }
 0x329   :  { %v7596_v13 = vmul.f32 %v23497_v6, %v7575_v28  ;;  %v7576_v48 = vmax.f32 %v7544_v51, %v7560_v2  ;;  %18489 = vmatprep.subr.bf16.mxu0 %v20354_v41  ;;  %18747 = vmatprep.subr.bf16.mxu1 %v20355_v52  ;;  %v20358_v28 = vld [vmem:[%s24831_s2 + $0x210] sm:$0xff]  }
 0x32a   :  { %v7594_v63 = vmul.f32 %v23497_v6, %v7573_v27  ;;  %v7574_v23 = vmax.f32 %v7542_v50, %v7558_v59  ;;  %v18227_v44 = vpop.f32.mrb[136].mxu1  ;;  %18474 = vmatmul.mubr.bf16.vlgmr.msra.gmra.mrb[144].mxu0 %v25221_v40 }
 0x32b   :  { %v7597_v17 = vmul.f32 %v23497_v6, %v7576_v48  ;;  %v7547_v47 = vadd.f32 %v18227_v44, %v23476_v36  ;;  %v7485_v14 = vpop.f32.mrb[137].mxu1  ;;  %18477 = vmatprep.mubr.bf16.mxu0 %v25222_v3  ;;  %18490 = vmatpush3.bf16.msra.mxu0 %v20354_v41  ;;  %v23720_v34 = vadd.f32 %v23507_v29, %v7596_v13  ;;  %v25302_v3 = vld [vmem:[#allocation14_spill] sm:$0xff] }
 0x32c   :  { %v7595_v21 = vmul.f32 %v23497_v6, %v7574_v23  ;;  %v7545_v35 = vadd.f32 %v23476_v36, %v7485_v14  ;;  %v18228_v51 = vpop.f32.mrb[138].mxu1  ;;  %18748 = vmatpush3.bf16.msra.mxu1 %v20355_v52  ;;  %18491 = vmatprep.subr.bf16.mxu0 %v20356_v37  ;;  %v23725_v40 = vadd.f32 %v23507_v29, %v7594_v63  ;;  %v20359_v52 = vld [vmem:[%s24831_s2 + $0x1d8] sm:$0xff]  }
 0x32d   :  { %v7563_v7 = vmul.f32 0.2, %v7547_v47  ;;  %v7548_v24 = vadd.f32 %v18228_v51, %v23476_v36  ;;  %v7488_v50 = vpop.f32.mrb[139].mxu1  ;;  %18749 = vmatprep.subr.bf16.mxu1 %v20357_v46  ;;  %v10738_v41 = vpack.c.bf16 %v25302_v3, %v25028_v15  ;;  %v23737_v2 = vadd.f32 %v23507_v29, %v7597_v17  ;;  %v20360_v17 = vld [vmem:[%s24831_s2 + $0x218] sm:$0xff]  }
 0x32e   :  { %v7561_v27 = vmul.f32 0.2, %v7545_v35  ;;  %v7546_v59 = vadd.f32 %v23476_v36, %v7488_v50  ;;  %v23741_v13 = vadd.f32 %v23507_v29, %v7595_v21 }
 0x32f   :  { %25303 = vst [vmem:[#allocation9_spill] sm:$0xff] %v23737_v2  ;;  %v7579_v63 = vmax.f32 %v7547_v47, %v7563_v7  ;;  %v7564_v23 = vmul.f32 0.2, %v7548_v24  ;;  %18492 = vmatpush3.bf16.msra.mxu0 %v20356_v37  ;;  %18734 = vmatmul.mubr.bf16.gmra.mrb[148].mxu1 %v22748_v20  ;;  %v20361_v20 = vld [vmem:[%s24831_s2 + $0x1e0] sm:$0xff]  }
 0x330   :  { %v7577_v44 = vmax.f32 %v7545_v35, %v7561_v27  ;;  %v7562_v14 = vmul.f32 0.2, %v7546_v59  ;;  %18737 = vmatprep.mubr.bf16.mxu1 %v10738_v41  ;;  %18750 = vmatpush3.bf16.msra.mxu1 %v20357_v46 }
 0x331   :  { %v7600_v47 = vmul.f32 %v23497_v6, %v7579_v63  ;;  %v7580_v7 = vmax.f32 %v7548_v24, %v7564_v23  ;;  %18493 = vmatprep.subr.bf16.mxu0 %v20358_v28  ;;  %18751 = vmatprep.subr.bf16.mxu1 %v20359_v52 }
 0x332   :  { %v7598_v37 = vmul.f32 %v23497_v6, %v7577_v44  ;;  %v7578_v46 = vmax.f32 %v7546_v59, %v7562_v14  ;;  %v18231_v35 = vpop.f32.mrb[140].mxu1  ;;  %18478 = vmatmul.mubr.bf16.gmra.mrb[148].mxu0 %v25224_v19 }
 0x333   :  { %v7601_v50 = vmul.f32 %v23497_v6, %v7580_v7  ;;  %v7551_v41 = vadd.f32 %v18231_v35, %v23476_v36  ;;  %v7501_v27 = vpop.f32.mrb[141].mxu1  ;;  %18481 = vmatprep.mubr.bf16.mxu0 %v22400_v42  ;;  %18494 = vmatpush3.bf16.msra.mxu0 %v20358_v28  ;;  %v7621_v24 = vadd.f32 %v23507_v29, %v7600_v47  ;;  %v20362_v42 = vld [vmem:[%s24831_s2 + $0x220] sm:$0xff]   ;;  %v20363_v28 = vld [vmem:[%s24831_s2 + $0x1e8] sm:$0xff]  }
 0x334   :  { %v7599_v63 = vmul.f32 %v23497_v6, %v7578_v46  ;;  %v7549_v23 = vadd.f32 %v23476_v36, %v7501_v27  ;;  %v18232_v51 = vpop.f32.mrb[142].mxu1  ;;  %18752 = vmatpush3.bf16.msra.mxu1 %v20359_v52  ;;  %18495 = vmatprep.subr.bf16.mxu0 %v20360_v17  ;;  %v7619_v59 = vadd.f32 %v23507_v29, %v7598_v37  ;;  %v25305_v27 = vld [vmem:[#allocation10_spill] sm:$0xff] }
 0x335   :  { %v7567_v19 = vmul.f32 0.2, %v7551_v41  ;;  %v7552_v44 = vadd.f32 %v18232_v51, %v23476_v36  ;;  %v7504_v14 = vpop.f32.mrb[143].mxu1  ;;  %18753 = vmatprep.subr.bf16.mxu1 %v20361_v20  ;;  %v7622_v47 = vadd.f32 %v23507_v29, %v7601_v50  ;;  %v25306_v57 = vpack.c.bf16 %v22830_v61, %v25305_v27 }
 0x336   :  { %v7565_v7 = vmul.f32 0.2, %v7549_v23  ;;  %v7550_v52 = vadd.f32 %v23476_v36, %v7504_v14  ;;  %v23775_v46 = vpack.c.bf16 %v7621_v24, %v7619_v59  ;;  %v23778_v37 = vadd.f32 %v23507_v29, %v7599_v63  ;;  %v20364_v36 = vld [vmem:[%s24831_s2 + $0x228] sm:$0xff]  }
 0x337   :  { %v7583_v51 = vmax.f32 %v7551_v41, %v7567_v19  ;;  %v7568_v35 = vmul.f32 0.2, %v7552_v44  ;;  %18496 = vmatpush3.bf16.msra.mxu0 %v20360_v17  ;;  %18738 = vmatmul.mubr.bf16.gmra.mrb[152].mxu1 %v25306_v57  ;;  %v25307_v50 = vpack.c.bf16 %v22875_v43, %v22822_v0  ;;  %v20365_v57 = vld [vmem:[%s24831_s2 + $0x1f0] sm:$0xff]  }
 0x338   :  { %25304 = vst [vmem:[#allocation12_spill] sm:$0xff] %v23775_v46  ;;  %v7581_v53 = vmax.f32 %v7549_v23, %v7565_v7  ;;  %v7566_v12 = vmul.f32 0.2, %v7550_v52  ;;  %18754 = vmatpush3.bf16.msra.mxu1 %v20361_v20  ;;  %v23790_v24 = vpack.c.bf16 %v7622_v47, %v23778_v37  ;;  %18497 = vmatprep.subr.bf16.mxu0 %v20362_v42 }
 0x339   :  { %18741 = vmatprep.mubr.bf16.mxu1 %v25307_v50  ;;  %v7604_v17 = vmul.f32 %v23497_v6, %v7583_v51  ;;  %v7584_v41 = vmax.f32 %v7552_v44, %v7568_v35  ;;  %18755 = vmatprep.subr.bf16.mxu1 %v20363_v28  ;;  %v25311_v51 = vld [vmem:[#allocation38_spill] sm:$0xff] }
 0x33a   :  { %v7602_v63 = vmul.f32 %v23497_v6, %v7581_v53  ;;  %v7582_v23 = vmax.f32 %v7550_v52, %v7566_v12  ;;  %18482 = vmatmul.mubr.bf16.gmra.mrb[152].mxu0 %v25225_v55  ;;  %v20366_v12 = vld [vmem:[%s24831_s2 + $0x230] sm:$0xff]   ;;  %v20367_v55 = vld [vmem:[%s24831_s2 + $0x1f8] sm:$0xff]   ;;  %v20371_v35 = vld [vmem:[%s24831_s2 + $0x208] sm:$0xff]  }
 0x33b   :  { %v7605_v20 = vmul.f32 %v23497_v6, %v7584_v41  ;;  %18485 = vmatprep.mubr.bf16.mxu0 %v25226_v45  ;;  %18498 = vmatpush3.bf16.msra.mxu0 %v20362_v42  ;;  %v7625_v59 = vadd.f32 %v23507_v29, %v7604_v17  ;;  %v25310_v42 = vld [vmem:[#allocation48_spill] sm:$0xff]  ;;  %v25313_v50 = vld [vmem:[#allocation58_spill] sm:$0xff]  ;;  %v20373_v41 = vld [vmem:[%s24831_s2 + $0x210] sm:$0xff]  }
 0x33c   :  { %v7603_v19 = vmul.f32 %v23497_v6, %v7582_v23  ;;  %18756 = vmatpush3.bf16.msra.mxu1 %v20363_v28  ;;  %18499 = vmatprep.subr.bf16.mxu0 %v20364_v36  ;;  %v7623_v44 = vadd.f32 %v23507_v29, %v7602_v63  ;;  %v25309_v6 = vpack.c.bf16 %v22915_v18, %v22870_v8  ;;  %v20368_v28 = vld [vmem:[%s24831_s2 + $0x238] sm:$0xff]   ;;  %v25312_v18 = vld [vmem:[#allocation85_spill] sm:$0xff]  ;;  %v20372_v17 = vld [vmem:[%s24831_s2 + $0x288] sm:$0xff]  }
 0x33d   :  { %18757 = vmatprep.subr.bf16.mxu1 %v20365_v57  ;;  %v7626_v45 = vadd.f32 %v23507_v29, %v7605_v20  ;;  %v25316_v63 = vld [vmem:[#allocation91_spill] sm:$0xff]  ;;  %v20375_v20 = vld [vmem:[%s24831_s2 + $0x218] sm:$0xff]  }
 0x33e   :  { %v23810_v53 = vpack.c.bf16 %v7625_v59, %v7623_v44  ;;  %v7624_v14 = vadd.f32 %v23507_v29, %v7603_v19  ;;  %v20369_v29 = vld [vmem:[%s24831_s2 + $0x200] sm:$0xff]   ;;  %v20374_v23 = vld [vmem:[%s24831_s2 + $0x290] sm:$0xff]   ;;  %v20376_v44 = vld [vmem:[%s24831_s2 + $0x298] sm:$0xff]  }
 0x33f   :  { %18500 = vmatpush3.bf16.msra.mxu0 %v20364_v36  ;;  %18742 = vmatmul.mubr.bf16.gmra.mrb[156].mxu1 %v25309_v6  ;;  %v25314_v36 = vld [vmem:[#allocation66_spill] sm:$0xff]  ;;  %v25317_v59 = vld [vmem:[#allocation45_spill] sm:$0xff] }
 0x340   :  { %25308 = vst [vmem:[#allocation64_spill] sm:$0xff] %v23810_v53  ;;  %18758 = vmatpush3.bf16.msra.mxu1 %v20365_v57  ;;  %18761 = vmatprep.mubr.bf16.mxu1 %v25310_v42  ;;  %v23820_v7 = vpack.c.bf16 %v7624_v14, %v7622_v47  ;;  %v23822_v52 = vpack.c.bf16 %v7626_v45, %v7624_v14  ;;  %v20370_v47 = vld [vmem:[%s24831_s2 + $0x280] sm:$0xff]   ;;  %v25315_v57 = vld [vmem:[#allocation28_spill] sm:$0xff]  ;;  %v20379_v6 = vld [vmem:[%s24831_s2 + $0x228] sm:$0xff]  }
 0x341   :  { %18501 = vmatprep.subr.bf16.mxu0 %v20366_v12  ;;  %18759 = vmatprep.subr.bf16.mxu1 %v20367_v55  ;;  %v25318_v19 = vld [vmem:[#allocation113_spill] sm:$0xff] }
 0x342   :  { %18486 = vmatmul.mubr.bf16.gmra.mrb[156].mxu0 %v25311_v51  ;;  %v25320_v45 = vld [vmem:[#allocation13_spill] sm:$0xff]  ;;  %v20381_v51 = vld [vmem:[%s24831_s2 + $0x230] sm:$0xff]  }
 0x343   :  { %18502 = vmatpush3.bf16.msra.mxu0 %v20366_v12  ;;  %18505 = vmatprep.mubr.bf16.mxu0 %v25312_v18  ;;  %v20377_v12 = vld [vmem:[%s24831_s2 + $0x220] sm:$0xff]   ;;  %v25323_v18 = vld [vmem:[#allocation100_spill] sm:$0xff] }
 0x344   :  { %18760 = vmatpush3.bf16.msra.mxu1 %v20367_v55  ;;  %18503 = vmatprep.subr.bf16.mxu0 %v20368_v28  ;;  %v25319_v55 = vld [vmem:[#allocation95_spill] sm:$0xff]  ;;  %v20378_v14 = vld [vmem:[%s24831_s2 + $0x2a0] sm:$0xff]  }
 0x345   :  { %18777 = vmatprep.subr.bf16.mxu1 %v20369_v29  ;;  %v25321_v42 = vld [vmem:[#allocation61_spill] sm:$0xff] }
 0x347   :  { %18504 = vmatpush3.bf16.msra.mxu0 %v20368_v28  ;;  %18762 = vmatmul.mubr.bf16.vlgmr.msra.gmra.mrb[144].mxu1 %v25313_v50  ;;  %v25322_v28 = vld [vmem:[#allocation18_spill] sm:$0xff]  ;;  %v20383_v50 = vld [vmem:[%s24831_s2 + $0x238] sm:$0xff]  }
 0x348   :  { %18765 = vmatprep.mubr.bf16.mxu1 %v25314_v36  ;;  %18778 = vmatpush3.bf16.msra.mxu1 %v20369_v29  ;;  %v20380_v29 = vld [vmem:[%s24831_s2 + $0x2a8] sm:$0xff]   ;;  %v25325_v36 = vld [vmem:[#allocation51_spill] sm:$0xff] }
 0x349   :  { %18809 = vmatprep.subr.bf16.mxu0 %v20370_v47  ;;  %18779 = vmatprep.subr.bf16.mxu1 %v20371_v35 }
 0x34a   :  { %18506 = vmatmul.mubr.bf16.vlgmr.msra.gmra.mrb[144].mxu0 %v25315_v57  ;;  %v25327_v57 = vld [vmem:[#allocation105_spill] sm:$0xff] }
 0x34b   :  { %18509 = vmatprep.mubr.bf16.mxu0 %v25316_v63  ;;  %18810 = vmatpush3.bf16.msra.mxu0 %v20370_v47  ;;  %v25324_v47 = vld [vmem:[#allocation102_spill] sm:$0xff]  ;;  %v25328_v63 = vmov 0.0|0.0  }
 0x34c   :  { %18780 = vmatpush3.bf16.msra.mxu1 %v20371_v35  ;;  %18811 = vmatprep.subr.bf16.mxu0 %v20372_v17  ;;  %v20382_v35 = vld [vmem:[%s24831_s2 + $0x2b0] sm:$0xff]  }
 0x34d   :  { %18781 = vmatprep.subr.bf16.mxu1 %v20373_v41 }
 0x34f   :  { %18766 = vmatmul.mubr.bf16.gmra.mrb[148].mxu1 %v25317_v59  ;;  %18812 = vmatpush3.bf16.msra.mxu0 %v20372_v17  ;;  %v25326_v17 = vld [vmem:[#allocation108_spill] sm:$0xff]  ;;  %v25331_v59 = vld [vmem:[#allocation111_spill] sm:$0xff] }
 0x350   :  { %18769 = vmatprep.mubr.bf16.mxu1 %v25318_v19  ;;  %18782 = vmatpush3.bf16.msra.mxu1 %v20373_v41  ;;  %v20384_v41 = vld [vmem:[%s24831_s2 + $0x2b8] sm:$0xff]   ;;  %v25332_v19 = vpack.c.bf16 %v25305_v27, %v25302_v3  ;;  %v20385_v3 = vld [vmem:[%s24831_s2 + $0x240] sm:$0xff]   ;;  %v20390_v27 = vld [vmem:[%s24831_s2 + $0x268] sm:$0xff]  }
 0x351   :  { %18813 = vmatprep.subr.bf16.mxu0 %v20374_v23  ;;  %18783 = vmatprep.subr.bf16.mxu1 %v20375_v20 }
 0x352   :  { %18510 = vmatmul.mubr.bf16.gmra.mrb[148].mxu0 %v25319_v55  ;;  %v25335_v55 = vld [vmem:[#allocation29_spill] sm:$0xff] }
 0x353   :  { %18513 = vmatprep.mubr.bf16.mxu0 %v25320_v45  ;;  %18814 = vmatpush3.bf16.msra.mxu0 %v20374_v23  ;;  %v25329_v23 = vld [vmem:[#allocation20_spill] sm:$0xff]  ;;  %v20391_v45 = vld [vmem:[%s24831_s2 + $0x270] sm:$0xff]  }
 0x354   :  { %18784 = vmatpush3.bf16.msra.mxu1 %v20375_v20  ;;  %18815 = vmatprep.subr.bf16.mxu0 %v20376_v44  ;;  %v25330_v20 = vld [vmem:[#allocation109_spill] sm:$0xff] }
 0x355   :  { %18785 = vmatprep.subr.bf16.mxu1 %v20377_v12 }
 0x357   :  { %18770 = vmatmul.mubr.bf16.gmra.mrb[152].mxu1 %v25321_v42  ;;  %18816 = vmatpush3.bf16.msra.mxu0 %v20376_v44  ;;  %v25333_v44 = vpack.c.bf16 %v22822_v0, %v22830_v61  ;;  %v20386_v0 = vld [vmem:[%s24831_s2 + $0x248] sm:$0xff]   ;;  %v20387_v61 = vld [vmem:[%s24831_s2 + $0x250] sm:$0xff]  }
 0x358   :  { %18773 = vmatprep.mubr.bf16.mxu1 %v25322_v28  ;;  %18786 = vmatpush3.bf16.msra.mxu1 %v20377_v12  ;;  %v25334_v12 = vpack.c.bf16 %v22870_v8, %v22875_v43  ;;  %v20388_v8 = vld [vmem:[%s24831_s2 + $0x258] sm:$0xff]   ;;  %v20389_v43 = vld [vmem:[%s24831_s2 + $0x260] sm:$0xff]   ;;  %v23942_v42 = vld [vmem:[%s24832_s3 + $0x8] ss:$0 sm:$0xff] }
 0x359   :  { %18817 = vmatprep.subr.bf16.mxu0 %v20378_v14  ;;  %18787 = vmatprep.subr.bf16.mxu1 %v20379_v6 }
 0x35a   :  { %18514 = vmatmul.mubr.bf16.gmra.mrb[152].mxu0 %v25323_v18 }
 0x35b   :  { %18517 = vmatprep.mubr.bf16.mxu0 %v25324_v47  ;;  %18818 = vmatpush3.bf16.msra.mxu0 %v20378_v14  ;;  %v20392_v14 = vld [vmem:[%s24831_s2 + $0x278] sm:$0xff]  }
 0x35c   :  { %18788 = vmatpush3.bf16.msra.mxu1 %v20379_v6  ;;  %18819 = vmatprep.subr.bf16.mxu0 %v20380_v29  ;;  %v23936_v6 = vld [vmem:[%s24831_s2 + $0x2c0] sm:$0xff]  }
 0x35d   :  { %18789 = vmatprep.subr.bf16.mxu1 %v20381_v51 }
 0x35f   :  { %18774 = vmatmul.mubr.bf16.gmra.mrb[156].mxu1 %v25325_v36  ;;  %18820 = vmatpush3.bf16.msra.mxu0 %v20380_v29 }
 0x360   :  { %18790 = vmatpush3.bf16.msra.mxu1 %v20381_v51  ;;  %18793 = vmatprep.mubr.bf16.mxu1 %v25326_v17  ;;  %v23950_v17 = vld [vmem:[%s24832_s3 + $0x9] ss:$0 sm:$0xff] }
 0x361   :  { %18821 = vmatprep.subr.bf16.mxu0 %v20382_v35  ;;  %18791 = vmatprep.subr.bf16.mxu1 %v20383_v50 }
 0x362   :  { %18518 = vmatmul.mubr.bf16.gmra.mrb[156].mxu0 %v25327_v57 }
 0x363   :  { %18822 = vmatpush3.bf16.msra.mxu0 %v20382_v35  ;;  %18825 = vmatprep.mubr.bf16.mxu0 %v25328_v63 }
 0x364   :  { %18792 = vmatpush3.bf16.msra.mxu1 %v20383_v50  ;;  %18823 = vmatprep.subr.bf16.mxu0 %v20384_v41 }
 0x367   :  { %18794 = vmatmul.mubr.bf16.vlgmr.msra.gmra.mrb[144].mxu1 %v25329_v23  ;;  %18824 = vmatpush3.bf16.msra.mxu0 %v20384_v41 }
 0x368   :  { %18797 = vmatprep.mubr.bf16.mxu1 %v25330_v20  ;;  %18841 = vmatprep.subr.bf16.mxu0 %v20385_v3 }
 0x36a   :  { %18826 = vmatmul.mubr.bf16.vlgmr.msra.gmra.mrb[160].mxu0 %v25328_v63 }
 0x36b   :  { %18829 = vmatprep.mubr.bf16.mxu0 %v23629_v25  ;;  %18842 = vmatpush3.bf16.msra.mxu0 %v20385_v3 }
 0x36c   :  { %18843 = vmatprep.subr.bf16.mxu0 %v20386_v0 }
 0x36f   :  { %18798 = vmatmul.mubr.bf16.gmra.mrb[148].mxu1 %v25331_v59  ;;  %18844 = vmatpush3.bf16.msra.mxu0 %v20386_v0 }
 0x370   :  { %18801 = vmatprep.mubr.bf16.mxu1 %v25332_v19  ;;  %18845 = vmatprep.subr.bf16.mxu0 %v20387_v61 }
 0x372   :  { %18830 = vmatmul.mubr.bf16.gmra.mrb[164].mxu0 %v23666_v56 }
 0x373   :  { %18833 = vmatprep.mubr.bf16.mxu0 %v23775_v46  ;;  %18846 = vmatpush3.bf16.msra.mxu0 %v20387_v61 }
 0x374   :  { %18847 = vmatprep.subr.bf16.mxu0 %v20388_v8 }
 0x377   :  { %18802 = vmatmul.mubr.bf16.gmra.mrb[152].mxu1 %v25333_v44  ;;  %18848 = vmatpush3.bf16.msra.mxu0 %v20388_v8  ;;  %v23956_v44 = vld [vmem:[%s24832_s3 + $0xa] ss:$0 sm:$0xff] }
 0x378   :  { %18805 = vmatprep.mubr.bf16.mxu1 %v25334_v12  ;;  %18849 = vmatprep.subr.bf16.mxu0 %v20389_v43 }
 0x37a   :  { %18834 = vmatmul.mubr.bf16.gmra.mrb[168].mxu0 %v23810_v53 }
 0x37b   :  { %18850 = vmatpush3.bf16.msra.mxu0 %v20389_v43 }
 0x37c   :  { %18851 = vmatprep.subr.bf16.mxu0 %v20390_v27 }
 0x37f   :  { %18806 = vmatmul.mubr.bf16.gmra.mrb[156].mxu1 %v25335_v55  ;;  %18852 = vmatpush3.bf16.msra.mxu0 %v20390_v27 }
 0x380   :  { %19113 = vmatprep.mubr.bf16.mxu1 %v25328_v63  ;;  %18853 = vmatprep.subr.bf16.mxu0 %v20391_v45 }
 0x383   :  { %18854 = vmatpush3.bf16.msra.mxu0 %v20391_v45 }
 0x384   :  { %18855 = vmatprep.subr.bf16.mxu0 %v20392_v14 }
 0x387   :  { %18856 = vmatpush3.bf16.msra.mxu0 %v20392_v14 }
 0x388   :  { %18873 = vmatprep.subr.bf16.mxu0 %v23936_v6 }
 0x41d   :  { %v18507_v28 = vpop.f32.mrb[144].mxu0 }
 0x41e   :  { %v9434_v29 = vadd.f32 %v18507_v28, %v23942_v42  ;;  %v9348_v51 = vpop.f32.mrb[145].mxu0 }
 0x41f   :  { %v9432_v18 = vadd.f32 %v23942_v42, %v9348_v51  ;;  %v18508_v47 = vpop.f32.mrb[146].mxu0 }
 0x420   :  { %v9450_v35 = vmul.f32 0.2, %v9434_v29  ;;  %v9435_v50 = vadd.f32 %v18508_v47, %v23942_v42  ;;  %v9351_v36 = vpop.f32.mrb[147].mxu0 }
 0x421   :  { %v9448_v41 = vmul.f32 0.2, %v9432_v18  ;;  %v9433_v57 = vadd.f32 %v23942_v42, %v9351_v36 }
 0x422   :  { %v9466_v23 = vmax.f32 %v9434_v29, %v9450_v35  ;;  %v9451_v20 = vmul.f32 0.2, %v9435_v50 }
 0x423   :  { %v9464_v59 = vmax.f32 %v9432_v18, %v9448_v41  ;;  %v9449_v19 = vmul.f32 0.2, %v9433_v57 }
 0x424   :  { %v9487_v12 = vmul.f32 %v23950_v17, %v9466_v23  ;;  %v9467_v55 = vmax.f32 %v9435_v50, %v9451_v20 }
 0x425   :  { %v9485_v3 = vmul.f32 %v23950_v17, %v9464_v59  ;;  %v9465_v0 = vmax.f32 %v9433_v57, %v9449_v19  ;;  %v18511_v61 = vpop.f32.mrb[148].mxu0 }
 0x426   :  { %v9488_v8 = vmul.f32 %v23950_v17, %v9467_v55  ;;  %v9438_v43 = vadd.f32 %v18511_v61, %v23942_v42  ;;  %v9364_v27 = vpop.f32.mrb[149].mxu0  ;;  %v23963_v45 = vadd.f32 %v23956_v44, %v9487_v12 }
 0x427   :  { %v9486_v14 = vmul.f32 %v23950_v17, %v9465_v0  ;;  %v9436_v28 = vadd.f32 %v23942_v42, %v9364_v27  ;;  %v18512_v29 = vpop.f32.mrb[150].mxu0  ;;  %v23968_v51 = vadd.f32 %v23956_v44, %v9485_v3 }
 0x428   :  { %v9454_v18 = vmul.f32 0.2, %v9438_v43  ;;  %v9439_v47 = vadd.f32 %v18512_v29, %v23942_v42  ;;  %v9367_v35 = vpop.f32.mrb[151].mxu0  ;;  %v23972_v50 = vadd.f32 %v23956_v44, %v9488_v8 }
 0x429   :  { %v9452_v36 = vmul.f32 0.2, %v9436_v28  ;;  %v9437_v41 = vadd.f32 %v23942_v42, %v9367_v35  ;;  %v23976_v57 = vadd.f32 %v23956_v44, %v9486_v14 }
 0x42a   :  { %v9470_v20 = vmax.f32 %v9438_v43, %v9454_v18  ;;  %v9455_v59 = vmul.f32 0.2, %v9439_v47 }
 0x42b   :  { %v9468_v19 = vmax.f32 %v9436_v28, %v9452_v36  ;;  %v9453_v12 = vmul.f32 0.2, %v9437_v41 }
 0x42c   :  { %v9491_v3 = vmul.f32 %v23950_v17, %v9470_v20  ;;  %v9471_v0 = vmax.f32 %v9439_v47, %v9455_v59 }
 0x42d   :  { %v9489_v61 = vmul.f32 %v23950_v17, %v9468_v19  ;;  %v9469_v8 = vmax.f32 %v9437_v41, %v9453_v12  ;;  %v18515_v27 = vpop.f32.mrb[152].mxu0 }
 0x42e   :  { %v9492_v14 = vmul.f32 %v23950_v17, %v9471_v0  ;;  %v9442_v29 = vadd.f32 %v18515_v27, %v23942_v42  ;;  %v9380_v35 = vpop.f32.mrb[153].mxu0  ;;  %v23987_v43 = vadd.f32 %v23956_v44, %v9491_v3 }
 0x42f   :  { %v9490_v28 = vmul.f32 %v23950_v17, %v9469_v8  ;;  %v9440_v18 = vadd.f32 %v23942_v42, %v9380_v35  ;;  %v18516_v36 = vpop.f32.mrb[154].mxu0  ;;  %v23992_v20 = vadd.f32 %v23956_v44, %v9489_v61 }
 0x430   :  { %v9458_v47 = vmul.f32 0.2, %v9442_v29  ;;  %v9443_v41 = vadd.f32 %v18516_v36, %v23942_v42  ;;  %v9383_v59 = vpop.f32.mrb[155].mxu0  ;;  %v23996_v19 = vadd.f32 %v23956_v44, %v9492_v14 }
 0x431   :  { %v9456_v12 = vmul.f32 0.2, %v9440_v18  ;;  %v9441_v0 = vadd.f32 %v23942_v42, %v9383_v59  ;;  %v24000_v3 = vadd.f32 %v23956_v44, %v9490_v28 }
 0x432   :  { %25336 = vst [vmem:[#allocation59_spill] sm:$0xff] %v23996_v19  ;;  %v9474_v27 = vmax.f32 %v9442_v29, %v9458_v47  ;;  %v9459_v35 = vmul.f32 0.2, %v9443_v41 }
 0x433   :  { %v9472_v61 = vmax.f32 %v9440_v18, %v9456_v12  ;;  %v9457_v55 = vmul.f32 0.2, %v9441_v0 }
 0x434   :  { %v9495_v23 = vmul.f32 %v23950_v17, %v9474_v27  ;;  %v9475_v48 = vmax.f32 %v9443_v41, %v9459_v35 }
 0x435   :  { %v9493_v59 = vmul.f32 %v23950_v17, %v9472_v61  ;;  %v9473_v28 = vmax.f32 %v9441_v0, %v9457_v55  ;;  %v18519_v4 = vpop.f32.mrb[156].mxu0 }
 0x436   :  { %v9496_v39 = vmul.f32 %v23950_v17, %v9475_v48  ;;  %v9446_v29 = vadd.f32 %v18519_v4, %v23942_v42  ;;  %v9396_v47 = vpop.f32.mrb[157].mxu0  ;;  %v9516_v18 = vadd.f32 %v23956_v44, %v9495_v23 }
 0x437   :  { %v9494_v12 = vmul.f32 %v23950_v17, %v9473_v28  ;;  %v9444_v8 = vadd.f32 %v23942_v42, %v9396_v47  ;;  %v18520_v31 = vpop.f32.mrb[158].mxu0  ;;  %v9514_v14 = vadd.f32 %v23956_v44, %v9493_v59 }
 0x438   :  { %v9462_v27 = vmul.f32 0.2, %v9446_v29  ;;  %v9447_v41 = vadd.f32 %v18520_v31, %v23942_v42  ;;  %v9399_v35 = vpop.f32.mrb[159].mxu0  ;;  %v9517_v55 = vadd.f32 %v23956_v44, %v9496_v39 }
 0x439   :  { %v9460_v0 = vmul.f32 0.2, %v9444_v8  ;;  %v9445_v48 = vadd.f32 %v23942_v42, %v9399_v35  ;;  %v24019_v4 = vpack.c.bf16 %v9516_v18, %v9514_v14  ;;  %v24022_v23 = vadd.f32 %v23956_v44, %v9494_v12 }
 0x43a   :  { %v9478_v61 = vmax.f32 %v9446_v29, %v9462_v27  ;;  %v9463_v28 = vmul.f32 0.2, %v9447_v41  ;;  %v18795_v47 = vpop.f32.mrb[144].mxu1 }
 0x43b   :  { %25337 = vst [vmem:[#allocation16_spill] sm:$0xff] %v24019_v4  ;;  %v9476_v36 = vmax.f32 %v9444_v8, %v9460_v0  ;;  %v9461_v21 = vmul.f32 0.2, %v9445_v48  ;;  %v11329_v59 = vadd.f32 %v18795_v47, %v23942_v42  ;;  %v11243_v49 = vpop.f32.mrb[145].mxu1  ;;  %18837 = vmatprep.mubr.bf16.mxu0 %v24019_v4  ;;  %v24029_v18 = vpack.c.bf16 %v9517_v55, %v24022_v23 }
 0x43c   :  { %v9499_v31 = vmul.f32 %v23950_v17, %v9478_v61  ;;  %v9479_v39 = vmax.f32 %v9447_v41, %v9463_v28  ;;  %v11327_v35 = vadd.f32 %v23942_v42, %v11243_v49  ;;  %v18796_v14 = vpop.f32.mrb[146].mxu1 }
 0x43d   :  { %v9497_v29 = vmul.f32 %v23950_v17, %v9476_v36  ;;  %v9477_v12 = vmax.f32 %v9445_v48, %v9461_v21  ;;  %v11345_v27 = vmul.f32 0.2, %v11329_v59  ;;  %v11330_v8 = vadd.f32 %v18796_v14, %v23942_v42  ;;  %v11246_v0 = vpop.f32.mrb[147].mxu1 }
 0x43e   :  { %v9500_v47 = vmul.f32 %v23950_v17, %v9479_v39  ;;  %v11343_v53 = vmul.f32 0.2, %v11327_v35  ;;  %v11328_v4 = vadd.f32 %v23942_v42, %v11246_v0  ;;  %v9520_v41 = vadd.f32 %v23956_v44, %v9499_v31 }
 0x43f   :  { %v9498_v49 = vmul.f32 %v23950_v17, %v9477_v12  ;;  %v11361_v61 = vmax.f32 %v11329_v59, %v11345_v27  ;;  %v11346_v28 = vmul.f32 0.2, %v11330_v8  ;;  %v9518_v46 = vadd.f32 %v23956_v44, %v9497_v29 }
 0x440   :  { %v11359_v56 = vmax.f32 %v11327_v35, %v11343_v53  ;;  %v11344_v36 = vmul.f32 0.2, %v11328_v4  ;;  %v9521_v21 = vadd.f32 %v23956_v44, %v9500_v47 }
 0x441   :  { %v11382_v48 = vmul.f32 %v23950_v17, %v11361_v61  ;;  %v11362_v14 = vmax.f32 %v11330_v8, %v11346_v28  ;;  %v24040_v25 = vpack.c.bf16 %v9520_v41, %v9518_v46  ;;  %v9519_v39 = vadd.f32 %v23956_v44, %v9498_v49 }
 0x442   :  { %v11380_v0 = vmul.f32 %v23950_v17, %v11359_v56  ;;  %v11360_v31 = vmax.f32 %v11328_v4, %v11344_v36  ;;  %v18799_v19 = vpop.f32.mrb[148].mxu1 }
 0x443   :  { %25338 = vst [vmem:[#allocation21_spill] sm:$0xff] %v24040_v25  ;;  %v11383_v59 = vmul.f32 %v23950_v17, %v11362_v14  ;;  %v11333_v12 = vadd.f32 %v18799_v19, %v23942_v42  ;;  %v11259_v29 = vpop.f32.mrb[149].mxu1  ;;  %18838 = vmatmul.mubr.bf16.gmra.mrb[172].mxu0 %v24040_v25  ;;  %v24047_v53 = vpack.c.bf16 %v9519_v39, %v9517_v55 }
 0x444   :  { %v24049_v35 = vpack.c.bf16 %v9521_v21, %v9519_v39  ;;  %v11381_v46 = vmul.f32 %v23950_v17, %v11360_v31  ;;  %v11331_v27 = vadd.f32 %v23942_v42, %v11259_v29  ;;  %v18800_v8 = vpop.f32.mrb[150].mxu1  ;;  %18857 = vmatprep.mubr.bf16.mxu0 %v25328_v63  ;;  %v24055_v56 = vadd.f32 %v23956_v44, %v11380_v0  ;;  %v20394_v29 = vld [vmem:[%s24831_s2 + $0x2c8] sm:$0xff]  }
 0x445   :  { %v24058_v4 = vadd.f32 %v23956_v44, %v11382_v48  ;;  %v11349_v19 = vmul.f32 0.2, %v11333_v12  ;;  %v11334_v47 = vadd.f32 %v18800_v8, %v23942_v42  ;;  %v11262_v55 = vpop.f32.mrb[151].mxu1  ;;  %v24062_v41 = vadd.f32 %v23956_v44, %v11383_v59 }
 0x446   :  { %v11347_v49 = vmul.f32 0.2, %v11331_v27  ;;  %v11332_v61 = vadd.f32 %v23942_v42, %v11262_v55  ;;  %v24066_v28 = vadd.f32 %v23956_v44, %v11381_v46 }
 0x447   :  { %v11365_v21 = vmax.f32 %v11333_v12, %v11349_v19  ;;  %v11350_v14 = vmul.f32 0.2, %v11334_v47  ;;  %v24079_v12 = vpack.c.bf16 %v23632_v58, %v25028_v15 }
 0x448   :  { %v11363_v48 = vmax.f32 %v11331_v27, %v11347_v49  ;;  %v11348_v39 = vmul.f32 0.2, %v11332_v61 }
 0x449   :  { %v11386_v31 = vmul.f32 %v23950_v17, %v11365_v21  ;;  %v11366_v59 = vmax.f32 %v11334_v47, %v11350_v14  ;;  %25339 = vst [vmem:[#allocation69_spill] sm:$0xff] %v24079_v12 }
 0x44a   :  { %v11384_v46 = vmul.f32 %v23950_v17, %v11363_v48  ;;  %v11364_v8 = vmax.f32 %v11332_v61, %v11348_v39  ;;  %v18803_v55 = vpop.f32.mrb[152].mxu1 }
 0x44b   :  { %v11387_v27 = vmul.f32 %v23950_v17, %v11366_v59  ;;  %v11337_v19 = vadd.f32 %v18803_v55, %v23942_v42  ;;  %v11275_v49 = vpop.f32.mrb[153].mxu1  ;;  %18858 = vmatmul.mubr.bf16.vlgmr.msra.gmra.mrb[160].mxu0 %v25328_v63  ;;  %v24085_v47 = vadd.f32 %v23956_v44, %v11386_v31  ;;  %v20395_v31 = vld [vmem:[%s24831_s2 + $0x2d0] sm:$0xff]  }
 0x44c   :  { %v11385_v21 = vmul.f32 %v23950_v17, %v11364_v8  ;;  %v11335_v14 = vadd.f32 %v23942_v42, %v11275_v49  ;;  %v18804_v61 = vpop.f32.mrb[154].mxu1  ;;  %18861 = vmatprep.mubr.bf16.mxu0 %v24079_v12  ;;  %18874 = vmatpush3.bf16.msra.mxu0 %v23936_v6  ;;  %v24092_v58 = vadd.f32 %v23956_v44, %v11384_v46 }
 0x44d   :  { %v11353_v48 = vmul.f32 0.2, %v11337_v19  ;;  %v11338_v39 = vadd.f32 %v18804_v61, %v23942_v42  ;;  %v11278_v59 = vpop.f32.mrb[155].mxu1  ;;  %18875 = vmatprep.subr.bf16.mxu0 %v20394_v29  ;;  %v24099_v8 = vadd.f32 %v23956_v44, %v11387_v27 }
 0x44e   :  { %v11351_v55 = vmul.f32 0.2, %v11335_v14  ;;  %v11336_v49 = vadd.f32 %v23942_v42, %v11278_v59  ;;  %v24103_v6 = vadd.f32 %v23956_v44, %v11385_v21  ;;  %v20396_v21 = vld [vmem:[%s24831_s2 + $0x2d8] sm:$0xff]  }
 0x44f   :  { %25340 = vst [vmem:[#allocation72_spill] sm:$0xff] %v24099_v8  ;;  %v11369_v0 = vmax.f32 %v11337_v19, %v11353_v48  ;;  %v11354_v61 = vmul.f32 0.2, %v11338_v39 }
 0x450   :  { %v11367_v36 = vmax.f32 %v11335_v14, %v11351_v55  ;;  %v11352_v25 = vmul.f32 0.2, %v11336_v49  ;;  %18876 = vmatpush3.bf16.msra.mxu0 %v20394_v29  ;;  %v24118_v29 = vpack.c.bf16 %v23778_v37, %v25028_v15 }
 0x451   :  { %v11390_v2 = vmul.f32 %v23950_v17, %v11369_v0  ;;  %v11370_v59 = vmax.f32 %v11338_v39, %v11354_v61  ;;  %18877 = vmatprep.subr.bf16.mxu0 %v20395_v31 }
 0x452   :  { %v11388_v19 = vmul.f32 %v23950_v17, %v11367_v36  ;;  %v11368_v48 = vmax.f32 %v11336_v49, %v11352_v25  ;;  %v18807_v14 = vpop.f32.mrb[156].mxu1  ;;  %25341 = vst [vmem:[#allocation25_spill] sm:$0xff] %v24118_v29 }
 0x453   :  { %v11391_v55 = vmul.f32 %v23950_v17, %v11370_v59  ;;  %v11341_v27 = vadd.f32 %v18807_v14, %v23942_v42  ;;  %v11291_v46 = vpop.f32.mrb[157].mxu1  ;;  %18862 = vmatmul.mubr.bf16.gmra.mrb[164].mxu0 %v23680_v32  ;;  %v24124_v0 = vadd.f32 %v23956_v44, %v11390_v2  ;;  %v20397_v2 = vld [vmem:[%s24831_s2 + $0x2e0] sm:$0xff]  }
 0x454   :  { %v11389_v39 = vmul.f32 %v23950_v17, %v11368_v48  ;;  %v11339_v36 = vadd.f32 %v23942_v42, %v11291_v46  ;;  %v18808_v25 = vpop.f32.mrb[158].mxu1  ;;  %18865 = vmatprep.mubr.bf16.mxu0 %v24118_v29  ;;  %18878 = vmatpush3.bf16.msra.mxu0 %v20395_v31  ;;  %v24130_v37 = vadd.f32 %v23956_v44, %v11388_v19 }
 0x455   :  { %v11357_v49 = vmul.f32 0.2, %v11341_v27  ;;  %v11342_v61 = vadd.f32 %v18808_v25, %v23942_v42  ;;  %v11294_v59 = vpop.f32.mrb[159].mxu1  ;;  %18879 = vmatprep.subr.bf16.mxu0 %v20396_v21  ;;  %v24137_v48 = vadd.f32 %v23956_v44, %v11391_v55 }
 0x456   :  { %v11355_v46 = vmul.f32 0.2, %v11339_v36  ;;  %v11340_v14 = vadd.f32 %v23942_v42, %v11294_v59  ;;  %v24141_v31 = vadd.f32 %v23956_v44, %v11389_v39  ;;  %v12844_v19 = vpack.c.bf16 %v24124_v0, %v24130_v37  ;;  %v20398_v42 = vld [vmem:[%s24831_s2 + $0x2e8] sm:$0xff]  }
 0x457   :  { %v11373_v12 = vmax.f32 %v11341_v27, %v11357_v49  ;;  %v11358_v25 = vmul.f32 0.2, %v11342_v61  ;;  %v24154_v27 = vpack.c.bf16 %v24022_v23, %v25028_v15 }
 0x458   :  { %v11371_v29 = vmax.f32 %v11339_v36, %v11355_v46  ;;  %v11356_v32 = vmul.f32 0.2, %v11340_v14  ;;  %18880 = vmatpush3.bf16.msra.mxu0 %v20396_v21  ;;  %v13047_v8 = vpack.c.bf16 %v24137_v48, %v24141_v31  ;;  %v20402_v46 = vld [vmem:[%s24831_s2 + $0x308] sm:$0xff]  }
 0x459   :  { %v11394_v55 = vmul.f32 %v23950_v17, %v11373_v12  ;;  %v11374_v26 = vmax.f32 %v11342_v61, %v11358_v25  ;;  %18881 = vmatprep.subr.bf16.mxu0 %v20397_v2  ;;  %v20404_v25 = vld [vmem:[%s24831_s2 + $0x318] sm:$0xff]  }
 0x45a   :  { %v11392_v39 = vmul.f32 %v23950_v17, %v11371_v29  ;;  %v11372_v59 = vmax.f32 %v11340_v14, %v11356_v32  ;;  %v20399_v32 = vld [vmem:[%s24831_s2 + $0x2f0] sm:$0xff]  }
 0x45b   :  { %v11395_v21 = vmul.f32 %v23950_v17, %v11374_v26  ;;  %18866 = vmatmul.mubr.bf16.gmra.mrb[168].mxu0 %v23820_v7  ;;  %v24159_v36 = vadd.f32 %v23956_v44, %v11394_v55  ;;  %v20403_v14 = vld [vmem:[%s24831_s2 + $0x310] sm:$0xff]   ;;  %v20405_v55 = vld [vmem:[%s24831_s2 + $0x320] sm:$0xff]  }
 0x45c   :  { %v11393_v12 = vmul.f32 %v23950_v17, %v11372_v59  ;;  %18869 = vmatprep.mubr.bf16.mxu0 %v24154_v27  ;;  %18882 = vmatpush3.bf16.msra.mxu0 %v20397_v2  ;;  %v24164_v49 = vadd.f32 %v23956_v44, %v11392_v39  ;;  %v20400_v2 = vld [vmem:[%s24831_s2 + $0x2f8] sm:$0xff]   ;;  %v20407_v39 = vld [vmem:[%s24831_s2 + $0x330] sm:$0xff]  }
 0x45d   :  { %18883 = vmatprep.subr.bf16.mxu0 %v20398_v42  ;;  %v24170_v26 = vadd.f32 %v23956_v44, %v11395_v21  ;;  %v20408_v59 = vld [vmem:[%s24831_s2 + $0x338] sm:$0xff]   ;;  %v12027_v21 = vpack.c.bf16 %v23546_v1, %v25028_v15 }
 0x45e   :  { %v24173_v23 = vadd.f32 %v23956_v44, %v11393_v12  ;;  %v12845_v17 = vpack.c.bf16 %v24159_v36, %v24164_v49  ;;  %v20401_v44 = vld [vmem:[%s24831_s2 + $0x300] sm:$0xff]  }
 0x45f   :  { %v20409_v12 = vld [vmem:[%s24831_s2 + $0x340] sm:$0xff]  }
 0x460   :  { %18884 = vmatpush3.bf16.msra.mxu0 %v20398_v42  ;;  %v12642_v29 = vpack.c.bf16 %v24173_v23, %v24137_v48  ;;  %v13048_v61 = vpack.c.bf16 %v24170_v26, %v24173_v23  ;;  %v20406_v42 = vld [vmem:[%s24831_s2 + $0x328] sm:$0xff]   ;;  %v24481_v23 = vld [vmem:[%s24832_s3 + $0x11] ss:$0 sm:$0xff] }
 0x461   :  { %18885 = vmatprep.subr.bf16.mxu0 %v20399_v32 }
 0x463   :  { %18870 = vmatmul.mubr.bf16.gmra.mrb[172].mxu0 %v24047_v53 }
 0x464   :  { %18886 = vmatpush3.bf16.msra.mxu0 %v20399_v32  ;;  %18889 = vmatprep.mubr.bf16.mxu0 %v25328_v63  ;;  %v20410_v32 = vld [vmem:[%s24831_s2 + $0x348] sm:$0xff]  }
 0x465   :  { %18887 = vmatprep.subr.bf16.mxu0 %v20400_v2 }
 0x468   :  { %18888 = vmatpush3.bf16.msra.mxu0 %v20400_v2  ;;  %v12029_v2 = vpack.c.bf16 %v23696_v38, %v25028_v15 }
 0x469   :  { %18905 = vmatprep.subr.bf16.mxu0 %v20401_v44 }
 0x46b   :  { %18890 = vmatmul.mubr.bf16.vlgmr.msra.gmra.mrb[160].mxu0 %v25328_v63 }
 0x46c   :  { %18893 = vmatprep.mubr.bf16.mxu0 %v23659_v22  ;;  %18906 = vmatpush3.bf16.msra.mxu0 %v20401_v44  ;;  %v25342_v44 = vpack.c.bf16 %v23586_v9, %v23532_v5 }
 0x46d   :  { %18907 = vmatprep.subr.bf16.mxu0 %v20402_v46 }
 0x470   :  { %18908 = vmatpush3.bf16.msra.mxu0 %v20402_v46  ;;  %v20411_v46 = vld [vmem:[%s24831_s2 + $0x350] sm:$0xff]  }
 0x471   :  { %18909 = vmatprep.subr.bf16.mxu0 %v20403_v14 }
 0x473   :  { %18894 = vmatmul.mubr.bf16.gmra.mrb[164].mxu0 %v23689_v60 }
 0x474   :  { %18897 = vmatprep.mubr.bf16.mxu0 %v23790_v24  ;;  %18910 = vmatpush3.bf16.msra.mxu0 %v20403_v14  ;;  %v20412_v14 = vld [vmem:[%s24831_s2 + $0x358] sm:$0xff]  }
 0x475   :  { %18911 = vmatprep.subr.bf16.mxu0 %v20404_v25 }
 0x478   :  { %18912 = vmatpush3.bf16.msra.mxu0 %v20404_v25  ;;  %v12031_v25 = vpack.c.bf16 %v23976_v57, %v25028_v15 }
 0x479   :  { %18913 = vmatprep.subr.bf16.mxu0 %v20405_v55 }
 0x47b   :  { %18898 = vmatmul.mubr.bf16.gmra.mrb[168].mxu0 %v23822_v52 }
 0x47c   :  { %18901 = vmatprep.mubr.bf16.mxu0 %v24029_v18  ;;  %18914 = vmatpush3.bf16.msra.mxu0 %v20405_v55  ;;  %v25343_v55 = vpack.c.bf16 %v23741_v13, %v23692_v16 }
 0x47d   :  { %18915 = vmatprep.subr.bf16.mxu0 %v20406_v42 }
 0x480   :  { %18916 = vmatpush3.bf16.msra.mxu0 %v20406_v42  ;;  %v20413_v42 = vld [vmem:[%s24831_s2 + $0x360] sm:$0xff]  }
 0x481   :  { %18917 = vmatprep.subr.bf16.mxu0 %v20407_v39 }
 0x483   :  { %18902 = vmatmul.mubr.bf16.gmra.mrb[172].mxu0 %v24049_v35 }
 0x484   :  { %18918 = vmatpush3.bf16.msra.mxu0 %v20407_v39  ;;  %18921 = vmatprep.mubr.bf16.mxu0 %v12027_v21  ;;  %v20414_v39 = vld [vmem:[%s24831_s2 + $0x368] sm:$0xff]   ;;  %v25344_v21 = vpack.c.bf16 %v24000_v3, %v23972_v50 }
 0x485   :  { %18919 = vmatprep.subr.bf16.mxu0 %v20408_v59 }
 0x488   :  { %18920 = vmatpush3.bf16.msra.mxu0 %v20408_v59  ;;  %v12033_v59 = vpack.c.bf16 %v24066_v28, %v25028_v15 }
 0x489   :  { %18937 = vmatprep.subr.bf16.mxu0 %v20409_v12 }
 0x48b   :  { %18922 = vmatmul.mubr.bf16.vlgmr.msra.gmra.mrb[160].mxu0 %v25342_v44  ;;  %v25346_v44 = vpack.c.bf16 %v23521_v30, %v23529_v33  ;;  %v20419_v30 = vld [vmem:[%s24831_s2 + $0x390] sm:$0xff]   ;;  %v20420_v33 = vld [vmem:[%s24831_s2 + $0x398] sm:$0xff]  }
 0x48c   :  { %18925 = vmatprep.mubr.bf16.mxu0 %v12029_v2  ;;  %18938 = vmatpush3.bf16.msra.mxu0 %v20409_v12  ;;  %v20415_v12 = vld [vmem:[%s24831_s2 + $0x370] sm:$0xff]   ;;  %v25345_v2 = vpack.c.bf16 %v24103_v6, %v24062_v41 }
 0x48d   :  { %18939 = vmatprep.subr.bf16.mxu0 %v20410_v32 }
 0x490   :  { %18940 = vmatpush3.bf16.msra.mxu0 %v20410_v32  ;;  %v20416_v32 = vld [vmem:[%s24831_s2 + $0x378] sm:$0xff]  }
 0x491   :  { %18941 = vmatprep.subr.bf16.mxu0 %v20411_v46 }
 0x493   :  { %18926 = vmatmul.mubr.bf16.gmra.mrb[164].mxu0 %v25343_v55  ;;  %v25348_v55 = vpack.c.bf16 %v23675_v11, %v23699_v62  ;;  %v20421_v11 = vld [vmem:[%s24831_s2 + $0x3a0] sm:$0xff]   ;;  %v20422_v62 = vld [vmem:[%s24831_s2 + $0x3a8] sm:$0xff]  }
 0x494   :  { %18929 = vmatprep.mubr.bf16.mxu0 %v12031_v25  ;;  %18942 = vmatpush3.bf16.msra.mxu0 %v20411_v46  ;;  %v20417_v46 = vld [vmem:[%s24831_s2 + $0x380] sm:$0xff]   ;;  %v25347_v25 = vpack.c.bf16 %v23563_v10, %v23568_v54  ;;  %v25349_v10 = vpack.c.bf16 %v23720_v34, %v23725_v40  ;;  %v25350_v54 = vpack.c.bf16 %v23963_v45, %v23968_v51  ;;  %v20423_v45 = vld [vmem:[%s24831_s2 + $0x3b0] sm:$0xff]   ;;  %v20424_v51 = vld [vmem:[%s24831_s2 + $0x3b8] sm:$0xff]  }
 0x495   :  { %18943 = vmatprep.subr.bf16.mxu0 %v20412_v14  ;;  %v25351_v34 = vpack.c.bf16 %v23987_v43, %v23992_v20  ;;  %v25352_v40 = vpack.c.bf16 %v24058_v4, %v24055_v56  ;;  %v25353_v43 = vpack.c.bf16 %v24085_v47, %v24092_v58  ;;  %v20449_v20 = vld [vmem:[%s24831_s2 + $0x4c0] sm:$0xff]   ;;  %v20450_v56 = vld [vmem:[%s24831_s2 + $0x4c8] sm:$0xff]   ;;  %v25354_v4 = vpack.c.bf16 %v23532_v5, %v23546_v1  ;;  %v20451_v47 = vld [vmem:[%s24831_s2 + $0x4d0] sm:$0xff]  }
 0x496   :  { %19097 = vmatprep.subr.bf16.mxu1 %v20449_v20  ;;  %v20426_v58 = vld [vmem:[%s24831_s2 + $0x3c8] sm:$0xff]   ;;  %v25355_v5 = vld [vmem:[#allocation35_spill] sm:$0xff] }
 0x497   :  { %19098 = vmatpush3.bf16.msra.mxu1 %v20449_v20  ;;  %v25356_v1 = vpack.c.bf16 %v25355_v5, %v23586_v9  ;;  %v25358_v9 = vld [vmem:[#allocation9_spill] sm:$0xff] }
 0x498   :  { %18944 = vmatpush3.bf16.msra.mxu0 %v20412_v14  ;;  %v20418_v14 = vld [vmem:[%s24831_s2 + $0x388] sm:$0xff]   ;;  %19099 = vmatprep.subr.bf16.mxu1 %v20450_v56  ;;  %v20445_v20 = vld [vmem:[%s24831_s2 + $0x460] sm:$0xff]  }
 0x499   :  { %18945 = vmatprep.subr.bf16.mxu0 %v20413_v42 }
 0x49b   :  { %18930 = vmatmul.mubr.bf16.gmra.mrb[168].mxu0 %v25344_v21  ;;  %19100 = vmatpush3.bf16.msra.mxu1 %v20450_v56  ;;  %v20428_v21 = vld [vmem:[%s24831_s2 + $0x3d8] sm:$0xff]   ;;  %v20446_v56 = vld [vmem:[%s24831_s2 + $0x468] sm:$0xff]  }
 0x49c   :  { %18933 = vmatprep.mubr.bf16.mxu0 %v12033_v59  ;;  %18946 = vmatpush3.bf16.msra.mxu0 %v20413_v42  ;;  %v20425_v42 = vld [vmem:[%s24831_s2 + $0x3c0] sm:$0xff]   ;;  %v20427_v59 = vld [vmem:[%s24831_s2 + $0x3d0] sm:$0xff]  }
 0x49d   :  { %18947 = vmatprep.subr.bf16.mxu0 %v20414_v39  ;;  %19101 = vmatprep.subr.bf16.mxu1 %v20451_v47 }
 0x49f   :  { %19102 = vmatpush3.bf16.msra.mxu1 %v20451_v47  ;;  %v20448_v47 = vld [vmem:[%s24831_s2 + $0x478] sm:$0xff]  }
 0x4a0   :  { %18948 = vmatpush3.bf16.msra.mxu0 %v20414_v39  ;;  %v25357_v39 = vpack.c.bf16 %v23692_v16, %v23696_v38  ;;  %v25360_v16 = vpack.c.bf16 %v23972_v50, %v23976_v57  ;;  %v20429_v38 = vld [vmem:[%s24831_s2 + $0x3e0] sm:$0xff]   ;;  %v25363_v50 = vpack.c.bf16 %v24062_v41, %v24066_v28  ;;  %v20431_v57 = vld [vmem:[%s24831_s2 + $0x3f0] sm:$0xff]   ;;  %v20434_v28 = vld [vmem:[%s24831_s2 + $0x408] sm:$0xff]  }
 0x4a1   :  { %18949 = vmatprep.subr.bf16.mxu0 %v20415_v12  ;;  %v20433_v41 = vld [vmem:[%s24831_s2 + $0x400] sm:$0xff]  }
 0x4a3   :  { %18934 = vmatmul.mubr.bf16.gmra.mrb[172].mxu0 %v25345_v2  ;;  %v25361_v2 = vld [vmem:[#allocation59_spill] sm:$0xff] }
 0x4a4   :  { %18950 = vmatpush3.bf16.msra.mxu0 %v20415_v12  ;;  %18953 = vmatprep.mubr.bf16.mxu0 %v25346_v44  ;;  %v25359_v12 = vpack.c.bf16 %v25358_v9, %v23741_v13  ;;  %v25362_v13 = vpack.c.bf16 %v25361_v2, %v24000_v3  ;;  %v20432_v44 = vld [vmem:[%s24831_s2 + $0x3f8] sm:$0xff]  }
 0x4a5   :  { %18951 = vmatprep.subr.bf16.mxu0 %v20416_v32 }
 0x4a8   :  { %18952 = vmatpush3.bf16.msra.mxu0 %v20416_v32  ;;  %v20430_v32 = vld [vmem:[%s24831_s2 + $0x3e8] sm:$0xff]  }
 0x4a9   :  { %18969 = vmatprep.subr.bf16.mxu0 %v20417_v46 }
 0x4ab   :  { %18954 = vmatmul.mubr.bf16.vlgmr.msra.gmra.mrb[160].mxu0 %v25347_v25  ;;  %v25367_v25 = vld [vmem:[#allocation55_spill] sm:$0xff] }
 0x4ac   :  { %18957 = vmatprep.mubr.bf16.mxu0 %v25348_v55  ;;  %18970 = vmatpush3.bf16.msra.mxu0 %v20417_v46  ;;  %v25364_v46 = vld [vmem:[#allocation72_spill] sm:$0xff]  ;;  %v25368_v55 = vld [vmem:[#allocation25_spill] sm:$0xff] }
 0x4ad   :  { %18971 = vmatprep.subr.bf16.mxu0 %v20418_v14  ;;  %v25365_v3 = vpack.c.bf16 %v25364_v46, %v24103_v6  ;;  %v20435_v6 = vld [vmem:[%s24831_s2 + $0x410] sm:$0xff]  }
 0x4b0   :  { %18972 = vmatpush3.bf16.msra.mxu0 %v20418_v14  ;;  %v25366_v14 = vld [vmem:[#allocation69_spill] sm:$0xff] }
 0x4b1   :  { %18973 = vmatprep.subr.bf16.mxu0 %v20419_v30 }
 0x4b3   :  { %18958 = vmatmul.mubr.bf16.gmra.mrb[164].mxu0 %v25349_v10  ;;  %v20438_v10 = vld [vmem:[%s24831_s2 + $0x428] sm:$0xff]  }
 0x4b4   :  { %18961 = vmatprep.mubr.bf16.mxu0 %v25350_v54  ;;  %18974 = vmatpush3.bf16.msra.mxu0 %v20419_v30  ;;  %v20436_v30 = vld [vmem:[%s24831_s2 + $0x418] sm:$0xff]   ;;  %v12641_v54 = vpack.c.bf16 %v24141_v31, %v25028_v15 }
 0x4b5   :  { %18975 = vmatprep.subr.bf16.mxu0 %v20420_v33 }
 0x4b8   :  { %18976 = vmatpush3.bf16.msra.mxu0 %v20420_v33  ;;  %v20437_v33 = vld [vmem:[%s24831_s2 + $0x420] sm:$0xff]  }
 0x4b9   :  { %18977 = vmatprep.subr.bf16.mxu0 %v20421_v11 }
 0x4bb   :  { %18962 = vmatmul.mubr.bf16.gmra.mrb[168].mxu0 %v25351_v34  ;;  %v25370_v34 = vld [vmem:[#allocation5_spill] sm:$0xff] }
 0x4bc   :  { %18965 = vmatprep.mubr.bf16.mxu0 %v25352_v40  ;;  %18978 = vmatpush3.bf16.msra.mxu0 %v20421_v11  ;;  %v25369_v11 = vld [vmem:[#allocation40_spill] sm:$0xff] }
 0x4bd   :  { %18979 = vmatprep.subr.bf16.mxu0 %v20422_v62  ;;  %v25371_v40 = vld [vmem:[#allocation12_spill] sm:$0xff] }
 0x4c0   :  { %18980 = vmatpush3.bf16.msra.mxu0 %v20422_v62  ;;  %v20442_v62 = vld [vmem:[%s24831_s2 + $0x448] sm:$0xff]  }
 0x4c1   :  { %18981 = vmatprep.subr.bf16.mxu0 %v20423_v45 }
 0x4c3   :  { %18966 = vmatmul.mubr.bf16.gmra.mrb[172].mxu0 %v25353_v43  ;;  %v25373_v43 = vld [vmem:[#allocation16_spill] sm:$0xff] }
 0x4c4   :  { %18982 = vmatpush3.bf16.msra.mxu0 %v20423_v45  ;;  %18985 = vmatprep.mubr.bf16.mxu0 %v25354_v4  ;;  %v20444_v45 = vld [vmem:[%s24831_s2 + $0x458] sm:$0xff]   ;;  %v25374_v4 = vld [vmem:[#allocation21_spill] sm:$0xff] }
 0x4c5   :  { %18983 = vmatprep.subr.bf16.mxu0 %v20424_v51 }
 0x4c8   :  { %18984 = vmatpush3.bf16.msra.mxu0 %v20424_v51  ;;  %v25372_v51 = vld [vmem:[#allocation64_spill] sm:$0xff] }
 0x4c9   :  { %19001 = vmatprep.subr.bf16.mxu0 %v20425_v42 }
 0x4cb   :  { %18986 = vmatmul.mubr.bf16.vlgmr.msra.gmra.mrb[160].mxu0 %v25356_v1 }
 0x4cc   :  { %18989 = vmatprep.mubr.bf16.mxu0 %v25357_v39  ;;  %19002 = vmatpush3.bf16.msra.mxu0 %v20425_v42  ;;  %v20447_v42 = vld [vmem:[%s24831_s2 + $0x470] sm:$0xff]  }
 0x4cd   :  { %19003 = vmatprep.subr.bf16.mxu0 %v20426_v58 }
 0x4d0   :  { %19004 = vmatpush3.bf16.msra.mxu0 %v20426_v58 }
 0x4d1   :  { %19005 = vmatprep.subr.bf16.mxu0 %v20427_v59 }
 0x4d3   :  { %18990 = vmatmul.mubr.bf16.gmra.mrb[164].mxu0 %v25359_v12 }
 0x4d4   :  { %18993 = vmatprep.mubr.bf16.mxu0 %v25360_v16  ;;  %19006 = vmatpush3.bf16.msra.mxu0 %v20427_v59  ;;  %v24487_v59 = vld [vmem:[%s24832_s3 + $0x12] ss:$0 sm:$0xff] }
 0x4d5   :  { %19007 = vmatprep.subr.bf16.mxu0 %v20428_v21 }
 0x4d8   :  { %19008 = vmatpush3.bf16.msra.mxu0 %v20428_v21 }
 0x4d9   :  { %19009 = vmatprep.subr.bf16.mxu0 %v20429_v38 }
 0x4db   :  { %18994 = vmatmul.mubr.bf16.gmra.mrb[168].mxu0 %v25362_v13 }
 0x4dc   :  { %18997 = vmatprep.mubr.bf16.mxu0 %v25363_v50  ;;  %19010 = vmatpush3.bf16.msra.mxu0 %v20429_v38 }
 0x4dd   :  { %19011 = vmatprep.subr.bf16.mxu0 %v20430_v32 }
 0x4e0   :  { %19012 = vmatpush3.bf16.msra.mxu0 %v20430_v32 }
 0x4e1   :  { %19013 = vmatprep.subr.bf16.mxu0 %v20431_v57 }
 0x4e3   :  { %18998 = vmatmul.mubr.bf16.gmra.mrb[172].mxu0 %v25365_v3 }
 0x4e4   :  { %19014 = vmatpush3.bf16.msra.mxu0 %v20431_v57  ;;  %19017 = vmatprep.mubr.bf16.mxu0 %v25366_v14 }
 0x4e5   :  { %19015 = vmatprep.subr.bf16.mxu0 %v20432_v44 }
 0x4e8   :  { %19016 = vmatpush3.bf16.msra.mxu0 %v20432_v44 }
 0x4e9   :  { %19033 = vmatprep.subr.bf16.mxu0 %v20433_v41 }
 0x4eb   :  { %19018 = vmatmul.mubr.bf16.vlgmr.msra.gmra.mrb[160].mxu0 %v25367_v25 }
 0x4ec   :  { %19021 = vmatprep.mubr.bf16.mxu0 %v25368_v55  ;;  %19034 = vmatpush3.bf16.msra.mxu0 %v20433_v41 }
 0x4ed   :  { %19035 = vmatprep.subr.bf16.mxu0 %v20434_v28 }
 0x4f0   :  { %19036 = vmatpush3.bf16.msra.mxu0 %v20434_v28 }
 0x4f1   :  { %19037 = vmatprep.subr.bf16.mxu0 %v20435_v6 }
 0x4f3   :  { %19022 = vmatmul.mubr.bf16.gmra.mrb[164].mxu0 %v23820_v7  ;;  %v20439_v7 = vld [vmem:[%s24831_s2 + $0x430] sm:$0xff]  }
 0x4f4   :  { %19025 = vmatprep.mubr.bf16.mxu0 %v24154_v27  ;;  %19038 = vmatpush3.bf16.msra.mxu0 %v20435_v6  ;;  %v20440_v27 = vld [vmem:[%s24831_s2 + $0x438] sm:$0xff]  }
 0x4f5   :  { %19039 = vmatprep.subr.bf16.mxu0 %v20436_v30 }
 0x4f8   :  { %19040 = vmatpush3.bf16.msra.mxu0 %v20436_v30 }
 0x4f9   :  { %19041 = vmatprep.subr.bf16.mxu0 %v20437_v33 }
 0x4fb   :  { %19026 = vmatmul.mubr.bf16.gmra.mrb[168].mxu0 %v24047_v53  ;;  %v20441_v53 = vld [vmem:[%s24831_s2 + $0x440] sm:$0xff]  }
 0x4fc   :  { %19029 = vmatprep.mubr.bf16.mxu0 %v12641_v54  ;;  %19042 = vmatpush3.bf16.msra.mxu0 %v20437_v33 }
 0x4fd   :  { %19043 = vmatprep.subr.bf16.mxu0 %v20438_v10 }
 0x500   :  { %19044 = vmatpush3.bf16.msra.mxu0 %v20438_v10 }
 0x501   :  { %19045 = vmatprep.subr.bf16.mxu0 %v20439_v7 }
 0x503   :  { %19030 = vmatmul.mubr.bf16.gmra.mrb[172].mxu0 %v12642_v29  ;;  %v20443_v29 = vld [vmem:[%s24831_s2 + $0x450] sm:$0xff]  }
 0x504   :  { %19046 = vmatpush3.bf16.msra.mxu0 %v20439_v7  ;;  %19049 = vmatprep.mubr.bf16.mxu0 %v25369_v11 }
 0x505   :  { %19047 = vmatprep.subr.bf16.mxu0 %v20440_v27 }
 0x508   :  { %19048 = vmatpush3.bf16.msra.mxu0 %v20440_v27 }
 0x509   :  { %19065 = vmatprep.subr.bf16.mxu0 %v20441_v53 }
 0x50b   :  { %19050 = vmatmul.mubr.bf16.vlgmr.msra.gmra.mrb[160].mxu0 %v25370_v34 }
 0x50c   :  { %19053 = vmatprep.mubr.bf16.mxu0 %v25371_v40  ;;  %19066 = vmatpush3.bf16.msra.mxu0 %v20441_v53 }
 0x50d   :  { %19067 = vmatprep.subr.bf16.mxu0 %v20442_v62 }
 0x510   :  { %19068 = vmatpush3.bf16.msra.mxu0 %v20442_v62 }
 0x511   :  { %19069 = vmatprep.subr.bf16.mxu0 %v20443_v29 }
 0x513   :  { %19054 = vmatmul.mubr.bf16.gmra.mrb[164].mxu0 %v25372_v51 }
 0x514   :  { %19057 = vmatprep.mubr.bf16.mxu0 %v25373_v43  ;;  %19070 = vmatpush3.bf16.msra.mxu0 %v20443_v29 }
 0x515   :  { %19071 = vmatprep.subr.bf16.mxu0 %v20444_v45 }
 0x518   :  { %19072 = vmatpush3.bf16.msra.mxu0 %v20444_v45 }
 0x519   :  { %19073 = vmatprep.subr.bf16.mxu0 %v20445_v20 }
 0x51b   :  { %19058 = vmatmul.mubr.bf16.gmra.mrb[168].mxu0 %v25374_v4 }
 0x51c   :  { %19061 = vmatprep.mubr.bf16.mxu0 %v12844_v19  ;;  %19074 = vmatpush3.bf16.msra.mxu0 %v20445_v20 }
 0x51d   :  { %19075 = vmatprep.subr.bf16.mxu0 %v20446_v56 }
 0x520   :  { %19076 = vmatpush3.bf16.msra.mxu0 %v20446_v56 }
 0x521   :  { %19077 = vmatprep.subr.bf16.mxu0 %v20447_v42 }
 0x523   :  { %19062 = vmatmul.mubr.bf16.gmra.mrb[172].mxu0 %v12845_v17 }
 0x524   :  { %19078 = vmatpush3.bf16.msra.mxu0 %v20447_v42  ;;  %19081 = vmatprep.mubr.bf16.mxu0 %v23659_v22  ;;  %v20452_v22 = vld [vmem:[%s24831_s2 + $0x4d8] sm:$0xff]  }
 0x525   :  { %19079 = vmatprep.subr.bf16.mxu0 %v20448_v47  ;;  %19103 = vmatprep.subr.bf16.mxu1 %v20452_v22 }
 0x526   :  { %19104 = vmatpush3.bf16.msra.mxu1 %v20452_v22 }
 0x528   :  { %19080 = vmatpush3.bf16.msra.mxu0 %v20448_v47 }
 0x52b   :  { %19082 = vmatmul.mubr.bf16.vlgmr.msra.gmra.mrb[160].mxu0 %v23689_v60  ;;  %v20453_v60 = vld [vmem:[%s24831_s2 + $0x4e0] sm:$0xff]  }
 0x52c   :  { %19085 = vmatprep.mubr.bf16.mxu0 %v23790_v24  ;;  %19105 = vmatprep.subr.bf16.mxu1 %v20453_v60  ;;  %v20454_v24 = vld [vmem:[%s24831_s2 + $0x4e8] sm:$0xff]  }
 0x52d   :  { %19106 = vmatpush3.bf16.msra.mxu1 %v20453_v60 }
 0x52e   :  { %19107 = vmatprep.subr.bf16.mxu1 %v20454_v24 }
 0x531   :  { %19108 = vmatpush3.bf16.msra.mxu1 %v20454_v24 }
 0x533   :  { %19086 = vmatmul.mubr.bf16.gmra.mrb[164].mxu0 %v23822_v52  ;;  %v20455_v52 = vld [vmem:[%s24831_s2 + $0x4f0] sm:$0xff]  }
 0x534   :  { %19089 = vmatprep.mubr.bf16.mxu0 %v24029_v18  ;;  %19109 = vmatprep.subr.bf16.mxu1 %v20455_v52  ;;  %v20456_v18 = vld [vmem:[%s24831_s2 + $0x4f8] sm:$0xff]  }
 0x535   :  { %19110 = vmatpush3.bf16.msra.mxu1 %v20455_v52 }
 0x536   :  { %19111 = vmatprep.subr.bf16.mxu1 %v20456_v18 }
 0x539   :  { %19112 = vmatpush3.bf16.msra.mxu1 %v20456_v18 }
 0x53b   :  { %19090 = vmatmul.mubr.bf16.gmra.mrb[168].mxu0 %v24049_v35  ;;  %v24467_v35 = vld [vmem:[%s24831_s2 + $0x480] sm:$0xff]  }
 0x53c   :  { %19093 = vmatprep.mubr.bf16.mxu0 %v13047_v8  ;;  %19117 = vmatprep.subr.bf16.mxu1 %v24467_v35  ;;  %v24473_v8 = vld [vmem:[%s24832_s3 + $0x10] ss:$0 sm:$0xff] }
 0x543   :  { %19094 = vmatmul.mubr.bf16.gmra.mrb[172].mxu0 %v13048_v61 }
 0x5fe   :  { %v19083_v0 = vpop.f32.mrb[160].mxu0 }
 0x5ff   :  { %v13235_v37 = vadd.f32 %v19083_v0, %v24473_v8  ;;  %v13148_v48 = vpop.f32.mrb[161].mxu0 }
 0x600   :  { %v13233_v31 = vadd.f32 %v24473_v8, %v13148_v48  ;;  %v19084_v19 = vpop.f32.mrb[162].mxu0 }
 0x601   :  { %v13251_v36 = vmul.f32 0.2, %v13235_v37  ;;  %v13236_v49 = vadd.f32 %v19084_v19, %v24473_v8  ;;  %v13151_v26 = vpop.f32.mrb[163].mxu0 }
 0x602   :  { %v13249_v17 = vmul.f32 0.2, %v13233_v31  ;;  %v13234_v61 = vadd.f32 %v24473_v8, %v13151_v26 }
 0x603   :  { %v13267_v58 = vmax.f32 %v13235_v37, %v13251_v36  ;;  %v13252_v5 = vmul.f32 0.2, %v13236_v49 }
 0x604   :  { %v13265_v1 = vmax.f32 %v13233_v31, %v13249_v17  ;;  %v13250_v39 = vmul.f32 0.2, %v13234_v61  ;;  %v20458_v31 = vld [vmem:[%s24831_s2 + $0x488] sm:$0xff]  }
 0x605   :  { %v13288_v21 = vmul.f32 %v24481_v23, %v13267_v58  ;;  %v13268_v9 = vmax.f32 %v13236_v49, %v13252_v5 }
 0x606   :  { %v13286_v12 = vmul.f32 %v24481_v23, %v13265_v1  ;;  %v13266_v16 = vmax.f32 %v13234_v61, %v13250_v39  ;;  %v19087_v38 = vpop.f32.mrb[164].mxu0 }
 0x607   :  { %v13289_v32 = vmul.f32 %v24481_v23, %v13268_v9  ;;  %v13239_v2 = vadd.f32 %v19087_v38, %v24473_v8  ;;  %v13164_v13 = vpop.f32.mrb[165].mxu0  ;;  %v24494_v50 = vadd.f32 %v24487_v59, %v13288_v21  ;;  %v20459_v21 = vld [vmem:[%s24831_s2 + $0x490] sm:$0xff]  }
 0x608   :  { %v13287_v57 = vmul.f32 %v24481_v23, %v13266_v16  ;;  %v13237_v44 = vadd.f32 %v24473_v8, %v13164_v13  ;;  %v19088_v46 = vpop.f32.mrb[166].mxu0  ;;  %v24499_v3 = vadd.f32 %v24487_v59, %v13286_v12 }
 0x609   :  { %v13255_v14 = vmul.f32 0.2, %v13239_v2  ;;  %v13240_v41 = vadd.f32 %v19088_v46, %v24473_v8  ;;  %v13167_v28 = vpop.f32.mrb[167].mxu0  ;;  %v24503_v25 = vadd.f32 %v24487_v59, %v13289_v32 }
 0x60a   :  { %v13253_v55 = vmul.f32 0.2, %v13237_v44  ;;  %v13238_v6 = vadd.f32 %v24473_v8, %v13167_v28  ;;  %v24507_v30 = vadd.f32 %v24487_v59, %v13287_v57  ;;  %v13835_v33 = vpack.c.bf16 %v24494_v50, %v24499_v3  ;;  %v20486_v50 = vld [vmem:[%s24831_s2 + $0x5a8] sm:$0xff]   ;;  %v20487_v3 = vld [vmem:[%s24831_s2 + $0x5b0] sm:$0xff]  }
 0x60b   :  { %v13271_v10 = vmax.f32 %v13239_v2, %v13255_v14  ;;  %v13256_v54 = vmul.f32 0.2, %v13240_v41 }
 0x60c   :  { %v13269_v7 = vmax.f32 %v13237_v44, %v13253_v55  ;;  %v13254_v27 = vmul.f32 0.2, %v13238_v6  ;;  %v13960_v11 = vpack.c.bf16 %v24503_v25, %v24507_v30  ;;  %v20494_v25 = vld [vmem:[%s24831_s2 + $0x5e8] sm:$0xff]  }
 0x60d   :  { %v13292_v53 = vmul.f32 %v24481_v23, %v13271_v10  ;;  %v13272_v62 = vmax.f32 %v13240_v41, %v13256_v54 }
 0x60e   :  { %v13290_v34 = vmul.f32 %v24481_v23, %v13269_v7  ;;  %v13270_v40 = vmax.f32 %v13238_v6, %v13254_v27  ;;  %v19091_v29 = vpop.f32.mrb[168].mxu0  ;;  %v20460_v6 = vld [vmem:[%s24831_s2 + $0x498] sm:$0xff]  }
 0x60f   :  { %v13313_v45 = vadd.f32 %v24487_v59, %v13292_v53  ;;  %v13293_v51 = vmul.f32 %v24481_v23, %v13272_v62  ;;  %v13243_v43 = vadd.f32 %v19091_v29, %v24473_v8  ;;  %v13180_v20 = vpop.f32.mrb[169].mxu0 }
 0x610   :  { %v13311_v56 = vadd.f32 %v24487_v59, %v13290_v34  ;;  %v13291_v4 = vmul.f32 %v24481_v23, %v13270_v40  ;;  %v13241_v42 = vadd.f32 %v24473_v8, %v13180_v20  ;;  %v19092_v47 = vpop.f32.mrb[170].mxu0 }
 0x611   :  { %v13314_v22 = vadd.f32 %v24487_v59, %v13293_v51  ;;  %v13259_v60 = vmul.f32 0.2, %v13243_v43  ;;  %v13244_v24 = vadd.f32 %v19092_v47, %v24473_v8  ;;  %v13183_v52 = vpop.f32.mrb[171].mxu0  ;;  %v20462_v47 = vld [vmem:[%s24831_s2 + $0x4a8] sm:$0xff]  }
 0x612   :  { %v24523_v18 = vpack.c.bf16 %v13313_v45, %v13311_v56  ;;  %v24526_v0 = vadd.f32 %v24487_v59, %v13291_v4  ;;  %v13257_v37 = vmul.f32 0.2, %v13241_v42  ;;  %v13242_v48 = vadd.f32 %v24473_v8, %v13183_v52  ;;  %v20461_v45 = vld [vmem:[%s24831_s2 + $0x4a0] sm:$0xff]  }
 0x613   :  { %v13275_v19 = vmax.f32 %v13243_v43, %v13259_v60  ;;  %v13260_v36 = vmul.f32 0.2, %v13244_v24 }
 0x614   :  { %v13273_v49 = vmax.f32 %v13241_v42, %v13257_v37  ;;  %v13258_v26 = vmul.f32 0.2, %v13242_v48  ;;  %19114 = vmatmul.mubr.bf16.vlgmr.msra.gmra.mrb[160].mxu1 %v24523_v18  ;;  %v24534_v17 = vpack.c.bf16 %v13314_v22, %v24526_v0  ;;  %v24605_v52 = vpack.c.bf16 %v24526_v0, %v25028_v15  ;;  %v20466_v37 = vld [vmem:[%s24831_s2 + $0x508] sm:$0xff]   ;;  %v20468_v0 = vld [vmem:[%s24831_s2 + $0x518] sm:$0xff]  }
 0x615   :  { %v13296_v61 = vmul.f32 %v24481_v23, %v13275_v19  ;;  %v13276_v58 = vmax.f32 %v13244_v24, %v13260_v36  ;;  %19118 = vmatpush3.bf16.msra.mxu1 %v24467_v35  ;;  %19133 = vmatprep.mubr.bf16.mxu1 %v25328_v63  ;;  %v20465_v24 = vld [vmem:[%s24831_s2 + $0x500] sm:$0xff]   ;;  %v20471_v19 = vld [vmem:[%s24831_s2 + $0x530] sm:$0xff]   ;;  %v20472_v36 = vld [vmem:[%s24831_s2 + $0x538] sm:$0xff]  }
 0x616   :  { %v13294_v5 = vmul.f32 %v24481_v23, %v13273_v49  ;;  %v13274_v1 = vmax.f32 %v13242_v48, %v13258_v26  ;;  %v19095_v39 = vpop.f32.mrb[172].mxu0  ;;  %19119 = vmatprep.subr.bf16.mxu1 %v20458_v31  ;;  %v20467_v48 = vld [vmem:[%s24831_s2 + $0x510] sm:$0xff]   ;;  %v20473_v49 = vld [vmem:[%s24831_s2 + $0x540] sm:$0xff]   ;;  %v20474_v26 = vld [vmem:[%s24831_s2 + $0x548] sm:$0xff]  }
 0x617   :  { %v24544_v9 = vadd.f32 %v24487_v59, %v13296_v61  ;;  %v13297_v12 = vmul.f32 %v24481_v23, %v13276_v58  ;;  %v13247_v16 = vadd.f32 %v19095_v39, %v24473_v8  ;;  %v13196_v38 = vpop.f32.mrb[173].mxu0  ;;  %v13711_v61 = vpack.c.bf16 %v24507_v30, %v25028_v15  ;;  %v20475_v58 = vld [vmem:[%s24831_s2 + $0x550] sm:$0xff]   ;;  %v20478_v39 = vld [vmem:[%s24831_s2 + $0x568] sm:$0xff]  }
 0x618   :  { %v24549_v35 = vadd.f32 %v24487_v59, %v13294_v5  ;;  %v13295_v32 = vmul.f32 %v24481_v23, %v13274_v1  ;;  %v13245_v2 = vadd.f32 %v24473_v8, %v13196_v38  ;;  %v19096_v13 = vpop.f32.mrb[174].mxu0  ;;  %v20476_v5 = vld [vmem:[%s24831_s2 + $0x558] sm:$0xff]   ;;  %v20477_v1 = vld [vmem:[%s24831_s2 + $0x560] sm:$0xff]   ;;  %v20495_v30 = vld [vmem:[%s24831_s2 + $0x5f0] sm:$0xff]  }
 0x619   :  { %v24554_v57 = vadd.f32 %v24487_v59, %v13297_v12  ;;  %v13263_v44 = vmul.f32 0.2, %v13247_v16  ;;  %v13248_v46 = vadd.f32 %v19096_v13, %v24473_v8  ;;  %19120 = vmatpush3.bf16.msra.mxu1 %v20458_v31  ;;  %v13199_v14 = vpop.f32.mrb[175].mxu0  ;;  %v20469_v31 = vld [vmem:[%s24831_s2 + $0x520] sm:$0xff]   ;;  %v20480_v12 = vld [vmem:[%s24831_s2 + $0x578] sm:$0xff]  }
 0x61a   :  { %v24558_v41 = vadd.f32 %v24487_v59, %v13295_v32  ;;  %v13261_v28 = vmul.f32 0.2, %v13245_v2  ;;  %v13246_v55 = vadd.f32 %v24473_v8, %v13199_v14  ;;  %19121 = vmatprep.subr.bf16.mxu1 %v20459_v21  ;;  %v13836_v10 = vpack.c.bf16 %v24544_v9, %v24549_v35  ;;  %v20482_v32 = vld [vmem:[%s24831_s2 + $0x588] sm:$0xff]   ;;  %v20484_v13 = vld [vmem:[%s24831_s2 + $0x598] sm:$0xff]   ;;  %v20493_v9 = vld [vmem:[%s24831_s2 + $0x5e0] sm:$0xff]  }
 0x61b   :  { %v13279_v54 = vmax.f32 %v13247_v16, %v13263_v44  ;;  %v13264_v7 = vmul.f32 0.2, %v13248_v46  ;;  %v20481_v16 = vld [vmem:[%s24831_s2 + $0x580] sm:$0xff]   ;;  %v20490_v14 = vld [vmem:[%s24831_s2 + $0x5c8] sm:$0xff]  }
 0x61c   :  { %v13277_v27 = vmax.f32 %v13245_v2, %v13261_v28  ;;  %v13262_v53 = vmul.f32 0.2, %v13246_v55  ;;  %v13961_v62 = vpack.c.bf16 %v24554_v57, %v24558_v41  ;;  %v13712_v38 = vpack.c.bf16 %v24558_v41, %v25028_v15  ;;  %v20483_v2 = vld [vmem:[%s24831_s2 + $0x590] sm:$0xff]   ;;  %v20485_v44 = vld [vmem:[%s24831_s2 + $0x5a0] sm:$0xff]   ;;  %v20502_v41 = vld [vmem:[%s24831_s2 + $0x628] sm:$0xff]  }
 0x61d   :  { %v13300_v34 = vmul.f32 %v24481_v23, %v13279_v54  ;;  %v13280_v40 = vmax.f32 %v13248_v46, %v13264_v7  ;;  %19122 = vmatpush3.bf16.msra.mxu1 %v20459_v21  ;;  %v20479_v21 = vld [vmem:[%s24831_s2 + $0x570] sm:$0xff]   ;;  %v20489_v46 = vld [vmem:[%s24831_s2 + $0x5c0] sm:$0xff]   ;;  %v20500_v54 = vld [vmem:[%s24831_s2 + $0x618] sm:$0xff]  }
 0x61e   :  { %v13298_v8 = vmul.f32 %v24481_v23, %v13277_v27  ;;  %v13278_v29 = vmax.f32 %v13246_v55, %v13262_v53  ;;  %19123 = vmatprep.subr.bf16.mxu1 %v20460_v6  ;;  %v20491_v28 = vld [vmem:[%s24831_s2 + $0x5d0] sm:$0xff]   ;;  %v20492_v55 = vld [vmem:[%s24831_s2 + $0x5d8] sm:$0xff]   ;;  %v20497_v35 = vld [vmem:[%s24831_s2 + $0x600] sm:$0xff]  }
 0x61f   :  { %v24574_v51 = vadd.f32 %v24487_v59, %v13300_v34  ;;  %v13301_v43 = vmul.f32 %v24481_v23, %v13280_v40  ;;  %v20501_v57 = vld [vmem:[%s24831_s2 + $0x620] sm:$0xff]   ;;  %v20503_v7 = vld [vmem:[%s24831_s2 + $0x630] sm:$0xff]   ;;  %v20504_v27 = vld [vmem:[%s24831_s2 + $0x638] sm:$0xff]  }
 0x620   :  { %v24578_v20 = vadd.f32 %v24487_v59, %v13298_v8  ;;  %v13299_v56 = vmul.f32 %v24481_v23, %v13278_v29  ;;  %v20463_v23 = vld [vmem:[%s24831_s2 + $0x4b0] sm:$0xff]   ;;  %v20505_v53 = vld [vmem:[%s24831_s2 + $0x640] sm:$0xff]   ;;  %v20506_v34 = vld [vmem:[%s24831_s2 + $0x648] sm:$0xff]  }
 0x621   :  { %v24582_v4 = vadd.f32 %v24487_v59, %v13301_v43  ;;  %19124 = vmatpush3.bf16.msra.mxu1 %v20460_v6  ;;  %v20498_v6 = vld [vmem:[%s24831_s2 + $0x608] sm:$0xff]   ;;  %v20507_v40 = vld [vmem:[%s24831_s2 + $0x650] sm:$0xff]   ;;  %v20509_v8 = vld [vmem:[%s24831_s2 + $0x660] sm:$0xff]  }
 0x622   :  { %v24585_v42 = vadd.f32 %v24487_v59, %v13299_v56  ;;  %19125 = vmatprep.subr.bf16.mxu1 %v20461_v45  ;;  %v14211_v22 = vpack.c.bf16 %v24574_v51, %v24578_v20  ;;  %v20464_v59 = vld [vmem:[%s24831_s2 + $0x4b8] sm:$0xff]   ;;  %v20511_v29 = vld [vmem:[%s24831_s2 + $0x670] sm:$0xff]   ;;  %v20513_v43 = vld [vmem:[%s24831_s2 + $0x680] sm:$0xff]  }
 0x623   :  { %v20514_v56 = vld [vmem:[%s24831_s2 + $0x688] sm:$0xff]   ;;  %v20517_v51 = vld [vmem:[%s24831_s2 + $0x6a0] sm:$0xff]   ;;  %v20519_v20 = vld [vmem:[%s24831_s2 + $0x6b0] sm:$0xff]  }
 0x624   :  { %v14336_v60 = vpack.c.bf16 %v24582_v4, %v24585_v42  ;;  %v16075_v4 = vld [vmem:[%s24832_s3 + $0x19] ss:$0 sm:$0xff] }
 0x625   :  { %19126 = vmatpush3.bf16.msra.mxu1 %v20461_v45  ;;  %v20512_v45 = vld [vmem:[%s24831_s2 + $0x678] sm:$0xff]  }
 0x626   :  { %19127 = vmatprep.subr.bf16.mxu1 %v20462_v47 }
 0x629   :  { %19128 = vmatpush3.bf16.msra.mxu1 %v20462_v47  ;;  %v20515_v47 = vld [vmem:[%s24831_s2 + $0x690] sm:$0xff]  }
 0x62a   :  { %19129 = vmatprep.subr.bf16.mxu1 %v20463_v23 }
 0x62d   :  { %19130 = vmatpush3.bf16.msra.mxu1 %v20463_v23  ;;  %v20516_v23 = vld [vmem:[%s24831_s2 + $0x698] sm:$0xff]  }
 0x62e   :  { %19131 = vmatprep.subr.bf16.mxu1 %v20464_v59 }
 0x631   :  { %19132 = vmatpush3.bf16.msra.mxu1 %v20464_v59  ;;  %v16073_v59 = vld [vmem:[%s24832_s3 + $0x18] ss:$0 sm:$0xff] }
 0x632   :  { %19137 = vmatprep.subr.bf16.mxu1 %v20465_v24 }
 0x634   :  { %19134 = vmatmul.mubr.bf16.vlgmr.msra.gmra.mrb[160].mxu1 %v24605_v52 }
 0x635   :  { %19138 = vmatpush3.bf16.msra.mxu1 %v20465_v24  ;;  %19153 = vmatprep.mubr.bf16.mxu1 %v25328_v63  ;;  %v20470_v63 = vld [vmem:[%s24831_s2 + $0x528] sm:$0xff]  }
 0x636   :  { %19139 = vmatprep.subr.bf16.mxu1 %v20466_v37 }
 0x639   :  { %19140 = vmatpush3.bf16.msra.mxu1 %v20466_v37 }
 0x63a   :  { %19141 = vmatprep.subr.bf16.mxu1 %v20467_v48 }
 0x63d   :  { %19142 = vmatpush3.bf16.msra.mxu1 %v20467_v48 }
 0x63e   :  { %19143 = vmatprep.subr.bf16.mxu1 %v20468_v0 }
 0x641   :  { %19144 = vmatpush3.bf16.msra.mxu1 %v20468_v0 }
 0x642   :  { %19145 = vmatprep.subr.bf16.mxu1 %v20469_v31 }
 0x645   :  { %19146 = vmatpush3.bf16.msra.mxu1 %v20469_v31 }
 0x646   :  { %19147 = vmatprep.subr.bf16.mxu1 %v20470_v63 }
 0x649   :  { %19148 = vmatpush3.bf16.msra.mxu1 %v20470_v63 }
 0x64a   :  { %19149 = vmatprep.subr.bf16.mxu1 %v20471_v19 }
 0x64d   :  { %19150 = vmatpush3.bf16.msra.mxu1 %v20471_v19 }
 0x64e   :  { %19151 = vmatprep.subr.bf16.mxu1 %v20472_v36 }
 0x651   :  { %19152 = vmatpush3.bf16.msra.mxu1 %v20472_v36 }
 0x652   :  { %19157 = vmatprep.subr.bf16.mxu1 %v20473_v49 }
 0x654   :  { %19154 = vmatmul.mubr.bf16.vlgmr.msra.gmra.mrb[160].mxu1 %v24534_v17 }
 0x655   :  { %19158 = vmatpush3.bf16.msra.mxu1 %v20473_v49  ;;  %19173 = vmatprep.mubr.bf16.mxu1 %v13711_v61 }
 0x656   :  { %19159 = vmatprep.subr.bf16.mxu1 %v20474_v26 }
 0x659   :  { %19160 = vmatpush3.bf16.msra.mxu1 %v20474_v26 }
 0x65a   :  { %19161 = vmatprep.subr.bf16.mxu1 %v20475_v58 }
 0x65d   :  { %19162 = vmatpush3.bf16.msra.mxu1 %v20475_v58  ;;  %v16077_v58 = vld [vmem:[%s24832_s3 + $0x1a] ss:$0 sm:$0xff] }
 0x65e   :  { %19163 = vmatprep.subr.bf16.mxu1 %v20476_v5 }
 0x661   :  { %19164 = vmatpush3.bf16.msra.mxu1 %v20476_v5 }
 0x662   :  { %19165 = vmatprep.subr.bf16.mxu1 %v20477_v1 }
 0x665   :  { %19166 = vmatpush3.bf16.msra.mxu1 %v20477_v1 }
 0x666   :  { %19167 = vmatprep.subr.bf16.mxu1 %v20478_v39 }
 0x669   :  { %19168 = vmatpush3.bf16.msra.mxu1 %v20478_v39 }
 0x66a   :  { %19169 = vmatprep.subr.bf16.mxu1 %v20479_v21 }
 0x66d   :  { %19170 = vmatpush3.bf16.msra.mxu1 %v20479_v21 }
 0x66e   :  { %19171 = vmatprep.subr.bf16.mxu1 %v20480_v12 }
 0x671   :  { %19172 = vmatpush3.bf16.msra.mxu1 %v20480_v12 }
 0x672   :  { %19177 = vmatprep.subr.bf16.mxu1 %v20481_v16 }
 0x674   :  { %19174 = vmatmul.mubr.bf16.vlgmr.msra.gmra.mrb[160].mxu1 %v13712_v38 }
 0x675   :  { %19178 = vmatpush3.bf16.msra.mxu1 %v20481_v16  ;;  %19193 = vmatprep.mubr.bf16.mxu1 %v13835_v33  ;;  %v20488_v33 = vld [vmem:[%s24831_s2 + $0x5b8] sm:$0xff]  }
 0x676   :  { %19179 = vmatprep.subr.bf16.mxu1 %v20482_v32 }
 0x679   :  { %19180 = vmatpush3.bf16.msra.mxu1 %v20482_v32  ;;  %v14491_v32 = vld [vmem:[%s24833_s4] sm:$0xff] }
 0x67a   :  { %19181 = vmatprep.subr.bf16.mxu1 %v20483_v2 }
 0x67d   :  { %19182 = vmatpush3.bf16.msra.mxu1 %v20483_v2  ;;  %v14492_v2 = vld [vmem:[%s24833_s4 + $0x8] sm:$0xff] }
 0x67e   :  { %19183 = vmatprep.subr.bf16.mxu1 %v20484_v13 }
 0x681   :  { %19184 = vmatpush3.bf16.msra.mxu1 %v20484_v13 }
 0x682   :  { %19185 = vmatprep.subr.bf16.mxu1 %v20485_v44 }
 0x685   :  { %19186 = vmatpush3.bf16.msra.mxu1 %v20485_v44 }
 0x686   :  { %19187 = vmatprep.subr.bf16.mxu1 %v20486_v50 }
 0x689   :  { %19188 = vmatpush3.bf16.msra.mxu1 %v20486_v50  ;;  %v14493_v50 = vld [vmem:[%s24833_s4 + $0x10] sm:$0xff] }
 0x68a   :  { %19189 = vmatprep.subr.bf16.mxu1 %v20487_v3 }
 0x68d   :  { %19190 = vmatpush3.bf16.msra.mxu1 %v20487_v3 }
 0x68e   :  { %19191 = vmatprep.subr.bf16.mxu1 %v20488_v33 }
 0x691   :  { %19192 = vmatpush3.bf16.msra.mxu1 %v20488_v33 }
 0x692   :  { %19197 = vmatprep.subr.bf16.mxu1 %v20489_v46 }
 0x694   :  { %19194 = vmatmul.mubr.bf16.vlgmr.msra.gmra.mrb[160].mxu1 %v13836_v10  ;;  %v20499_v10 = vld [vmem:[%s24831_s2 + $0x610] sm:$0xff]  }
 0x695   :  { %19198 = vmatpush3.bf16.msra.mxu1 %v20489_v46  ;;  %19213 = vmatprep.mubr.bf16.mxu1 %v13960_v11  ;;  %v20496_v11 = vld [vmem:[%s24831_s2 + $0x5f8] sm:$0xff]  }
 0x696   :  { %19199 = vmatprep.subr.bf16.mxu1 %v20490_v14 }
 0x699   :  { %19200 = vmatpush3.bf16.msra.mxu1 %v20490_v14  ;;  %v14494_v14 = vld [vmem:[%s24833_s4 + $0x18] sm:$0xff] }
 0x69a   :  { %19201 = vmatprep.subr.bf16.mxu1 %v20491_v28 }
 0x69d   :  { %19202 = vmatpush3.bf16.msra.mxu1 %v20491_v28 }
 0x69e   :  { %19203 = vmatprep.subr.bf16.mxu1 %v20492_v55 }
 0x6a1   :  { %19204 = vmatpush3.bf16.msra.mxu1 %v20492_v55 }
 0x6a2   :  { %19205 = vmatprep.subr.bf16.mxu1 %v20493_v9 }
 0x6a5   :  { %19206 = vmatpush3.bf16.msra.mxu1 %v20493_v9 }
 0x6a6   :  { %19207 = vmatprep.subr.bf16.mxu1 %v20494_v25 }
 0x6a9   :  { %19208 = vmatpush3.bf16.msra.mxu1 %v20494_v25 }
 0x6aa   :  { %19209 = vmatprep.subr.bf16.mxu1 %v20495_v30 }
 0x6ad   :  { %19210 = vmatpush3.bf16.msra.mxu1 %v20495_v30 }
 0x6ae   :  { %19211 = vmatprep.subr.bf16.mxu1 %v20496_v11 }
 0x6b1   :  { %19212 = vmatpush3.bf16.msra.mxu1 %v20496_v11  ;;  %v20541_v11 = vmov 0  }
 0x6b2   :  { %19217 = vmatprep.subr.bf16.mxu1 %v20497_v35  ;;  %19952 = vset.pattern.permute.xlu0 %v20541_v11 }
 0x6b4   :  { %19214 = vmatmul.mubr.bf16.vlgmr.msra.gmra.mrb[160].mxu1 %v13961_v62  ;;  %v14086_v62 = vpack.c.bf16 %v24585_v42, %v25028_v15  ;;  %v20508_v15 = vld [vmem:[%s24831_s2 + $0x658] sm:$0xff]  }
 0x6b5   :  { %19218 = vmatpush3.bf16.msra.mxu1 %v20497_v35  ;;  %19233 = vmatprep.mubr.bf16.mxu1 %v24605_v52  ;;  %v16078_v35 = vld [vmem:[%s24832_s3 + $0x3] ss:$0 sm:$0xff] }
 0x6b6   :  { %19219 = vmatprep.subr.bf16.mxu1 %v20498_v6 }
 0x6b9   :  { %19220 = vmatpush3.bf16.msra.mxu1 %v20498_v6 }
 0x6ba   :  { %19221 = vmatprep.subr.bf16.mxu1 %v20499_v10 }
 0x6bd   :  { %19222 = vmatpush3.bf16.msra.mxu1 %v20499_v10 }
 0x6be   :  { %19223 = vmatprep.subr.bf16.mxu1 %v20500_v54 }
 0x6c1   :  { %19224 = vmatpush3.bf16.msra.mxu1 %v20500_v54 }
 0x6c2   :  { %19225 = vmatprep.subr.bf16.mxu1 %v20501_v57 }
 0x6c5   :  { %19226 = vmatpush3.bf16.msra.mxu1 %v20501_v57 }
 0x6c6   :  { %19227 = vmatprep.subr.bf16.mxu1 %v20502_v41 }
 0x6c9   :  { %19228 = vmatpush3.bf16.msra.mxu1 %v20502_v41 }
 0x6ca   :  { %19229 = vmatprep.subr.bf16.mxu1 %v20503_v7 }
 0x6cd   :  { %19230 = vmatpush3.bf16.msra.mxu1 %v20503_v7 }
 0x6ce   :  { %19231 = vmatprep.subr.bf16.mxu1 %v20504_v27 }
 0x6d1   :  { %19232 = vmatpush3.bf16.msra.mxu1 %v20504_v27 }
 0x6d2   :  { %19237 = vmatprep.subr.bf16.mxu1 %v20505_v53 }
 0x6d4   :  { %19234 = vmatmul.mubr.bf16.vlgmr.msra.gmra.mrb[160].mxu1 %v14086_v62 }
 0x6d5   :  { %19238 = vmatpush3.bf16.msra.mxu1 %v20505_v53  ;;  %19253 = vmatprep.mubr.bf16.mxu1 %v24523_v18  ;;  %v20510_v18 = vld [vmem:[%s24831_s2 + $0x668] sm:$0xff]  }
 0x6d6   :  { %19239 = vmatprep.subr.bf16.mxu1 %v20506_v34 }
 0x6d9   :  { %19240 = vmatpush3.bf16.msra.mxu1 %v20506_v34 }
 0x6da   :  { %19241 = vmatprep.subr.bf16.mxu1 %v20507_v40 }
 0x6dd   :  { %19242 = vmatpush3.bf16.msra.mxu1 %v20507_v40 }
 0x6de   :  { %19243 = vmatprep.subr.bf16.mxu1 %v20508_v15 }
 0x6e1   :  { %19244 = vmatpush3.bf16.msra.mxu1 %v20508_v15 }
 0x6e2   :  { %19245 = vmatprep.subr.bf16.mxu1 %v20509_v8 }
 0x6e5   :  { %19246 = vmatpush3.bf16.msra.mxu1 %v20509_v8 }
 0x6e6   :  { %19247 = vmatprep.subr.bf16.mxu1 %v20510_v18 }
 0x6e9   :  { %19248 = vmatpush3.bf16.msra.mxu1 %v20510_v18 }
 0x6ea   :  { %19249 = vmatprep.subr.bf16.mxu1 %v20511_v29 }
 0x6ed   :  { %19250 = vmatpush3.bf16.msra.mxu1 %v20511_v29 }
 0x6ee   :  { %19251 = vmatprep.subr.bf16.mxu1 %v20512_v45 }
 0x6f1   :  { %19252 = vmatpush3.bf16.msra.mxu1 %v20512_v45 }
 0x6f2   :  { %19257 = vmatprep.subr.bf16.mxu1 %v20513_v43 }
 0x6f4   :  { %19254 = vmatmul.mubr.bf16.vlgmr.msra.gmra.mrb[160].mxu1 %v14211_v22  ;;  %v20520_v22 = vld [vmem:[%s24831_s2 + $0x6b8] sm:$0xff]  }
 0x6f5   :  { %19258 = vmatpush3.bf16.msra.mxu1 %v20513_v43  ;;  %19273 = vmatprep.mubr.bf16.mxu1 %v24534_v17  ;;  %v20518_v17 = vld [vmem:[%s24831_s2 + $0x6a8] sm:$0xff]  }
 0x6f6   :  { %19259 = vmatprep.subr.bf16.mxu1 %v20514_v56 }
 0x6f9   :  { %19260 = vmatpush3.bf16.msra.mxu1 %v20514_v56 }
 0x6fa   :  { %19261 = vmatprep.subr.bf16.mxu1 %v20515_v47 }
 0x6fd   :  { %19262 = vmatpush3.bf16.msra.mxu1 %v20515_v47 }
 0x6fe   :  { %19263 = vmatprep.subr.bf16.mxu1 %v20516_v23 }
 0x701   :  { %19264 = vmatpush3.bf16.msra.mxu1 %v20516_v23 }
 0x702   :  { %19265 = vmatprep.subr.bf16.mxu1 %v20517_v51 }
 0x705   :  { %19266 = vmatpush3.bf16.msra.mxu1 %v20517_v51 }
 0x706   :  { %19267 = vmatprep.subr.bf16.mxu1 %v20518_v17 }
 0x709   :  { %19268 = vmatpush3.bf16.msra.mxu1 %v20518_v17 }
 0x70a   :  { %19269 = vmatprep.subr.bf16.mxu1 %v20519_v20 }
 0x70d   :  { %19270 = vmatpush3.bf16.msra.mxu1 %v20519_v20 }
 0x70e   :  { %19271 = vmatprep.subr.bf16.mxu1 %v20520_v22 }
 0x711   :  { %19272 = vmatpush3.bf16.msra.mxu1 %v20520_v22 }
 0x714   :  { %19274 = vmatmul.mubr.bf16.vlgmr.msra.gmra.mrb[160].mxu1 %v14336_v60 }
 0x7e7   :  { %v19275_v24 = vpop.f32.mrb[160].mxu1 }
 0x7e8   :  { %v14463_v52 = vadd.f32 %v19275_v24, %v16073_v59  ;;  %v14436_v37 = vpop.f32.mrb[161].mxu1 }
 0x7e9   :  { %v14461_v48 = vadd.f32 %v16073_v59, %v14436_v37  ;;  %v19276_v0 = vpop.f32.mrb[162].mxu1 }
 0x7ea   :  { %v14467_v31 = vmul.f32 0.2, %v14463_v52  ;;  %v14464_v63 = vadd.f32 %v19276_v0, %v16073_v59  ;;  %v14439_v19 = vpop.f32.mrb[163].mxu1 }
 0x7eb   :  { %v14465_v36 = vmul.f32 0.2, %v14461_v48  ;;  %v14462_v49 = vadd.f32 %v16073_v59, %v14439_v19 }
 0x7ec   :  { %v14471_v26 = vmax.f32 %v14463_v52, %v14467_v31  ;;  %v14468_v42 = vmul.f32 0.2, %v14464_v63 }
 0x7ed   :  { %v14469_v60 = vmax.f32 %v14461_v48, %v14465_v36  ;;  %v14466_v61 = vmul.f32 0.2, %v14462_v49 }
 0x7ee   :  { %v14472_v5 = vmax.f32 %v14464_v63, %v14468_v42  ;;  %v14480_v1 = vmul.f32 %v16075_v4, %v14471_v26 }
 0x7ef   :  { %v14478_v39 = vmul.f32 %v16075_v4, %v14469_v60  ;;  %v14470_v21 = vmax.f32 %v14462_v49, %v14466_v61 }
 0x7f0   :  { %v14481_v16 = vmul.f32 %v16075_v4, %v14472_v5  ;;  %v14489_v44 = vadd.f32 %v16077_v58, %v14480_v1 }
 0x7f1   :  { %v14487_v12 = vadd.f32 %v16077_v58, %v14478_v39  ;;  %v14479_v38 = vmul.f32 %v16075_v4, %v14470_v21 }
 0x7f2   :  { %v14490_v3 = vadd.f32 %v16077_v58, %v14481_v16  ;;  %v14497_v28 = vmul.f32 %v14493_v50, %v14489_v44 }
 0x7f3   :  { %v14488_v13 = vadd.f32 %v16077_v58, %v14479_v38  ;;  %v14495_v33 = vmul.f32 %v14491_v32, %v14487_v12 }
 0x7f4   :  { %v14498_v9 = vmul.f32 %v14494_v14, %v14490_v3 }
 0x7f5   :  { %v14496_v46 = vmul.f32 %v14492_v2, %v14488_v13 }
 0x7f7   :  { %v14499_v55 = vadd.f32 %v14496_v46, %v14495_v33 }
 0x7f9   :  { %v14500_v25 = vadd.f32 %v14499_v55, %v14497_v28 }
 0x7fb   :  { %v14501_v30 = vadd.f32 %v14500_v25, %v14498_v9 }
 0x7fd   :  { %14502 = vadd.xlane.f32.xlu0 %v14501_v30 }
 0x88a   :  { %v14503_v6 = vpop.xlane.xlu0 %14502 }
 0x88b   :  { %v14509_v10 = vadd.f32 %v16078_v35, %v14503_v6 }
 0x88d   :  { %v14510_v54 = vand.u32 2147483647, %v14509_v10  ;;  %vm14517_vm1 = vcmp.ge.f32.partialorder %v14509_v10, 0.0 }
 0x88f   :  { %v14511_v57 = vsub.f32 0.0, %v14510_v54 }
 0x891   :  { %v14512_v41 = vmul.f32 1.442695, %v14511_v57 }
 0x893   :  { %20521 = vpow2.f32 %v14512_v41 }
 0x89d   :  { %v20522_v7 = vpop.eup %20521 }
 0x89e   :  { %v14514_v27 = vadd.f32 1.0, %v20522_v7 }
 0x8a0   :  { %20523 = vrcp.f32 %v14514_v27 }
 0x8aa   :  { %v20524_v53 = vpop.eup %20523 }
 0x8ab   :  { %v14518_v62 = vsub.f32 1.0, %v20524_v53 }
 0x8ad   :  { %v14519_v34 = vsel %vm14517_vm1, %v20524_v53, %v14518_v62 }
 0x8ae   :  { %14522 = vperm.xlu0 %19952, %v14519_v34  }
 0x92d   :  { %v14523_v40 = vpop.permute.xlu0 %14522 }
 0x92e   :  { %14525 = vst [vmem:[%s24834_s5] sm:$0xff] %v14523_v40 }

</bundles_post_ra>
